<compile_context>
chip_gen: v5e
topology: v5e:2x2
jax: 0.10.0
libtpu: 0.0.40
codegen_flags: <defaults>
</compile_context>

<pallas_src>
import functools

import jax
import jax.numpy as jnp
from jax import lax
from jax.experimental import pallas as pl
from jax.experimental.pallas import tpu as pltpu

_VMEM_LIMIT = 32 * 1024 * 1024  # above v5e's 16 MiB default, below v7x's 64 MiB


def _round_up(x, m):
    return (x + m - 1) // m * m


# ---------------------------------------------------------------------------
# Kernel 1: 1x1 conv == row-tiled matmul + bias (the `emb` Conv2d(2048, 256))
# ---------------------------------------------------------------------------
def _conv1x1_kernel(x_ref, w_ref, b_ref, o_ref):
    acc = jnp.dot(x_ref[...], w_ref[...], preferred_element_type=jnp.float32)
    o_ref[...] = (acc + b_ref[...]).astype(o_ref.dtype)


def conv1x1(x2d, w, b, *, tile_m=512, out_dtype=jnp.bfloat16):
    """x2d: (M, K) bf16, w: (K, C) bf16, b: (C,) f32 -> (M, C)."""
    M, K = x2d.shape
    C = w.shape[1]
    tm = min(tile_m, _round_up(M, 8))
    m_pad = _round_up(M, tm)
    if m_pad != M:
        x2d = jnp.pad(x2d, ((0, m_pad - M), (0, 0)))
    out = pl.pallas_call(
        _conv1x1_kernel,
        out_shape=jax.ShapeDtypeStruct((m_pad, C), out_dtype),
        grid=(m_pad // tm,),
        in_specs=[
            pl.BlockSpec((tm, K), lambda i: (i, 0)),
            pl.BlockSpec((K, C), lambda i: (0, 0)),
            pl.BlockSpec((1, C), lambda i: (0, 0)),
        ],
        out_specs=pl.BlockSpec((tm, C), lambda i: (i, 0)),
        compiler_params=pltpu.CompilerParams(
            dimension_semantics=("parallel",),
            vmem_limit_bytes=_VMEM_LIMIT),
    )(x2d, w, b.reshape(1, C))
    return out[:M] if m_pad != M else out


# ---------------------------------------------------------------------------
# Kernel 2: non-local context  k_b = (phi_b^T @ g_b) / S   (Cint x Cint)
#   phi/g projections fused into one matmul; reduction over S blocks.
# ---------------------------------------------------------------------------
def nl_context(x_seq_pad, w_pg, b_pg, *, s_actual, tile_s):
    B, s_pad, cin = x_seq_pad.shape
    cint2 = w_pg.shape[1]
    cint = cint2 // 2
    n_s = s_pad // tile_s

    def kernel(x_ref, wpg_ref, bpg_ref, k_ref):
        si = pl.program_id(1)

        @pl.when(si == 0)
        def _init():
            k_ref[...] = jnp.zeros_like(k_ref)

        pg = jnp.dot(x_ref[...], wpg_ref[...],
                     preferred_element_type=jnp.float32) + bpg_ref[...]
        phi = pg[:, :cint]
        g = pg[:, cint:]
        if s_pad != s_actual:  # mask zero-padded rows (their bias-only phi)
            rid = si * tile_s + lax.broadcasted_iota(jnp.int32, (tile_s, 1), 0)
            phi = jnp.where(rid < s_actual, phi, 0.0)
        k_ref[...] += lax.dot_general(
            phi.astype(jnp.bfloat16), g.astype(jnp.bfloat16),
            (((0,), (0,)), ((), ())), preferred_element_type=jnp.float32)

        @pl.when(si == n_s - 1)
        def _finalize():
            k_ref[...] *= (1.0 / s_actual)   # 'dot' mode: divide by N positions

    return pl.pallas_call(
        kernel,
        out_shape=jax.ShapeDtypeStruct((B, cint, cint), jnp.float32),
        grid=(B, n_s),
        in_specs=[
            pl.BlockSpec((None, tile_s, cin), lambda b, si: (b, si, 0)),
            pl.BlockSpec((cin, cint2), lambda b, si: (0, 0)),
            pl.BlockSpec((1, cint2), lambda b, si: (0, 0)),
        ],
        out_specs=pl.BlockSpec((None, cint, cint), lambda b, si: (b, 0, 0)),
        compiler_params=pltpu.CompilerParams(
            dimension_semantics=("parallel", "arbitrary"),
            vmem_limit_bytes=_VMEM_LIMIT),
    )(x_seq_pad, w_pg, b_pg)


# ---------------------------------------------------------------------------
# Kernel 3: non-local output + fused last_layer
#   theta = x@w_theta+b ; y = theta@k ; wy = y@W_z'+b_z' (BN folded)
#   z = wy + x ; logits = x@W_top + z@W_bot + b_last   (lane-padded to 128)
# ---------------------------------------------------------------------------
def nl_output(x_seq_pad, k_ctx, w_tq, b_tq, w_zf, b_zf, w_bot, b_last,
              *, tile_s, nc_pad):
    B, s_pad, cin = x_seq_pad.shape
    cint = k_ctx.shape[1]
    n_s = s_pad // tile_s

    def kernel(x_ref, k_ref, wtq_ref, btq_ref, wz_ref, bz_ref,
               wbot_ref, bl_ref, o_ref):
        x = x_ref[...]                                            # (tile_s, Cin) bf16
        xt = jnp.dot(x, wtq_ref[...],
                     preferred_element_type=jnp.float32) + btq_ref[...]
        theta = xt[:, :cint]                                      # x@w_theta + b_theta
        x_wtop = xt[:, cint:]                                     # x@W_top
        y = jnp.dot(theta.astype(jnp.bfloat16), k_ref[...].astype(jnp.bfloat16),
                    preferred_element_type=jnp.float32)
        wy = jnp.dot(y.astype(jnp.bfloat16), wz_ref[...],
                     preferred_element_type=jnp.float32) + bz_ref[...]
        z = wy + x.astype(jnp.float32)                            # residual
        logits = (x_wtop
                  + jnp.dot(z.astype(jnp.bfloat16), wbot_ref[...],
                            preferred_element_type=jnp.float32)
                  + bl_ref[...])
        o_ref[...] = logits.astype(o_ref.dtype)

    return pl.pallas_call(
        kernel,
        out_shape=jax.ShapeDtypeStruct((B, s_pad, nc_pad), jnp.float32),
        grid=(B, n_s),
        in_specs=[
            pl.BlockSpec((None, tile_s, cin), lambda b, si: (b, si, 0)),
            pl.BlockSpec((None, cint, cint), lambda b, si: (b, 0, 0)),
            pl.BlockSpec(w_tq.shape, lambda b, si: (0, 0)),
            pl.BlockSpec(b_tq.shape, lambda b, si: (0, 0)),
            pl.BlockSpec(w_zf.shape, lambda b, si: (0, 0)),
            pl.BlockSpec(b_zf.shape, lambda b, si: (0, 0)),
            pl.BlockSpec(w_bot.shape, lambda b, si: (0, 0)),
            pl.BlockSpec(b_last.shape, lambda b, si: (0, 0)),
        ],
        out_specs=pl.BlockSpec((None, tile_s, nc_pad), lambda b, si: (b, si, 0)),
        compiler_params=pltpu.CompilerParams(
            dimension_semantics=("parallel", "parallel"),
            vmem_limit_bytes=_VMEM_LIMIT),
    )(x_seq_pad, k_ctx, w_tq, b_tq, w_zf, b_zf, w_bot, b_last)


# ---------------------------------------------------------------------------
# Wrapper-time parameter folding / fusion (all exact f32 constant folds)
# ---------------------------------------------------------------------------
def _prepare_fused(params, num_class, nc_pad):
    f32, bf16 = jnp.float32, jnp.bfloat16
    nl = params["nl"]
    C = params["emb_w"].shape[1]

    # Eval-mode BN folded into W_z / b_z
    w_zf = (nl["w_z"] * nl["bn_scale"][None, :]).astype(bf16)
    b_zf = (nl["b_z"] * nl["bn_scale"] + nl["bn_shift"]).reshape(1, -1).astype(f32)

    # Split + lane-pad the last layer (concat([emb, z]) @ W_last + b)
    pad = nc_pad - num_class
    w_top = jnp.pad(params["last_w"][:C], ((0, 0), (0, pad)))
    w_bot = jnp.pad(params["last_w"][C:], ((0, 0), (0, pad))).astype(bf16)
    b_last = jnp.pad(params["last_b"], (0, pad)).reshape(1, -1).astype(f32)

    # Fused projections
    w_pg = jnp.concatenate([nl["w_phi"], nl["w_g"]], axis=1).astype(bf16)
    b_pg = jnp.concatenate([nl["b_phi"], nl["b_g"]]).reshape(1, -1).astype(f32)
    w_tq = jnp.concatenate([nl["w_theta"], w_top], axis=1).astype(bf16)
    b_tq = jnp.concatenate(
        [nl["b_theta"], jnp.zeros((nc_pad,), f32)]).reshape(1, -1).astype(f32)

    return dict(
        emb_w=params["emb_w"].astype(bf16), emb_b=params["emb_b"].astype(f32),
        w_pg=w_pg, b_pg=b_pg, w_tq=w_tq, b_tq=b_tq,
        w_zf=w_zf, b_zf=b_zf, w_bot=w_bot, b_last=b_last)


# ---------------------------------------------------------------------------
# Non_local3d forward (core path, downsample=False)
# ---------------------------------------------------------------------------
def non_local3d_forward(x_feat_nchw, params, *, clip_num):
    # x_feat_nchw: (N, 2048, H, W) encoder output, N = clip_num * B
    # TODO(synk): the ResNet encoder (net_enc) is an external module; its final
    # feature map is the kernel input here.
    N, Cf, H, W = x_feat_nchw.shape
    B = N // clip_num
    HW = H * W
    S = clip_num * HW
    C = params["emb_w"].shape[1]
    num_class = params["last_w"].shape[1]
    nc_pad = _round_up(num_class, 128)

    fused = _prepare_fused(params, num_class, nc_pad)

    # TODO(synk): this NCHW->rows relayout of the 2048-ch feature could be
    # folded into the emb conv kernel (K-blocked BlockSpec + in-kernel
    # transpose); kept as a single fused XLA transpose+cast pass here.
    x_rows = jnp.transpose(x_feat_nchw, (0, 2, 3, 1)).astype(
        jnp.bfloat16).reshape(N * HW, Cf)

    # emb = Conv2d(2048, 256, 1, 1)  -> bf16 rows
    emb_rows = conv1x1(x_rows, fused["emb_w"], fused["emb_b"])     # (N*HW, C)

    # sequence layout (B, S=T*HW, C); frame t of batch b was row n = t*B + b
    x_seq = emb_rows.reshape(clip_num, B, HW, C).transpose(1, 0, 2, 3)
    x_seq = x_seq.reshape(B, S, C)

    tile_s = min(512, _round_up(S, 8))
    s_pad = _round_up(S, tile_s)
    if s_pad != S:
        x_seq = jnp.pad(x_seq, ((0, 0), (0, s_pad - S), (0, 0)))

    # Re-associated non-local block ('dot' mode): k = (phi^T g)/S, y = theta k
    k_ctx = nl_context(x_seq, fused["w_pg"], fused["b_pg"],
                       s_actual=S, tile_s=tile_s)                  # (B, Ci, Ci)
    logits_seq = nl_output(x_seq, k_ctx, fused["w_tq"], fused["b_tq"],
                           fused["w_zf"], fused["b_zf"],
                           fused["w_bot"], fused["b_last"],
                           tile_s=tile_s, nc_pad=nc_pad)           # (B, s_pad, 128)

    logits_seq = logits_seq[:, :S, :num_class]
    logits = logits_seq.reshape(B, clip_num, H, W, num_class)
    logits = jnp.transpose(logits, (1, 0, 4, 2, 3)).reshape(N, num_class, H, W)

    # torch.split(x, N // clip_num, dim=0)
    preds = [logits[c * B:(c + 1) * B] for c in range(clip_num)]
    # TODO(synk): training branch (log_softmax + bilinear interpolation to label
    # size + external `crit` + pixel_acc), the segSize softmax branch and the
    # downsample=True avg_pool/interpolate path are external / dynamic-size and
    # left to the caller.
    return preds


# ---------------------------------------------------------------------------
# Pure-JAX f32 reference in the literal PyTorch op order (for validation)
# ---------------------------------------------------------------------------
def _reference_forward(x_feat, params, clip_num):
    N, Cf, H, W = x_feat.shape
    B = N // clip_num
    HW = H * W
    S = clip_num * HW
    nl = params["nl"]
    C = params["emb_w"].shape[1]
    nc = params["last_w"].shape[1]

    x_rows = jnp.transpose(x_feat, (0, 2, 3, 1)).reshape(N * HW, Cf)
    emb = x_rows @ params["emb_w"] + params["emb_b"]
    x_seq = emb.reshape(clip_num, B, HW, C).transpose(1, 0, 2, 3).reshape(B, S, C)

    theta = x_seq @ nl["w_theta"] + nl["b_theta"]
    phi = x_seq @ nl["w_phi"] + nl["b_phi"]
    g = x_seq @ nl["w_g"] + nl["b_g"]
    f = jnp.einsum("bik,bjk->bij", theta, phi) / S
    y = jnp.einsum("bij,bjc->bic", f, g)
    wy = (y @ nl["w_z"] + nl["b_z"]) * nl["bn_scale"] + nl["bn_shift"]
    z = wy + x_seq

    cat = jnp.concatenate([x_seq, z], axis=-1)
    logits_seq = cat @ params["last_w"] + params["last_b"]
    logits = logits_seq.reshape(B, clip_num, H, W, nc)
    logits = jnp.transpose(logits, (1, 0, 4, 2, 3)).reshape(N, nc, H, W)
    return [logits[c * B:(c + 1) * B] for c in range(clip_num)]


# ---------------------------------------------------------------------------
# Deterministic parameter initialisation (shapes from the module __init__)
# ---------------------------------------------------------------------------
def init_params(key, num_class=8):
    Cf, C, Ci = 2048, 256, 128     # encoder feat, emb channels, inter channels
    ks = jax.random.split(key, 16)

    def w(k, shape, scale=0.02):
        return scale * jax.random.normal(k, shape, dtype=jnp.float32)

    # BatchNorm3d(256) in W_z, eval-mode folded into scale/shift
    eps = 1e-5
    gamma = 1.0 + w(ks[10], (C,), 0.1)
    beta = w(ks[11], (C,), 0.1)
    run_mean = w(ks[12], (C,), 0.1)
    run_var = 1.0 + jnp.abs(w(ks[13], (C,), 0.1))
    bn_scale = gamma / jnp.sqrt(run_var + eps)
    bn_shift = beta - run_mean * bn_scale

    return {
        "emb_w": w(ks[0], (Cf, C)), "emb_b": w(ks[1], (C,)),
        "last_w": w(ks[2], (2 * C, num_class)), "last_b": w(ks[3], (num_class,)),
        "nl": {
            "w_theta": w(ks[4], (C, Ci)), "b_theta": w(ks[5], (Ci,)),
            "w_phi": w(ks[6], (C, Ci)), "b_phi": w(ks[7], (Ci,)),
            "w_g": w(ks[8], (C, Ci)), "b_g": w(ks[9], (Ci,)),
            "w_z": w(ks[14], (Ci, C)), "b_z": w(ks[15], (C,)),
            "bn_scale": bn_scale, "bn_shift": bn_shift,
        },
    }


if __name__ == "__main__":
    key = jax.random.PRNGKey(0)
    k_in, k_p = jax.random.split(key)

    clip_num, batch_per_clip, H, W = 2, 1, 8, 8
    N = clip_num * batch_per_clip
    num_class = 8

    # Encoder output feature map (stand-in for net_enc(...)[-1]): (N, 2048, H, W)
    x_feat = jax.random.normal(k_in, (N, 2048, H, W), dtype=jnp.float32)
    params = init_params(k_p, num_class=num_class)

    fwd = jax.jit(functools.partial(non_local3d_forward, clip_num=clip_num))
    preds = fwd(x_feat, params)
    preds = [jax.block_until_ready(p) for p in preds]

    assert len(preds) == clip_num
    assert preds[0].shape == (batch_per_clip, num_class, H, W)

    # Validate against the pure-JAX f32 reference (bf16 MXU inputs -> loose tol)
    ref = jax.jit(functools.partial(_reference_forward, clip_num=clip_num))(
        x_feat, params)
    max_err = max(float(jnp.max(jnp.abs(p - r))) for p, r in zip(preds, ref))
    assert max_err < 0.1, f"max abs error vs f32 reference: {max_err}"

    print("KERNEL_OK")
</pallas_src>

<mosaic_0001>
module attributes {stable_mosaic.version = 11 : i64} {
  func.func @_conv1x1_kernel(%arg0: i32, %arg1: memref<128x2048xbf16, #tpu.memory_space<vmem>>, %arg2: memref<2048x256xbf16, #tpu.memory_space<vmem>>, %arg3: memref<1x256xf32, #tpu.memory_space<vmem>>, %arg4: memref<128x256xbf16, #tpu.memory_space<vmem>>) attributes {dimension_semantics = [#tpu.dimension_semantics<parallel>], iteration_bounds = array<i64: 1>, scalar_prefetch = 0 : i64, scratch_operands = 0 : i64, tpu.core_type = #tpu.core_type<tc>, window_params = [{transform_indices = @transform_0, window_bounds = array<i64: 128, 2048>}, {pipeline_mode = #tpu.pipeline_mode<synchronous>, transform_indices = @transform_1, window_bounds = array<i64: 2048, 256>}, {pipeline_mode = #tpu.pipeline_mode<synchronous>, transform_indices = @transform_2, window_bounds = array<i64: 1, 256>}, {transform_indices = @transform_3, window_bounds = array<i64: 128, 256>}]} {
    %c0 = arith.constant 0 : index
    %c0_0 = arith.constant 0 : index
    %0 = vector.load %arg1[%c0, %c0_0] : memref<128x2048xbf16, #tpu.memory_space<vmem>>, vector<128x2048xbf16>
    %c0_1 = arith.constant 0 : index
    %c0_2 = arith.constant 0 : index
    %1 = vector.load %arg2[%c0_1, %c0_2] : memref<2048x256xbf16, #tpu.memory_space<vmem>>, vector<2048x256xbf16>
    %cst = arith.constant dense<0.000000e+00> : vector<128x256xf32>
    %2 = tpu.matmul %0, %1, %cst {dimension_numbers = #tpu.dot_dimension_numbers<[1], [0], [0], [1], [0, 0, 1, 1], [], []>} : vector<128x2048xbf16>, vector<2048x256xbf16>, vector<128x256xf32> -> vector<128x256xf32>
    %c0_3 = arith.constant 0 : index
    %c0_4 = arith.constant 0 : index
    %3 = vector.load %arg3[%c0_3, %c0_4] : memref<1x256xf32, #tpu.memory_space<vmem>>, vector<1x256xf32>
    %4 = vector.broadcast %3 : vector<1x256xf32> to vector<128x256xf32>
    %5 = arith.addf %2, %4 : vector<128x256xf32>
    %6 = arith.truncf %5 : vector<128x256xf32> to vector<128x256xbf16>
    %c0_5 = arith.constant 0 : index
    %c0_6 = arith.constant 0 : index
    %7 = vector.load %arg4[%c0_5, %c0_6] : memref<128x256xbf16, #tpu.memory_space<vmem>>, vector<128x256xbf16>
    tpu.vector_store %arg4[%c0_5, %c0_6], %6 {strides = array<i32>} : memref<128x256xbf16, #tpu.memory_space<vmem>>, vector<128x256xbf16>,
    return
  }
  func.func @transform_0(%arg0: i32) -> (i32, i32) {
    %c0_i32 = arith.constant 0 : i32
    %c0_i32_0 = arith.constant 0 : i32
    return %arg0, %c0_i32 : i32, i32
  }
  func.func @transform_1(%arg0: i32) -> (i32, i32) {
    %c0_i32 = arith.constant 0 : i32
    %c0_i32_0 = arith.constant 0 : i32
    %c0_i32_1 = arith.constant 0 : i32
    return %c0_i32, %c0_i32_0 : i32, i32
  }
  func.func @transform_2(%arg0: i32) -> (i32, i32) {
    %c0_i32 = arith.constant 0 : i32
    %c0_i32_0 = arith.constant 0 : i32
    %c0_i32_1 = arith.constant 0 : i32
    return %c0_i32, %c0_i32_0 : i32, i32
  }
  func.func @transform_3(%arg0: i32) -> (i32, i32) {
    %c0_i32 = arith.constant 0 : i32
    %c0_i32_0 = arith.constant 0 : i32
    return %arg0, %c0_i32 : i32, i32
  }
}

module attributes {stable_mosaic.version = 11 : i64} {
  func.func @kernel(%arg0: i32, %arg1: i32, %arg2: memref<1x128x256xbf16, #tpu.memory_space<vmem>>, %arg3: memref<256x256xbf16, #tpu.memory_space<vmem>>, %arg4: memref<1x256xf32, #tpu.memory_space<vmem>>, %arg5: memref<1x128x128xf32, #tpu.memory_space<vmem>>) attributes {dimension_semantics = [#tpu.dimension_semantics<parallel>, #tpu.dimension_semantics<arbitrary>], iteration_bounds = array<i64: 1, 1>, scalar_prefetch = 0 : i64, scratch_operands = 0 : i64, tpu.core_type = #tpu.core_type<tc>, window_params = [{transform_indices = @transform_0, window_bounds = array<i64: 1, 128, 256>}, {pipeline_mode = #tpu.pipeline_mode<synchronous>, transform_indices = @transform_1, window_bounds = array<i64: 256, 256>}, {pipeline_mode = #tpu.pipeline_mode<synchronous>, transform_indices = @transform_2, window_bounds = array<i64: 1, 256>}, {transform_indices = @transform_3, window_bounds = array<i64: 1, 128, 128>}]} {
    %c0_i32 = arith.constant 0 : i32
    %0 = arith.cmpi eq, %arg1, %c0_i32 : i32
    %1 = arith.extui %0 : i1 to i32
    %c0_i32_0 = arith.constant 0 : i32
    %2 = arith.cmpi ne, %1, %c0_i32_0 : i32
    scf.if %2 {
      %cst_16 = arith.constant 0.000000e+00 : f32
      %24 = vector.broadcast %cst_16 : f32 to vector<128x128xf32>
      %c0_17 = arith.constant 0 : index
      %c0_18 = arith.constant 0 : index
      %c0_19 = arith.constant 0 : index
      %25 = vector.load %arg5[%c0_17, %c0_18, %c0_19] : memref<1x128x128xf32, #tpu.memory_space<vmem>>, vector<1x128x128xf32>
      %26 = vector.shape_cast %25 : vector<1x128x128xf32> to vector<128x128xf32>
      %27 = vector.shape_cast %24 : vector<128x128xf32> to vector<1x128x128xf32>
      tpu.vector_store %arg5[%c0_17, %c0_18, %c0_19], %27 {strides = array<i32>} : memref<1x128x128xf32, #tpu.memory_space<vmem>>, vector<1x128x128xf32>,
    } else {
    }
    %c0 = arith.constant 0 : index
    %c0_1 = arith.constant 0 : index
    %c0_2 = arith.constant 0 : index
    %3 = vector.load %arg2[%c0, %c0_1, %c0_2] : memref<1x128x256xbf16, #tpu.memory_space<vmem>>, vector<1x128x256xbf16>
    %4 = vector.shape_cast %3 : vector<1x128x256xbf16> to vector<128x256xbf16>
    %c0_3 = arith.constant 0 : index
    %c0_4 = arith.constant 0 : index
    %5 = vector.load %arg3[%c0_3, %c0_4] : memref<256x256xbf16, #tpu.memory_space<vmem>>, vector<256x256xbf16>
    %cst = arith.constant dense<0.000000e+00> : vector<128x256xf32>
    %6 = tpu.matmul %4, %5, %cst {dimension_numbers = #tpu.dot_dimension_numbers<[1], [0], [0], [1], [0, 0, 1, 1], [], []>} : vector<128x256xbf16>, vector<256x256xbf16>, vector<128x256xf32> -> vector<128x256xf32>
    %c0_5 = arith.constant 0 : index
    %c0_6 = arith.constant 0 : index
    %7 = vector.load %arg4[%c0_5, %c0_6] : memref<1x256xf32, #tpu.memory_space<vmem>>, vector<1x256xf32>
    %8 = vector.broadcast %7 : vector<1x256xf32> to vector<128x256xf32>
    %9 = arith.addf %6, %8 : vector<128x256xf32>
    %10 = vector.extract_strided_slice %9 {offsets = [0, 0], sizes = [128, 128], strides = [1, 1]} : vector<128x256xf32> to vector<128x128xf32>
    %11 = vector.extract_strided_slice %9 {offsets = [0, 128], sizes = [128, 128], strides = [1, 1]} : vector<128x256xf32> to vector<128x128xf32>
    %c0_7 = arith.constant 0 : index
    %c0_8 = arith.constant 0 : index
    %c0_9 = arith.constant 0 : index
    %12 = vector.load %arg5[%c0_7, %c0_8, %c0_9] : memref<1x128x128xf32, #tpu.memory_space<vmem>>, vector<1x128x128xf32>
    %13 = vector.shape_cast %12 : vector<1x128x128xf32> to vector<128x128xf32>
    %14 = arith.truncf %10 : vector<128x128xf32> to vector<128x128xbf16>
    %15 = arith.truncf %11 : vector<128x128xf32> to vector<128x128xbf16>
    %cst_10 = arith.constant dense<0.000000e+00> : vector<128x128xf32>
    %16 = tpu.matmul %14, %15, %cst_10 {dimension_numbers = #tpu.dot_dimension_numbers<[0], [0], [1], [1], [0, 1, 1, 1], [], []>} : vector<128x128xbf16>, vector<128x128xbf16>, vector<128x128xf32> -> vector<128x128xf32>
    %17 = arith.addf %13, %16 : vector<128x128xf32>
    %c0_11 = arith.constant 0 : index
    %c0_12 = arith.constant 0 : index
    %c0_13 = arith.constant 0 : index
    %18 = vector.load %arg5[%c0_11, %c0_12, %c0_13] : memref<1x128x128xf32, #tpu.memory_space<vmem>>, vector<1x128x128xf32>
    %19 = vector.shape_cast %18 : vector<1x128x128xf32> to vector<128x128xf32>
    %20 = vector.shape_cast %17 : vector<128x128xf32> to vector<1x128x128xf32>
    tpu.vector_store %arg5[%c0_11, %c0_12, %c0_13], %20 {strides = array<i32>} : memref<1x128x128xf32, #tpu.memory_space<vmem>>, vector<1x128x128xf32>,
    %c0_i32_14 = arith.constant 0 : i32
    %21 = arith.cmpi eq, %arg1, %c0_i32_14 : i32
    %22 = arith.extui %21 : i1 to i32
    %c0_i32_15 = arith.constant 0 : i32
    %23 = arith.cmpi ne, %22, %c0_i32_15 : i32
    scf.if %23 {
      %c0_16 = arith.constant 0 : index
      %c0_17 = arith.constant 0 : index
      %c0_18 = arith.constant 0 : index
      %24 = vector.load %arg5[%c0_16, %c0_17, %c0_18] : memref<1x128x128xf32, #tpu.memory_space<vmem>>, vector<1x128x128xf32>
      %25 = vector.shape_cast %24 : vector<1x128x128xf32> to vector<128x128xf32>
      %cst_19 = arith.constant 7.812500e-03 : f32
      %26 = vector.broadcast %cst_19 : f32 to vector<128x128xf32>
      %27 = arith.mulf %25, %26 : vector<128x128xf32>
      %c0_20 = arith.constant 0 : index
      %c0_21 = arith.constant 0 : index
      %c0_22 = arith.constant 0 : index
      %28 = vector.load %arg5[%c0_20, %c0_21, %c0_22] : memref<1x128x128xf32, #tpu.memory_space<vmem>>, vector<1x128x128xf32>
      %29 = vector.shape_cast %28 : vector<1x128x128xf32> to vector<128x128xf32>
      %30 = vector.shape_cast %27 : vector<128x128xf32> to vector<1x128x128xf32>
      tpu.vector_store %arg5[%c0_20, %c0_21, %c0_22], %30 {strides = array<i32>} : memref<1x128x128xf32, #tpu.memory_space<vmem>>, vector<1x128x128xf32>,
    } else {
    }
    return
  }
  func.func @transform_0(%arg0: i32, %arg1: i32) -> (i32, i32, i32) {
    %c0_i32 = arith.constant 0 : i32
    %c0_i32_0 = arith.constant 0 : i32
    return %arg0, %arg1, %c0_i32 : i32, i32, i32
  }
  func.func @transform_1(%arg0: i32, %arg1: i32) -> (i32, i32) {
    %c0_i32 = arith.constant 0 : i32
    %c0_i32_0 = arith.constant 0 : i32
    %c0_i32_1 = arith.constant 0 : i32
    return %c0_i32, %c0_i32_0 : i32, i32
  }
  func.func @transform_2(%arg0: i32, %arg1: i32) -> (i32, i32) {
    %c0_i32 = arith.constant 0 : i32
    %c0_i32_0 = arith.constant 0 : i32
    %c0_i32_1 = arith.constant 0 : i32
    return %c0_i32, %c0_i32_0 : i32, i32
  }
  func.func @transform_3(%arg0: i32, %arg1: i32) -> (i32, i32, i32) {
    %c0_i32 = arith.constant 0 : i32
    %c0_i32_0 = arith.constant 0 : i32
    %c0_i32_1 = arith.constant 0 : i32
    return %arg0, %c0_i32, %c0_i32_0 : i32, i32, i32
  }
}

module attributes {stable_mosaic.version = 11 : i64} {
  func.func @kernel(%arg0: i32, %arg1: i32, %arg2: memref<1x128x256xbf16, #tpu.memory_space<vmem>>, %arg3: memref<1x128x128xf32, #tpu.memory_space<vmem>>, %arg4: memref<256x256xbf16, #tpu.memory_space<vmem>>, %arg5: memref<1x256xf32, #tpu.memory_space<vmem>>, %arg6: memref<128x256xbf16, #tpu.memory_space<vmem>>, %arg7: memref<1x256xf32, #tpu.memory_space<vmem>>, %arg8: memref<256x128xbf16, #tpu.memory_space<vmem>>, %arg9: memref<1x128xf32, #tpu.memory_space<vmem>>, %arg10: memref<1x128x128xf32, #tpu.memory_space<vmem>>) attributes {dimension_semantics = [#tpu.dimension_semantics<parallel>, #tpu.dimension_semantics<parallel>], iteration_bounds = array<i64: 1, 1>, scalar_prefetch = 0 : i64, scratch_operands = 0 : i64, tpu.core_type = #tpu.core_type<tc>, window_params = [{transform_indices = @transform_0, window_bounds = array<i64: 1, 128, 256>}, {transform_indices = @transform_1, window_bounds = array<i64: 1, 128, 128>}, {pipeline_mode = #tpu.pipeline_mode<synchronous>, transform_indices = @transform_2, window_bounds = array<i64: 256, 256>}, {pipeline_mode = #tpu.pipeline_mode<synchronous>, transform_indices = @transform_3, window_bounds = array<i64: 1, 256>}, {pipeline_mode = #tpu.pipeline_mode<synchronous>, transform_indices = @transform_4, window_bounds = array<i64: 128, 256>}, {pipeline_mode = #tpu.pipeline_mode<synchronous>, transform_indices = @transform_5, window_bounds = array<i64: 1, 256>}, {pipeline_mode = #tpu.pipeline_mode<synchronous>, transform_indices = @transform_6, window_bounds = array<i64: 256, 128>}, {pipeline_mode = #tpu.pipeline_mode<synchronous>, transform_indices = @transform_7, window_bounds = array<i64: 1, 128>}, {transform_indices = @transform_8, window_bounds = array<i64: 1, 128, 128>}]} {
    %c0 = arith.constant 0 : index
    %c0_0 = arith.constant 0 : index
    %c0_1 = arith.constant 0 : index
    %0 = vector.load %arg2[%c0, %c0_0, %c0_1] : memref<1x128x256xbf16, #tpu.memory_space<vmem>>, vector<1x128x256xbf16>
    %1 = vector.shape_cast %0 : vector<1x128x256xbf16> to vector<128x256xbf16>
    %c0_2 = arith.constant 0 : index
    %c0_3 = arith.constant 0 : index
    %2 = vector.load %arg4[%c0_2, %c0_3] : memref<256x256xbf16, #tpu.memory_space<vmem>>, vector<256x256xbf16>
    %cst = arith.constant dense<0.000000e+00> : vector<128x256xf32>
    %3 = tpu.matmul %1, %2, %cst {dimension_numbers = #tpu.dot_dimension_numbers<[1], [0], [0], [1], [0, 0, 1, 1], [], []>} : vector<128x256xbf16>, vector<256x256xbf16>, vector<128x256xf32> -> vector<128x256xf32>
    %c0_4 = arith.constant 0 : index
    %c0_5 = arith.constant 0 : index
    %4 = vector.load %arg5[%c0_4, %c0_5] : memref<1x256xf32, #tpu.memory_space<vmem>>, vector<1x256xf32>
    %5 = vector.broadcast %4 : vector<1x256xf32> to vector<128x256xf32>
    %6 = arith.addf %3, %5 : vector<128x256xf32>
    %7 = vector.extract_strided_slice %6 {offsets = [0, 0], sizes = [128, 128], strides = [1, 1]} : vector<128x256xf32> to vector<128x128xf32>
    %8 = vector.extract_strided_slice %6 {offsets = [0, 128], sizes = [128, 128], strides = [1, 1]} : vector<128x256xf32> to vector<128x128xf32>
    %9 = arith.truncf %7 : vector<128x128xf32> to vector<128x128xbf16>
    %c0_6 = arith.constant 0 : index
    %c0_7 = arith.constant 0 : index
    %c0_8 = arith.constant 0 : index
    %10 = vector.load %arg3[%c0_6, %c0_7, %c0_8] : memref<1x128x128xf32, #tpu.memory_space<vmem>>, vector<1x128x128xf32>
    %11 = vector.shape_cast %10 : vector<1x128x128xf32> to vector<128x128xf32>
    %12 = arith.truncf %11 : vector<128x128xf32> to vector<128x128xbf16>
    %cst_9 = arith.constant dense<0.000000e+00> : vector<128x128xf32>
    %13 = tpu.matmul %9, %12, %cst_9 {dimension_numbers = #tpu.dot_dimension_numbers<[1], [0], [0], [1], [0, 0, 1, 1], [], []>} : vector<128x128xbf16>, vector<128x128xbf16>, vector<128x128xf32> -> vector<128x128xf32>
    %14 = arith.truncf %13 : vector<128x128xf32> to vector<128x128xbf16>
    %c0_10 = arith.constant 0 : index
    %c0_11 = arith.constant 0 : index
    %15 = vector.load %arg6[%c0_10, %c0_11] : memref<128x256xbf16, #tpu.memory_space<vmem>>, vector<128x256xbf16>
    %cst_12 = arith.constant dense<0.000000e+00> : vector<128x256xf32>
    %16 = tpu.matmul %14, %15, %cst_12 {dimension_numbers = #tpu.dot_dimension_numbers<[1], [0], [0], [1], [0, 0, 1, 1], [], []>} : vector<128x128xbf16>, vector<128x256xbf16>, vector<128x256xf32> -> vector<128x256xf32>
    %c0_13 = arith.constant 0 : index
    %c0_14 = arith.constant 0 : index
    %17 = vector.load %arg7[%c0_13, %c0_14] : memref<1x256xf32, #tpu.memory_space<vmem>>, vector<1x256xf32>
    %18 = vector.broadcast %17 : vector<1x256xf32> to vector<128x256xf32>
    %19 = arith.addf %16, %18 : vector<128x256xf32>
    %20 = arith.extf %1 : vector<128x256xbf16> to vector<128x256xf32>
    %21 = arith.addf %19, %20 : vector<128x256xf32>
    %22 = arith.truncf %21 : vector<128x256xf32> to vector<128x256xbf16>
    %c0_15 = arith.constant 0 : index
    %c0_16 = arith.constant 0 : index
    %23 = vector.load %arg8[%c0_15, %c0_16] : memref<256x128xbf16, #tpu.memory_space<vmem>>, vector<256x128xbf16>
    %cst_17 = arith.constant dense<0.000000e+00> : vector<128x128xf32>
    %24 = tpu.matmul %22, %23, %cst_17 {dimension_numbers = #tpu.dot_dimension_numbers<[1], [0], [0], [1], [0, 0, 1, 1], [], []>} : vector<128x256xbf16>, vector<256x128xbf16>, vector<128x128xf32> -> vector<128x128xf32>
    %25 = arith.addf %8, %24 : vector<128x128xf32>
    %c0_18 = arith.constant 0 : index
    %c0_19 = arith.constant 0 : index
    %26 = vector.load %arg9[%c0_18, %c0_19] : memref<1x128xf32, #tpu.memory_space<vmem>>, vector<1x128xf32>
    %27 = vector.broadcast %26 : vector<1x128xf32> to vector<128x128xf32>
    %28 = arith.addf %25, %27 : vector<128x128xf32>
    %c0_20 = arith.constant 0 : index
    %c0_21 = arith.constant 0 : index
    %c0_22 = arith.constant 0 : index
    %29 = vector.load %arg10[%c0_20, %c0_21, %c0_22] : memref<1x128x128xf32, #tpu.memory_space<vmem>>, vector<1x128x128xf32>
    %30 = vector.shape_cast %29 : vector<1x128x128xf32> to vector<128x128xf32>
    %31 = vector.shape_cast %28 : vector<128x128xf32> to vector<1x128x128xf32>
    tpu.vector_store %arg10[%c0_20, %c0_21, %c0_22], %31 {strides = array<i32>} : memref<1x128x128xf32, #tpu.memory_space<vmem>>, vector<1x128x128xf32>,
    return
  }
  func.func @transform_0(%arg0: i32, %arg1: i32) -> (i32, i32, i32) {
    %c0_i32 = arith.constant 0 : i32
    %c0_i32_0 = arith.constant 0 : i32
    return %arg0, %arg1, %c0_i32 : i32, i32, i32
  }
  func.func @transform_1(%arg0: i32, %arg1: i32) -> (i32, i32, i32) {
    %c0_i32 = arith.constant 0 : i32
    %c0_i32_0 = arith.constant 0 : i32
    %c0_i32_1 = arith.constant 0 : i32
    return %arg0, %c0_i32, %c0_i32_0 : i32, i32, i32
  }
  func.func @transform_2(%arg0: i32, %arg1: i32) -> (i32, i32) {
    %c0_i32 = arith.constant 0 : i32
    %c0_i32_0 = arith.constant 0 : i32
    %c0_i32_1 = arith.constant 0 : i32
    return %c0_i32, %c0_i32_0 : i32, i32
  }
  func.func @transform_3(%arg0: i32, %arg1: i32) -> (i32, i32) {
    %c0_i32 = arith.constant 0 : i32
    %c0_i32_0 = arith.constant 0 : i32
    %c0_i32_1 = arith.constant 0 : i32
    return %c0_i32, %c0_i32_0 : i32, i32
  }
  func.func @transform_4(%arg0: i32, %arg1: i32) -> (i32, i32) {
    %c0_i32 = arith.constant 0 : i32
    %c0_i32_0 = arith.constant 0 : i32
    %c0_i32_1 = arith.constant 0 : i32
    return %c0_i32, %c0_i32_0 : i32, i32
  }
  func.func @transform_5(%arg0: i32, %arg1: i32) -> (i32, i32) {
    %c0_i32 = arith.constant 0 : i32
    %c0_i32_0 = arith.constant 0 : i32
    %c0_i32_1 = arith.constant 0 : i32
    return %c0_i32, %c0_i32_0 : i32, i32
  }
  func.func @transform_6(%arg0: i32, %arg1: i32) -> (i32, i32) {
    %c0_i32 = arith.constant 0 : i32
    %c0_i32_0 = arith.constant 0 : i32
    %c0_i32_1 = arith.constant 0 : i32
    return %c0_i32, %c0_i32_0 : i32, i32
  }
  func.func @transform_7(%arg0: i32, %arg1: i32) -> (i32, i32) {
    %c0_i32 = arith.constant 0 : i32
    %c0_i32_0 = arith.constant 0 : i32
    %c0_i32_1 = arith.constant 0 : i32
    return %c0_i32, %c0_i32_0 : i32, i32
  }
  func.func @transform_8(%arg0: i32, %arg1: i32) -> (i32, i32, i32) {
    %c0_i32 = arith.constant 0 : i32
    %c0_i32_0 = arith.constant 0 : i32
    return %arg0, %arg1, %c0_i32 : i32, i32, i32
  }
}

</mosaic_0001>

<bundles_post_ra>
// kernel: non_local3d_forward.4
= control target key start
LH: loop header
LB: loop body
LE: loop exit
PB: predicated region body
PF: predicated region fallthrough
CT: control target
= control target key end

     0   :  { %s1527_s1 = inlined_call_operand.vmem [shape: bf16[256,256], index: 1, kind: input, shape index: {}]   ;;  %s1528_s0 = inlined_call_operand.vmem [shape: bf16[1,128,256], index: 0, kind: input, shape index: {}]   ;;  %s1529_s2 = inlined_call_operand.vmem [shape: f32[1,256], index: 2, kind: input, shape index: {}]   ;;  %s1530_s3 = inlined_call_operand.vmem [shape: f32[1,128,128], index: 3, kind: output, shape index: {}]  }
   0x1   :  { %v830_v0 = vld [vmem:[%s1527_s1 + $0x70] sm:$0xf]  ;;  %v931_v1 = vld [vmem:[%s1527_s1 + $0x74] sm:$0xf0]  ;;  %v822_v2 = vld [vmem:[%s1527_s1 + $0x60] sm:$0xf] }
   0x2   :  { %v831_v3 = vor.u32 %v931_v1, %v830_v0  ;;  %v929_v4 = vld [vmem:[%s1527_s1 + $0x64] sm:$0xf0]  ;;  %v814_v6 = vld [vmem:[%s1527_s1 + $0x50] sm:$0xf]  ;;  %v927_v7 = vld [vmem:[%s1527_s1 + $0x54] sm:$0xf0] }
   0x3   :  { %v823_v5 = vor.u32 %v929_v4, %v822_v2  ;;  %v815_v8 = vor.u32 %v927_v7, %v814_v6  ;;  %v806_v9 = vld [vmem:[%s1527_s1 + $0x40] sm:$0xf]  ;;  %v925_v10 = vld [vmem:[%s1527_s1 + $0x44] sm:$0xf0]  ;;  %v798_v12 = vld [vmem:[%s1527_s1 + $0x30] sm:$0xf] }
   0x4   :  { %948 = vmatpush.bf16.msra.mxu1 %v831_v3  ;;  %949 = vmatpush.bf16.msra.mxu2 %v831_v3  ;;  %v807_v11 = vor.u32 %v925_v10, %v806_v9  ;;  %v923_v13 = vld [vmem:[%s1527_s1 + $0x34] sm:$0xf0]  ;;  %v790_v15 = vld [vmem:[%s1527_s1 + $0x20] sm:$0xf]  ;;  %v921_v16 = vld [vmem:[%s1527_s1 + $0x24] sm:$0xf0] }
   0x5   :  { %950 = vmatpush.bf16.msra.mxu3 %v831_v3  ;;  %328 = vmatpush.bf16.msra.mxu0 %v831_v3  ;;  %v799_v14 = vor.u32 %v923_v13, %v798_v12  ;;  %v791_v17 = vor.u32 %v921_v16, %v790_v15  ;;  %v782_v18 = vld [vmem:[%s1527_s1 + $0x10] sm:$0xf]  ;;  %v919_v19 = vld [vmem:[%s1527_s1 + $0x14] sm:$0xf0]  ;;  %v774_v21 = vld [vmem:[%s1527_s1] sm:$0xf] }
   0x6   :  { %v783_v20 = vor.u32 %v919_v19, %v782_v18  ;;  %v917_v22 = vld [vmem:[%s1527_s1 + $0x4] sm:$0xf0]  ;;  %v726_v23 = vld [vmem:[%s1528_s0 + $0x20] sm:$0xf]  ;;  %v894_v24 = vld [vmem:[%s1527_s1 + $0xf0] sm:$0xf] }
   0x7   :  { %v947_v25 = vld [vmem:[%s1527_s1 + $0xf4] sm:$0xf0]  ;;  %v930_v26 = vld [vmem:[%s1527_s1 + $0x74] sm:$0xf]  ;;  %v832_v27 = vld [vmem:[%s1527_s1 + $0x78] sm:$0xf0]  ;;  %v775_v30 = vor.u32 %v917_v22, %v774_v21 }
   0x8   :  { %951 = vmatpush.bf16.msra.mxu1 %v823_v5  ;;  %952 = vmatpush.bf16.msra.mxu2 %v823_v5  ;;  %v946_v28 = vld [vmem:[%s1527_s1 + $0xf4] sm:$0xf]  ;;  %v896_v29 = vld [vmem:[%s1527_s1 + $0xf8] sm:$0xf0]  ;;  %v905_v31 = vld [vmem:[%s1528_s0 + $0x24] sm:$0xf0]  ;;  %v895_v34 = vor.u32 %v947_v25, %v894_v24  ;;  %v835_v37 = vor.u32 %v930_v26, %v832_v27 }
   0x9   :  { %953 = vmatpush.bf16.msra.mxu3 %v823_v5  ;;  %329 = vmatpush.bf16.msra.mxu0 %v823_v5  ;;  %v742_v32 = vld [vmem:[%s1528_s0 + $0x40] sm:$0xf]  ;;  %v909_v33 = vld [vmem:[%s1528_s0 + $0x44] sm:$0xf0]  ;;  %v899_v38 = vor.u32 %v946_v28, %v896_v29  ;;  %v928_v41 = vld [vmem:[%s1527_s1 + $0x64] sm:$0xf]  ;;  %v1115_v42 = vor.u32 %v905_v31, %v726_v23 }
   0xa   :  { %v758_v35 = vld [vmem:[%s1528_s0 + $0x60] sm:$0xf]  ;;  %v913_v36 = vld [vmem:[%s1528_s0 + $0x64] sm:$0xf0]  ;;  %v1117_v43 = vor.u32 %v909_v33, %v742_v32  ;;  %v824_v44 = vld [vmem:[%s1527_s1 + $0x68] sm:$0xf0] }
   0xb   :  { %v886_v39 = vld [vmem:[%s1527_s1 + $0xe0] sm:$0xf]  ;;  %v945_v40 = vld [vmem:[%s1527_s1 + $0xe4] sm:$0xf0]  ;;  %v944_v45 = vld [vmem:[%s1527_s1 + $0xe4] sm:$0xf]  ;;  %v1128_v47 = vor.u32 %v913_v36, %v758_v35  ;;  %v827_v51 = vor.u32 %v928_v41, %v824_v44 }
   0xc   :  { %954 = vmatpush.bf16.msra.mxu1 %v815_v8  ;;  %955 = vmatpush.bf16.msra.mxu2 %v815_v8  ;;  %v888_v46 = vld [vmem:[%s1527_s1 + $0xe8] sm:$0xf0]  ;;  %v710_v48 = vld [vmem:[%s1528_s0] sm:$0xf]  ;;  %v901_v49 = vld [vmem:[%s1528_s0 + $0x4] sm:$0xf0]  ;;  %v887_v50 = vor.u32 %v945_v40, %v886_v39 }
   0xd   :  { %956 = vmatpush.bf16.msra.mxu3 %v815_v8  ;;  %330 = vmatpush.bf16.msra.mxu0 %v815_v8  ;;  %v891_v52 = vor.u32 %v944_v45, %v888_v46  ;;  %v878_v53 = vld [vmem:[%s1527_s1 + $0xd0] sm:$0xf]  ;;  %v943_v54 = vld [vmem:[%s1527_s1 + $0xd4] sm:$0xf0]  ;;  %v926_v55 = vld [vmem:[%s1527_s1 + $0x54] sm:$0xf]  ;;  %v1156_v59 = vor.u32 %v901_v49, %v710_v48 }
   0xe   :  { %v816_v56 = vld [vmem:[%s1527_s1 + $0x58] sm:$0xf0]  ;;  %v942_v57 = vld [vmem:[%s1527_s1 + $0xd4] sm:$0xf]  ;;  %v879_v60 = vor.u32 %v943_v54, %v878_v53  ;;  %v870_v63 = vld [vmem:[%s1527_s1 + $0xc0] sm:$0xf] }
   0xf   :  { %v880_v58 = vld [vmem:[%s1527_s1 + $0xd8] sm:$0xf0]  ;;  %v819_v61 = vor.u32 %v926_v55, %v816_v56  ;;  %v941_v0 = vld [vmem:[%s1527_s1 + $0xc4] sm:$0xf0]  ;;  %v924_v1 = vld [vmem:[%s1527_s1 + $0x44] sm:$0xf] }
  0x10   :  { %957 = vmatpush.bf16.msra.mxu1 %v807_v11  ;;  %958 = vmatpush.bf16.msra.mxu2 %v807_v11  ;;  %v883_v62 = vor.u32 %v942_v57, %v880_v58  ;;  %v808_v2 = vld [vmem:[%s1527_s1 + $0x48] sm:$0xf0]  ;;  %v940_v3 = vld [vmem:[%s1527_s1 + $0xc4] sm:$0xf]  ;;  %v871_v5 = vor.u32 %v941_v0, %v870_v63  ;;  %v734_v8 = vld [vmem:[%s1528_s0 + $0x30] sm:$0xf] }
  0x11   :  { %959 = vmatpush.bf16.msra.mxu3 %v807_v11  ;;  %331 = vmatpush.bf16.msra.mxu0 %v807_v11  ;;  %v872_v4 = vld [vmem:[%s1527_s1 + $0xc8] sm:$0xf0]  ;;  %v811_v6 = vor.u32 %v924_v1, %v808_v2  ;;  %v862_v9 = vld [vmem:[%s1527_s1 + $0xb0] sm:$0xf]  ;;  %v939_v10 = vld [vmem:[%s1527_s1 + $0xb4] sm:$0xf0] }
  0x12   :  { %v875_v7 = vor.u32 %v940_v3, %v872_v4  ;;  %v922_v11 = vld [vmem:[%s1527_s1 + $0x34] sm:$0xf]  ;;  %v800_v12 = vld [vmem:[%s1527_s1 + $0x38] sm:$0xf0]  ;;  %v907_v15 = vld [vmem:[%s1528_s0 + $0x34] sm:$0xf0]  ;;  %v863_v18 = vor.u32 %v939_v10, %v862_v9 }
  0x13   :  { %v938_v13 = vld [vmem:[%s1527_s1 + $0xb4] sm:$0xf]  ;;  %v750_v16 = vld [vmem:[%s1528_s0 + $0x50] sm:$0xf]  ;;  %v803_v21 = vor.u32 %v922_v11, %v800_v12  ;;  %v854_v23 = vld [vmem:[%s1527_s1 + $0xa0] sm:$0xf]  ;;  %v1223_v26 = vor.u32 %v907_v15, %v734_v8 }
  0x14   :  { %960 = vmatpush.bf16.msra.mxu1 %v799_v14  ;;  %961 = vmatpush.bf16.msra.mxu2 %v799_v14  ;;  %v766_v19 = vld [vmem:[%s1528_s0 + $0x70] sm:$0xf]  ;;  %v937_v24 = vld [vmem:[%s1527_s1 + $0xa4] sm:$0xf0]  ;;  %v920_v25 = vld [vmem:[%s1527_s1 + $0x24] sm:$0xf] }
  0x15   :  { %962 = vmatpush.bf16.msra.mxu3 %v799_v14  ;;  %332 = vmatpush.bf16.msra.mxu0 %v799_v14  ;;  %v864_v14 = vld [vmem:[%s1527_s1 + $0xb8] sm:$0xf0]  ;;  %v792_v28 = vld [vmem:[%s1527_s1 + $0x28] sm:$0xf0]  ;;  %v936_v29 = vld [vmem:[%s1527_s1 + $0xa4] sm:$0xf] }
  0x16   :  { %v867_v22 = vor.u32 %v938_v13, %v864_v14  ;;  %v718_v32 = vld [vmem:[%s1528_s0 + $0x10] sm:$0xf]  ;;  %v903_v33 = vld [vmem:[%s1528_s0 + $0x14] sm:$0xf0]  ;;  %v795_v35 = vor.u32 %v920_v25, %v792_v28  ;;  %v918_v39 = vld [vmem:[%s1527_s1 + $0x14] sm:$0xf] }
  0x17   :  { %v784_v40 = vld [vmem:[%s1527_s1 + $0x18] sm:$0xf0]  ;;  %v934_v41 = vld [vmem:[%s1527_s1 + $0x94] sm:$0xf]  ;;  %v719_v45 = vor.u32 %v903_v33, %v718_v32  ;;  %v776_v53 = vld [vmem:[%s1527_s1 + $0x8] sm:$0xf0] }
  0x18   :  { %963 = vmatpush.bf16.msra.mxu1 %v791_v17  ;;  %964 = vmatpush.bf16.msra.mxu2 %v791_v17  ;;  %v848_v44 = vld [vmem:[%s1527_s1 + $0x98] sm:$0xf0]  ;;  %v787_v48 = vor.u32 %v918_v39, %v784_v40  ;;  %v932_v54 = vld [vmem:[%s1527_s1 + $0x84] sm:$0xf]  ;;  %v840_v55 = vld [vmem:[%s1527_s1 + $0x88] sm:$0xf0] }
  0x19   :  { %965 = vmatpush.bf16.msra.mxu3 %v791_v17  ;;  %333 = vmatpush.bf16.msra.mxu0 %v791_v17  ;;  %v911_v17 = vld [vmem:[%s1528_s0 + $0x54] sm:$0xf0]  ;;  %v851_v49 = vor.u32 %v934_v41, %v848_v44  ;;  %v843_v58 = vor.u32 %v932_v54, %v840_v55  ;;  %v902_v63 = vld [vmem:[%s1528_s0 + $0x14] sm:$0xf]  ;;  %v720_v0 = vld [vmem:[%s1528_s0 + $0x18] sm:$0xf0] }
  0x1a   :  { %v1225_v27 = vor.u32 %v911_v17, %v750_v16  ;;  %v723_v1 = vor.u32 %v902_v63, %v720_v0  ;;  %v904_v2 = vld [vmem:[%s1528_s0 + $0x24] sm:$0xf]  ;;  %v906_v4 = vld [vmem:[%s1528_s0 + $0x34] sm:$0xf]  ;;  %v752_v10 = vld [vmem:[%s1528_s0 + $0x58] sm:$0xf0] }
  0x1b   :  { %v910_v9 = vld [vmem:[%s1528_s0 + $0x54] sm:$0xf]  ;;  %v912_v12 = vld [vmem:[%s1528_s0 + $0x64] sm:$0xf] }
  0x1c   :  { %966 = vmatpush.bf16.msra.mxu1 %v783_v20  ;;  %967 = vmatpush.bf16.msra.mxu2 %v783_v20  ;;  %v755_v11 = vor.u32 %v910_v9, %v752_v10 }
  0x1d   :  { %968 = vmatpush.bf16.msra.mxu3 %v783_v20  ;;  %334 = vmatpush.bf16.msra.mxu0 %v783_v20  ;;  %v915_v20 = vld [vmem:[%s1528_s0 + $0x74] sm:$0xf0] }
  0x1e   :  { %v1236_v31 = vor.u32 %v915_v20, %v766_v19  ;;  %v768_v19 = vld [vmem:[%s1528_s0 + $0x78] sm:$0xf0] }
  0x20   :  { %969 = vmatpush.bf16.msra.mxu1 %v775_v30  ;;  %970 = vmatpush.bf16.msra.mxu2 %v775_v30 }
  0x21   :  { %971 = vmatpush.bf16.msra.mxu3 %v775_v30  ;;  %335 = vmatpush.bf16.msra.mxu0 %v775_v30  ;;  %v856_v30 = vld [vmem:[%s1527_s1 + $0xa8] sm:$0xf0] }
  0x22   :  { %v859_v36 = vor.u32 %v936_v29, %v856_v30  ;;  %v82_v30 = vld [vmem:[%s1529_s2] sm:$0x3] }
  0x23   :  { %346 = vmatmul.bf16.vlgmr.msra.gmra.mxu1 %v1115_v42  ;;  %356 = vmatmul.bf16.vlgmr.msra.gmra.mxu2 %v1117_v43  ;;  %v1357_v33 = vperm.slane %v82_v30, 0 }
  0x24   :  { %377 = vmatpush.bf16.msrb.mxu1 %v895_v34  ;;  %426 = vmatpush.bf16.msrb.mxu2 %v835_v37  ;;  %v855_v34 = vor.u32 %v937_v24, %v854_v23  ;;  %v846_v37 = vld [vmem:[%s1527_s1 + $0x90] sm:$0xf] }
  0x25   :  { %475 = vmatpush.bf16.msrb.mxu3 %v899_v38  ;;  %336 = vmatmul.bf16.vlgmr.msra.gmra.mxu0 %v1156_v59  ;;  %v935_v38 = vld [vmem:[%s1527_s1 + $0x94] sm:$0xf0] }
  0x26   :  { %366 = vmatmul.bf16.vlgmr.msra.gmra.mxu3 %v1128_v47  ;;  %v847_v46 = vor.u32 %v935_v38, %v846_v37 }
  0x28   :  { %378 = vmatpush.bf16.msrb.mxu1 %v887_v50  ;;  %427 = vmatpush.bf16.msrb.mxu2 %v827_v51  ;;  %v838_v50 = vld [vmem:[%s1527_s1 + $0x80] sm:$0xf]  ;;  %v933_v51 = vld [vmem:[%s1527_s1 + $0x84] sm:$0xf0] }
  0x29   :  { %476 = vmatpush.bf16.msrb.mxu3 %v891_v52  ;;  %v916_v52 = vld [vmem:[%s1527_s1 + $0x4] sm:$0xf]  ;;  %v839_v56 = vor.u32 %v933_v51, %v838_v50 }
  0x2a   :  { %v779_v57 = vor.u32 %v916_v52, %v776_v53 }
  0x2c   :  { %379 = vmatpush.bf16.msrb.mxu1 %v879_v60  ;;  %428 = vmatpush.bf16.msrb.mxu2 %v819_v61  ;;  %v900_v60 = vld [vmem:[%s1528_s0 + $0x4] sm:$0xf]  ;;  %v712_v61 = vld [vmem:[%s1528_s0 + $0x8] sm:$0xf0] }
  0x2d   :  { %477 = vmatpush.bf16.msrb.mxu3 %v883_v62  ;;  %v715_v62 = vor.u32 %v900_v60, %v712_v61 }
  0x30   :  { %380 = vmatpush.bf16.msrb.mxu1 %v871_v5  ;;  %429 = vmatpush.bf16.msrb.mxu2 %v811_v6  ;;  %v736_v5 = vld [vmem:[%s1528_s0 + $0x38] sm:$0xf0] }
  0x31   :  { %478 = vmatpush.bf16.msrb.mxu3 %v875_v7  ;;  %v739_v6 = vor.u32 %v906_v4, %v736_v5  ;;  %v908_v7 = vld [vmem:[%s1528_s0 + $0x44] sm:$0xf] }
  0x33   :  { %351 = vmatmul.bf16.gmra.mxu1 %v1223_v26  ;;  %361 = vmatmul.bf16.gmra.mxu2 %v1225_v27 }
  0x34   :  { %381 = vmatpush.bf16.msrb.mxu1 %v863_v18  ;;  %430 = vmatpush.bf16.msrb.mxu2 %v803_v21  ;;  %v914_v18 = vld [vmem:[%s1528_s0 + $0x74] sm:$0xf] }
  0x35   :  { %479 = vmatpush.bf16.msrb.mxu3 %v867_v22  ;;  %341 = vmatmul.bf16.gmra.mxu0 %v719_v45  ;;  %v771_v22 = vor.u32 %v914_v18, %v768_v19 }
  0x36   :  { %371 = vmatmul.bf16.gmra.mxu3 %v1236_v31 }
  0x38   :  { %382 = vmatpush.bf16.msrb.mxu1 %v855_v34  ;;  %431 = vmatpush.bf16.msrb.mxu2 %v795_v35 }
  0x39   :  { %480 = vmatpush.bf16.msrb.mxu3 %v859_v36 }
  0x3c   :  { %383 = vmatpush.bf16.msrb.mxu1 %v847_v46  ;;  %432 = vmatpush.bf16.msrb.mxu2 %v787_v48 }
  0x3d   :  { %481 = vmatpush.bf16.msrb.mxu3 %v851_v49 }
  0x40   :  { %384 = vmatpush.bf16.msrb.mxu1 %v839_v56  ;;  %433 = vmatpush.bf16.msrb.mxu2 %v779_v57 }
  0x41   :  { %482 = vmatpush.bf16.msrb.mxu3 %v843_v58 }
  0x43   :  { %385 = vmatmul.bf16.vlgmr.msrb.gmra.mxu1 %v715_v62  ;;  %434 = vmatmul.bf16.vlgmr.msrb.gmra.mxu2 %v1156_v59  ;;  %v728_v59 = vld [vmem:[%s1528_s0 + $0x28] sm:$0xf0] }
  0x44   :  { %v731_v3 = vor.u32 %v904_v2, %v728_v59 }
  0x46   :  { %483 = vmatmul.bf16.vlgmr.msrb.gmra.mxu3 %v715_v62 }
  0x53   :  { %390 = vmatmul.bf16.gmra.mxu1 %v723_v1  ;;  %439 = vmatmul.bf16.gmra.mxu2 %v719_v45 }
  0x56   :  { %488 = vmatmul.bf16.gmra.mxu3 %v723_v1 }
  0x63   :  { %395 = vmatmul.bf16.gmra.mxu1 %v731_v3  ;;  %444 = vmatmul.bf16.gmra.mxu2 %v1115_v42  ;;  %v744_v42 = vld [vmem:[%s1528_s0 + $0x48] sm:$0xf0] }
  0x64   :  { %v747_v8 = vor.u32 %v908_v7, %v744_v42 }
  0x66   :  { %493 = vmatmul.bf16.gmra.mxu3 %v731_v3 }
  0x73   :  { %400 = vmatmul.bf16.gmra.mxu1 %v739_v6  ;;  %449 = vmatmul.bf16.gmra.mxu2 %v1223_v26 }
  0x76   :  { %498 = vmatmul.bf16.gmra.mxu3 %v739_v6 }
  0x83   :  { %405 = vmatmul.bf16.gmra.mxu1 %v747_v8  ;;  %454 = vmatmul.bf16.gmra.mxu2 %v1117_v43  ;;  %v760_v43 = vld [vmem:[%s1528_s0 + $0x68] sm:$0xf0] }
  0x84   :  { %v763_v13 = vor.u32 %v912_v12, %v760_v43 }
  0x86   :  { %503 = vmatmul.bf16.gmra.mxu3 %v747_v8 }
  0x93   :  { %410 = vmatmul.bf16.gmra.mxu1 %v755_v11  ;;  %459 = vmatmul.bf16.gmra.mxu2 %v1225_v27 }
  0x96   :  { %508 = vmatmul.bf16.gmra.mxu3 %v755_v11 }
  0xa0   :  { %v347_v14 = vpop.f32.mrf.mxu1 }
  0xa1   :  { %v348_v59 = vadd.f32 %v347_v14, %v1357_v33 }
  0xa2   :  { %v337_v23 = vpop.f32.mrf.mxu0 }
  0xa3   :  { %415 = vmatmul.bf16.gmra.mxu1 %v763_v13  ;;  %464 = vmatmul.bf16.gmra.mxu2 %v1128_v47  ;;  %v338_v34 = vadd.f32 %v337_v23, %v1357_v33 }
  0xa6   :  { %513 = vmatmul.bf16.gmra.mxu3 %v763_v13  ;;  %v1331_v15 = vpop.f32.mrf.mxu2 }
  0xa8   :  { %v349_v17 = vpop.f32.mrf.mxu1 }
  0xa9   :  { %v1333_v16 = vpop.f32.mrf.mxu3  ;;  %v350_v9 = vadd.f32 %v349_v17, %v1357_v33 }
  0xaa   :  { %v339_v28 = vpop.f32.mrf.mxu0 }
  0xab   :  { %v340_v35 = vadd.f32 %v339_v28, %v1357_v33 }
  0xae   :  { %v1341_v20 = vpop.f32.mrf.mxu2 }
  0xb0   :  { %v352_v47 = vpop.f32.mrf.mxu1 }
  0xb1   :  { %v1343_v21 = vpop.f32.mrf.mxu3  ;;  %v353_v19 = vadd.f32 %v352_v47, %v1357_v33 }
  0xb2   :  { %v342_v40 = vpop.f32.mrf.mxu0 }
  0xb3   :  { %420 = vmatmul.bf16.gmra.mxu1 %v771_v22  ;;  %469 = vmatmul.bf16.gmra.mxu2 %v1236_v31  ;;  %v1359_v31 = vperm.slane %v82_v30, 1  ;;  %v343_v55 = vadd.f32 %v342_v40, %v1357_v33 }
  0xb6   :  { %518 = vmatmul.bf16.gmra.mxu3 %v771_v22  ;;  %v1346_v24 = vpop.f32.mrf.mxu2 }
  0xb8   :  { %v354_v26 = vpop.f32.mrf.mxu1 }
  0xb9   :  { %v1348_v25 = vpop.f32.mrf.mxu3 }
  0xba   :  { %v344_v53 = vpop.f32.mrf.mxu0 }
  0xbb   :  { %v345_v56 = vadd.f32 %v344_v53, %v1357_v33 }
  0xbe   :  { %v1350_v27 = vpop.f32.mrf.mxu2 }
  0xc0   :  { %v386_v32 = vpop.f32.mrf.mxu1 }
  0xc1   :  { %v1352_v29 = vpop.f32.mrf.mxu3  ;;  %v1364_v41 = vadd.f32 %v386_v32, %v338_v34 }
  0xc6   :  { %v435_v36 = vpop.f32.mrf.mxu2 }
  0xc7   :  { %v436_v37 = vadd.f32 %v435_v36, %v1359_v31 }
  0xc8   :  { %v388_v39 = vpop.f32.mrf.mxu1 }
  0xc9   :  { %v484_v38 = vpop.f32.mrf.mxu3  ;;  %v1366_v44 = vadd.f32 %v388_v39, %v340_v35  ;;  %v355_v35 = vadd.f32 %v354_v26, %v1357_v33 }
  0xca   :  { %v1368_v45 = vadd.f32 %v484_v38, %v436_v37 }
  0xcb   :  { %v540_v46 = vpack.c.bf16 %v1366_v44, %v1364_v41 }
  0xce   :  { %v437_v48 = vpop.f32.mrf.mxu2 }
  0xcf   :  { %v438_v49 = vadd.f32 %v437_v48, %v1359_v31 }
  0xd0   :  { %v391_v51 = vpop.f32.mrf.mxu1 }
  0xd1   :  { %v486_v50 = vpop.f32.mrf.mxu3  ;;  %v1380_v62 = vadd.f32 %v391_v51, %v343_v55 }
  0xd2   :  { %v1373_v52 = vadd.f32 %v486_v50, %v438_v49  ;;  %v358_v49 = vadd.f32 %v1331_v15, %v1357_v33 }
  0xd4   :  { %v548_v54 = vpack.c.bf16 %v1373_v52, %v1368_v45 }
  0xd6   :  { %v440_v57 = vpop.f32.mrf.mxu2 }
  0xd7   :  { %v441_v58 = vadd.f32 %v440_v57, %v1359_v31 }
  0xd8   :  { %v393_v61 = vpop.f32.mrf.mxu1 }
  0xd9   :  { %v489_v60 = vpop.f32.mrf.mxu3  ;;  %v1382_v63 = vadd.f32 %v393_v61, %v345_v56 }
  0xda   :  { %v1384_v0 = vadd.f32 %v489_v60, %v441_v58  ;;  %v360_v58 = vadd.f32 %v1341_v20, %v1357_v33 }
  0xdb   :  { %v541_v1 = vpack.c.bf16 %v1382_v63, %v1380_v62 }
  0xde   :  { %v442_v2 = vpop.f32.mrf.mxu2 }
  0xdf   :  { %v443_v3 = vadd.f32 %v442_v2, %v1359_v31 }
  0xe0   :  { %v396_v5 = vpop.f32.mrf.mxu1 }
  0xe1   :  { %v491_v4 = vpop.f32.mrf.mxu3  ;;  %v1390_v6 = vadd.f32 %v396_v5, %v348_v59 }
  0xe2   :  { %v1392_v7 = vadd.f32 %v491_v4, %v443_v3 }
  0xe4   :  { %v549_v42 = vpack.c.bf16 %v1392_v7, %v1384_v0 }
  0xe6   :  { %v445_v8 = vpop.f32.mrf.mxu2 }
  0xe7   :  { %v446_v10 = vadd.f32 %v445_v8, %v1359_v31 }
  0xe8   :  { %v398_v12 = vpop.f32.mrf.mxu1 }
  0xe9   :  { %v494_v11 = vpop.f32.mrf.mxu3  ;;  %v1398_v43 = vadd.f32 %v398_v12, %v350_v9 }
  0xea   :  { %v1400_v13 = vadd.f32 %v494_v11, %v446_v10  ;;  %v363_v10 = vadd.f32 %v1346_v24, %v1357_v33  ;;  %v365_v11 = vadd.f32 %v1350_v27, %v1357_v33 }
  0xeb   :  { %v542_v14 = vpack.c.bf16 %v1398_v43, %v1390_v6 }
  0xee   :  { %v447_v18 = vpop.f32.mrf.mxu2 }
  0xef   :  { %v448_v22 = vadd.f32 %v447_v18, %v1359_v31 }
  0xf0   :  { %v401_v28 = vpop.f32.mrf.mxu1 }
  0xf1   :  { %v496_v23 = vpop.f32.mrf.mxu3  ;;  %v1406_v30 = vadd.f32 %v401_v28, %v353_v19 }
  0xf2   :  { %v1408_v17 = vadd.f32 %v496_v23, %v448_v22 }
  0xf4   :  { %v550_v32 = vpack.c.bf16 %v1408_v17, %v1400_v13 }
  0xf6   :  { %v450_v34 = vpop.f32.mrf.mxu2 }
  0xf7   :  { %v451_v36 = vadd.f32 %v450_v34, %v1359_v31 }
  0xf8   :  { %v403_v38 = vpop.f32.mrf.mxu1 }
  0xf9   :  { %v499_v37 = vpop.f32.mrf.mxu3  ;;  %v1414_v39 = vadd.f32 %v403_v38, %v355_v35 }
  0xfa   :  { %v1416_v47 = vadd.f32 %v499_v37, %v451_v36  ;;  %v368_v36 = vadd.f32 %v1333_v16, %v1357_v33  ;;  %v370_v37 = vadd.f32 %v1343_v21, %v1357_v33 }
  0xfb   :  { %v543_v40 = vpack.c.bf16 %v1414_v39, %v1406_v30 }
  0xfe   :  { %v452_v48 = vpop.f32.mrf.mxu2 }
  0xff   :  { %v453_v50 = vadd.f32 %v452_v48, %v1359_v31 }
 0x100   :  { %v406_v53 = vpop.f32.mrf.mxu1 }
 0x101   :  { %v501_v51 = vpop.f32.mrf.mxu3  ;;  %v1423_v26 = vadd.f32 %v406_v53, %v358_v49 }
 0x102   :  { %v1425_v55 = vadd.f32 %v501_v51, %v453_v50 }
 0x104   :  { %v551_v56 = vpack.c.bf16 %v1425_v55, %v1416_v47 }
 0x106   :  { %v455_v57 = vpop.f32.mrf.mxu2 }
 0x107   :  { %v456_v60 = vadd.f32 %v455_v57, %v1359_v31  ;;  %v373_v57 = vadd.f32 %v1348_v25, %v1357_v33 }
 0x108   :  { %v408_v2 = vpop.f32.mrf.mxu1 }
 0x109   :  { %v504_v61 = vpop.f32.mrf.mxu3  ;;  %v409_v15 = vadd.f32 %v408_v2, %v360_v58  ;;  %v375_v58 = vadd.f32 %v1352_v29, %v1357_v33 }
 0x10a   :  { %v1432_v59 = vadd.f32 %v504_v61, %v456_v60 }
 0x10b   :  { %v544_v3 = vpack.c.bf16 %v409_v15, %v1423_v26 }
 0x10e   :  { %v457_v4 = vpop.f32.mrf.mxu2 }
 0x110   :  { %v411_v8 = vpop.f32.mrf.mxu1 }
 0x111   :  { %v506_v5 = vpop.f32.mrf.mxu3  ;;  %v412_v18 = vadd.f32 %v411_v8, %v363_v10 }
 0x116   :  { %v460_v9 = vpop.f32.mrf.mxu2 }
 0x117   :  { %v461_v29 = vadd.f32 %v460_v9, %v1359_v31 }
 0x118   :  { %v413_v12 = vpop.f32.mrf.mxu1 }
 0x119   :  { %v509_v20 = vpop.f32.mrf.mxu3  ;;  %v414_v19 = vadd.f32 %v413_v12, %v365_v11 }
 0x11b   :  { %v545_v22 = vpack.c.bf16 %v414_v19, %v412_v18 }
 0x11e   :  { %v462_v23 = vpop.f32.mrf.mxu2 }
 0x11f   :  { %v463_v33 = vadd.f32 %v462_v23, %v1359_v31 }
 0x120   :  { %v416_v34 = vpop.f32.mrf.mxu1 }
 0x121   :  { %v511_v28 = vpop.f32.mrf.mxu3  ;;  %v417_v48 = vadd.f32 %v416_v34, %v368_v36 }
 0x126   :  { %v465_v35 = vpop.f32.mrf.mxu2 }
 0x127   :  { %v466_v10 = vadd.f32 %v465_v35, %v1359_v31  ;;  %v510_v35 = vadd.f32 %v509_v20, %v461_v29 }
 0x128   :  { %v418_v24 = vpop.f32.mrf.mxu1 }
 0x129   :  { %v514_v38 = vpop.f32.mrf.mxu3  ;;  %v419_v49 = vadd.f32 %v418_v24, %v370_v37  ;;  %v458_v24 = vadd.f32 %v457_v4, %v1359_v31 }
 0x12a   :  { %v515_v34 = vadd.f32 %v514_v38, %v466_v10 }
 0x12b   :  { %v546_v27 = vpack.c.bf16 %v419_v49, %v417_v48  ;;  %v512_v48 = vadd.f32 %v511_v28, %v463_v33 }
 0x12e   :  { %v467_v50 = vpop.f32.mrf.mxu2 }
 0x12f   :  { %v468_v11 = vadd.f32 %v467_v50, %v1359_v31  ;;  %v507_v50 = vadd.f32 %v506_v5, %v458_v24 }
 0x130   :  { %v421_v53 = vpop.f32.mrf.mxu1 }
 0x131   :  { %v516_v51 = vpop.f32.mrf.mxu3  ;;  %v422_v61 = vadd.f32 %v421_v53, %v373_v57  ;;  %v553_v53 = vpack.c.bf16 %v512_v48, %v510_v35  ;;  %v552_v9 = vpack.c.bf16 %v507_v50, %v1432_v59 }
 0x132   :  { %v517_v36 = vadd.f32 %v516_v51, %v468_v11 }
 0x134   :  { %v554_v49 = vpack.c.bf16 %v517_v36, %v515_v34 }
 0x136   :  { %v470_v26 = vpop.f32.mrf.mxu2 }
 0x137   :  { %v471_v21 = vadd.f32 %v470_v26, %v1359_v31 }
 0x138   :  { %v423_v16 = vpop.f32.mrf.mxu1 }
 0x139   :  { %v519_v60 = vpop.f32.mrf.mxu3  ;;  %v424_v2 = vadd.f32 %v423_v16, %v375_v58 }
 0x13a   :  { %v520_v12 = vadd.f32 %v519_v60, %v471_v21 }
 0x13b   :  { %v547_v15 = vpack.c.bf16 %v424_v2, %v422_v61 }
 0x13d   :  { %975 = vmatpush.lsf.bf16.msrb.mxu0 %v547_v15 }
 0x13e   :  { %v472_v8 = vpop.f32.mrf.mxu2 }
 0x13f   :  { %v473_v18 = vadd.f32 %v472_v8, %v1359_v31 }
 0x141   :  { %v521_v25 = vpop.f32.mrf.mxu3  ;;  %976 = vmatpush.lsf.bf16.msrb.mxu0 %v546_v27 }
 0x142   :  { %v522_v19 = vadd.f32 %v521_v25, %v473_v18 }
 0x144   :  { %v555_v37 = vpack.c.bf16 %v522_v19, %v520_v12 }
 0x146   :  { %572 = vmatpush.bf16.msra.mxu0 %v555_v37 }
 0x14a   :  { %977 = vmatpush.lsf.bf16.msrb.mxu0 %v545_v22 }
 0x14e   :  { %573 = vmatpush.bf16.msra.mxu0 %v554_v49 }
 0x152   :  { %978 = vmatpush.lsf.bf16.msrb.mxu0 %v544_v3 }
 0x156   :  { %574 = vmatpush.bf16.msra.mxu0 %v553_v53 }
 0x15a   :  { %979 = vmatpush.lsf.bf16.msrb.mxu0 %v543_v40 }
 0x15e   :  { %575 = vmatpush.bf16.msra.mxu0 %v552_v9 }
 0x162   :  { %980 = vmatpush.lsf.bf16.msrb.mxu0 %v542_v14 }
 0x166   :  { %576 = vmatpush.bf16.msra.mxu0 %v551_v56 }
 0x16a   :  { %981 = vmatpush.lsf.bf16.msrb.mxu0 %v541_v1 }
 0x16e   :  { %577 = vmatpush.bf16.msra.mxu0 %v550_v32 }
 0x172   :  { %982 = vmatpush.lsf.bf16.msrb.mxu0 %v540_v46 }
 0x174   :  { %983 = vllmr.16.mxu0 }
 0x176   :  { %578 = vmatpush.bf16.msra.mxu0 %v549_v42 }
 0x17a   :  { %579 = vmatpush.bf16.msra.mxu0 %v548_v54 }
 0x195   :  { %984 = vmatmul.lmr.bf16.vlgmr.msra.gmra.16.mxu0 }
 0x19d   :  { %985 = vmatmul.lmr.bf16.gmra.16.mxu0 }
 0x1a5   :  { %986 = vmatmul.lmr.bf16.gmra.16.mxu0 }
 0x1ad   :  { %987 = vmatmul.lmr.bf16.gmra.16.mxu0 }
 0x1b5   :  { %988 = vmatmul.lmr.bf16.gmra.16.mxu0 }
 0x1bd   :  { %989 = vmatmul.lmr.bf16.gmra.16.mxu0 }
 0x1c5   :  { %990 = vmatmul.lmr.bf16.gmra.16.mxu0 }
 0x1cd   :  { %991 = vmatmul.lmr.bf16.gmra.16.mxu0 }
 0x1d5   :  { %992 = vmatmul.lmr.bf16.gmra.16.mxu0 }
 0x1dd   :  { %993 = vmatmul.lmr.bf16.gmra.16.mxu0 }
 0x1e5   :  { %994 = vmatmul.lmr.bf16.gmra.16.mxu0 }
 0x1ed   :  { %995 = vmatmul.lmr.bf16.gmra.16.mxu0 }
 0x1f5   :  { %996 = vmatmul.lmr.bf16.gmra.16.mxu0 }
 0x1fd   :  { %997 = vmatmul.lmr.bf16.gmra.16.mxu0 }
 0x205   :  { %998 = vmatmul.lmr.bf16.gmra.16.mxu0 }
 0x20d   :  { %999 = vmatmul.lmr.bf16.gmra.16.mxu0 }
 0x212   :  { %v581_v31 = vpop.f32.mrf.mxu0 }
 0x213   :  { %v672_v41 = vmul.f32 0.0078125, %v581_v31 }
 0x215   :  { %688 = vst [vmem:[%s1530_s3] sm:$0xff] %v672_v41 }
 0x21a   :  { %v583_v44 = vpop.f32.mrf.mxu0 }
 0x21b   :  { %v673_v45 = vmul.f32 0.0078125, %v583_v44 }
 0x21d   :  { %689 = vst [vmem:[%s1530_s3 + $0x8] sm:$0xff] %v673_v45 }
 0x222   :  { %v586_v46 = vpop.f32.mrf.mxu0 }
 0x223   :  { %v674_v52 = vmul.f32 0.0078125, %v586_v46 }
 0x225   :  { %690 = vst [vmem:[%s1530_s3 + $0x10] sm:$0xff] %v674_v52 }
 0x22a   :  { %v588_v54 = vpop.f32.mrf.mxu0 }
 0x22b   :  { %v675_v62 = vmul.f32 0.0078125, %v588_v54 }
 0x22d   :  { %691 = vst [vmem:[%s1530_s3 + $0x18] sm:$0xff] %v675_v62 }
 0x232   :  { %v591_v63 = vpop.f32.mrf.mxu0 }
 0x233   :  { %v676_v0 = vmul.f32 0.0078125, %v591_v63 }
 0x235   :  { %692 = vst [vmem:[%s1530_s3 + $0x20] sm:$0xff] %v676_v0 }
 0x23a   :  { %v593_v1 = vpop.f32.mrf.mxu0 }
 0x23b   :  { %v677_v6 = vmul.f32 0.0078125, %v593_v1 }
 0x23d   :  { %693 = vst [vmem:[%s1530_s3 + $0x28] sm:$0xff] %v677_v6 }
 0x242   :  { %v596_v7 = vpop.f32.mrf.mxu0 }
 0x243   :  { %v678_v42 = vmul.f32 0.0078125, %v596_v7 }
 0x245   :  { %694 = vst [vmem:[%s1530_s3 + $0x30] sm:$0xff] %v678_v42 }
 0x24a   :  { %v598_v43 = vpop.f32.mrf.mxu0 }
 0x24b   :  { %v679_v13 = vmul.f32 0.0078125, %v598_v43 }
 0x24d   :  { %695 = vst [vmem:[%s1530_s3 + $0x38] sm:$0xff] %v679_v13 }
 0x252   :  { %v601_v14 = vpop.f32.mrf.mxu0 }
 0x253   :  { %v680_v30 = vmul.f32 0.0078125, %v601_v14 }
 0x255   :  { %696 = vst [vmem:[%s1530_s3 + $0x40] sm:$0xff] %v680_v30 }
 0x25a   :  { %v603_v17 = vpop.f32.mrf.mxu0 }
 0x25b   :  { %v681_v32 = vmul.f32 0.0078125, %v603_v17 }
 0x25d   :  { %697 = vst [vmem:[%s1530_s3 + $0x48] sm:$0xff] %v681_v32 }
 0x262   :  { %v606_v39 = vpop.f32.mrf.mxu0 }
 0x263   :  { %v682_v47 = vmul.f32 0.0078125, %v606_v39 }
 0x265   :  { %698 = vst [vmem:[%s1530_s3 + $0x50] sm:$0xff] %v682_v47 }
 0x26a   :  { %v608_v40 = vpop.f32.mrf.mxu0 }
 0x26b   :  { %v683_v55 = vmul.f32 0.0078125, %v608_v40 }
 0x26d   :  { %699 = vst [vmem:[%s1530_s3 + $0x58] sm:$0xff] %v683_v55 }
 0x272   :  { %v611_v56 = vpop.f32.mrf.mxu0 }
 0x273   :  { %v684_v59 = vmul.f32 0.0078125, %v611_v56 }
 0x275   :  { %700 = vst [vmem:[%s1530_s3 + $0x60] sm:$0xff] %v684_v59 }
 0x27a   :  { %v613_v3 = vpop.f32.mrf.mxu0 }
 0x27b   :  { %v685_v4 = vmul.f32 0.0078125, %v613_v3 }
 0x27d   :  { %701 = vst [vmem:[%s1530_s3 + $0x68] sm:$0xff] %v685_v4 }
 0x282   :  { %v616_v5 = vpop.f32.mrf.mxu0 }
 0x283   :  { %v686_v20 = vmul.f32 0.0078125, %v616_v5 }
 0x285   :  { %702 = vst [vmem:[%s1530_s3 + $0x70] sm:$0xff] %v686_v20 }
 0x28a   :  { %v618_v22 = vpop.f32.mrf.mxu0 }
 0x28b   :  { %v687_v23 = vmul.f32 0.0078125, %v618_v22 }
 0x28d   :  { %703 = vst [vmem:[%s1530_s3 + $0x78] sm:$0xff] %v687_v23 }

// kernel: non_local3d_forward.5
= control target key start
LH: loop header
LB: loop body
LE: loop exit
PB: predicated region body
PF: predicated region fallthrough
CT: control target
= control target key end

     0   :  { %s2458_s2 = inlined_call_operand.vmem [shape: bf16[256,256], index: 2, kind: input, shape index: {}]   ;;  %s2459_s0 = inlined_call_operand.vmem [shape: bf16[1,128,256], index: 0, kind: input, shape index: {}]   ;;  %s2460_s1 = inlined_call_operand.vmem [shape: f32[1,128,128], index: 1, kind: input, shape index: {}]   ;;  %s2461_s4 = inlined_call_operand.vmem [shape: bf16[128,256], index: 4, kind: input, shape index: {}]   ;;  %s2462_s3 = inlined_call_operand.vmem [shape: f32[1,256], index: 3, kind: input, shape index: {}]   ;;  %s2463_s6 = inlined_call_operand.vmem [shape: bf16[256,128], index: 6, kind: input, shape index: {}]   ;;  %s2464_s5 = inlined_call_operand.vmem [shape: f32[1,256], index: 5, kind: input, shape index: {}]   ;;  %s2465_s7 = inlined_call_operand.vmem [shape: f32[1,128], index: 7, kind: input, shape index: {}]   ;;  %s2466_s8 = inlined_call_operand.vmem [shape: f32[1,128,128], index: 8, kind: output, shape index: {}]  }
   0x1   :  { %v1292_v0 = vld [vmem:[%s2458_s2 + $0x70] sm:$0xf]  ;;  %v1521_v1 = vld [vmem:[%s2458_s2 + $0x74] sm:$0xf0]  ;;  %v1284_v2 = vld [vmem:[%s2458_s2 + $0x60] sm:$0xf] }
   0x2   :  { %v1293_v3 = vor.u32 %v1521_v1, %v1292_v0  ;;  %v1519_v4 = vld [vmem:[%s2458_s2 + $0x64] sm:$0xf0]  ;;  %v1276_v6 = vld [vmem:[%s2458_s2 + $0x50] sm:$0xf]  ;;  %v1517_v7 = vld [vmem:[%s2458_s2 + $0x54] sm:$0xf0] }
   0x3   :  { %v1285_v5 = vor.u32 %v1519_v4, %v1284_v2  ;;  %v1277_v8 = vor.u32 %v1517_v7, %v1276_v6  ;;  %v1268_v9 = vld [vmem:[%s2458_s2 + $0x40] sm:$0xf]  ;;  %v1515_v10 = vld [vmem:[%s2458_s2 + $0x44] sm:$0xf0]  ;;  %v1260_v12 = vld [vmem:[%s2458_s2 + $0x30] sm:$0xf] }
   0x4   :  { %1570 = vmatpush.bf16.msra.mxu1 %v1293_v3  ;;  %323 = vmatpush.bf16.msra.mxu0 %v1293_v3  ;;  %v1269_v11 = vor.u32 %v1515_v10, %v1268_v9  ;;  %v1513_v13 = vld [vmem:[%s2458_s2 + $0x34] sm:$0xf0]  ;;  %v1252_v15 = vld [vmem:[%s2458_s2 + $0x20] sm:$0xf]  ;;  %v1511_v16 = vld [vmem:[%s2458_s2 + $0x24] sm:$0xf0] }
   0x5   :  { %1571 = vmatpush.bf16.msra.mxu2 %v1293_v3  ;;  %1572 = vmatpush.bf16.msra.mxu3 %v1293_v3  ;;  %v1261_v14 = vor.u32 %v1513_v13, %v1260_v12  ;;  %v1253_v17 = vor.u32 %v1511_v16, %v1252_v15  ;;  %v1244_v18 = vld [vmem:[%s2458_s2 + $0x10] sm:$0xf]  ;;  %v1509_v19 = vld [vmem:[%s2458_s2 + $0x14] sm:$0xf0]  ;;  %v1236_v21 = vld [vmem:[%s2458_s2] sm:$0xf] }
   0x6   :  { %v1245_v20 = vor.u32 %v1509_v19, %v1244_v18  ;;  %v1507_v22 = vld [vmem:[%s2458_s2 + $0x4] sm:$0xf0]  ;;  %v1356_v23 = vld [vmem:[%s2458_s2 + $0xf0] sm:$0xf]  ;;  %v1537_v24 = vld [vmem:[%s2458_s2 + $0xf4] sm:$0xf0] }
   0x7   :  { %v1188_v25 = vld [vmem:[%s2459_s0 + $0x20] sm:$0xf]  ;;  %v1237_v26 = vor.u32 %v1507_v22, %v1236_v21  ;;  %v1495_v27 = vld [vmem:[%s2459_s0 + $0x24] sm:$0xf0]  ;;  %v1357_v30 = vor.u32 %v1537_v24, %v1356_v23  ;;  %v1340_v36 = vld [vmem:[%s2458_s2 + $0xd0] sm:$0xf] }
   0x8   :  { %1573 = vmatpush.bf16.msra.mxu1 %v1285_v5  ;;  %324 = vmatpush.bf16.msra.mxu0 %v1285_v5  ;;  %v1172_v28 = vld [vmem:[%s2459_s0] sm:$0xf]  ;;  %v1491_v29 = vld [vmem:[%s2459_s0 + $0x4] sm:$0xf0]  ;;  %v1712_v33 = vor.u32 %v1495_v27, %v1188_v25  ;;  %v1533_v37 = vld [vmem:[%s2458_s2 + $0xd4] sm:$0xf0] }
   0x9   :  { %1574 = vmatpush.bf16.msra.mxu2 %v1285_v5  ;;  %1575 = vmatpush.bf16.msra.mxu3 %v1285_v5  ;;  %v1348_v31 = vld [vmem:[%s2458_s2 + $0xe0] sm:$0xf]  ;;  %v1535_v32 = vld [vmem:[%s2458_s2 + $0xe4] sm:$0xf0]  ;;  %v1714_v34 = vor.u32 %v1491_v29, %v1172_v28  ;;  %v1341_v38 = vor.u32 %v1533_v37, %v1340_v36  ;;  %v1324_v42 = vld [vmem:[%s2458_s2 + $0xb0] sm:$0xf] }
   0xa   :  { %v1349_v35 = vor.u32 %v1535_v32, %v1348_v31  ;;  %v1332_v39 = vld [vmem:[%s2458_s2 + $0xc0] sm:$0xf]  ;;  %v1531_v40 = vld [vmem:[%s2458_s2 + $0xc4] sm:$0xf0]  ;;  %v1529_v43 = vld [vmem:[%s2458_s2 + $0xb4] sm:$0xf0] }
   0xb   :  { %v1333_v41 = vor.u32 %v1531_v40, %v1332_v39  ;;  %v1196_v44 = vld [vmem:[%s2459_s0 + $0x30] sm:$0xf]  ;;  %v1497_v45 = vld [vmem:[%s2459_s0 + $0x34] sm:$0xf0]  ;;  %v1325_v48 = vor.u32 %v1529_v43, %v1324_v42  ;;  %v1316_v49 = vld [vmem:[%s2458_s2 + $0xa0] sm:$0xf] }
   0xc   :  { %1576 = vmatpush.bf16.msra.mxu1 %v1277_v8  ;;  %325 = vmatpush.bf16.msra.mxu0 %v1277_v8  ;;  %v1180_v46 = vld [vmem:[%s2459_s0 + $0x10] sm:$0xf]  ;;  %v1493_v47 = vld [vmem:[%s2459_s0 + $0x14] sm:$0xf0]  ;;  %v1527_v50 = vld [vmem:[%s2458_s2 + $0xa4] sm:$0xf0]  ;;  %v1754_v51 = vor.u32 %v1497_v45, %v1196_v44 }
   0xd   :  { %1577 = vmatpush.bf16.msra.mxu2 %v1277_v8  ;;  %1578 = vmatpush.bf16.msra.mxu3 %v1277_v8  ;;  %v1756_v52 = vor.u32 %v1493_v47, %v1180_v46  ;;  %v1317_v53 = vor.u32 %v1527_v50, %v1316_v49  ;;  %v1308_v54 = vld [vmem:[%s2458_s2 + $0x90] sm:$0xf]  ;;  %v1525_v55 = vld [vmem:[%s2458_s2 + $0x94] sm:$0xf0]  ;;  %v1300_v57 = vld [vmem:[%s2458_s2 + $0x80] sm:$0xf] }
   0xe   :  { %v1309_v56 = vor.u32 %v1525_v55, %v1308_v54  ;;  %v1523_v58 = vld [vmem:[%s2458_s2 + $0x84] sm:$0xf0]  ;;  %v1490_v60 = vld [vmem:[%s2459_s0 + $0x4] sm:$0xf]  ;;  %v1174_v61 = vld [vmem:[%s2459_s0 + $0x8] sm:$0xf0] }
   0xf   :  { %v1301_v59 = vor.u32 %v1523_v58, %v1300_v57  ;;  %v1778_v62 = vor.u32 %v1490_v60, %v1174_v61  ;;  %v1204_v63 = vld [vmem:[%s2459_s0 + $0x40] sm:$0xf]  ;;  %v1499_v0 = vld [vmem:[%s2459_s0 + $0x44] sm:$0xf0]  ;;  %v1492_v2 = vld [vmem:[%s2459_s0 + $0x14] sm:$0xf] }
  0x10   :  { %1579 = vmatpush.bf16.msra.mxu1 %v1269_v11  ;;  %326 = vmatpush.bf16.msra.mxu0 %v1269_v11  ;;  %v1787_v1 = vor.u32 %v1499_v0, %v1204_v63  ;;  %v1182_v3 = vld [vmem:[%s2459_s0 + $0x18] sm:$0xf0]  ;;  %v1212_v5 = vld [vmem:[%s2459_s0 + $0x50] sm:$0xf]  ;;  %v1501_v6 = vld [vmem:[%s2459_s0 + $0x54] sm:$0xf0] }
  0x11   :  { %1580 = vmatpush.bf16.msra.mxu2 %v1269_v11  ;;  %1581 = vmatpush.bf16.msra.mxu3 %v1269_v11  ;;  %v1796_v4 = vor.u32 %v1492_v2, %v1182_v3  ;;  %v1805_v7 = vor.u32 %v1501_v6, %v1212_v5  ;;  %v1494_v8 = vld [vmem:[%s2459_s0 + $0x24] sm:$0xf]  ;;  %v1190_v9 = vld [vmem:[%s2459_s0 + $0x28] sm:$0xf0]  ;;  %v1220_v11 = vld [vmem:[%s2459_s0 + $0x60] sm:$0xf] }
  0x12   :  { %v1814_v10 = vor.u32 %v1494_v8, %v1190_v9  ;;  %v1503_v12 = vld [vmem:[%s2459_s0 + $0x64] sm:$0xf0]  ;;  %v1198_v15 = vld [vmem:[%s2459_s0 + $0x38] sm:$0xf0]  ;;  %v1206_v18 = vld [vmem:[%s2459_s0 + $0x48] sm:$0xf0] }
  0x13   :  { %v1823_v13 = vor.u32 %v1503_v12, %v1220_v11  ;;  %v1505_v21 = vld [vmem:[%s2459_s0 + $0x74] sm:$0xf0]  ;;  %v541_v23 = vld [vmem:[%s2460_s1 + $0x70] sm:$0xff]  ;;  %v1294_v27 = vld [vmem:[%s2458_s2 + $0x78] sm:$0xf0] }
  0x14   :  { %1582 = vmatpush.bf16.msra.mxu1 %v1261_v14  ;;  %327 = vmatpush.bf16.msra.mxu0 %v1261_v14  ;;  %v542_v24 = vld [vmem:[%s2460_s1 + $0x78] sm:$0xff]  ;;  %v1520_v25 = vld [vmem:[%s2458_s2 + $0x74] sm:$0xf]  ;;  %v539_v37 = vld [vmem:[%s2460_s1 + $0x60] sm:$0xff] }
  0x15   :  { %1583 = vmatpush.bf16.msra.mxu2 %v1261_v14  ;;  %1584 = vmatpush.bf16.msra.mxu3 %v1261_v14  ;;  %v1496_v14 = vld [vmem:[%s2459_s0 + $0x34] sm:$0xf]  ;;  %v1297_v28 = vor.u32 %v1520_v25, %v1294_v27  ;;  %v1358_v32 = vld [vmem:[%s2458_s2 + $0xf8] sm:$0xf0]  ;;  %v1518_v39 = vld [vmem:[%s2458_s2 + $0x64] sm:$0xf] }
  0x16   :  { %v1832_v16 = vor.u32 %v1496_v14, %v1198_v15  ;;  %v1500_v29 = vld [vmem:[%s2459_s0 + $0x54] sm:$0xf]  ;;  %v1534_v43 = vld [vmem:[%s2458_s2 + $0xe4] sm:$0xf]  ;;  %v1350_v44 = vld [vmem:[%s2458_s2 + $0xe8] sm:$0xf0] }
  0x17   :  { %v1536_v31 = vld [vmem:[%s2458_s2 + $0xf4] sm:$0xf]  ;;  %v1353_v45 = vor.u32 %v1534_v43, %v1350_v44  ;;  %v538_v47 = vld [vmem:[%s2460_s1 + $0x58] sm:$0xff]  ;;  %v535_v57 = vld [vmem:[%s2460_s1 + $0x40] sm:$0xff] }
  0x18   :  { %1585 = vmatpush.bf16.msra.mxu1 %v1253_v17  ;;  %328 = vmatpush.bf16.msra.mxu0 %v1253_v17  ;;  %v537_v46 = vld [vmem:[%s2460_s1 + $0x50] sm:$0xff]  ;;  %v1278_v50 = vld [vmem:[%s2458_s2 + $0x58] sm:$0xf0]  ;;  %v536_v58 = vld [vmem:[%s2460_s1 + $0x48] sm:$0xff] }
  0x19   :  { %1586 = vmatpush.bf16.msra.mxu2 %v1253_v17  ;;  %1587 = vmatpush.bf16.msra.mxu3 %v1253_v17  ;;  %v1498_v17 = vld [vmem:[%s2459_s0 + $0x44] sm:$0xf]  ;;  %v548_v49 = vpack.c.bf16 %v538_v47, %v537_v46  ;;  %v1532_v54 = vld [vmem:[%s2458_s2 + $0xd4] sm:$0xf]  ;;  %v1342_v55 = vld [vmem:[%s2458_s2 + $0xd8] sm:$0xf0]  ;;  %v547_v60 = vpack.c.bf16 %v536_v58, %v535_v57 }
  0x1a   :  { %v1841_v19 = vor.u32 %v1498_v17, %v1206_v18  ;;  %v1270_v61 = vld [vmem:[%s2458_s2 + $0x48] sm:$0xf0]  ;;  %v1530_v0 = vld [vmem:[%s2458_s2 + $0xc4] sm:$0xf]  ;;  %v533_v3 = vld [vmem:[%s2460_s1 + $0x30] sm:$0xff] }
  0x1b   :  { %v1334_v2 = vld [vmem:[%s2458_s2 + $0xc8] sm:$0xf0]  ;;  %v534_v6 = vld [vmem:[%s2460_s1 + $0x38] sm:$0xff]  ;;  %v1512_v8 = vld [vmem:[%s2458_s2 + $0x34] sm:$0xf] }
  0x1c   :  { %1588 = vmatpush.bf16.msra.mxu1 %v1245_v20  ;;  %329 = vmatpush.bf16.msra.mxu0 %v1245_v20  ;;  %v1337_v5 = vor.u32 %v1530_v0, %v1334_v2  ;;  %v1262_v9 = vld [vmem:[%s2458_s2 + $0x38] sm:$0xf0]  ;;  %v546_v11 = vpack.c.bf16 %v534_v6, %v533_v3  ;;  %v1502_v14 = vld [vmem:[%s2459_s0 + $0x64] sm:$0xf]  ;;  %v1222_v15 = vld [vmem:[%s2459_s0 + $0x68] sm:$0xf0] }
  0x1d   :  { %1589 = vmatpush.bf16.msra.mxu2 %v1245_v20  ;;  %1590 = vmatpush.bf16.msra.mxu3 %v1245_v20  ;;  %v1228_v20 = vld [vmem:[%s2459_s0 + $0x70] sm:$0xf]  ;;  %v1265_v12 = vor.u32 %v1512_v8, %v1262_v9  ;;  %v1528_v17 = vld [vmem:[%s2458_s2 + $0xb4] sm:$0xf]  ;;  %v1326_v18 = vld [vmem:[%s2458_s2 + $0xb8] sm:$0xf0] }
  0x1e   :  { %v1849_v22 = vor.u32 %v1505_v21, %v1228_v20  ;;  %v1329_v20 = vor.u32 %v1528_v17, %v1326_v18  ;;  %v1958_v21 = vor.u32 %v1502_v14, %v1222_v15  ;;  %v1510_v25 = vld [vmem:[%s2458_s2 + $0x24] sm:$0xf]  ;;  %v1310_v43 = vld [vmem:[%s2458_s2 + $0x98] sm:$0xf0]  ;;  %v528_v46 = vld [vmem:[%s2460_s1 + $0x8] sm:$0xff] }
  0x1f   :  { %v1506_v47 = vld [vmem:[%s2458_s2 + $0x4] sm:$0xf]  ;;  %v1504_v57 = vld [vmem:[%s2459_s0 + $0x74] sm:$0xf]  ;;  %v1230_v58 = vld [vmem:[%s2459_s0 + $0x78] sm:$0xf0] }
  0x20   :  { %1591 = vmatpush.bf16.msra.mxu1 %v1237_v26  ;;  %330 = vmatpush.bf16.msra.mxu0 %v1237_v26  ;;  %v1552_v0 = vld [vmem:[%s2461_s4 + $0x74] sm:$0xf]  ;;  %v2051_v6 = vld [vmem:[%s2462_s3] sm:$0x3]  ;;  %v1414_v14 = vld [vmem:[%s2461_s4 + $0x68] sm:$0xf0] }
  0x21   :  { %1592 = vmatpush.bf16.msra.mxu2 %v1237_v26  ;;  %1593 = vmatpush.bf16.msra.mxu3 %v1237_v26  ;;  %v550_v26 = vpack.c.bf16 %v542_v24, %v541_v23  ;;  %v531_v23 = vld [vmem:[%s2460_s1 + $0x20] sm:$0xff]  ;;  %v532_v24 = vld [vmem:[%s2460_s1 + $0x28] sm:$0xff]  ;;  %v2066_v15 = vperm.slane %v2051_v6, 0 }
  0x22   :  { %v545_v27 = vpack.c.bf16 %v532_v24, %v531_v23 }
  0x23   :  { %341 = vmatmul.bf16.vlgmr.msra.gmra.mxu1 %v1712_v33  ;;  %331 = vmatmul.bf16.vlgmr.msra.gmra.mxu0 %v1714_v34 }
  0x24   :  { %372 = vmatpush.bf16.msrb.mxu1 %v1357_v30  ;;  %351 = vmatmul.bf16.vlgmr.msra.gmra.mxu2 %v1787_v1  ;;  %v1214_v30 = vld [vmem:[%s2459_s0 + $0x58] sm:$0xf0] }
  0x25   :  { %361 = vmatmul.bf16.vlgmr.msra.gmra.mxu3 %v1823_v13  ;;  %551 = vmatpush.bf16.msrb.mxu0 %v550_v26  ;;  %v1877_v36 = vor.u32 %v1500_v29, %v1214_v30  ;;  %v1526_v30 = vld [vmem:[%s2458_s2 + $0xa4] sm:$0xf] }
  0x26   :  { %421 = vmatpush.bf16.msrb.mxu2 %v1297_v28  ;;  %v1254_v28 = vld [vmem:[%s2458_s2 + $0x28] sm:$0xf0] }
  0x27   :  { %v1257_v29 = vor.u32 %v1510_v25, %v1254_v28 }
  0x28   :  { %373 = vmatpush.bf16.msrb.mxu1 %v1349_v35  ;;  %v1361_v35 = vor.u32 %v1536_v31, %v1358_v32  ;;  %v1318_v31 = vld [vmem:[%s2458_s2 + $0xa8] sm:$0xf0]  ;;  %v529_v32 = vld [vmem:[%s2460_s1 + $0x10] sm:$0xff] }
  0x2a   :  { %470 = vmatpush.bf16.msrb.mxu3 %v1361_v35  ;;  %v1321_v35 = vor.u32 %v1526_v30, %v1318_v31  ;;  %v1404_v30 = vld [vmem:[%s2461_s4 + $0x50] sm:$0xf]  ;;  %v1549_v31 = vld [vmem:[%s2461_s4 + $0x54] sm:$0xf0] }
  0x2c   :  { %374 = vmatpush.bf16.msrb.mxu1 %v1341_v38  ;;  %v540_v38 = vld [vmem:[%s2460_s1 + $0x68] sm:$0xff] }
  0x2d   :  { %v549_v40 = vpack.c.bf16 %v540_v38, %v539_v37  ;;  %v530_v37 = vld [vmem:[%s2460_s1 + $0x18] sm:$0xff]  ;;  %v1508_v38 = vld [vmem:[%s2458_s2 + $0x14] sm:$0xf] }
  0x2e   :  { %471 = vmatpush.bf16.msrb.mxu3 %v1353_v45  ;;  %v527_v45 = vld [vmem:[%s2460_s1] sm:$0xff] }
  0x2f   :  { %552 = vmatpush.bf16.msrb.mxu0 %v549_v40  ;;  %v544_v40 = vpack.c.bf16 %v530_v37, %v529_v32  ;;  %v1548_v32 = vld [vmem:[%s2461_s4 + $0x54] sm:$0xf] }
  0x30   :  { %375 = vmatpush.bf16.msrb.mxu1 %v1333_v41  ;;  %v1286_v41 = vld [vmem:[%s2458_s2 + $0x68] sm:$0xf0] }
  0x31   :  { %v1289_v42 = vor.u32 %v1518_v39, %v1286_v41  ;;  %v1246_v39 = vld [vmem:[%s2458_s2 + $0x18] sm:$0xf0] }
  0x32   :  { %v1249_v41 = vor.u32 %v1508_v38, %v1246_v39 }
  0x33   :  { %346 = vmatmul.bf16.gmra.mxu1 %v1754_v51  ;;  %336 = vmatmul.bf16.gmra.mxu0 %v1756_v52 }
  0x34   :  { %376 = vmatpush.bf16.msrb.mxu1 %v1325_v48  ;;  %356 = vmatmul.bf16.gmra.mxu2 %v1805_v7  ;;  %v1516_v48 = vld [vmem:[%s2458_s2 + $0x54] sm:$0xf] }
  0x35   :  { %366 = vmatmul.bf16.gmra.mxu3 %v1849_v22  ;;  %422 = vmatpush.bf16.msrb.mxu2 %v1289_v42  ;;  %v1524_v42 = vld [vmem:[%s2458_s2 + $0x94] sm:$0xf] }
  0x36   :  { %553 = vmatpush.bf16.msrb.mxu0 %v548_v49  ;;  %v1313_v44 = vor.u32 %v1524_v42, %v1310_v43  ;;  %v543_v49 = vpack.c.bf16 %v528_v46, %v527_v45  ;;  %v1396_v45 = vld [vmem:[%s2461_s4 + $0x40] sm:$0xf]  ;;  %v1547_v46 = vld [vmem:[%s2461_s4 + $0x44] sm:$0xf0] }
  0x38   :  { %377 = vmatpush.bf16.msrb.mxu1 %v1317_v53  ;;  %v1281_v53 = vor.u32 %v1516_v48, %v1278_v50  ;;  %v1238_v50 = vld [vmem:[%s2458_s2 + $0x8] sm:$0xf0] }
  0x3a   :  { %423 = vmatpush.bf16.msrb.mxu2 %v1281_v53  ;;  %554 = vmatpush.bf16.msrb.mxu0 %v547_v60  ;;  %v1241_v53 = vor.u32 %v1506_v47, %v1238_v50  ;;  %v1546_v47 = vld [vmem:[%s2461_s4 + $0x44] sm:$0xf] }
  0x3c   :  { %378 = vmatpush.bf16.msrb.mxu1 %v1309_v56  ;;  %v1345_v56 = vor.u32 %v1532_v54, %v1342_v55  ;;  %v1522_v54 = vld [vmem:[%s2458_s2 + $0x84] sm:$0xf]  ;;  %v1302_v55 = vld [vmem:[%s2458_s2 + $0x88] sm:$0xf0] }
  0x3e   :  { %472 = vmatpush.bf16.msrb.mxu3 %v1345_v56  ;;  %555 = vmatpush.bf16.msrb.mxu0 %v546_v11  ;;  %v1305_v56 = vor.u32 %v1522_v54, %v1302_v55  ;;  %v1412_v11 = vld [vmem:[%s2461_s4 + $0x60] sm:$0xf] }
  0x40   :  { %379 = vmatpush.bf16.msrb.mxu1 %v1301_v59  ;;  %v1514_v59 = vld [vmem:[%s2458_s2 + $0x44] sm:$0xf] }
  0x41   :  { %v1273_v63 = vor.u32 %v1514_v59, %v1270_v61  ;;  %v2026_v59 = vor.u32 %v1504_v57, %v1230_v58  ;;  %v1420_v61 = vld [vmem:[%s2461_s4 + $0x70] sm:$0xf] }
  0x42   :  { %473 = vmatpush.bf16.msrb.mxu3 %v1337_v5  ;;  %556 = vmatpush.bf16.msrb.mxu0 %v545_v27 }
  0x43   :  { %380 = vmatmul.bf16.vlgmr.msrb.gmra.mxu1 %v1778_v62  ;;  %424 = vmatpush.bf16.msrb.mxu2 %v1273_v63  ;;  %v1553_v63 = vld [vmem:[%s2461_s4 + $0x74] sm:$0xf0] }
  0x44   :  { %v1421_v2 = vor.u32 %v1553_v63, %v1420_v61  ;;  %v1388_v61 = vld [vmem:[%s2461_s4 + $0x30] sm:$0xf] }
  0x46   :  { %474 = vmatpush.bf16.msrb.mxu3 %v1329_v20  ;;  %557 = vmatpush.bf16.msrb.mxu0 %v544_v40 }
  0x47   :  { %425 = vmatpush.bf16.msrb.mxu2 %v1265_v12  ;;  %710 = vmatpush.bf16.msra.mxu1 %v1421_v2  ;;  %v1551_v12 = vld [vmem:[%s2461_s4 + $0x64] sm:$0xf0] }
  0x4a   :  { %475 = vmatpush.bf16.msrb.mxu3 %v1321_v35  ;;  %558 = vmatpush.bf16.msrb.mxu0 %v543_v49  ;;  %v1405_v35 = vor.u32 %v1549_v31, %v1404_v30  ;;  %v1397_v49 = vor.u32 %v1547_v46, %v1396_v45  ;;  %v1541_v30 = vld [vmem:[%s2461_s4 + $0x14] sm:$0xf0]  ;;  %v1540_v31 = vld [vmem:[%s2461_s4 + $0x14] sm:$0xf]  ;;  %v1366_v46 = vld [vmem:[%s2461_s4 + $0x8] sm:$0xf0] }
  0x4b   :  { %426 = vmatpush.bf16.msrb.mxu2 %v1257_v29 }
  0x4e   :  { %476 = vmatpush.bf16.msrb.mxu3 %v1313_v44 }
  0x4f   :  { %427 = vmatpush.bf16.msrb.mxu2 %v1249_v41 }
  0x52   :  { %477 = vmatpush.bf16.msrb.mxu3 %v1305_v56 }
  0x53   :  { %385 = vmatmul.bf16.gmra.mxu1 %v1796_v4  ;;  %428 = vmatpush.bf16.msrb.mxu2 %v1241_v53 }
  0x55   :  { %478 = vmatmul.bf16.vlgmr.msrb.gmra.mxu3 %v1778_v62 }
  0x56   :  { %429 = vmatmul.bf16.vlgmr.msrb.gmra.mxu2 %v1714_v34  ;;  %v1422_v34 = vld [vmem:[%s2461_s4 + $0x78] sm:$0xf0] }
  0x57   :  { %v1425_v62 = vor.u32 %v1552_v0, %v1422_v34 }
  0x59   :  { %759 = vmatpush.bf16.msra.mxu2 %v1425_v62 }
  0x63   :  { %390 = vmatmul.bf16.gmra.mxu1 %v1814_v10 }
  0x65   :  { %483 = vmatmul.bf16.gmra.mxu3 %v1796_v4  ;;  %v1413_v4 = vor.u32 %v1551_v12, %v1412_v11 }
  0x66   :  { %434 = vmatmul.bf16.gmra.mxu2 %v1756_v52  ;;  %v1550_v52 = vld [vmem:[%s2461_s4 + $0x64] sm:$0xf] }
  0x67   :  { %v1417_v17 = vor.u32 %v1550_v52, %v1414_v14  ;;  %711 = vmatpush.bf16.msra.mxu1 %v1413_v4  ;;  %v1380_v52 = vld [vmem:[%s2461_s4 + $0x20] sm:$0xf] }
  0x69   :  { %760 = vmatpush.bf16.msra.mxu2 %v1417_v17 }
  0x6b   :  { %712 = vmatpush.bf16.msra.mxu1 %v1405_v35 }
  0x6f   :  { %713 = vmatpush.bf16.msra.mxu1 %v1397_v49 }
  0x73   :  { %395 = vmatmul.bf16.gmra.mxu1 %v1832_v16 }
  0x75   :  { %488 = vmatmul.bf16.gmra.mxu3 %v1814_v10 }
  0x76   :  { %439 = vmatmul.bf16.gmra.mxu2 %v1712_v33  ;;  %v1406_v33 = vld [vmem:[%s2461_s4 + $0x58] sm:$0xf0] }
  0x77   :  { %v1409_v37 = vor.u32 %v1548_v32, %v1406_v33 }
  0x79   :  { %761 = vmatpush.bf16.msra.mxu2 %v1409_v37 }
  0x83   :  { %400 = vmatmul.bf16.gmra.mxu1 %v1841_v19 }
  0x85   :  { %493 = vmatmul.bf16.gmra.mxu3 %v1832_v16 }
  0x86   :  { %444 = vmatmul.bf16.gmra.mxu2 %v1754_v51  ;;  %v1398_v51 = vld [vmem:[%s2461_s4 + $0x48] sm:$0xf0] }
  0x87   :  { %v1401_v50 = vor.u32 %v1546_v47, %v1398_v51 }
  0x89   :  { %762 = vmatpush.bf16.msra.mxu2 %v1401_v50 }
  0x93   :  { %405 = vmatmul.bf16.gmra.mxu1 %v1877_v36 }
  0x95   :  { %498 = vmatmul.bf16.gmra.mxu3 %v1841_v19 }
  0x96   :  { %449 = vmatmul.bf16.gmra.mxu2 %v1787_v1  ;;  %v1390_v1 = vld [vmem:[%s2461_s4 + $0x38] sm:$0xf0] }
  0xa0   :  { %v1969_v26 = vpop.f32.mrf.mxu1  ;;  %v332_v3 = vpop.f32.mrf.mxu0 }
  0xa1   :  { %v333_v18 = vadd.f32 %v332_v3, %v2066_v15  ;;  %v343_v16 = vadd.f32 %v1969_v26, %v2066_v15  ;;  %v1545_v26 = vld [vmem:[%s2461_s4 + $0x34] sm:$0xf0] }
  0xa2   :  { %v1389_v63 = vor.u32 %v1545_v26, %v1388_v61 }
  0xa3   :  { %410 = vmatmul.bf16.gmra.mxu1 %v1958_v21 }
  0xa4   :  { %714 = vmatpush.bf16.msra.mxu1 %v1389_v63 }
  0xa5   :  { %503 = vmatmul.bf16.gmra.mxu3 %v1877_v36 }
  0xa6   :  { %454 = vmatmul.bf16.gmra.mxu2 %v1805_v7  ;;  %v1382_v7 = vld [vmem:[%s2461_s4 + $0x28] sm:$0xf0] }
  0xa7   :  { %v352_v19 = vpop.f32.mrf.mxu2 }
  0xa8   :  { %v2008_v48 = vpop.f32.mrf.mxu1  ;;  %v334_v8 = vpop.f32.mrf.mxu0  ;;  %v353_v14 = vadd.f32 %v352_v19, %v2066_v15 }
  0xa9   :  { %v335_v20 = vadd.f32 %v334_v8, %v2066_v15  ;;  %v345_v53 = vadd.f32 %v2008_v48, %v2066_v15  ;;  %v1544_v48 = vld [vmem:[%s2461_s4 + $0x34] sm:$0xf] }
  0xaa   :  { %v1393_v0 = vor.u32 %v1544_v48, %v1390_v1 }
  0xac   :  { %763 = vmatpush.bf16.msra.mxu2 %v1393_v0 }
  0xaf   :  { %v354_v11 = vpop.f32.mrf.mxu2 }
  0xb0   :  { %v2029_v60 = vpop.f32.mrf.mxu1  ;;  %v337_v27 = vpop.f32.mrf.mxu0  ;;  %v355_v17 = vadd.f32 %v354_v11, %v2066_v15 }
  0xb1   :  { %v338_v38 = vadd.f32 %v337_v27, %v2066_v15  ;;  %v348_v2 = vadd.f32 %v2029_v60, %v2066_v15  ;;  %v1543_v60 = vld [vmem:[%s2461_s4 + $0x24] sm:$0xf0]  ;;  %v362_v27 = vpop.f32.mrf.mxu3 }
  0xb2   :  { %v1381_v4 = vor.u32 %v1543_v60, %v1380_v52  ;;  %v363_v50 = vadd.f32 %v362_v27, %v2066_v15 }
  0xb3   :  { %415 = vmatmul.bf16.gmra.mxu1 %v2026_v59 }
  0xb4   :  { %715 = vmatpush.bf16.msra.mxu1 %v1381_v4  ;;  %v1560_v4 = vld [vmem:[%s2463_s6 + $0x30] sm:$0xff] }
  0xb5   :  { %508 = vmatmul.bf16.gmra.mxu3 %v1958_v21 }
  0xb6   :  { %459 = vmatmul.bf16.gmra.mxu2 %v1823_v13  ;;  %v1374_v13 = vld [vmem:[%s2461_s4 + $0x18] sm:$0xf0] }
  0xb7   :  { %v1377_v35 = vor.u32 %v1540_v31, %v1374_v13 }
  0xb8   :  { %v2044_v5 = vpop.f32.mrf.mxu1  ;;  %v339_v10 = vpop.f32.mrf.mxu0 }
  0xb9   :  { %v340_v39 = vadd.f32 %v339_v10, %v2066_v15  ;;  %v350_v34 = vadd.f32 %v2044_v5, %v2066_v15  ;;  %v1542_v5 = vld [vmem:[%s2461_s4 + $0x24] sm:$0xf]  ;;  %v364_v37 = vpop.f32.mrf.mxu3 }
  0xba   :  { %v1385_v36 = vor.u32 %v1542_v5, %v1382_v7 }
  0xbc   :  { %764 = vmatpush.bf16.msra.mxu2 %v1385_v36 }
  0xc0   :  { %v381_v9 = vpop.f32.mrf.mxu1  ;;  %765 = vmatpush.bf16.msra.mxu2 %v1377_v35 }
  0xc1   :  { %v382_v24 = vadd.f32 %v381_v9, %v333_v18  ;;  %v367_v51 = vpop.f32.mrf.mxu3 }
  0xc2   :  { %v368_v63 = vadd.f32 %v367_v51, %v2066_v15 }
  0xc5   :  { %513 = vmatmul.bf16.gmra.mxu3 %v2026_v59 }
  0xc6   :  { %464 = vmatmul.bf16.gmra.mxu2 %v1849_v22 }
  0xc8   :  { %v383_v23 = vpop.f32.mrf.mxu1 }
  0xc9   :  { %v384_v25 = vadd.f32 %v383_v23, %v335_v20  ;;  %v369_v22 = vpop.f32.mrf.mxu3 }
  0xca   :  { %v370_v1 = vadd.f32 %v369_v22, %v2066_v15 }
  0xcb   :  { %v519_v28 = vpack.c.bf16 %v384_v25, %v382_v24  ;;  %v357_v24 = vpop.f32.mrf.mxu2 }
  0xcc   :  { %v358_v33 = vadd.f32 %v357_v24, %v2066_v15 }
  0xcd   :  { %559 = vmatmul.bf16.vlgmr.msrb.gmra.mxu0 %v519_v28 }
  0xd0   :  { %v386_v29 = vpop.f32.mrf.mxu1 }
  0xd1   :  { %v387_v41 = vadd.f32 %v386_v29, %v338_v38  ;;  %v1372_v29 = vld [vmem:[%s2461_s4 + $0x10] sm:$0xf] }
  0xd2   :  { %v1373_v32 = vor.u32 %v1541_v30, %v1372_v29 }
  0xd3   :  { %v359_v21 = vpop.f32.mrf.mxu2 }
  0xd4   :  { %716 = vmatpush.bf16.msra.mxu1 %v1373_v32  ;;  %v360_v10 = vadd.f32 %v359_v21, %v2066_v15  ;;  %v1567_v21 = vld [vmem:[%s2463_s6 + $0x68] sm:$0xff] }
  0xd8   :  { %v388_v40 = vpop.f32.mrf.mxu1  ;;  %v479_v26 = vpop.f32.mrf.mxu3 }
  0xd9   :  { %v389_v42 = vadd.f32 %v388_v40, %v340_v39 }
  0xdb   :  { %v520_v43 = vpack.c.bf16 %v389_v42, %v387_v41  ;;  %v1364_v42 = vld [vmem:[%s2461_s4] sm:$0xf]  ;;  %v430_v59 = vpop.f32.mrf.mxu2 }
  0xdd   :  { %564 = vmatmul.bf16.gmra.mxu0 %v520_v43  ;;  %v1539_v43 = vld [vmem:[%s2461_s4 + $0x4] sm:$0xf0] }
  0xde   :  { %v1365_v45 = vor.u32 %v1539_v43, %v1364_v42 }
  0xe0   :  { %v391_v44 = vpop.f32.mrf.mxu1  ;;  %717 = vmatpush.bf16.msra.mxu1 %v1365_v45  ;;  %v1566_v45 = vld [vmem:[%s2463_s6 + $0x60] sm:$0xff] }
  0xe1   :  { %v392_v55 = vadd.f32 %v391_v44, %v343_v16  ;;  %v1538_v44 = vld [vmem:[%s2461_s4 + $0x4] sm:$0xf]  ;;  %v365_v16 = vadd.f32 %v364_v37, %v2066_v15  ;;  %v1569_v15 = vld [vmem:[%s2463_s6 + $0x78] sm:$0xff] }
  0xe2   :  { %v1369_v47 = vor.u32 %v1538_v44, %v1366_v46  ;;  %1065 = vmatpush.bf16.msra.mxu0 %v1569_v15  ;;  %v1564_v15 = vld [vmem:[%s2463_s6 + $0x50] sm:$0xff] }
  0xe4   :  { %766 = vmatpush.bf16.msra.mxu2 %v1369_v47 }
  0xe8   :  { %v393_v54 = vpop.f32.mrf.mxu1 }
  0xe9   :  { %v394_v56 = vadd.f32 %v393_v54, %v345_v53 }
  0xeb   :  { %v521_v57 = vpack.c.bf16 %v394_v56, %v392_v55 }
  0xed   :  { %569 = vmatmul.bf16.gmra.mxu0 %v521_v57  ;;  %v2171_v57 = vperm.slane %v2051_v6, 1  ;;  %v1561_v6 = vld [vmem:[%s2463_s6 + $0x38] sm:$0xff] }
  0xee   :  { %1016 = vmatpush.bf16.msra.mxu3 %v1561_v6 }
  0xef   :  { %v431_v61 = vadd.f32 %v430_v59, %v2171_v57  ;;  %v1565_v59 = vld [vmem:[%s2463_s6 + $0x58] sm:$0xff] }
  0xf0   :  { %v396_v58 = vpop.f32.mrf.mxu1 }
  0xf1   :  { %v397_v3 = vadd.f32 %v396_v58, %v348_v2  ;;  %v2174_v48 = vadd.f32 %v479_v26, %v431_v61 }
  0xf2   :  { %1017 = vmatpush.bf16.msra.mxu3 %v1560_v4 }
  0xf8   :  { %v398_v62 = vpop.f32.mrf.mxu1 }
  0xf9   :  { %v399_v8 = vadd.f32 %v398_v62, %v350_v34  ;;  %v2178_v34 = vpop.f32.mrf.mxu2  ;;  %v2180_v62 = vpop.f32.mrf.mxu3 }
  0xfb   :  { %v522_v9 = vpack.c.bf16 %v399_v8, %v397_v3 }
  0xfd   :  { %574 = vmatmul.bf16.gmra.mxu0 %v522_v9 }
 0x100   :  { %v401_v12 = vpop.f32.mrf.mxu1 }
 0x101   :  { %v402_v20 = vadd.f32 %v401_v12, %v353_v14  ;;  %v435_v8 = vpop.f32.mrf.mxu2  ;;  %v484_v11 = vpop.f32.mrf.mxu3 }
 0x102   :  { %v436_v9 = vadd.f32 %v435_v8, %v2171_v57 }
 0x104   :  { %v2186_v12 = vadd.f32 %v484_v11, %v436_v9 }
 0x108   :  { %v403_v18 = vpop.f32.mrf.mxu1 }
 0x109   :  { %v404_v23 = vadd.f32 %v403_v18, %v355_v17  ;;  %v2191_v52 = vpop.f32.mrf.mxu2  ;;  %v2193_v5 = vpop.f32.mrf.mxu3 }
 0x10b   :  { %v523_v25 = vpack.c.bf16 %v404_v23, %v402_v20  ;;  %v1568_v23 = vld [vmem:[%s2463_s6 + $0x70] sm:$0xff] }
 0x10c   :  { %1066 = vmatpush.bf16.msra.mxu0 %v1568_v23 }
 0x10d   :  { %579 = vmatmul.bf16.gmra.mxu0 %v523_v25 }
 0x110   :  { %v406_v28 = vpop.f32.mrf.mxu1  ;;  %1067 = vmatpush.bf16.msra.mxu0 %v1567_v21 }
 0x111   :  { %v407_v39 = vadd.f32 %v406_v28, %v358_v33  ;;  %v440_v7 = vpop.f32.mrf.mxu2  ;;  %v489_v17 = vpop.f32.mrf.mxu3  ;;  %v1559_v28 = vld [vmem:[%s2463_s6 + $0x28] sm:$0xff] }
 0x112   :  { %v441_v14 = vadd.f32 %v440_v7, %v2171_v57  ;;  %1018 = vmatpush.bf16.msra.mxu3 %v1559_v28 }
 0x114   :  { %v2199_v20 = vadd.f32 %v489_v17, %v441_v14  ;;  %1068 = vmatpush.bf16.msra.mxu0 %v1566_v45  ;;  %v1555_v14 = vld [vmem:[%s2463_s6 + $0x8] sm:$0xff] }
 0x118   :  { %v408_v38 = vpop.f32.mrf.mxu1  ;;  %1069 = vmatpush.bf16.msra.mxu0 %v1565_v59 }
 0x119   :  { %v409_v40 = vadd.f32 %v408_v38, %v360_v10  ;;  %v2204_v24 = vpop.f32.mrf.mxu2  ;;  %v2206_v27 = vpop.f32.mrf.mxu3  ;;  %v1558_v38 = vld [vmem:[%s2463_s6 + $0x20] sm:$0xff] }
 0x11a   :  { %1019 = vmatpush.bf16.msra.mxu3 %v1558_v38  ;;  %v1562_v38 = vld [vmem:[%s2463_s6 + $0x40] sm:$0xff] }
 0x11b   :  { %v524_v41 = vpack.c.bf16 %v409_v40, %v407_v39 }
 0x11c   :  { %1070 = vmatpush.bf16.msra.mxu0 %v1564_v15 }
 0x11d   :  { %584 = vmatmul.bf16.gmra.mxu0 %v524_v41 }
 0x120   :  { %v411_v49 = vpop.f32.mrf.mxu1 }
 0x121   :  { %v412_v54 = vadd.f32 %v411_v49, %v363_v50  ;;  %v445_v29 = vpop.f32.mrf.mxu2  ;;  %v494_v32 = vpop.f32.mrf.mxu3  ;;  %v1557_v50 = vld [vmem:[%s2463_s6 + $0x18] sm:$0xff] }
 0x122   :  { %v446_v31 = vadd.f32 %v445_v29, %v2171_v57  ;;  %1020 = vmatpush.bf16.msra.mxu3 %v1557_v50 }
 0x124   :  { %v2212_v35 = vadd.f32 %v494_v32, %v446_v31  ;;  %v1563_v31 = vld [vmem:[%s2463_s6 + $0x48] sm:$0xff]  ;;  %v1554_v32 = vld [vmem:[%s2463_s6] sm:$0xff] }
 0x125   :  { %1071 = vmatpush.bf16.msra.mxu0 %v1563_v31 }
 0x128   :  { %v413_v53 = vpop.f32.mrf.mxu1 }
 0x129   :  { %v414_v55 = vadd.f32 %v413_v53, %v365_v16  ;;  %v2217_v33 = vpop.f32.mrf.mxu2  ;;  %v2219_v10 = vpop.f32.mrf.mxu3  ;;  %1072 = vmatpush.bf16.msra.mxu0 %v1562_v38 }
 0x12b   :  { %v525_v56 = vpack.c.bf16 %v414_v55, %v412_v54 }
 0x12d   :  { %589 = vmatmul.bf16.gmra.mxu0 %v525_v56 }
 0x130   :  { %v416_v58 = vpop.f32.mrf.mxu1 }
 0x131   :  { %v417_v19 = vadd.f32 %v416_v58, %v368_v63  ;;  %v450_v39 = vpop.f32.mrf.mxu2  ;;  %v499_v42 = vpop.f32.mrf.mxu3 }
 0x132   :  { %v451_v41 = vadd.f32 %v450_v39, %v2171_v57 }
 0x134   :  { %v2225_v44 = vadd.f32 %v499_v42, %v451_v41 }
 0x138   :  { %v418_v0 = vpop.f32.mrf.mxu1 }
 0x139   :  { %v419_v2 = vadd.f32 %v418_v0, %v370_v1  ;;  %v452_v46 = vpop.f32.mrf.mxu2  ;;  %v501_v51 = vpop.f32.mrf.mxu3  ;;  %v1556_v0 = vld [vmem:[%s2463_s6 + $0x10] sm:$0xff] }
 0x13a   :  { %v453_v49 = vadd.f32 %v452_v46, %v2171_v57  ;;  %1021 = vmatpush.bf16.msra.mxu3 %v1556_v0 }
 0x13b   :  { %v526_v3 = vpack.c.bf16 %v419_v2, %v417_v19 }
 0x13c   :  { %v2234_v16 = vadd.f32 %v501_v51, %v453_v49  ;;  %v30_v49 = vld [vmem:[%s2459_s0 + $0x8] sm:$0xff] }
 0x13d   :  { %594 = vmatmul.bf16.gmra.mxu0 %v526_v3  ;;  %v811_v0 = vunpack.c.h.bf16 %v30_v49 }
 0x13e   :  { %1022 = vmatpush.bf16.msra.mxu3 %v1555_v14 }
 0x141   :  { %v455_v53 = vpop.f32.mrf.mxu2  ;;  %v504_v22 = vpop.f32.mrf.mxu3 }
 0x142   :  { %v456_v55 = vadd.f32 %v455_v53, %v2171_v57  ;;  %1023 = vmatpush.bf16.msra.mxu3 %v1554_v32 }
 0x144   :  { %v2237_v58 = vadd.f32 %v504_v22, %v456_v55 }
 0x149   :  { %v457_v61 = vpop.f32.mrf.mxu2  ;;  %v506_v1 = vpop.f32.mrf.mxu3 }
 0x14a   :  { %v560_v60 = vpop.f32.mrf.mxu0  ;;  %v458_v63 = vadd.f32 %v457_v61, %v2171_v57 }
 0x14c   :  { %v2246_v19 = vadd.f32 %v506_v1, %v458_v63 }
 0x151   :  { %v460_v2 = vpop.f32.mrf.mxu2  ;;  %v509_v8 = vpop.f32.mrf.mxu3 }
 0x152   :  { %v562_v36 = vpop.f32.mrf.mxu0  ;;  %v461_v3 = vadd.f32 %v460_v2, %v2171_v57 }
 0x153   :  { %v600_v18 = vpack.c.bf16 %v562_v36, %v560_v60 }
 0x154   :  { %v2249_v11 = vadd.f32 %v509_v8, %v461_v3 }
 0x155   :  { %718 = vmatmul.bf16.vlgmr.msra.gmra.mxu1 %v600_v18  ;;  %767 = vmatmul.bf16.vlgmr.msra.gmra.mxu2 %v600_v18 }
 0x159   :  { %v462_v60 = vpop.f32.mrf.mxu2  ;;  %v511_v36 = vpop.f32.mrf.mxu3 }
 0x15a   :  { %v565_v25 = vpop.f32.mrf.mxu0  ;;  %v463_v7 = vadd.f32 %v462_v60, %v2171_v57  ;;  %v31_v60 = vld [vmem:[%s2459_s0 + $0x10] sm:$0xff] }
 0x15b   :  { %v812_v14 = vunpack.c.l.bf16 %v31_v60  ;;  %v813_v32 = vunpack.c.h.bf16 %v31_v60  ;;  %v36_v60 = vld [vmem:[%s2459_s0 + $0x38] sm:$0xff] }
 0x15c   :  { %v2258_v17 = vadd.f32 %v511_v36, %v463_v7 }
 0x161   :  { %v465_v18 = vpop.f32.mrf.mxu2  ;;  %v514_v29 = vpop.f32.mrf.mxu3 }
 0x162   :  { %v567_v30 = vpop.f32.mrf.mxu0 }
 0x163   :  { %v601_v13 = vpack.c.bf16 %v567_v30, %v565_v25  ;;  %v466_v25 = vadd.f32 %v465_v18, %v2171_v57 }
 0x165   :  { %723 = vmatmul.bf16.gmra.mxu1 %v601_v13  ;;  %772 = vmatmul.bf16.gmra.mxu2 %v601_v13  ;;  %v2261_v30 = vadd.f32 %v514_v29, %v466_v25 }
 0x169   :  { %v2272_v42 = vpop.f32.mrf.mxu2 }
 0x16a   :  { %v570_v37 = vpop.f32.mrf.mxu0 }
 0x172   :  { %v572_v40 = vpop.f32.mrf.mxu0 }
 0x173   :  { %v602_v43 = vpack.c.bf16 %v572_v40, %v570_v37 }
 0x175   :  { %728 = vmatmul.bf16.gmra.mxu1 %v602_v43  ;;  %777 = vmatmul.bf16.gmra.mxu2 %v602_v43  ;;  %v624_v43 = vld [vmem:[%s2464_s5] sm:$0x3] }
 0x176   :  { %v2277_v46 = vperm.slane %v624_v43, 0  ;;  %v2286_v22 = vperm.slane %v624_v43, 1 }
 0x17a   :  { %v575_v47 = vpop.f32.mrf.mxu0 }
 0x182   :  { %v577_v54 = vpop.f32.mrf.mxu0 }
 0x183   :  { %v603_v56 = vpack.c.bf16 %v577_v54, %v575_v47  ;;  %v29_v47 = vld [vmem:[%s2459_s0] sm:$0xff]  ;;  %v810_v54 = vunpack.c.l.bf16 %v30_v49 }
 0x184   :  { %v808_v53 = vunpack.c.l.bf16 %v29_v47  ;;  %v809_v63 = vunpack.c.h.bf16 %v29_v47  ;;  %v34_v47 = vld [vmem:[%s2459_s0 + $0x28] sm:$0xff] }
 0x185   :  { %733 = vmatmul.bf16.gmra.mxu1 %v603_v56  ;;  %782 = vmatmul.bf16.gmra.mxu2 %v603_v56 }
 0x18a   :  { %v580_v26 = vpop.f32.mrf.mxu0 }
 0x192   :  { %v582_v6 = vpop.f32.mrf.mxu0 }
 0x193   :  { %v604_v9 = vpack.c.bf16 %v582_v6, %v580_v26 }
 0x195   :  { %738 = vmatmul.bf16.gmra.mxu1 %v604_v9  ;;  %787 = vmatmul.bf16.gmra.mxu2 %v604_v9 }
 0x19a   :  { %v585_v4 = vpop.f32.mrf.mxu0 }
 0x1a2   :  { %v587_v23 = vpop.f32.mrf.mxu0 }
 0x1a3   :  { %v605_v28 = vpack.c.bf16 %v587_v23, %v585_v4  ;;  %v32_v4 = vld [vmem:[%s2459_s0 + $0x18] sm:$0xff] }
 0x1a4   :  { %v814_v18 = vunpack.c.l.bf16 %v32_v4 }
 0x1a5   :  { %743 = vmatmul.bf16.gmra.mxu1 %v605_v28  ;;  %792 = vmatmul.bf16.gmra.mxu2 %v605_v28 }
 0x1aa   :  { %v590_v13 = vpop.f32.mrf.mxu0 }
 0x1b2   :  { %v592_v21 = vpop.f32.mrf.mxu0 }
 0x1b3   :  { %v606_v37 = vpack.c.bf16 %v592_v21, %v590_v13  ;;  %v815_v13 = vunpack.c.h.bf16 %v32_v4 }
 0x1b5   :  { %748 = vmatmul.bf16.gmra.mxu1 %v606_v37  ;;  %797 = vmatmul.bf16.gmra.mxu2 %v606_v37 }
 0x1ba   :  { %v595_v39 = vpop.f32.mrf.mxu0 }
 0x1c2   :  { %v597_v40 = vpop.f32.mrf.mxu0 }
 0x1c3   :  { %v607_v41 = vpack.c.bf16 %v597_v40, %v595_v39 }
 0x1c5   :  { %753 = vmatmul.bf16.gmra.mxu1 %v607_v41  ;;  %802 = vmatmul.bf16.gmra.mxu2 %v607_v41 }
 0x1d2   :  { %v719_v45 = vpop.f32.mrf.mxu1 }
 0x1d3   :  { %v720_v50 = vadd.f32 %v719_v45, %v2277_v46  ;;  %v33_v45 = vld [vmem:[%s2459_s0 + $0x20] sm:$0xff] }
 0x1d5   :  { %v840_v59 = vadd.f32 %v808_v53, %v720_v50  ;;  %v816_v50 = vunpack.c.l.bf16 %v33_v45  ;;  %v818_v53 = vunpack.c.l.bf16 %v34_v47 }
 0x1d8   :  { %v768_v51 = vpop.f32.mrf.mxu2 }
 0x1d9   :  { %v769_v26 = vadd.f32 %v768_v51, %v2286_v22 }
 0x1da   :  { %v721_v55 = vpop.f32.mrf.mxu1 }
 0x1db   :  { %v722_v56 = vadd.f32 %v721_v55, %v2277_v46  ;;  %v841_v8 = vadd.f32 %v809_v63, %v769_v26  ;;  %v817_v26 = vunpack.c.h.bf16 %v33_v45  ;;  %v819_v63 = vunpack.c.h.bf16 %v34_v47  ;;  %v38_v45 = vld [vmem:[%s2459_s0 + $0x48] sm:$0xff] }
 0x1dd   :  { %v842_v61 = vadd.f32 %v810_v54, %v722_v56 }
 0x1df   :  { %v872_v1 = vpack.c.bf16 %v842_v61, %v840_v59 }
 0x1e0   :  { %v770_v2 = vpop.f32.mrf.mxu2 }
 0x1e1   :  { %v771_v6 = vadd.f32 %v770_v2, %v2286_v22  ;;  %1024 = vmatmul.bf16.vlgmr.msra.gmra.mxu3 %v872_v1 }
 0x1e2   :  { %v724_v3 = vpop.f32.mrf.mxu1 }
 0x1e3   :  { %v843_v9 = vadd.f32 %v811_v0, %v771_v6  ;;  %v725_v36 = vadd.f32 %v724_v3, %v2277_v46 }
 0x1e5   :  { %v873_v15 = vpack.c.bf16 %v843_v9, %v841_v8  ;;  %v844_v28 = vadd.f32 %v812_v14, %v725_v36  ;;  %v822_v14 = vunpack.c.l.bf16 %v36_v60 }
 0x1e7   :  { %1073 = vmatmul.bf16.vlgmr.msra.gmra.mxu0 %v873_v15  ;;  %v35_v15 = vld [vmem:[%s2459_s0 + $0x30] sm:$0xff] }
 0x1e8   :  { %v773_v7 = vpop.f32.mrf.mxu2  ;;  %v820_v36 = vunpack.c.l.bf16 %v35_v15 }
 0x1e9   :  { %v774_v31 = vadd.f32 %v773_v7, %v2286_v22 }
 0x1ea   :  { %v726_v23 = vpop.f32.mrf.mxu1 }
 0x1eb   :  { %v727_v25 = vadd.f32 %v726_v23, %v2277_v46  ;;  %v845_v40 = vadd.f32 %v813_v32, %v774_v31  ;;  %v821_v31 = vunpack.c.h.bf16 %v35_v15  ;;  %v823_v32 = vunpack.c.h.bf16 %v36_v60  ;;  %v40_v15 = vld [vmem:[%s2459_s0 + $0x58] sm:$0xff] }
 0x1ed   :  { %v846_v29 = vadd.f32 %v814_v18, %v727_v25 }
 0x1ef   :  { %v874_v21 = vpack.c.bf16 %v846_v29, %v844_v28 }
 0x1f0   :  { %v775_v37 = vpop.f32.mrf.mxu2 }
 0x1f1   :  { %v776_v38 = vadd.f32 %v775_v37, %v2286_v22  ;;  %1029 = vmatmul.bf16.gmra.mxu3 %v874_v21 }
 0x1f2   :  { %v729_v39 = vpop.f32.mrf.mxu1 }
 0x1f3   :  { %v847_v41 = vadd.f32 %v815_v13, %v776_v38  ;;  %v730_v51 = vadd.f32 %v729_v39, %v2277_v46 }
 0x1f5   :  { %v875_v43 = vpack.c.bf16 %v847_v41, %v845_v40  ;;  %v848_v56 = vadd.f32 %v816_v50, %v730_v51  ;;  %v826_v50 = vunpack.c.l.bf16 %v38_v45 }
 0x1f7   :  { %1078 = vmatmul.bf16.gmra.mxu0 %v875_v43  ;;  %v37_v43 = vld [vmem:[%s2459_s0 + $0x40] sm:$0xff] }
 0x1f8   :  { %v778_v49 = vpop.f32.mrf.mxu2  ;;  %v824_v51 = vunpack.c.l.bf16 %v37_v43 }
 0x1f9   :  { %v779_v61 = vadd.f32 %v778_v49, %v2286_v22 }
 0x1fa   :  { %v731_v54 = vpop.f32.mrf.mxu1 }
 0x1fb   :  { %v732_v55 = vadd.f32 %v731_v54, %v2277_v46  ;;  %v849_v3 = vadd.f32 %v817_v26, %v779_v61  ;;  %v825_v61 = vunpack.c.h.bf16 %v37_v43  ;;  %v827_v26 = vunpack.c.h.bf16 %v38_v45  ;;  %v42_v43 = vld [vmem:[%s2459_s0 + $0x68] sm:$0xff] }
 0x1fd   :  { %v850_v59 = vadd.f32 %v818_v53, %v732_v55 }
 0x1ff   :  { %v876_v1 = vpack.c.bf16 %v850_v59, %v848_v56 }
 0x200   :  { %v780_v0 = vpop.f32.mrf.mxu2 }
 0x201   :  { %v781_v2 = vadd.f32 %v780_v0, %v2286_v22  ;;  %1034 = vmatmul.bf16.gmra.mxu3 %v876_v1 }
 0x202   :  { %v734_v6 = vpop.f32.mrf.mxu1 }
 0x203   :  { %v851_v8 = vadd.f32 %v819_v63, %v781_v2  ;;  %v735_v7 = vadd.f32 %v734_v6, %v2277_v46 }
 0x205   :  { %v877_v9 = vpack.c.bf16 %v851_v8, %v849_v3  ;;  %v852_v25 = vadd.f32 %v820_v36, %v735_v7  ;;  %v830_v36 = vunpack.c.l.bf16 %v40_v15 }
 0x207   :  { %1083 = vmatmul.bf16.gmra.mxu0 %v877_v9  ;;  %v39_v9 = vld [vmem:[%s2459_s0 + $0x50] sm:$0xff] }
 0x208   :  { %v783_v4 = vpop.f32.mrf.mxu2  ;;  %v828_v7 = vunpack.c.l.bf16 %v39_v9 }
 0x209   :  { %v784_v29 = vadd.f32 %v783_v4, %v2286_v22 }
 0x20a   :  { %v736_v18 = vpop.f32.mrf.mxu1 }
 0x20b   :  { %v737_v23 = vadd.f32 %v736_v18, %v2277_v46  ;;  %v853_v39 = vadd.f32 %v821_v31, %v784_v29  ;;  %v829_v29 = vunpack.c.h.bf16 %v39_v9  ;;  %v831_v31 = vunpack.c.h.bf16 %v40_v15  ;;  %v44_v9 = vld [vmem:[%s2459_s0 + $0x78] sm:$0xff] }
 0x20d   :  { %v854_v28 = vadd.f32 %v822_v14, %v737_v23 }
 0x20f   :  { %v878_v13 = vpack.c.bf16 %v854_v28, %v852_v25 }
 0x210   :  { %v785_v21 = vpop.f32.mrf.mxu2 }
 0x211   :  { %v786_v37 = vadd.f32 %v785_v21, %v2286_v22  ;;  %1039 = vmatmul.bf16.gmra.mxu3 %v878_v13 }
 0x212   :  { %v739_v38 = vpop.f32.mrf.mxu1 }
 0x213   :  { %v855_v40 = vadd.f32 %v823_v32, %v786_v37  ;;  %v740_v49 = vadd.f32 %v739_v38, %v2277_v46 }
 0x215   :  { %v879_v41 = vpack.c.bf16 %v855_v40, %v853_v39  ;;  %v856_v55 = vadd.f32 %v824_v51, %v740_v49  ;;  %v834_v51 = vunpack.c.l.bf16 %v42_v43 }
 0x217   :  { %1088 = vmatmul.bf16.gmra.mxu0 %v879_v41  ;;  %v41_v41 = vld [vmem:[%s2459_s0 + $0x60] sm:$0xff] }
 0x218   :  { %v788_v47 = vpop.f32.mrf.mxu2  ;;  %v832_v49 = vunpack.c.l.bf16 %v41_v41 }
 0x219   :  { %v789_v59 = vadd.f32 %v788_v47, %v2286_v22 }
 0x21a   :  { %v741_v53 = vpop.f32.mrf.mxu1 }
 0x21b   :  { %v742_v54 = vadd.f32 %v741_v53, %v2277_v46  ;;  %v857_v6 = vadd.f32 %v825_v61, %v789_v59  ;;  %v833_v59 = vunpack.c.h.bf16 %v41_v41  ;;  %v835_v61 = vunpack.c.h.bf16 %v42_v43  ;;  %v2366_v43 = vld [vmem:[%s2465_s7] ss:$0 sm:$0xff] }
 0x21d   :  { %v858_v56 = vadd.f32 %v826_v50, %v742_v54 }
 0x21f   :  { %v880_v63 = vpack.c.bf16 %v858_v56, %v856_v55 }
 0x220   :  { %v790_v1 = vpop.f32.mrf.mxu2 }
 0x221   :  { %v791_v0 = vadd.f32 %v790_v1, %v2286_v22  ;;  %1044 = vmatmul.bf16.gmra.mxu3 %v880_v63 }
 0x222   :  { %v744_v2 = vpop.f32.mrf.mxu1 }
 0x223   :  { %v859_v3 = vadd.f32 %v827_v26, %v791_v0  ;;  %v745_v4 = vadd.f32 %v744_v2, %v2277_v46 }
 0x225   :  { %v881_v8 = vpack.c.bf16 %v859_v3, %v857_v6  ;;  %v860_v23 = vadd.f32 %v828_v7, %v745_v4  ;;  %v838_v7 = vunpack.c.l.bf16 %v44_v9 }
 0x227   :  { %1093 = vmatmul.bf16.gmra.mxu0 %v881_v8  ;;  %v43_v8 = vld [vmem:[%s2459_s0 + $0x70] sm:$0xff] }
 0x228   :  { %v793_v60 = vpop.f32.mrf.mxu2  ;;  %v836_v4 = vunpack.c.l.bf16 %v43_v8 }
 0x229   :  { %v794_v28 = vadd.f32 %v793_v60, %v2286_v22 }
 0x22a   :  { %v746_v14 = vpop.f32.mrf.mxu1 }
 0x22b   :  { %v747_v18 = vadd.f32 %v746_v14, %v2277_v46  ;;  %v861_v38 = vadd.f32 %v829_v29, %v794_v28  ;;  %v837_v28 = vunpack.c.h.bf16 %v43_v8  ;;  %v839_v29 = vunpack.c.h.bf16 %v44_v9 }
 0x22c   :  { %v443_v9 = vadd.f32 %v2204_v24, %v2171_v57 }
 0x22d   :  { %v862_v25 = vadd.f32 %v830_v36, %v747_v18 }
 0x22f   :  { %v882_v32 = vpack.c.bf16 %v862_v25, %v860_v23 }
 0x230   :  { %v795_v13 = vpop.f32.mrf.mxu2 }
 0x231   :  { %v796_v21 = vadd.f32 %v795_v13, %v2286_v22  ;;  %1049 = vmatmul.bf16.gmra.mxu3 %v882_v32 }
 0x232   :  { %v749_v37 = vpop.f32.mrf.mxu1 }
 0x233   :  { %v863_v39 = vadd.f32 %v831_v31, %v796_v21  ;;  %v750_v47 = vadd.f32 %v749_v37, %v2277_v46 }
 0x235   :  { %v883_v40 = vpack.c.bf16 %v863_v39, %v861_v38  ;;  %v864_v54 = vadd.f32 %v832_v49, %v750_v47  ;;  %v2361_v39 = vpop.f32.mrf.mxu3 }
 0x237   :  { %1098 = vmatmul.bf16.gmra.mxu0 %v883_v40 }
 0x238   :  { %v798_v45 = vpop.f32.mrf.mxu2 }
 0x239   :  { %v799_v56 = vadd.f32 %v798_v45, %v2286_v22 }
 0x23a   :  { %v751_v50 = vpop.f32.mrf.mxu1 }
 0x23b   :  { %v752_v53 = vadd.f32 %v751_v50, %v2277_v46  ;;  %v865_v2 = vadd.f32 %v833_v59, %v799_v56 }
 0x23d   :  { %v866_v55 = vadd.f32 %v834_v51, %v752_v53 }
 0x23f   :  { %v884_v26 = vpack.c.bf16 %v866_v55, %v864_v54 }
 0x240   :  { %v800_v63 = vpop.f32.mrf.mxu2 }
 0x241   :  { %v801_v1 = vadd.f32 %v800_v63, %v2286_v22  ;;  %1054 = vmatmul.bf16.gmra.mxu3 %v884_v26 }
 0x242   :  { %v754_v0 = vpop.f32.mrf.mxu1 }
 0x243   :  { %v867_v6 = vadd.f32 %v835_v61, %v801_v1  ;;  %v755_v60 = vadd.f32 %v754_v0, %v2277_v46  ;;  %v438_v61 = vadd.f32 %v2191_v52, %v2171_v57 }
 0x245   :  { %v885_v3 = vpack.c.bf16 %v867_v6, %v865_v2  ;;  %v868_v18 = vadd.f32 %v836_v4, %v755_v60  ;;  %v487_v1 = vadd.f32 %v2193_v5, %v438_v61  ;;  %v492_v4 = vadd.f32 %v2206_v27, %v443_v9 }
 0x247   :  { %1103 = vmatmul.bf16.gmra.mxu0 %v885_v3 }
 0x248   :  { %v803_v15 = vpop.f32.mrf.mxu2 }
 0x249   :  { %v804_v25 = vadd.f32 %v803_v15, %v2286_v22 }
 0x24a   :  { %v756_v36 = vpop.f32.mrf.mxu1 }
 0x24b   :  { %v757_v14 = vadd.f32 %v756_v36, %v2277_v46  ;;  %v869_v21 = vadd.f32 %v837_v28, %v804_v25  ;;  %v448_v25 = vadd.f32 %v2217_v33, %v2171_v57 }
 0x24d   :  { %v870_v23 = vadd.f32 %v838_v7, %v757_v14 }
 0x24f   :  { %v886_v31 = vpack.c.bf16 %v870_v23, %v868_v18 }
 0x250   :  { %v805_v32 = vpop.f32.mrf.mxu2 }
 0x251   :  { %v806_v13 = vadd.f32 %v805_v32, %v2286_v22  ;;  %1059 = vmatmul.bf16.gmra.mxu3 %v886_v31  ;;  %v433_v22 = vadd.f32 %v2178_v34, %v2171_v57  ;;  %v497_v31 = vadd.f32 %v2219_v10, %v448_v25 }
 0x253   :  { %v871_v37 = vadd.f32 %v839_v29, %v806_v13  ;;  %v482_v50 = vadd.f32 %v2180_v62, %v433_v22 }
 0x255   :  { %v887_v38 = vpack.c.bf16 %v871_v37, %v869_v21 }
 0x257   :  { %1108 = vmatmul.bf16.gmra.mxu0 %v887_v38 }
 0x264   :  { %v1025_v40 = vpop.f32.mrf.mxu3  ;;  %v1074_v41 = vpop.f32.mrf.mxu0 }
 0x265   :  { %v1075_v46 = vadd.f32 %v1074_v41, %v1025_v40 }
 0x267   :  { %v1114_v45 = vadd.f32 %v1075_v46, %v2174_v48 }
 0x269   :  { %v1134_v47 = vadd.f32 %v2366_v43, %v1114_v45 }
 0x26b   :  { %1150 = vst [vmem:[%s2466_s8] sm:$0xff] %v1134_v47 }
 0x26c   :  { %v1027_v49 = vpop.f32.mrf.mxu3  ;;  %v1076_v51 = vpop.f32.mrf.mxu0 }
 0x26d   :  { %v1077_v53 = vadd.f32 %v1076_v51, %v1027_v49 }
 0x26f   :  { %v1115_v54 = vadd.f32 %v1077_v53, %v482_v50 }
 0x271   :  { %v1135_v55 = vadd.f32 %v2366_v43, %v1115_v54 }
 0x273   :  { %1151 = vst [vmem:[%s2466_s8 + $0x8] sm:$0xff] %v1135_v55 }
 0x274   :  { %v1030_v48 = vpop.f32.mrf.mxu3  ;;  %v1079_v34 = vpop.f32.mrf.mxu0 }
 0x275   :  { %v1080_v56 = vadd.f32 %v1079_v34, %v1030_v48 }
 0x277   :  { %v1116_v59 = vadd.f32 %v1080_v56, %v2186_v12 }
 0x279   :  { %v1136_v26 = vadd.f32 %v2366_v43, %v1116_v59 }
 0x27b   :  { %1152 = vst [vmem:[%s2466_s8 + $0x10] sm:$0xff] %v1136_v26 }
 0x27c   :  { %v1032_v62 = vpop.f32.mrf.mxu3  ;;  %v1081_v63 = vpop.f32.mrf.mxu0 }
 0x27d   :  { %v1082_v0 = vadd.f32 %v1081_v63, %v1032_v62 }
 0x27f   :  { %v1117_v2 = vadd.f32 %v1082_v0, %v487_v1 }
 0x281   :  { %v1137_v6 = vadd.f32 %v2366_v43, %v1117_v2 }
 0x283   :  { %1153 = vst [vmem:[%s2466_s8 + $0x18] sm:$0xff] %v1137_v6 }
 0x284   :  { %v1035_v12 = vpop.f32.mrf.mxu3  ;;  %v1084_v52 = vpop.f32.mrf.mxu0 }
 0x285   :  { %v1085_v3 = vadd.f32 %v1084_v52, %v1035_v12  ;;  %v468_v12 = vadd.f32 %v2272_v42, %v2171_v57 }
 0x287   :  { %v1118_v8 = vadd.f32 %v1085_v3, %v2199_v20 }
 0x289   :  { %v1138_v15 = vadd.f32 %v2366_v43, %v1118_v8  ;;  %v517_v8 = vadd.f32 %v2361_v39, %v468_v12 }
 0x28b   :  { %1154 = vst [vmem:[%s2466_s8 + $0x20] sm:$0xff] %v1138_v15 }
 0x28c   :  { %v1037_v5 = vpop.f32.mrf.mxu3  ;;  %v1086_v60 = vpop.f32.mrf.mxu0 }
 0x28d   :  { %v1087_v7 = vadd.f32 %v1086_v60, %v1037_v5 }
 0x28f   :  { %v1119_v36 = vadd.f32 %v1087_v7, %v492_v4 }
 0x291   :  { %v1139_v14 = vadd.f32 %v2366_v43, %v1119_v36 }
 0x293   :  { %1155 = vst [vmem:[%s2466_s8 + $0x28] sm:$0xff] %v1139_v14 }
 0x294   :  { %v1040_v20 = vpop.f32.mrf.mxu3  ;;  %v1089_v24 = vpop.f32.mrf.mxu0 }
 0x295   :  { %v1090_v18 = vadd.f32 %v1089_v24, %v1040_v20 }
 0x297   :  { %v1120_v23 = vadd.f32 %v1090_v18, %v2212_v35 }
 0x299   :  { %v1140_v28 = vadd.f32 %v2366_v43, %v1120_v23 }
 0x29b   :  { %1156 = vst [vmem:[%s2466_s8 + $0x30] sm:$0xff] %v1140_v28 }
 0x29c   :  { %v1042_v27 = vpop.f32.mrf.mxu3  ;;  %v1091_v29 = vpop.f32.mrf.mxu0 }
 0x29d   :  { %v1092_v32 = vadd.f32 %v1091_v29, %v1042_v27 }
 0x29f   :  { %v1121_v13 = vadd.f32 %v1092_v32, %v497_v31 }
 0x2a1   :  { %v1141_v21 = vadd.f32 %v2366_v43, %v1121_v13 }
 0x2a3   :  { %1157 = vst [vmem:[%s2466_s8 + $0x38] sm:$0xff] %v1141_v21 }
 0x2a4   :  { %v1045_v35 = vpop.f32.mrf.mxu3  ;;  %v1094_v33 = vpop.f32.mrf.mxu0 }
 0x2a5   :  { %v1095_v37 = vadd.f32 %v1094_v33, %v1045_v35 }
 0x2a7   :  { %v1122_v38 = vadd.f32 %v1095_v37, %v2225_v44 }
 0x2a9   :  { %v1142_v40 = vadd.f32 %v2366_v43, %v1122_v38 }
 0x2ab   :  { %1158 = vst [vmem:[%s2466_s8 + $0x40] sm:$0xff] %v1142_v40 }
 0x2ac   :  { %v1047_v10 = vpop.f32.mrf.mxu3  ;;  %v1096_v41 = vpop.f32.mrf.mxu0 }
 0x2ad   :  { %v1097_v46 = vadd.f32 %v1096_v41, %v1047_v10 }
 0x2af   :  { %v1123_v45 = vadd.f32 %v1097_v46, %v2234_v16 }
 0x2b1   :  { %v1143_v22 = vadd.f32 %v2366_v43, %v1123_v45 }
 0x2b3   :  { %1159 = vst [vmem:[%s2466_s8 + $0x48] sm:$0xff] %v1143_v22 }
 0x2b4   :  { %v1050_v47 = vpop.f32.mrf.mxu3  ;;  %v1099_v49 = vpop.f32.mrf.mxu0 }
 0x2b5   :  { %v1100_v44 = vadd.f32 %v1099_v49, %v1050_v47 }
 0x2b7   :  { %v1124_v51 = vadd.f32 %v1100_v44, %v2237_v58 }
 0x2b9   :  { %v1144_v50 = vadd.f32 %v2366_v43, %v1124_v51 }
 0x2bb   :  { %1160 = vst [vmem:[%s2466_s8 + $0x50] sm:$0xff] %v1144_v50 }
 0x2bc   :  { %v1052_v53 = vpop.f32.mrf.mxu3  ;;  %v1101_v54 = vpop.f32.mrf.mxu0 }
 0x2bd   :  { %v1102_v16 = vadd.f32 %v1101_v54, %v1052_v53 }
 0x2bf   :  { %v1125_v55 = vadd.f32 %v1102_v16, %v2246_v19 }
 0x2c1   :  { %v1145_v48 = vadd.f32 %v2366_v43, %v1125_v55 }
 0x2c3   :  { %1161 = vst [vmem:[%s2466_s8 + $0x58] sm:$0xff] %v1145_v48 }
 0x2c4   :  { %v1055_v34 = vpop.f32.mrf.mxu3  ;;  %v1104_v56 = vpop.f32.mrf.mxu0 }
 0x2c5   :  { %v1105_v58 = vadd.f32 %v1104_v56, %v1055_v34 }
 0x2c7   :  { %v1126_v59 = vadd.f32 %v1105_v58, %v2249_v11 }
 0x2c9   :  { %v1146_v61 = vadd.f32 %v2366_v43, %v1126_v59 }
 0x2cb   :  { %1162 = vst [vmem:[%s2466_s8 + $0x60] sm:$0xff] %v1146_v61 }
 0x2cc   :  { %v1057_v26 = vpop.f32.mrf.mxu3  ;;  %v1106_v62 = vpop.f32.mrf.mxu0 }
 0x2cd   :  { %v1107_v19 = vadd.f32 %v1106_v62, %v1057_v26 }
 0x2cf   :  { %v1127_v63 = vadd.f32 %v1107_v19, %v2258_v17 }
 0x2d1   :  { %v1147_v1 = vadd.f32 %v2366_v43, %v1127_v63 }
 0x2d3   :  { %1163 = vst [vmem:[%s2466_s8 + $0x68] sm:$0xff] %v1147_v1 }
 0x2d4   :  { %v1060_v0 = vpop.f32.mrf.mxu3  ;;  %v1109_v2 = vpop.f32.mrf.mxu0 }
 0x2d5   :  { %v1110_v11 = vadd.f32 %v1109_v2, %v1060_v0 }
 0x2d7   :  { %v1128_v6 = vadd.f32 %v1110_v11, %v2261_v30 }
 0x2d9   :  { %v1148_v52 = vadd.f32 %v2366_v43, %v1128_v6 }
 0x2db   :  { %1164 = vst [vmem:[%s2466_s8 + $0x70] sm:$0xff] %v1148_v52 }
 0x2dc   :  { %v1062_v17 = vpop.f32.mrf.mxu3  ;;  %v1111_v3 = vpop.f32.mrf.mxu0 }
 0x2dd   :  { %v1112_v9 = vadd.f32 %v1111_v3, %v1062_v17 }
 0x2df   :  { %v1129_v15 = vadd.f32 %v1112_v9, %v517_v8 }
 0x2e1   :  { %v1149_v5 = vadd.f32 %v2366_v43, %v1129_v15 }
 0x2e3   :  { %1165 = vst [vmem:[%s2466_s8 + $0x78] sm:$0xff] %v1149_v5 }

// kernel: non_local3d_forward.3
= control target key start
LH: loop header
LB: loop body
LE: loop exit
PB: predicated region body
PF: predicated region fallthrough
CT: control target
= control target key end

     0   :  { %s9111_s1 = inlined_call_operand.vmem [shape: bf16[2048,256], index: 1, kind: input, shape index: {}]   ;;  %s9112_s0 = inlined_call_operand.vmem [shape: bf16[128,2048], index: 0, kind: input, shape index: {}]   ;;  %s9113_s2 = inlined_call_operand.vmem [shape: f32[1,256], index: 2, kind: input, shape index: {}]   ;;  %s9114_s3 = inlined_call_operand.vmem [shape: bf16[128,256], index: 3, kind: output, shape index: {}]  }
   0x1   :  { %v4498_v0 = vld [vmem:[%s9111_s1 + $0x70] sm:$0xf]  ;;  %v5607_v1 = vld [vmem:[%s9111_s1 + $0x74] sm:$0xf0]  ;;  %v4490_v11 = vld [vmem:[%s9111_s1 + $0x60] sm:$0xf] }
   0x2   :  { %v4562_v2 = vld [vmem:[%s9111_s1 + $0xf0] sm:$0xf]  ;;  %v4499_v3 = vor.u32 %v5607_v1, %v4498_v0  ;;  %v5623_v4 = vld [vmem:[%s9111_s1 + $0xf4] sm:$0xf0]  ;;  %v5605_v13 = vld [vmem:[%s9111_s1 + $0x64] sm:$0xf0] }
   0x3   :  { %v4626_v5 = vld [vmem:[%s9111_s1 + $0x170] sm:$0xf]  ;;  %v5639_v6 = vld [vmem:[%s9111_s1 + $0x174] sm:$0xf0]  ;;  %v4563_v7 = vor.u32 %v5623_v4, %v4562_v2  ;;  %v4554_v14 = vld [vmem:[%s9111_s1 + $0xe0] sm:$0xf]  ;;  %v4491_v16 = vor.u32 %v5605_v13, %v4490_v11 }
   0x4   :  { %v4627_v8 = vor.u32 %v5639_v6, %v4626_v5  ;;  %v4690_v9 = vld [vmem:[%s9111_s1 + $0x1f0] sm:$0xf]  ;;  %v5655_v10 = vld [vmem:[%s9111_s1 + $0x1f4] sm:$0xf0]  ;;  %2324 = vmatpush.bf16.msra.mxu0 %v4499_v3  ;;  %v5621_v15 = vld [vmem:[%s9111_s1 + $0xe4] sm:$0xf0] }
   0x5   :  { %v4691_v12 = vor.u32 %v5655_v10, %v4690_v9  ;;  %2373 = vmatpush.bf16.msra.mxu1 %v4563_v7  ;;  %v4555_v17 = vor.u32 %v5621_v15, %v4554_v14  ;;  %v4618_v18 = vld [vmem:[%s9111_s1 + $0x160] sm:$0xf]  ;;  %v5637_v19 = vld [vmem:[%s9111_s1 + $0x164] sm:$0xf0]  ;;  %v4482_v23 = vld [vmem:[%s9111_s1 + $0x50] sm:$0xf] }
   0x6   :  { %2422 = vmatpush.bf16.msra.mxu2 %v4627_v8  ;;  %v4682_v20 = vld [vmem:[%s9111_s1 + $0x1e0] sm:$0xf]  ;;  %v4619_v21 = vor.u32 %v5637_v19, %v4618_v18  ;;  %v5653_v22 = vld [vmem:[%s9111_s1 + $0x1e4] sm:$0xf0]  ;;  %v5603_v24 = vld [vmem:[%s9111_s1 + $0x54] sm:$0xf0] }
   0x7   :  { %2471 = vmatpush.bf16.msra.mxu3 %v4691_v12  ;;  %v4683_v25 = vor.u32 %v5653_v22, %v4682_v20  ;;  %v4546_v26 = vld [vmem:[%s9111_s1 + $0xd0] sm:$0xf]  ;;  %v5619_v27 = vld [vmem:[%s9111_s1 + $0xd4] sm:$0xf0]  ;;  %v4483_v29 = vor.u32 %v5603_v24, %v4482_v23  ;;  %v4474_v35 = vld [vmem:[%s9111_s1 + $0x40] sm:$0xf] }
   0x8   :  { %v4610_v28 = vld [vmem:[%s9111_s1 + $0x150] sm:$0xf]  ;;  %2325 = vmatpush.bf16.msra.mxu0 %v4491_v16  ;;  %v5635_v30 = vld [vmem:[%s9111_s1 + $0x154] sm:$0xf0]  ;;  %v4547_v33 = vor.u32 %v5619_v27, %v4546_v26  ;;  %v5601_v36 = vld [vmem:[%s9111_s1 + $0x44] sm:$0xf0] }
   0x9   :  { %v4674_v31 = vld [vmem:[%s9111_s1 + $0x1d0] sm:$0xf]  ;;  %v5651_v32 = vld [vmem:[%s9111_s1 + $0x1d4] sm:$0xf0]  ;;  %2374 = vmatpush.bf16.msra.mxu1 %v4555_v17  ;;  %v4611_v34 = vor.u32 %v5635_v30, %v4610_v28  ;;  %v4538_v37 = vld [vmem:[%s9111_s1 + $0xc0] sm:$0xf]  ;;  %v4475_v44 = vor.u32 %v5601_v36, %v4474_v35 }
   0xa   :  { %2423 = vmatpush.bf16.msra.mxu2 %v4619_v21  ;;  %v4675_v38 = vor.u32 %v5651_v32, %v4674_v31  ;;  %v5617_v39 = vld [vmem:[%s9111_s1 + $0xc4] sm:$0xf0]  ;;  %v4602_v40 = vld [vmem:[%s9111_s1 + $0x140] sm:$0xf]  ;;  %v4466_v47 = vld [vmem:[%s9111_s1 + $0x30] sm:$0xf] }
   0xb   :  { %2472 = vmatpush.bf16.msra.mxu3 %v4683_v25  ;;  %v5633_v41 = vld [vmem:[%s9111_s1 + $0x144] sm:$0xf0]  ;;  %v4666_v42 = vld [vmem:[%s9111_s1 + $0x1c0] sm:$0xf]  ;;  %v4539_v45 = vor.u32 %v5617_v39, %v4538_v37  ;;  %v5599_v48 = vld [vmem:[%s9111_s1 + $0x34] sm:$0xf0] }
   0xc   :  { %v5649_v43 = vld [vmem:[%s9111_s1 + $0x1c4] sm:$0xf0]  ;;  %2326 = vmatpush.bf16.msra.mxu0 %v4483_v29  ;;  %v4603_v46 = vor.u32 %v5633_v41, %v4602_v40  ;;  %v4530_v49 = vld [vmem:[%s9111_s1 + $0xb0] sm:$0xf]  ;;  %v5615_v51 = vld [vmem:[%s9111_s1 + $0xb4] sm:$0xf0]  ;;  %v4467_v56 = vor.u32 %v5599_v48, %v4466_v47 }
   0xd   :  { %2375 = vmatpush.bf16.msra.mxu1 %v4547_v33  ;;  %v4667_v50 = vor.u32 %v5649_v43, %v4666_v42  ;;  %v4594_v52 = vld [vmem:[%s9111_s1 + $0x130] sm:$0xf]  ;;  %v5631_v53 = vld [vmem:[%s9111_s1 + $0x134] sm:$0xf0]  ;;  %v4531_v57 = vor.u32 %v5615_v51, %v4530_v49  ;;  %v4458_v59 = vld [vmem:[%s9111_s1 + $0x20] sm:$0xf] }
   0xe   :  { %2424 = vmatpush.bf16.msra.mxu2 %v4611_v34  ;;  %v4658_v54 = vld [vmem:[%s9111_s1 + $0x1b0] sm:$0xf]  ;;  %v5647_v55 = vld [vmem:[%s9111_s1 + $0x1b4] sm:$0xf0]  ;;  %v4595_v58 = vor.u32 %v5631_v53, %v4594_v52  ;;  %v5597_v60 = vld [vmem:[%s9111_s1 + $0x24] sm:$0xf0] }
   0xf   :  { %2473 = vmatpush.bf16.msra.mxu3 %v4675_v38  ;;  %v4522_v61 = vld [vmem:[%s9111_s1 + $0xa0] sm:$0xf]  ;;  %v4659_v62 = vor.u32 %v5647_v55, %v4658_v54  ;;  %v5613_v63 = vld [vmem:[%s9111_s1 + $0xa4] sm:$0xf0]  ;;  %v4459_v4 = vor.u32 %v5597_v60, %v4458_v59  ;;  %v4450_v7 = vld [vmem:[%s9111_s1 + $0x10] sm:$0xf] }
  0x10   :  { %2327 = vmatpush.bf16.msra.mxu0 %v4475_v44  ;;  %v4586_v0 = vld [vmem:[%s9111_s1 + $0x120] sm:$0xf]  ;;  %v5629_v1 = vld [vmem:[%s9111_s1 + $0x124] sm:$0xf0]  ;;  %v4523_v5 = vor.u32 %v5613_v63, %v4522_v61  ;;  %v5595_v8 = vld [vmem:[%s9111_s1 + $0x14] sm:$0xf0] }
  0x11   :  { %2376 = vmatpush.bf16.msra.mxu1 %v4539_v45  ;;  %v4650_v2 = vld [vmem:[%s9111_s1 + $0x1a0] sm:$0xf]  ;;  %v5645_v3 = vld [vmem:[%s9111_s1 + $0x1a4] sm:$0xf0]  ;;  %v4587_v6 = vor.u32 %v5629_v1, %v4586_v0  ;;  %v4514_v9 = vld [vmem:[%s9111_s1 + $0x90] sm:$0xf]  ;;  %v4451_v17 = vor.u32 %v5595_v8, %v4450_v7 }
  0x12   :  { %2425 = vmatpush.bf16.msra.mxu2 %v4603_v46  ;;  %v4651_v10 = vor.u32 %v5645_v3, %v4650_v2  ;;  %v5611_v11 = vld [vmem:[%s9111_s1 + $0x94] sm:$0xf0]  ;;  %v4578_v12 = vld [vmem:[%s9111_s1 + $0x110] sm:$0xf]  ;;  %v4442_v16 = vld [vmem:[%s9111_s1] sm:$0xf] }
  0x13   :  { %2474 = vmatpush.bf16.msra.mxu3 %v4667_v50  ;;  %v5627_v13 = vld [vmem:[%s9111_s1 + $0x114] sm:$0xf0]  ;;  %v4642_v14 = vld [vmem:[%s9111_s1 + $0x190] sm:$0xf]  ;;  %v5593_v18 = vld [vmem:[%s9111_s1 + $0x4] sm:$0xf0]  ;;  %v4515_v21 = vor.u32 %v5611_v11, %v4514_v9 }
  0x14   :  { %2328 = vmatpush.bf16.msra.mxu0 %v4467_v56  ;;  %v5643_v15 = vld [vmem:[%s9111_s1 + $0x194] sm:$0xf0]  ;;  %v4506_v19 = vld [vmem:[%s9111_s1 + $0x80] sm:$0xf]  ;;  %v5609_v20 = vld [vmem:[%s9111_s1 + $0x84] sm:$0xf0]  ;;  %v4579_v22 = vor.u32 %v5627_v13, %v4578_v12  ;;  %v4443_v34 = vor.u32 %v5593_v18, %v4442_v16 }
  0x15   :  { %2377 = vmatpush.bf16.msra.mxu1 %v4531_v57  ;;  %v4570_v23 = vld [vmem:[%s9111_s1 + $0x100] sm:$0xf]  ;;  %v5625_v24 = vld [vmem:[%s9111_s1 + $0x104] sm:$0xf0]  ;;  %v4643_v26 = vor.u32 %v5643_v15, %v4642_v14  ;;  %v5464_v30 = vld [vmem:[%s9112_s0 + $0x4] sm:$0xf]  ;;  %v4507_v38 = vor.u32 %v5609_v20, %v4506_v19 }
  0x16   :  { %2426 = vmatpush.bf16.msra.mxu2 %v4595_v58  ;;  %v4634_v25 = vld [vmem:[%s9111_s1 + $0x180] sm:$0xf]  ;;  %v5641_v27 = vld [vmem:[%s9111_s1 + $0x184] sm:$0xf0]  ;;  %v3932_v31 = vld [vmem:[%s9112_s0 + $0x40] sm:$0xf0]  ;;  %v4571_v39 = vor.u32 %v5625_v24, %v4570_v23 }
  0x17   :  { %2475 = vmatpush.bf16.msra.mxu3 %v4659_v62  ;;  %v3930_v28 = vld [vmem:[%s9112_s0] sm:$0xf]  ;;  %v4882_v32 = vld [vmem:[%s9111_s1 + $0x370] sm:$0xf]  ;;  %v5703_v33 = vld [vmem:[%s9111_s1 + $0x374] sm:$0xf0]  ;;  %v4635_v43 = vor.u32 %v5641_v27, %v4634_v25  ;;  %v6117_v53 = vor.u32 %v5464_v30, %v3932_v31 }
  0x18   :  { %2329 = vmatpush.bf16.msra.mxu0 %v4459_v4  ;;  %v5472_v29 = vld [vmem:[%s9112_s0 + $0x3c] sm:$0xf0]  ;;  %v3938_v35 = vld [vmem:[%s9112_s0 + $0x8] sm:$0xf]  ;;  %v4946_v36 = vld [vmem:[%s9111_s1 + $0x3f0] sm:$0xf]  ;;  %v4883_v44 = vor.u32 %v5703_v33, %v4882_v32 }
  0x19   :  { %2378 = vmatpush.bf16.msra.mxu1 %v4523_v5  ;;  %v5719_v37 = vld [vmem:[%s9111_s1 + $0x3f4] sm:$0xf0]  ;;  %v5473_v40 = vld [vmem:[%s9112_s0 + $0x44] sm:$0xf0]  ;;  %v5465_v41 = vld [vmem:[%s9112_s0 + $0xc] sm:$0xf]  ;;  %v6106_v48 = vor.u32 %v5472_v29, %v3930_v28 }
  0x1a   :  { %2427 = vmatpush.bf16.msra.mxu2 %v4587_v6  ;;  %v3940_v42 = vld [vmem:[%s9112_s0 + $0x48] sm:$0xf0]  ;;  %v4754_v45 = vld [vmem:[%s9111_s1 + $0x270] sm:$0xf]  ;;  %v5671_v46 = vld [vmem:[%s9111_s1 + $0x274] sm:$0xf0]  ;;  %v4947_v49 = vor.u32 %v5719_v37, %v4946_v36  ;;  %v6119_v54 = vor.u32 %v5473_v40, %v3938_v35 }
  0x1b   :  { %2476 = vmatpush.bf16.msra.mxu3 %v4651_v10  ;;  %v4818_v47 = vld [vmem:[%s9111_s1 + $0x2f0] sm:$0xf]  ;;  %v5687_v50 = vld [vmem:[%s9111_s1 + $0x2f4] sm:$0xf0]  ;;  %v4874_v51 = vld [vmem:[%s9111_s1 + $0x360] sm:$0xf]  ;;  %v6127_v57 = vor.u32 %v5465_v41, %v3940_v42  ;;  %v4755_v58 = vor.u32 %v5671_v46, %v4754_v45 }
  0x1c   :  { %2330 = vmatpush.bf16.msra.mxu0 %v4451_v17  ;;  %v5701_v52 = vld [vmem:[%s9111_s1 + $0x364] sm:$0xf0]  ;;  %v4938_v55 = vld [vmem:[%s9111_s1 + $0x3e0] sm:$0xf]  ;;  %v4819_v59 = vor.u32 %v5687_v50, %v4818_v47  ;;  %v4866_v3 = vld [vmem:[%s9111_s1 + $0x350] sm:$0xf] }
  0x1d   :  { %2379 = vmatpush.bf16.msra.mxu1 %v4515_v21  ;;  %v5717_v56 = vld [vmem:[%s9111_s1 + $0x3e4] sm:$0xf0]  ;;  %v4875_v60 = vor.u32 %v5701_v52, %v4874_v51  ;;  %v4746_v61 = vld [vmem:[%s9111_s1 + $0x260] sm:$0xf]  ;;  %v5699_v4 = vld [vmem:[%s9111_s1 + $0x354] sm:$0xf0] }
  0x1e   :  { %2428 = vmatpush.bf16.msra.mxu2 %v4579_v22  ;;  %v5669_v62 = vld [vmem:[%s9111_s1 + $0x264] sm:$0xf0]  ;;  %v4939_v63 = vor.u32 %v5717_v56, %v4938_v55  ;;  %v4810_v0 = vld [vmem:[%s9111_s1 + $0x2e0] sm:$0xf]  ;;  %v4738_v5 = vld [vmem:[%s9111_s1 + $0x250] sm:$0xf]  ;;  %v4867_v7 = vor.u32 %v5699_v4, %v4866_v3 }
  0x1f   :  { %2477 = vmatpush.bf16.msra.mxu3 %v4643_v26  ;;  %v5685_v1 = vld [vmem:[%s9111_s1 + $0x2e4] sm:$0xf0]  ;;  %v4747_v2 = vor.u32 %v5669_v62, %v4746_v61  ;;  %v5667_v8 = vld [vmem:[%s9111_s1 + $0x254] sm:$0xf0]  ;;  %v4930_v9 = vld [vmem:[%s9111_s1 + $0x3d0] sm:$0xf] }
  0x20   :  { %2331 = vmatpush.bf16.msra.mxu0 %v4443_v34  ;;  %v4811_v6 = vor.u32 %v5685_v1, %v4810_v0  ;;  %v5715_v10 = vld [vmem:[%s9111_s1 + $0x3d4] sm:$0xf0]  ;;  %v4802_v12 = vld [vmem:[%s9111_s1 + $0x2d0] sm:$0xf]  ;;  %v4739_v14 = vor.u32 %v5667_v8, %v4738_v5  ;;  %v3994_v16 = vld [vmem:[%s9112_s0 + $0x80] sm:$0xf] }
  0x21   :  { %2380 = vmatpush.bf16.msra.mxu1 %v4507_v38  ;;  %v4931_v11 = vor.u32 %v5715_v10, %v4930_v9  ;;  %v5683_v13 = vld [vmem:[%s9111_s1 + $0x2d4] sm:$0xf0]  ;;  %v5488_v17 = vld [vmem:[%s9112_s0 + $0xbc] sm:$0xf0]  ;;  %v5480_v18 = vld [vmem:[%s9112_s0 + $0x84] sm:$0xf] }
  0x22   :  { %2429 = vmatpush.bf16.msra.mxu2 %v4571_v39  ;;  %v4803_v15 = vor.u32 %v5683_v13, %v4802_v12  ;;  %v3996_v19 = vld [vmem:[%s9112_s0 + $0xc0] sm:$0xf0]  ;;  %v4002_v20 = vld [vmem:[%s9112_s0 + $0x88] sm:$0xf]  ;;  %v5481_v22 = vld [vmem:[%s9112_s0 + $0x8c] sm:$0xf]  ;;  %v6193_v24 = vor.u32 %v5488_v17, %v3994_v16 }
  0x23   :  { %2478 = vmatpush.bf16.msra.mxu3 %v4635_v43  ;;  %2332 = vmatmul.bf16.vlgmr.msra.gmra.mxu0 %v6106_v48  ;;  %v5489_v21 = vld [vmem:[%s9112_s0 + $0xc4] sm:$0xf0]  ;;  %v4004_v23 = vld [vmem:[%s9112_s0 + $0xc8] sm:$0xf0]  ;;  %v6195_v25 = vor.u32 %v5480_v18, %v3996_v19  ;;  %v4858_v28 = vld [vmem:[%s9111_s1 + $0x340] sm:$0xf] }
  0x24   :  { %2381 = vmatmul.bf16.vlgmr.msra.gmra.mxu1 %v6117_v53  ;;  %2520 = vmatpush.bf16.msrb.mxu0 %v4755_v58  ;;  %v6197_v26 = vor.u32 %v5489_v21, %v4002_v20  ;;  %v6199_v27 = vor.u32 %v5481_v22, %v4004_v23  ;;  %v5697_v29 = vld [vmem:[%s9111_s1 + $0x344] sm:$0xf0]  ;;  %v4730_v30 = vld [vmem:[%s9111_s1 + $0x240] sm:$0xf]  ;;  %v5496_v42 = vld [vmem:[%s9112_s0 + $0x104] sm:$0xf] }
  0x25   :  { %2430 = vmatmul.bf16.vlgmr.msra.gmra.mxu2 %v6119_v54  ;;  %2569 = vmatpush.bf16.msrb.mxu1 %v4819_v59  ;;  %v4859_v31 = vor.u32 %v5697_v29, %v4858_v28  ;;  %v5665_v32 = vld [vmem:[%s9111_s1 + $0x244] sm:$0xf0]  ;;  %v4922_v33 = vld [vmem:[%s9111_s1 + $0x3c0] sm:$0xf]  ;;  %v4060_v43 = vld [vmem:[%s9112_s0 + $0x140] sm:$0xf0] }
  0x26   :  { %2618 = vmatpush.bf16.msrb.mxu2 %v4883_v44  ;;  %2479 = vmatmul.bf16.vlgmr.msra.gmra.mxu3 %v6127_v57  ;;  %v5713_v34 = vld [vmem:[%s9111_s1 + $0x3c4] sm:$0xf0]  ;;  %v4731_v35 = vor.u32 %v5665_v32, %v4730_v30  ;;  %v4794_v37 = vld [vmem:[%s9111_s1 + $0x2c0] sm:$0xf]  ;;  %v5497_v46 = vld [vmem:[%s9112_s0 + $0x10c] sm:$0xf]  ;;  %v6255_v50 = vor.u32 %v5496_v42, %v4060_v43 }
  0x27   :  { %2667 = vmatpush.bf16.msrb.mxu3 %v4947_v49  ;;  %v4923_v36 = vor.u32 %v5713_v34, %v4922_v33  ;;  %v5681_v38 = vld [vmem:[%s9111_s1 + $0x2c4] sm:$0xf0]  ;;  %v4058_v40 = vld [vmem:[%s9112_s0 + $0x100] sm:$0xf]  ;;  %v4068_v47 = vld [vmem:[%s9112_s0 + $0x148] sm:$0xf0] }
  0x28   :  { %2521 = vmatpush.bf16.msrb.mxu0 %v4747_v2  ;;  %v4795_v39 = vor.u32 %v5681_v38, %v4794_v37  ;;  %v5504_v41 = vld [vmem:[%s9112_s0 + $0x13c] sm:$0xf0]  ;;  %v4066_v44 = vld [vmem:[%s9112_s0 + $0x108] sm:$0xf]  ;;  %v6259_v52 = vor.u32 %v5497_v46, %v4068_v47  ;;  %v4850_v55 = vld [vmem:[%s9111_s1 + $0x330] sm:$0xf] }
  0x29   :  { %2570 = vmatpush.bf16.msrb.mxu1 %v4811_v6  ;;  %v5505_v45 = vld [vmem:[%s9112_s0 + $0x144] sm:$0xf0]  ;;  %v6253_v49 = vor.u32 %v5504_v41, %v4058_v40  ;;  %v5695_v56 = vld [vmem:[%s9111_s1 + $0x334] sm:$0xf0]  ;;  %v4722_v58 = vld [vmem:[%s9111_s1 + $0x230] sm:$0xf] }
  0x2a   :  { %2619 = vmatpush.bf16.msrb.mxu2 %v4875_v60  ;;  %v6257_v51 = vor.u32 %v5505_v45, %v4066_v44  ;;  %v4851_v59 = vor.u32 %v5695_v56, %v4850_v55  ;;  %v5663_v60 = vld [vmem:[%s9111_s1 + $0x234] sm:$0xf0]  ;;  %v4914_v61 = vld [vmem:[%s9111_s1 + $0x3b0] sm:$0xf]  ;;  %v4122_v4 = vld [vmem:[%s9112_s0 + $0x180] sm:$0xf] }
  0x2b   :  { %2668 = vmatpush.bf16.msrb.mxu3 %v4939_v63  ;;  %v5711_v62 = vld [vmem:[%s9111_s1 + $0x3b4] sm:$0xf0]  ;;  %v4723_v63 = vor.u32 %v5663_v60, %v4722_v58  ;;  %v4786_v1 = vld [vmem:[%s9111_s1 + $0x2b0] sm:$0xf]  ;;  %v5520_v5 = vld [vmem:[%s9112_s0 + $0x1bc] sm:$0xf0] }
  0x2c   :  { %2522 = vmatpush.bf16.msrb.mxu0 %v4739_v14  ;;  %v4915_v0 = vor.u32 %v5711_v62, %v4914_v61  ;;  %v5679_v2 = vld [vmem:[%s9111_s1 + $0x2b4] sm:$0xf0]  ;;  %v5512_v6 = vld [vmem:[%s9112_s0 + $0x184] sm:$0xf]  ;;  %v4130_v8 = vld [vmem:[%s9112_s0 + $0x188] sm:$0xf]  ;;  %v6313_v12 = vor.u32 %v5520_v5, %v4122_v4 }
  0x2d   :  { %2571 = vmatpush.bf16.msrb.mxu1 %v4803_v15  ;;  %v4787_v3 = vor.u32 %v5679_v2, %v4786_v1  ;;  %v5521_v9 = vld [vmem:[%s9112_s0 + $0x1c4] sm:$0xf0]  ;;  %v5513_v10 = vld [vmem:[%s9112_s0 + $0x18c] sm:$0xf]  ;;  %v4842_v16 = vld [vmem:[%s9111_s1 + $0x320] sm:$0xf] }
  0x2e   :  { %2620 = vmatpush.bf16.msrb.mxu2 %v4867_v7  ;;  %v4124_v7 = vld [vmem:[%s9112_s0 + $0x1c0] sm:$0xf0]  ;;  %v6317_v14 = vor.u32 %v5521_v9, %v4130_v8  ;;  %v5693_v17 = vld [vmem:[%s9111_s1 + $0x324] sm:$0xf0]  ;;  %v4714_v18 = vld [vmem:[%s9111_s1 + $0x220] sm:$0xf] }
  0x2f   :  { %2669 = vmatpush.bf16.msrb.mxu3 %v4931_v11  ;;  %v4132_v11 = vld [vmem:[%s9112_s0 + $0x1c8] sm:$0xf0]  ;;  %v6315_v13 = vor.u32 %v5512_v6, %v4124_v7  ;;  %v4843_v19 = vor.u32 %v5693_v17, %v4842_v16  ;;  %v5661_v20 = vld [vmem:[%s9111_s1 + $0x224] sm:$0xf0]  ;;  %v4906_v21 = vld [vmem:[%s9111_s1 + $0x3a0] sm:$0xf] }
  0x30   :  { %2523 = vmatpush.bf16.msrb.mxu0 %v4731_v35  ;;  %v6319_v15 = vor.u32 %v5513_v10, %v4132_v11  ;;  %v5709_v22 = vld [vmem:[%s9111_s1 + $0x3a4] sm:$0xf0]  ;;  %v4715_v23 = vor.u32 %v5661_v20, %v4714_v18  ;;  %v4778_v29 = vld [vmem:[%s9111_s1 + $0x2a0] sm:$0xf]  ;;  %v5528_v34 = vld [vmem:[%s9112_s0 + $0x204] sm:$0xf] }
  0x31   :  { %2572 = vmatpush.bf16.msrb.mxu1 %v4795_v39  ;;  %v4907_v28 = vor.u32 %v5709_v22, %v4906_v21  ;;  %v5677_v30 = vld [vmem:[%s9111_s1 + $0x2a4] sm:$0xf0]  ;;  %v4186_v32 = vld [vmem:[%s9112_s0 + $0x200] sm:$0xf]  ;;  %v4188_v35 = vld [vmem:[%s9112_s0 + $0x240] sm:$0xf0] }
  0x32   :  { %2621 = vmatpush.bf16.msrb.mxu2 %v4859_v31  ;;  %v4779_v31 = vor.u32 %v5677_v30, %v4778_v29  ;;  %v5536_v33 = vld [vmem:[%s9112_s0 + $0x23c] sm:$0xf0]  ;;  %v5537_v37 = vld [vmem:[%s9112_s0 + $0x244] sm:$0xf0]  ;;  %v5529_v38 = vld [vmem:[%s9112_s0 + $0x20c] sm:$0xf]  ;;  %v6375_v41 = vor.u32 %v5528_v34, %v4188_v35 }
  0x33   :  { %2337 = vmatmul.bf16.gmra.mxu0 %v6193_v24  ;;  %2670 = vmatpush.bf16.msrb.mxu3 %v4923_v36  ;;  %v4194_v36 = vld [vmem:[%s9112_s0 + $0x208] sm:$0xf]  ;;  %v4196_v39 = vld [vmem:[%s9112_s0 + $0x248] sm:$0xf0]  ;;  %v6373_v40 = vor.u32 %v5536_v33, %v4186_v32  ;;  %v4834_v44 = vld [vmem:[%s9111_s1 + $0x310] sm:$0xf] }
  0x34   :  { %2386 = vmatmul.bf16.gmra.mxu1 %v6195_v25  ;;  %2524 = vmatpush.bf16.msrb.mxu0 %v4723_v63  ;;  %v6377_v42 = vor.u32 %v5537_v37, %v4194_v36  ;;  %v6379_v43 = vor.u32 %v5529_v38, %v4196_v39  ;;  %v5691_v45 = vld [vmem:[%s9111_s1 + $0x314] sm:$0xf0]  ;;  %v4706_v46 = vld [vmem:[%s9111_s1 + $0x210] sm:$0xf]  ;;  %v5552_v1 = vld [vmem:[%s9112_s0 + $0x2bc] sm:$0xf0] }
  0x35   :  { %2435 = vmatmul.bf16.gmra.mxu2 %v6197_v26  ;;  %2573 = vmatpush.bf16.msrb.mxu1 %v4787_v3  ;;  %v4835_v47 = vor.u32 %v5691_v45, %v4834_v44  ;;  %v5659_v55 = vld [vmem:[%s9111_s1 + $0x214] sm:$0xf0]  ;;  %v4898_v56 = vld [vmem:[%s9111_s1 + $0x390] sm:$0xf]  ;;  %v5544_v2 = vld [vmem:[%s9112_s0 + $0x284] sm:$0xf] }
  0x36   :  { %2484 = vmatmul.bf16.gmra.mxu3 %v6199_v27  ;;  %2622 = vmatpush.bf16.msrb.mxu2 %v4851_v59  ;;  %v5707_v58 = vld [vmem:[%s9111_s1 + $0x394] sm:$0xf0]  ;;  %v4707_v59 = vor.u32 %v5659_v55, %v4706_v46  ;;  %v4770_v61 = vld [vmem:[%s9111_s1 + $0x290] sm:$0xf]  ;;  %v4252_v3 = vld [vmem:[%s9112_s0 + $0x2c0] sm:$0xf0] }
  0x37   :  { %2671 = vmatpush.bf16.msrb.mxu3 %v4915_v0  ;;  %v4899_v60 = vor.u32 %v5707_v58, %v4898_v56  ;;  %v5675_v62 = vld [vmem:[%s9111_s1 + $0x294] sm:$0xf0]  ;;  %v4250_v0 = vld [vmem:[%s9112_s0 + $0x280] sm:$0xf]  ;;  %v4258_v4 = vld [vmem:[%s9112_s0 + $0x288] sm:$0xf]  ;;  %v6435_v9 = vor.u32 %v5544_v2, %v4252_v3 }
  0x38   :  { %2525 = vmatpush.bf16.msrb.mxu0 %v4715_v23  ;;  %v4771_v63 = vor.u32 %v5675_v62, %v4770_v61  ;;  %v5553_v5 = vld [vmem:[%s9112_s0 + $0x2c4] sm:$0xf0]  ;;  %v5545_v6 = vld [vmem:[%s9112_s0 + $0x28c] sm:$0xf]  ;;  %v6433_v8 = vor.u32 %v5552_v1, %v4250_v0  ;;  %v4826_v16 = vld [vmem:[%s9111_s1 + $0x300] sm:$0xf] }
  0x39   :  { %2574 = vmatpush.bf16.msrb.mxu1 %v4779_v31  ;;  %v4260_v7 = vld [vmem:[%s9112_s0 + $0x2c8] sm:$0xf0]  ;;  %v6437_v10 = vor.u32 %v5553_v5, %v4258_v4  ;;  %v5689_v17 = vld [vmem:[%s9111_s1 + $0x304] sm:$0xf0]  ;;  %v4698_v18 = vld [vmem:[%s9111_s1 + $0x200] sm:$0xf] }
  0x3a   :  { %2623 = vmatpush.bf16.msrb.mxu2 %v4843_v19  ;;  %v6439_v11 = vor.u32 %v5545_v6, %v4260_v7  ;;  %v4827_v19 = vor.u32 %v5689_v17, %v4826_v16  ;;  %v5657_v20 = vld [vmem:[%s9111_s1 + $0x204] sm:$0xf0]  ;;  %v4890_v21 = vld [vmem:[%s9111_s1 + $0x380] sm:$0xf]  ;;  %v5560_v34 = vld [vmem:[%s9112_s0 + $0x304] sm:$0xf] }
  0x3b   :  { %2672 = vmatpush.bf16.msrb.mxu3 %v4907_v28  ;;  %v5705_v22 = vld [vmem:[%s9111_s1 + $0x384] sm:$0xf0]  ;;  %v4699_v23 = vor.u32 %v5657_v20, %v4698_v18  ;;  %v4762_v29 = vld [vmem:[%s9111_s1 + $0x280] sm:$0xf]  ;;  %v4316_v35 = vld [vmem:[%s9112_s0 + $0x340] sm:$0xf0] }
  0x3c   :  { %2526 = vmatpush.bf16.msrb.mxu0 %v4707_v59  ;;  %v4891_v28 = vor.u32 %v5705_v22, %v4890_v21  ;;  %v5673_v30 = vld [vmem:[%s9111_s1 + $0x284] sm:$0xf0]  ;;  %v4314_v32 = vld [vmem:[%s9112_s0 + $0x300] sm:$0xf]  ;;  %v5561_v38 = vld [vmem:[%s9112_s0 + $0x30c] sm:$0xf]  ;;  %v6495_v45 = vor.u32 %v5560_v34, %v4316_v35 }
  0x3d   :  { %2575 = vmatpush.bf16.msrb.mxu1 %v4771_v63  ;;  %v4763_v31 = vor.u32 %v5673_v30, %v4762_v29  ;;  %v5568_v33 = vld [vmem:[%s9112_s0 + $0x33c] sm:$0xf0]  ;;  %v4322_v36 = vld [vmem:[%s9112_s0 + $0x308] sm:$0xf]  ;;  %v4324_v39 = vld [vmem:[%s9112_s0 + $0x348] sm:$0xf0] }
  0x3e   :  { %2624 = vmatpush.bf16.msrb.mxu2 %v4835_v47  ;;  %v5569_v37 = vld [vmem:[%s9112_s0 + $0x344] sm:$0xf0]  ;;  %v6493_v44 = vor.u32 %v5568_v33, %v4314_v32  ;;  %v6499_v47 = vor.u32 %v5561_v38, %v4324_v39  ;;  %v5138_v55 = vld [vmem:[%s9111_s1 + $0x570] sm:$0xf]  ;;  %v5767_v56 = vld [vmem:[%s9111_s1 + $0x574] sm:$0xf0] }
  0x3f   :  { %2673 = vmatpush.bf16.msrb.mxu3 %v4899_v60  ;;  %v6497_v46 = vor.u32 %v5569_v37, %v4322_v36  ;;  %v5010_v58 = vld [vmem:[%s9111_s1 + $0x470] sm:$0xf]  ;;  %v5139_v59 = vor.u32 %v5767_v56, %v5138_v55  ;;  %v5735_v60 = vld [vmem:[%s9111_s1 + $0x474] sm:$0xf0]  ;;  %v4378_v4 = vld [vmem:[%s9112_s0 + $0x380] sm:$0xf] }
  0x40   :  { %2527 = vmatpush.bf16.msrb.mxu0 %v4699_v23  ;;  %v5202_v61 = vld [vmem:[%s9111_s1 + $0x5f0] sm:$0xf]  ;;  %v5783_v62 = vld [vmem:[%s9111_s1 + $0x5f4] sm:$0xf0]  ;;  %v5011_v63 = vor.u32 %v5735_v60, %v5010_v58  ;;  %v5584_v5 = vld [vmem:[%s9112_s0 + $0x3bc] sm:$0xf0] }
  0x41   :  { %2576 = vmatpush.bf16.msrb.mxu1 %v4763_v31  ;;  %v5203_v0 = vor.u32 %v5783_v62, %v5202_v61  ;;  %v5074_v1 = vld [vmem:[%s9111_s1 + $0x4f0] sm:$0xf]  ;;  %v5751_v2 = vld [vmem:[%s9111_s1 + $0x4f4] sm:$0xf0]  ;;  %v5576_v6 = vld [vmem:[%s9112_s0 + $0x384] sm:$0xf]  ;;  %v6553_v20 = vor.u32 %v5584_v5, %v4378_v4 }
  0x42   :  { %2625 = vmatpush.bf16.msrb.mxu2 %v4827_v19  ;;  %v5075_v3 = vor.u32 %v5751_v2, %v5074_v1  ;;  %v4380_v7 = vld [vmem:[%s9112_s0 + $0x3c0] sm:$0xf0]  ;;  %v4386_v16 = vld [vmem:[%s9112_s0 + $0x388] sm:$0xf]  ;;  %v5577_v18 = vld [vmem:[%s9112_s0 + $0x38c] sm:$0xf] }
  0x43   :  { %2342 = vmatmul.bf16.gmra.mxu0 %v6253_v49  ;;  %2674 = vmatpush.bf16.msrb.mxu3 %v4891_v28  ;;  %v5585_v17 = vld [vmem:[%s9112_s0 + $0x3c4] sm:$0xf0]  ;;  %v4388_v19 = vld [vmem:[%s9112_s0 + $0x3c8] sm:$0xf0]  ;;  %9211 = vst [vmem:[#allocation2_spill] sm:$0xff] %v6553_v20  ;;  %v6555_v21 = vor.u32 %v5576_v6, %v4380_v7 }
  0x44   :  { %2391 = vmatmul.bf16.gmra.mxu1 %v6255_v50  ;;  %2716 = vmatpush.bf16.msra.mxu0 %v5011_v63  ;;  %v6557_v22 = vor.u32 %v5585_v17, %v4386_v16  ;;  %v6559_v23 = vor.u32 %v5577_v18, %v4388_v19  ;;  %v5130_v28 = vld [vmem:[%s9111_s1 + $0x560] sm:$0xf]  ;;  %v5765_v29 = vld [vmem:[%s9111_s1 + $0x564] sm:$0xf0]  ;;  %v3946_v58 = vld [vmem:[%s9112_s0 + $0x10] sm:$0xf] }
  0x45   :  { %2440 = vmatmul.bf16.gmra.mxu2 %v6257_v51  ;;  %2765 = vmatpush.bf16.msra.mxu1 %v5075_v3  ;;  %9212 = vst [vmem:[#allocation3_spill] sm:$0xff] %v6555_v21  ;;  %v5002_v30 = vld [vmem:[%s9111_s1 + $0x460] sm:$0xf]  ;;  %v5131_v31 = vor.u32 %v5765_v29, %v5130_v28  ;;  %v5733_v32 = vld [vmem:[%s9111_s1 + $0x464] sm:$0xf0] }
  0x46   :  { %2489 = vmatmul.bf16.gmra.mxu3 %v6259_v52  ;;  %2814 = vmatpush.bf16.msra.mxu2 %v5139_v59  ;;  %9213 = vst [vmem:[#allocation4_spill] sm:$0xff] %v6557_v22  ;;  %v5194_v33 = vld [vmem:[%s9111_s1 + $0x5e0] sm:$0xf]  ;;  %v5781_v34 = vld [vmem:[%s9111_s1 + $0x5e4] sm:$0xf0]  ;;  %v5003_v35 = vor.u32 %v5733_v32, %v5002_v30 }
  0x47   :  { %2863 = vmatpush.bf16.msra.mxu3 %v5203_v0  ;;  %9214 = vst [vmem:[#allocation5_spill] sm:$0xff] %v6559_v23  ;;  %v5195_v36 = vor.u32 %v5781_v34, %v5194_v33  ;;  %v398_v37 = vld [vmem:[%s9113_s2] sm:$0x3]  ;;  %v5749_v39 = vld [vmem:[%s9111_s1 + $0x4e4] sm:$0xf0] }
  0x48   :  { %2717 = vmatpush.bf16.msra.mxu0 %v5003_v35  ;;  %v5066_v38 = vld [vmem:[%s9111_s1 + $0x4e0] sm:$0xf]  ;;  %v6592_v55 = vperm.slane %v398_v37, 0  ;;  %v5474_v59 = vld [vmem:[%s9112_s0 + $0x4c] sm:$0xf0] }
  0x49   :  { %v5067_v56 = vor.u32 %v5749_v39, %v5066_v38  ;;  %v5466_v60 = vld [vmem:[%s9112_s0 + $0x14] sm:$0xf]  ;;  %v3954_v62 = vld [vmem:[%s9112_s0 + $0x18] sm:$0xf]  ;;  %v5467_v0 = vld [vmem:[%s9112_s0 + $0x1c] sm:$0xf]  ;;  %v6618_v2 = vor.u32 %v5474_v59, %v3946_v58 }
  0x4a   :  { %2815 = vmatpush.bf16.msra.mxu2 %v5131_v31  ;;  %v3948_v61 = vld [vmem:[%s9112_s0 + $0x50] sm:$0xf0]  ;;  %v5475_v63 = vld [vmem:[%s9112_s0 + $0x54] sm:$0xf0]  ;;  %v3956_v1 = vld [vmem:[%s9112_s0 + $0x58] sm:$0xf0] }
  0x4b   :  { %2864 = vmatpush.bf16.msra.mxu3 %v5195_v36  ;;  %2766 = vmatpush.bf16.msra.mxu1 %v5067_v56  ;;  %9215 = vst [vmem:[#allocation6_spill] sm:$0xff] %v6618_v2  ;;  %v6620_v4 = vor.u32 %v5466_v60, %v3948_v61  ;;  %v6622_v5 = vor.u32 %v5475_v63, %v3954_v62  ;;  %v5122_v18 = vld [vmem:[%s9111_s1 + $0x550] sm:$0xf]  ;;  %v5763_v19 = vld [vmem:[%s9111_s1 + $0x554] sm:$0xf0] }
  0x4c   :  { %v6625_v16 = vor.u32 %v5467_v0, %v3956_v1  ;;  %v4994_v28 = vld [vmem:[%s9111_s1 + $0x450] sm:$0xf]  ;;  %v5123_v29 = vor.u32 %v5763_v19, %v5122_v18  ;;  %v5731_v30 = vld [vmem:[%s9111_s1 + $0x454] sm:$0xf0]  ;;  %v5482_v1 = vld [vmem:[%s9112_s0 + $0x94] sm:$0xf] }
  0x4d   :  { %9216 = vst [vmem:[#allocation7_spill] sm:$0xff] %v6620_v4  ;;  %v5186_v31 = vld [vmem:[%s9111_s1 + $0x5d0] sm:$0xf]  ;;  %v5779_v32 = vld [vmem:[%s9111_s1 + $0x5d4] sm:$0xf0]  ;;  %v4995_v34 = vor.u32 %v5731_v30, %v4994_v28 }
  0x4e   :  { %9217 = vst [vmem:[#allocation8_spill] sm:$0xff] %v6622_v5  ;;  %v5187_v35 = vor.u32 %v5779_v32, %v5186_v31  ;;  %2816 = vmatpush.bf16.msra.mxu2 %v5123_v29  ;;  %v5058_v59 = vld [vmem:[%s9111_s1 + $0x4d0] sm:$0xf]  ;;  %v5747_v60 = vld [vmem:[%s9111_s1 + $0x4d4] sm:$0xf0] }
  0x4f   :  { %9218 = vst [vmem:[#allocation9_spill] sm:$0xff] %v6625_v16  ;;  %2718 = vmatpush.bf16.msra.mxu0 %v4995_v34  ;;  %v5059_v62 = vor.u32 %v5747_v60, %v5058_v59  ;;  %v4010_v63 = vld [vmem:[%s9112_s0 + $0x90] sm:$0xf]  ;;  %v4020_v18 = vld [vmem:[%s9112_s0 + $0xd8] sm:$0xf0] }
  0x50   :  { %2865 = vmatpush.bf16.msra.mxu3 %v5187_v35  ;;  %v5490_v0 = vld [vmem:[%s9112_s0 + $0xcc] sm:$0xf0]  ;;  %v4986_v59 = vld [vmem:[%s9111_s1 + $0x440] sm:$0xf] }
  0x51   :  { %2767 = vmatpush.bf16.msra.mxu1 %v5059_v62  ;;  %v6682_v28 = vor.u32 %v5490_v0, %v4010_v63  ;;  %v5178_v62 = vld [vmem:[%s9111_s1 + $0x5c0] sm:$0xf]  ;;  %v5777_v63 = vld [vmem:[%s9111_s1 + $0x5c4] sm:$0xf0] }
  0x53   :  { %2347 = vmatmul.bf16.gmra.mxu0 %v6313_v12  ;;  %9219 = vst [vmem:[#allocation10_spill] sm:$0xff] %v6682_v28 }
  0x54   :  { %2396 = vmatmul.bf16.gmra.mxu1 %v6315_v13 }
  0x55   :  { %2445 = vmatmul.bf16.gmra.mxu2 %v6317_v14 }
  0x56   :  { %2494 = vmatmul.bf16.gmra.mxu3 %v6319_v15 }
  0x63   :  { %2352 = vmatmul.bf16.gmra.mxu0 %v6373_v40 }
  0x64   :  { %2401 = vmatmul.bf16.gmra.mxu1 %v6375_v41 }
  0x65   :  { %2450 = vmatmul.bf16.gmra.mxu2 %v6377_v42 }
  0x66   :  { %2499 = vmatmul.bf16.gmra.mxu3 %v6379_v43 }
  0x73   :  { %2357 = vmatmul.bf16.gmra.mxu0 %v6433_v8 }
  0x74   :  { %2406 = vmatmul.bf16.gmra.mxu1 %v6435_v9 }
  0x75   :  { %2455 = vmatmul.bf16.gmra.mxu2 %v6437_v10 }
  0x76   :  { %2504 = vmatmul.bf16.gmra.mxu3 %v6439_v11 }
  0x83   :  { %2362 = vmatmul.bf16.gmra.mxu0 %v6493_v44 }
  0x84   :  { %2411 = vmatmul.bf16.gmra.mxu1 %v6495_v45 }
  0x85   :  { %2460 = vmatmul.bf16.gmra.mxu2 %v6497_v46 }
  0x86   :  { %2509 = vmatmul.bf16.gmra.mxu3 %v6499_v47 }
  0x93   :  { %2367 = vmatmul.bf16.gmra.mxu0 %v6553_v20 }
  0x94   :  { %2416 = vmatmul.bf16.gmra.mxu1 %v6555_v21 }
  0x95   :  { %2465 = vmatmul.bf16.gmra.mxu2 %v6557_v22 }
  0x96   :  { %2514 = vmatmul.bf16.gmra.mxu3 %v6559_v23 }
  0xa0   :  { %v2333_v3 = vpop.f32.mrf.mxu0 }
  0xa1   :  { %v2334_v6 = vadd.f32 %v2333_v3, %v6592_v55  ;;  %v2382_v7 = vpop.f32.mrf.mxu1  ;;  %v4012_v3 = vld [vmem:[%s9112_s0 + $0xd0] sm:$0xf0] }
  0xa2   :  { %v6684_v32 = vor.u32 %v5482_v1, %v4012_v3  ;;  %v5179_v3 = vor.u32 %v5777_v63, %v5178_v62  ;;  %v5499_v62 = vld [vmem:[%s9112_s0 + $0x11c] sm:$0xf] }
  0xa3   :  { %v2383_v17 = vadd.f32 %v2382_v7, %v2334_v6  ;;  %2528 = vmatmul.bf16.vlgmr.msrb.gmra.mxu0 %v6618_v2  ;;  %v4018_v6 = vld [vmem:[%s9112_s0 + $0x98] sm:$0xf]  ;;  %v4084_v63 = vld [vmem:[%s9112_s0 + $0x158] sm:$0xf0] }
  0xa4   :  { %2577 = vmatmul.bf16.vlgmr.msrb.gmra.mxu1 %v6620_v4  ;;  %v5491_v7 = vld [vmem:[%s9112_s0 + $0xd4] sm:$0xf0]  ;;  %9220 = vst [vmem:[#allocation11_spill] sm:$0xff] %v6684_v32  ;;  %2866 = vmatpush.bf16.msra.mxu3 %v5179_v3 }
  0xa5   :  { %2626 = vmatmul.bf16.vlgmr.msrb.gmra.mxu2 %v6622_v5 }
  0xa6   :  { %2675 = vmatmul.bf16.vlgmr.msrb.gmra.mxu3 %v6625_v16 }
  0xa8   :  { %v2431_v33 = vpop.f32.mrf.mxu2  ;;  %v2335_v38 = vpop.f32.mrf.mxu0 }
  0xa9   :  { %v2432_v36 = vadd.f32 %v2431_v33, %v2383_v17  ;;  %v2480_v37 = vpop.f32.mrf.mxu3  ;;  %v2336_v39 = vadd.f32 %v2335_v38, %v6592_v55  ;;  %v2384_v56 = vpop.f32.mrf.mxu1  ;;  %v5483_v17 = vld [vmem:[%s9112_s0 + $0x9c] sm:$0xf]  ;;  %v6686_v33 = vor.u32 %v5491_v7, %v4018_v6 }
  0xab   :  { %v6650_v58 = vadd.f32 %v2480_v37, %v2432_v36  ;;  %v2385_v61 = vadd.f32 %v2384_v56, %v2336_v39  ;;  %9221 = vst [vmem:[#allocation12_spill] sm:$0xff] %v6686_v33  ;;  %v6689_v36 = vor.u32 %v5483_v17, %v4020_v18  ;;  %v5114_v39 = vld [vmem:[%s9111_s1 + $0x540] sm:$0xf]  ;;  %v5761_v56 = vld [vmem:[%s9111_s1 + $0x544] sm:$0xf0] }
  0xac   :  { %v5115_v60 = vor.u32 %v5761_v56, %v5114_v39  ;;  %v5506_v39 = vld [vmem:[%s9112_s0 + $0x14c] sm:$0xf0]  ;;  %v5498_v56 = vld [vmem:[%s9112_s0 + $0x114] sm:$0xf] }
  0xad   :  { %9222 = vst [vmem:[#allocation13_spill] sm:$0xff] %v6689_v36 }
  0xae   :  { %2817 = vmatpush.bf16.msra.mxu2 %v5115_v60  ;;  %v4082_v60 = vld [vmem:[%s9112_s0 + $0x118] sm:$0xf] }
  0xb0   :  { %v2433_v19 = vpop.f32.mrf.mxu2  ;;  %v2338_v31 = vpop.f32.mrf.mxu0 }
  0xb1   :  { %v2434_v29 = vadd.f32 %v2433_v19, %v2385_v61  ;;  %v2482_v30 = vpop.f32.mrf.mxu3  ;;  %v2339_v34 = vadd.f32 %v2338_v31, %v6592_v55  ;;  %v2387_v35 = vpop.f32.mrf.mxu1  ;;  %v5729_v61 = vld [vmem:[%s9111_s1 + $0x444] sm:$0xf0] }
  0xb2   :  { %v4987_v1 = vor.u32 %v5729_v61, %v4986_v59  ;;  %v5745_v31 = vld [vmem:[%s9111_s1 + $0x4c4] sm:$0xf0]  ;;  %v4076_v59 = vld [vmem:[%s9112_s0 + $0x150] sm:$0xf0]  ;;  %v5507_v61 = vld [vmem:[%s9112_s0 + $0x154] sm:$0xf0] }
  0xb3   :  { %v6691_v37 = vadd.f32 %v2482_v30, %v2434_v29  ;;  %v2388_v38 = vadd.f32 %v2387_v35, %v2339_v34  ;;  %2533 = vmatmul.bf16.gmra.mxu0 %v6682_v28  ;;  %v5050_v30 = vld [vmem:[%s9111_s1 + $0x4c0] sm:$0xf] }
  0xb4   :  { %2582 = vmatmul.bf16.gmra.mxu1 %v6684_v32  ;;  %2719 = vmatpush.bf16.msra.mxu0 %v4987_v1  ;;  %v5051_v35 = vor.u32 %v5745_v31, %v5050_v30  ;;  %v6755_v31 = vor.u32 %v5499_v62, %v4084_v63 }
  0xb5   :  { %2631 = vmatmul.bf16.gmra.mxu2 %v6686_v33 }
  0xb6   :  { %2680 = vmatmul.bf16.gmra.mxu3 %v6689_v36  ;;  %2768 = vmatpush.bf16.msra.mxu1 %v5051_v35  ;;  %9226 = vst [vmem:[#allocation17_spill] sm:$0xff] %v6755_v31 }
  0xb8   :  { %v2436_v0 = vpop.f32.mrf.mxu2  ;;  %v2340_v17 = vpop.f32.mrf.mxu0 }
  0xb9   :  { %v2437_v6 = vadd.f32 %v2436_v0, %v2388_v38  ;;  %v2485_v7 = vpop.f32.mrf.mxu3  ;;  %v2341_v18 = vadd.f32 %v2340_v17, %v6592_v55  ;;  %v2389_v19 = vpop.f32.mrf.mxu1  ;;  %v4074_v38 = vld [vmem:[%s9112_s0 + $0x110] sm:$0xf]  ;;  %v6750_v17 = vor.u32 %v5498_v56, %v4076_v59  ;;  %v5727_v59 = vld [vmem:[%s9111_s1 + $0x434] sm:$0xf0] }
  0xba   :  { %v6748_v1 = vor.u32 %v5506_v39, %v4074_v38  ;;  %v5759_v38 = vld [vmem:[%s9111_s1 + $0x534] sm:$0xf0]  ;;  %v4978_v39 = vld [vmem:[%s9111_s1 + $0x430] sm:$0xf] }
  0xbb   :  { %v6716_v29 = vadd.f32 %v2485_v7, %v2437_v6  ;;  %v2390_v34 = vadd.f32 %v2389_v19, %v2341_v18  ;;  %9224 = vst [vmem:[#allocation15_spill] sm:$0xff] %v6750_v17  ;;  %v6752_v18 = vor.u32 %v5507_v61, %v4082_v60  ;;  %v5170_v60 = vld [vmem:[%s9111_s1 + $0x5b0] sm:$0xf]  ;;  %v5775_v61 = vld [vmem:[%s9111_s1 + $0x5b4] sm:$0xf0]  ;;  %v4979_v63 = vor.u32 %v5727_v59, %v4978_v39 }
  0xbc   :  { %9223 = vst [vmem:[#allocation14_spill] sm:$0xff] %v6748_v1  ;;  %v5743_v39 = vld [vmem:[%s9111_s1 + $0x4b4] sm:$0xf0] }
  0xbd   :  { %9225 = vst [vmem:[#allocation16_spill] sm:$0xff] %v6752_v18  ;;  %2720 = vmatpush.bf16.msra.mxu0 %v4979_v63  ;;  %v4146_v63 = vld [vmem:[%s9112_s0 + $0x198] sm:$0xf] }
  0xc0   :  { %v2438_v0 = vpop.f32.mrf.mxu2  ;;  %v2343_v7 = vpop.f32.mrf.mxu0 }
  0xc1   :  { %v2439_v3 = vadd.f32 %v2438_v0, %v2390_v34  ;;  %v2487_v6 = vpop.f32.mrf.mxu3  ;;  %v2344_v19 = vadd.f32 %v2343_v7, %v6592_v55  ;;  %v2392_v30 = vpop.f32.mrf.mxu1  ;;  %v5106_v34 = vld [vmem:[%s9111_s1 + $0x530] sm:$0xf]  ;;  %v5171_v0 = vor.u32 %v5775_v61, %v5170_v60  ;;  %v5514_v61 = vld [vmem:[%s9112_s0 + $0x194] sm:$0xf] }
  0xc2   :  { %v5107_v56 = vor.u32 %v5759_v38, %v5106_v34  ;;  %v5042_v38 = vld [vmem:[%s9111_s1 + $0x4b0] sm:$0xf] }
  0xc3   :  { %v6757_v35 = vadd.f32 %v2487_v6, %v2439_v3  ;;  %v2393_v36 = vadd.f32 %v2392_v30, %v2344_v19  ;;  %2538 = vmatmul.bf16.gmra.mxu0 %v6748_v1  ;;  %2867 = vmatpush.bf16.msra.mxu3 %v5171_v0  ;;  %v5522_v60 = vld [vmem:[%s9112_s0 + $0x1cc] sm:$0xf0]  ;;  %v5523_v0 = vld [vmem:[%s9112_s0 + $0x1d4] sm:$0xf0] }
  0xc4   :  { %2587 = vmatmul.bf16.gmra.mxu1 %v6750_v17  ;;  %2818 = vmatpush.bf16.msra.mxu2 %v5107_v56  ;;  %v4138_v56 = vld [vmem:[%s9112_s0 + $0x190] sm:$0xf] }
  0xc5   :  { %2636 = vmatmul.bf16.gmra.mxu2 %v6752_v18  ;;  %v6818_v18 = vor.u32 %v5523_v0, %v4146_v63  ;;  %v5773_v63 = vld [vmem:[%s9111_s1 + $0x5a4] sm:$0xf0] }
  0xc6   :  { %2685 = vmatmul.bf16.gmra.mxu3 %v6755_v31 }
  0xc7   :  { %9229 = vst [vmem:[#allocation20_spill] sm:$0xff] %v6818_v18 }
  0xc8   :  { %v2441_v62 = vpop.f32.mrf.mxu2  ;;  %v2345_v7 = vpop.f32.mrf.mxu0 }
  0xc9   :  { %v2442_v3 = vadd.f32 %v2441_v62, %v2393_v36  ;;  %v2490_v6 = vpop.f32.mrf.mxu3  ;;  %v2346_v19 = vadd.f32 %v2345_v7, %v6592_v55  ;;  %v2394_v30 = vpop.f32.mrf.mxu1  ;;  %v5043_v36 = vor.u32 %v5743_v39, %v5042_v38  ;;  %v4140_v62 = vld [vmem:[%s9112_s0 + $0x1d0] sm:$0xf0] }
  0xca   :  { %v6816_v31 = vor.u32 %v5514_v61, %v4140_v62  ;;  %v5725_v61 = vld [vmem:[%s9111_s1 + $0x424] sm:$0xf0]  ;;  %v5162_v62 = vld [vmem:[%s9111_s1 + $0x5a0] sm:$0xf] }
  0xcb   :  { %v6782_v34 = vadd.f32 %v2490_v6, %v2442_v3  ;;  %v2395_v59 = vadd.f32 %v2394_v30, %v2346_v19  ;;  %2769 = vmatpush.bf16.msra.mxu1 %v5043_v36  ;;  %v5515_v3 = vld [vmem:[%s9112_s0 + $0x19c] sm:$0xf]  ;;  %v6814_v19 = vor.u32 %v5522_v60, %v4138_v56  ;;  %v5757_v56 = vld [vmem:[%s9111_s1 + $0x524] sm:$0xf0] }
  0xcc   :  { %v4148_v6 = vld [vmem:[%s9112_s0 + $0x1d8] sm:$0xf0]  ;;  %9228 = vst [vmem:[#allocation19_spill] sm:$0xff] %v6816_v31 }
  0xcd   :  { %9227 = vst [vmem:[#allocation18_spill] sm:$0xff] %v6814_v19  ;;  %v6821_v1 = vor.u32 %v5515_v3, %v4148_v6  ;;  %v5163_v6 = vor.u32 %v5773_v63, %v5162_v62  ;;  %v5538_v62 = vld [vmem:[%s9112_s0 + $0x24c] sm:$0xf0]  ;;  %v5530_v63 = vld [vmem:[%s9112_s0 + $0x214] sm:$0xf] }
  0xcf   :  { %9230 = vst [vmem:[#allocation21_spill] sm:$0xff] %v6821_v1  ;;  %2868 = vmatpush.bf16.msra.mxu3 %v5163_v6  ;;  %v5539_v6 = vld [vmem:[%s9112_s0 + $0x254] sm:$0xf0] }
  0xd0   :  { %v2443_v7 = vpop.f32.mrf.mxu2  ;;  %v2348_v39 = vpop.f32.mrf.mxu0 }
  0xd1   :  { %v2444_v30 = vadd.f32 %v2443_v7, %v2395_v59  ;;  %v2492_v38 = vpop.f32.mrf.mxu3  ;;  %v2349_v36 = vadd.f32 %v2348_v39, %v6592_v55  ;;  %v2397_v17 = vpop.f32.mrf.mxu1  ;;  %v5098_v59 = vld [vmem:[%s9111_s1 + $0x520] sm:$0xf] }
  0xd2   :  { %v5099_v60 = vor.u32 %v5757_v56, %v5098_v59  ;;  %v5034_v56 = vld [vmem:[%s9111_s1 + $0x4a0] sm:$0xf] }
  0xd3   :  { %v6823_v33 = vadd.f32 %v2492_v38, %v2444_v30  ;;  %v2398_v32 = vadd.f32 %v2397_v17, %v2349_v36  ;;  %2543 = vmatmul.bf16.gmra.mxu0 %v6814_v19  ;;  %v4970_v17 = vld [vmem:[%s9111_s1 + $0x420] sm:$0xf] }
  0xd4   :  { %2592 = vmatmul.bf16.gmra.mxu1 %v6816_v31  ;;  %v4971_v3 = vor.u32 %v5725_v61, %v4970_v17  ;;  %2819 = vmatpush.bf16.msra.mxu2 %v5099_v60  ;;  %v5741_v17 = vld [vmem:[%s9111_s1 + $0x4a4] sm:$0xf0]  ;;  %v4202_v60 = vld [vmem:[%s9112_s0 + $0x210] sm:$0xf] }
  0xd5   :  { %2641 = vmatmul.bf16.gmra.mxu2 %v6818_v18 }
  0xd6   :  { %2690 = vmatmul.bf16.gmra.mxu3 %v6821_v1  ;;  %2721 = vmatpush.bf16.msra.mxu0 %v4971_v3  ;;  %v4210_v3 = vld [vmem:[%s9112_s0 + $0x218] sm:$0xf] }
  0xd7   :  { %v6884_v18 = vor.u32 %v5539_v6, %v4210_v3  ;;  %v5771_v3 = vld [vmem:[%s9111_s1 + $0x594] sm:$0xf0] }
  0xd8   :  { %v2446_v0 = vpop.f32.mrf.mxu2  ;;  %v2350_v38 = vpop.f32.mrf.mxu0 }
  0xd9   :  { %v2447_v7 = vadd.f32 %v2446_v0, %v2398_v32  ;;  %v2495_v30 = vpop.f32.mrf.mxu3  ;;  %v2351_v39 = vadd.f32 %v2350_v38, %v6592_v55  ;;  %v2399_v36 = vpop.f32.mrf.mxu1  ;;  %v5035_v32 = vor.u32 %v5741_v17, %v5034_v56  ;;  %v4204_v0 = vld [vmem:[%s9112_s0 + $0x250] sm:$0xf0]  ;;  %9233 = vst [vmem:[#allocation24_spill] sm:$0xff] %v6884_v18 }
  0xda   :  { %v6882_v1 = vor.u32 %v5530_v63, %v4204_v0  ;;  %v5723_v63 = vld [vmem:[%s9111_s1 + $0x414] sm:$0xf0]  ;;  %v5154_v0 = vld [vmem:[%s9111_s1 + $0x590] sm:$0xf] }
  0xdb   :  { %v6848_v59 = vadd.f32 %v2495_v30, %v2447_v7  ;;  %v2400_v61 = vadd.f32 %v2399_v36, %v2351_v39  ;;  %2770 = vmatpush.bf16.msra.mxu1 %v5035_v32  ;;  %v5531_v7 = vld [vmem:[%s9112_s0 + $0x21c] sm:$0xf]  ;;  %v6880_v39 = vor.u32 %v5538_v62, %v4202_v60  ;;  %v5755_v60 = vld [vmem:[%s9111_s1 + $0x514] sm:$0xf0] }
  0xdc   :  { %v4212_v30 = vld [vmem:[%s9112_s0 + $0x258] sm:$0xf0]  ;;  %9232 = vst [vmem:[#allocation23_spill] sm:$0xff] %v6882_v1 }
  0xdd   :  { %9231 = vst [vmem:[#allocation22_spill] sm:$0xff] %v6880_v39  ;;  %v6887_v19 = vor.u32 %v5531_v7, %v4212_v30  ;;  %v5155_v30 = vor.u32 %v5771_v3, %v5154_v0  ;;  %v5554_v0 = vld [vmem:[%s9112_s0 + $0x2cc] sm:$0xf0]  ;;  %v5546_v3 = vld [vmem:[%s9112_s0 + $0x294] sm:$0xf] }
  0xdf   :  { %9234 = vst [vmem:[#allocation25_spill] sm:$0xff] %v6887_v19  ;;  %2869 = vmatpush.bf16.msra.mxu3 %v5155_v30  ;;  %v5555_v30 = vld [vmem:[%s9112_s0 + $0x2d4] sm:$0xf0] }
  0xe0   :  { %v2448_v38 = vpop.f32.mrf.mxu2  ;;  %v2353_v17 = vpop.f32.mrf.mxu0 }
  0xe1   :  { %v2449_v36 = vadd.f32 %v2448_v38, %v2400_v61  ;;  %v2497_v56 = vpop.f32.mrf.mxu3  ;;  %v2354_v32 = vadd.f32 %v2353_v17, %v6592_v55  ;;  %v2402_v31 = vpop.f32.mrf.mxu1  ;;  %v5090_v61 = vld [vmem:[%s9111_s1 + $0x510] sm:$0xf] }
  0xe2   :  { %v5091_v62 = vor.u32 %v5755_v60, %v5090_v61  ;;  %v5026_v60 = vld [vmem:[%s9111_s1 + $0x490] sm:$0xf] }
  0xe3   :  { %v6889_v28 = vadd.f32 %v2497_v56, %v2449_v36  ;;  %v2403_v16 = vadd.f32 %v2402_v31, %v2354_v32  ;;  %2548 = vmatmul.bf16.gmra.mxu0 %v6880_v39  ;;  %v4962_v31 = vld [vmem:[%s9111_s1 + $0x410] sm:$0xf] }
  0xe4   :  { %2597 = vmatmul.bf16.gmra.mxu1 %v6882_v1  ;;  %v4963_v7 = vor.u32 %v5723_v63, %v4962_v31  ;;  %2820 = vmatpush.bf16.msra.mxu2 %v5091_v62  ;;  %v5739_v31 = vld [vmem:[%s9111_s1 + $0x494] sm:$0xf0]  ;;  %v4266_v62 = vld [vmem:[%s9112_s0 + $0x290] sm:$0xf] }
  0xe5   :  { %2646 = vmatmul.bf16.gmra.mxu2 %v6884_v18 }
  0xe6   :  { %2695 = vmatmul.bf16.gmra.mxu3 %v6887_v19  ;;  %2722 = vmatpush.bf16.msra.mxu0 %v4963_v7  ;;  %v4274_v7 = vld [vmem:[%s9112_s0 + $0x298] sm:$0xf] }
  0xe7   :  { %v6950_v18 = vor.u32 %v5555_v30, %v4274_v7  ;;  %v5769_v7 = vld [vmem:[%s9111_s1 + $0x584] sm:$0xf0] }
  0xe8   :  { %v2451_v6 = vpop.f32.mrf.mxu2  ;;  %v2355_v56 = vpop.f32.mrf.mxu0 }
  0xe9   :  { %v2452_v38 = vadd.f32 %v2451_v6, %v2403_v16  ;;  %v2500_v36 = vpop.f32.mrf.mxu3  ;;  %v2356_v17 = vadd.f32 %v2355_v56, %v6592_v55  ;;  %v2404_v32 = vpop.f32.mrf.mxu1  ;;  %v5027_v16 = vor.u32 %v5739_v31, %v5026_v60  ;;  %v4268_v6 = vld [vmem:[%s9112_s0 + $0x2d0] sm:$0xf0]  ;;  %9237 = vst [vmem:[#allocation28_spill] sm:$0xff] %v6950_v18 }
  0xea   :  { %v6948_v19 = vor.u32 %v5546_v3, %v4268_v6  ;;  %v5721_v3 = vld [vmem:[%s9111_s1 + $0x404] sm:$0xf0]  ;;  %v5146_v6 = vld [vmem:[%s9111_s1 + $0x580] sm:$0xf] }
  0xeb   :  { %v6914_v61 = vadd.f32 %v2500_v36, %v2452_v38  ;;  %v2405_v63 = vadd.f32 %v2404_v32, %v2356_v17  ;;  %2771 = vmatpush.bf16.msra.mxu1 %v5027_v16  ;;  %v5547_v38 = vld [vmem:[%s9112_s0 + $0x29c] sm:$0xf]  ;;  %v6946_v17 = vor.u32 %v5554_v0, %v4266_v62  ;;  %v5753_v62 = vld [vmem:[%s9111_s1 + $0x504] sm:$0xf0] }
  0xec   :  { %v4276_v36 = vld [vmem:[%s9112_s0 + $0x2d8] sm:$0xf0]  ;;  %9236 = vst [vmem:[#allocation27_spill] sm:$0xff] %v6948_v19 }
  0xed   :  { %9235 = vst [vmem:[#allocation26_spill] sm:$0xff] %v6946_v17  ;;  %v6953_v39 = vor.u32 %v5547_v38, %v4276_v36  ;;  %v5147_v36 = vor.u32 %v5769_v7, %v5146_v6  ;;  %v5570_v6 = vld [vmem:[%s9112_s0 + $0x34c] sm:$0xf0]  ;;  %v5562_v7 = vld [vmem:[%s9112_s0 + $0x314] sm:$0xf] }
  0xef   :  { %9238 = vst [vmem:[#allocation29_spill] sm:$0xff] %v6953_v39  ;;  %2870 = vmatpush.bf16.msra.mxu3 %v5147_v36  ;;  %v5571_v36 = vld [vmem:[%s9112_s0 + $0x354] sm:$0xf0] }
  0xf0   :  { %v2453_v56 = vpop.f32.mrf.mxu2  ;;  %v2358_v31 = vpop.f32.mrf.mxu0 }
  0xf1   :  { %v2454_v32 = vadd.f32 %v2453_v56, %v2405_v63  ;;  %v2502_v60 = vpop.f32.mrf.mxu3  ;;  %v2359_v16 = vadd.f32 %v2358_v31, %v6592_v55  ;;  %v2407_v1 = vpop.f32.mrf.mxu1  ;;  %v5082_v63 = vld [vmem:[%s9111_s1 + $0x500] sm:$0xf] }
  0xf2   :  { %v5083_v0 = vor.u32 %v5753_v62, %v5082_v63  ;;  %v5018_v62 = vld [vmem:[%s9111_s1 + $0x480] sm:$0xf] }
  0xf3   :  { %v6955_v5 = vadd.f32 %v2502_v60, %v2454_v32  ;;  %v2408_v4 = vadd.f32 %v2407_v1, %v2359_v16  ;;  %2553 = vmatmul.bf16.gmra.mxu0 %v6946_v17  ;;  %v4954_v1 = vld [vmem:[%s9111_s1 + $0x400] sm:$0xf] }
  0xf4   :  { %2602 = vmatmul.bf16.gmra.mxu1 %v6948_v19  ;;  %v4955_v38 = vor.u32 %v5721_v3, %v4954_v1  ;;  %2821 = vmatpush.bf16.msra.mxu2 %v5083_v0  ;;  %v5737_v1 = vld [vmem:[%s9111_s1 + $0x484] sm:$0xf0]  ;;  %v4330_v0 = vld [vmem:[%s9112_s0 + $0x310] sm:$0xf] }
  0xf5   :  { %2651 = vmatmul.bf16.gmra.mxu2 %v6950_v18 }
  0xf6   :  { %2700 = vmatmul.bf16.gmra.mxu3 %v6953_v39  ;;  %2723 = vmatpush.bf16.msra.mxu0 %v4955_v38  ;;  %v4338_v38 = vld [vmem:[%s9112_s0 + $0x318] sm:$0xf] }
  0xf7   :  { %v7016_v18 = vor.u32 %v5571_v36, %v4338_v38  ;;  %v5847_v38 = vld [vmem:[%s9111_s1 + $0x7f4] sm:$0xf0] }
  0xf8   :  { %v2456_v30 = vpop.f32.mrf.mxu2  ;;  %v2360_v60 = vpop.f32.mrf.mxu0 }
  0xf9   :  { %v2457_v56 = vadd.f32 %v2456_v30, %v2408_v4  ;;  %v2505_v32 = vpop.f32.mrf.mxu3  ;;  %v2361_v31 = vadd.f32 %v2360_v60, %v6592_v55  ;;  %v2409_v16 = vpop.f32.mrf.mxu1  ;;  %v5019_v4 = vor.u32 %v5737_v1, %v5018_v62  ;;  %v4332_v30 = vld [vmem:[%s9112_s0 + $0x350] sm:$0xf0]  ;;  %9241 = vst [vmem:[#allocation32_spill] sm:$0xff] %v7016_v18 }
  0xfa   :  { %v7014_v39 = vor.u32 %v5562_v7, %v4332_v30  ;;  %v5799_v7 = vld [vmem:[%s9111_s1 + $0x674] sm:$0xf0]  ;;  %v5458_v30 = vld [vmem:[%s9111_s1 + $0x7f0] sm:$0xf] }
  0xfb   :  { %v6980_v63 = vadd.f32 %v2505_v32, %v2457_v56  ;;  %v2410_v3 = vadd.f32 %v2409_v16, %v2361_v31  ;;  %2772 = vmatpush.bf16.msra.mxu1 %v5019_v4  ;;  %v5563_v56 = vld [vmem:[%s9112_s0 + $0x31c] sm:$0xf]  ;;  %v7012_v31 = vor.u32 %v5570_v6, %v4330_v0  ;;  %v5831_v0 = vld [vmem:[%s9111_s1 + $0x774] sm:$0xf0] }
  0xfc   :  { %v4340_v32 = vld [vmem:[%s9112_s0 + $0x358] sm:$0xf0]  ;;  %9240 = vst [vmem:[#allocation31_spill] sm:$0xff] %v7014_v39 }
  0xfd   :  { %9239 = vst [vmem:[#allocation30_spill] sm:$0xff] %v7012_v31  ;;  %v7019_v17 = vor.u32 %v5563_v56, %v4340_v32  ;;  %v5459_v32 = vor.u32 %v5847_v38, %v5458_v30  ;;  %v5586_v30 = vld [vmem:[%s9112_s0 + $0x3cc] sm:$0xf0]  ;;  %v5578_v38 = vld [vmem:[%s9112_s0 + $0x394] sm:$0xf] }
  0xff   :  { %9242 = vst [vmem:[#allocation33_spill] sm:$0xff] %v7019_v17  ;;  %3059 = vmatpush.bf16.msrb.mxu3 %v5459_v32  ;;  %v5587_v32 = vld [vmem:[%s9112_s0 + $0x3d4] sm:$0xf0] }
 0x100   :  { %v2458_v60 = vpop.f32.mrf.mxu2  ;;  %v2363_v1 = vpop.f32.mrf.mxu0 }
 0x101   :  { %v2459_v16 = vadd.f32 %v2458_v60, %v2410_v3  ;;  %v2507_v62 = vpop.f32.mrf.mxu3  ;;  %v2364_v4 = vadd.f32 %v2363_v1, %v6592_v55  ;;  %v2412_v19 = vpop.f32.mrf.mxu1  ;;  %v5394_v3 = vld [vmem:[%s9111_s1 + $0x770] sm:$0xf] }
 0x102   :  { %v5395_v6 = vor.u32 %v5831_v0, %v5394_v3  ;;  %v5330_v0 = vld [vmem:[%s9111_s1 + $0x6f0] sm:$0xf] }
 0x103   :  { %v7021_v2 = vadd.f32 %v2507_v62, %v2459_v16  ;;  %v2413_v23 = vadd.f32 %v2412_v19, %v2364_v4  ;;  %2558 = vmatmul.bf16.gmra.mxu0 %v7012_v31  ;;  %v5266_v19 = vld [vmem:[%s9111_s1 + $0x670] sm:$0xf] }
 0x104   :  { %2607 = vmatmul.bf16.gmra.mxu1 %v7014_v39  ;;  %v5267_v56 = vor.u32 %v5799_v7, %v5266_v19  ;;  %3010 = vmatpush.bf16.msrb.mxu2 %v5395_v6  ;;  %v5815_v19 = vld [vmem:[%s9111_s1 + $0x6f4] sm:$0xf0]  ;;  %v4394_v6 = vld [vmem:[%s9112_s0 + $0x390] sm:$0xf] }
 0x105   :  { %2656 = vmatmul.bf16.gmra.mxu2 %v7016_v18 }
 0x106   :  { %2705 = vmatmul.bf16.gmra.mxu3 %v7019_v17  ;;  %2912 = vmatpush.bf16.msrb.mxu0 %v5267_v56  ;;  %v4402_v56 = vld [vmem:[%s9112_s0 + $0x398] sm:$0xf] }
 0x107   :  { %v7082_v18 = vor.u32 %v5587_v32, %v4402_v56  ;;  %v5845_v56 = vld [vmem:[%s9111_s1 + $0x7e4] sm:$0xf0] }
 0x108   :  { %v2461_v36 = vpop.f32.mrf.mxu2  ;;  %v2365_v62 = vpop.f32.mrf.mxu0 }
 0x109   :  { %v2462_v60 = vadd.f32 %v2461_v36, %v2413_v23  ;;  %v2510_v16 = vpop.f32.mrf.mxu3  ;;  %v2366_v1 = vadd.f32 %v2365_v62, %v6592_v55  ;;  %v2414_v4 = vpop.f32.mrf.mxu1  ;;  %v5331_v23 = vor.u32 %v5815_v19, %v5330_v0  ;;  %v4396_v36 = vld [vmem:[%s9112_s0 + $0x3d0] sm:$0xf0]  ;;  %9245 = vst [vmem:[#allocation36_spill] sm:$0xff] %v7082_v18 }
 0x10a   :  { %v7080_v17 = vor.u32 %v5578_v38, %v4396_v36  ;;  %v5797_v38 = vld [vmem:[%s9111_s1 + $0x664] sm:$0xf0]  ;;  %v5450_v36 = vld [vmem:[%s9111_s1 + $0x7e0] sm:$0xf] }
 0x10b   :  { %v7046_v3 = vadd.f32 %v2510_v16, %v2462_v60  ;;  %v2415_v7 = vadd.f32 %v2414_v4, %v2366_v1  ;;  %2961 = vmatpush.bf16.msrb.mxu1 %v5331_v23  ;;  %v5579_v60 = vld [vmem:[%s9112_s0 + $0x39c] sm:$0xf]  ;;  %v7078_v1 = vor.u32 %v5586_v30, %v4394_v6  ;;  %v5829_v6 = vld [vmem:[%s9111_s1 + $0x764] sm:$0xf0] }
 0x10c   :  { %v4404_v16 = vld [vmem:[%s9112_s0 + $0x3d8] sm:$0xf0]  ;;  %9244 = vst [vmem:[#allocation35_spill] sm:$0xff] %v7080_v17 }
 0x10d   :  { %9243 = vst [vmem:[#allocation34_spill] sm:$0xff] %v7078_v1  ;;  %v7085_v31 = vor.u32 %v5579_v60, %v4404_v16  ;;  %v5451_v16 = vor.u32 %v5845_v56, %v5450_v36  ;;  %v5468_v36 = vld [vmem:[%s9112_s0 + $0x24] sm:$0xf] }
 0x10e   :  { %v3964_v56 = vld [vmem:[%s9112_s0 + $0x60] sm:$0xf0] }
 0x10f   :  { %9246 = vst [vmem:[#allocation37_spill] sm:$0xff] %v7085_v31  ;;  %3060 = vmatpush.bf16.msrb.mxu3 %v5451_v16  ;;  %v5469_v16 = vld [vmem:[%s9112_s0 + $0x2c] sm:$0xf] }
 0x110   :  { %v2463_v62 = vpop.f32.mrf.mxu2  ;;  %v2368_v19 = vpop.f32.mrf.mxu0 }
 0x111   :  { %v2464_v4 = vadd.f32 %v2463_v62, %v2415_v7  ;;  %v2512_v0 = vpop.f32.mrf.mxu3  ;;  %v2369_v23 = vadd.f32 %v2368_v19, %v6592_v55  ;;  %v2417_v39 = vpop.f32.mrf.mxu1  ;;  %v5386_v7 = vld [vmem:[%s9111_s1 + $0x760] sm:$0xf] }
 0x112   :  { %v5387_v30 = vor.u32 %v5829_v6, %v5386_v7  ;;  %v5322_v6 = vld [vmem:[%s9111_s1 + $0x6e0] sm:$0xf] }
 0x113   :  { %v7087_v22 = vadd.f32 %v2512_v0, %v2464_v4  ;;  %v2418_v21 = vadd.f32 %v2417_v39, %v2369_v23  ;;  %2563 = vmatmul.bf16.gmra.mxu0 %v7078_v1  ;;  %v5258_v39 = vld [vmem:[%s9111_s1 + $0x660] sm:$0xf] }
 0x114   :  { %2612 = vmatmul.bf16.gmra.mxu1 %v7080_v17  ;;  %v5259_v60 = vor.u32 %v5797_v38, %v5258_v39  ;;  %3011 = vmatpush.bf16.msrb.mxu2 %v5387_v30  ;;  %v5813_v39 = vld [vmem:[%s9111_s1 + $0x6e4] sm:$0xf0]  ;;  %v3962_v30 = vld [vmem:[%s9112_s0 + $0x20] sm:$0xf] }
 0x115   :  { %2661 = vmatmul.bf16.gmra.mxu2 %v7082_v18 }
 0x116   :  { %2710 = vmatmul.bf16.gmra.mxu3 %v7085_v31  ;;  %2913 = vmatpush.bf16.msrb.mxu0 %v5259_v60  ;;  %v5477_v60 = vld [vmem:[%s9112_s0 + $0x64] sm:$0xf0] }
 0x118   :  { %v2466_v32 = vpop.f32.mrf.mxu2  ;;  %v2370_v0 = vpop.f32.mrf.mxu0 }
 0x119   :  { %v2467_v62 = vadd.f32 %v2466_v32, %v2418_v21  ;;  %v2515_v4 = vpop.f32.mrf.mxu3  ;;  %v2371_v19 = vadd.f32 %v2370_v0, %v6592_v55  ;;  %v2419_v23 = vpop.f32.mrf.mxu1  ;;  %v5323_v21 = vor.u32 %v5813_v39, %v5322_v6  ;;  %v5476_v55 = vld [vmem:[%s9112_s0 + $0x5c] sm:$0xf0]  ;;  %v3970_v32 = vld [vmem:[%s9112_s0 + $0x28] sm:$0xf]  ;;  %v7146_v39 = vor.u32 %v5468_v36, %v3964_v56  ;;  %v5442_v36 = vld [vmem:[%s9111_s1 + $0x7d0] sm:$0xf] }
 0x11a   :  { %v7144_v0 = vor.u32 %v5476_v55, %v3962_v30  ;;  %v7148_v31 = vor.u32 %v5477_v60, %v3970_v32  ;;  %v5795_v55 = vld [vmem:[%s9111_s1 + $0x654] sm:$0xf0] }
 0x11b   :  { %v7112_v7 = vadd.f32 %v2515_v4, %v2467_v62  ;;  %v2420_v38 = vadd.f32 %v2419_v23, %v2371_v19  ;;  %2962 = vmatpush.bf16.msrb.mxu1 %v5323_v21  ;;  %v3972_v62 = vld [vmem:[%s9112_s0 + $0x68] sm:$0xf0]  ;;  %9248 = vst [vmem:[#allocation39_spill] sm:$0xff] %v7146_v39  ;;  %v5843_v56 = vld [vmem:[%s9111_s1 + $0x7d4] sm:$0xf0] }
 0x11c   :  { %9247 = vst [vmem:[#allocation38_spill] sm:$0xff] %v7144_v0  ;;  %v7151_v17 = vor.u32 %v5469_v16, %v3972_v62  ;;  %v5443_v16 = vor.u32 %v5843_v56, %v5442_v36  ;;  %v4028_v36 = vld [vmem:[%s9112_s0 + $0xe0] sm:$0xf0]  ;;  %v4034_v56 = vld [vmem:[%s9112_s0 + $0xa8] sm:$0xf] }
 0x11d   :  { %9249 = vst [vmem:[#allocation40_spill] sm:$0xff] %v7148_v31 }
 0x11e   :  { %9250 = vst [vmem:[#allocation41_spill] sm:$0xff] %v7151_v17  ;;  %3061 = vmatpush.bf16.msrb.mxu3 %v5443_v16  ;;  %v4036_v16 = vld [vmem:[%s9112_s0 + $0xe8] sm:$0xf0] }
 0x120   :  { %v2468_v4 = vpop.f32.mrf.mxu2  ;;  %v2529_v6 = vpop.f32.mrf.mxu0 }
 0x121   :  { %v2469_v19 = vadd.f32 %v2468_v4, %v2420_v38  ;;  %v2517_v23 = vpop.f32.mrf.mxu3  ;;  %v2530_v21 = vadd.f32 %v2529_v6, %v6650_v58  ;;  %v2578_v18 = vpop.f32.mrf.mxu1  ;;  %v5378_v38 = vld [vmem:[%s9111_s1 + $0x750] sm:$0xf]  ;;  %v5827_v58 = vld [vmem:[%s9111_s1 + $0x754] sm:$0xf0] }
 0x122   :  { %v5379_v30 = vor.u32 %v5827_v58, %v5378_v38  ;;  %v5314_v38 = vld [vmem:[%s9111_s1 + $0x6d0] sm:$0xf]  ;;  %v5811_v58 = vld [vmem:[%s9111_s1 + $0x6d4] sm:$0xf0] }
 0x123   :  { %v7153_v1 = vadd.f32 %v2517_v23, %v2469_v19  ;;  %v2579_v20 = vadd.f32 %v2578_v18, %v2530_v21  ;;  %2724 = vmatmul.bf16.vlgmr.msra.gmra.mxu0 %v7144_v0  ;;  %v5250_v18 = vld [vmem:[%s9111_s1 + $0x650] sm:$0xf] }
 0x124   :  { %2773 = vmatmul.bf16.vlgmr.msra.gmra.mxu1 %v7146_v39  ;;  %v5251_v60 = vor.u32 %v5795_v55, %v5250_v18  ;;  %3012 = vmatpush.bf16.msrb.mxu2 %v5379_v30  ;;  %v4026_v30 = vld [vmem:[%s9112_s0 + $0xa0] sm:$0xf]  ;;  %v5484_v55 = vld [vmem:[%s9112_s0 + $0xa4] sm:$0xf] }
 0x125   :  { %2822 = vmatmul.bf16.vlgmr.msra.gmra.mxu2 %v7148_v31 }
 0x126   :  { %2871 = vmatmul.bf16.vlgmr.msra.gmra.mxu3 %v7151_v17  ;;  %2914 = vmatpush.bf16.msrb.mxu0 %v5251_v60  ;;  %v5485_v60 = vld [vmem:[%s9112_s0 + $0xac] sm:$0xf] }
 0x127   :  { %v7217_v31 = vor.u32 %v5485_v60, %v4036_v16 }
 0x128   :  { %v2627_v32 = vpop.f32.mrf.mxu2  ;;  %v2531_v19 = vpop.f32.mrf.mxu0 }
 0x129   :  { %v2628_v62 = vadd.f32 %v2627_v32, %v2579_v20  ;;  %v2676_v4 = vpop.f32.mrf.mxu3  ;;  %v2532_v23 = vadd.f32 %v2531_v19, %v6691_v37  ;;  %v2580_v6 = vpop.f32.mrf.mxu1  ;;  %v5315_v20 = vor.u32 %v5811_v58, %v5314_v38  ;;  %v5492_v37 = vld [vmem:[%s9112_s0 + $0xdc] sm:$0xf0]  ;;  %v5493_v32 = vld [vmem:[%s9112_s0 + $0xe4] sm:$0xf0]  ;;  %v7212_v38 = vor.u32 %v5484_v55, %v4028_v36  ;;  %9254 = vst [vmem:[#allocation45_spill] sm:$0xff] %v7217_v31 }
 0x12a   :  { %v7214_v58 = vor.u32 %v5493_v32, %v4034_v56  ;;  %v5434_v55 = vld [vmem:[%s9111_s1 + $0x7c0] sm:$0xf]  ;;  %v5841_v36 = vld [vmem:[%s9111_s1 + $0x7c4] sm:$0xf0] }
 0x12b   :  { %v7178_v21 = vadd.f32 %v2676_v4, %v2628_v62  ;;  %v2581_v18 = vadd.f32 %v2580_v6, %v2532_v23  ;;  %2963 = vmatpush.bf16.msrb.mxu1 %v5315_v20  ;;  %v7210_v4 = vor.u32 %v5492_v37, %v4026_v30  ;;  %9252 = vst [vmem:[#allocation43_spill] sm:$0xff] %v7212_v38  ;;  %v5793_v37 = vld [vmem:[%s9111_s1 + $0x644] sm:$0xf0] }
 0x12c   :  { %9253 = vst [vmem:[#allocation44_spill] sm:$0xff] %v7214_v58  ;;  %v5435_v60 = vor.u32 %v5841_v36, %v5434_v55  ;;  %v4092_v55 = vld [vmem:[%s9112_s0 + $0x160] sm:$0xf0]  ;;  %v4098_v36 = vld [vmem:[%s9112_s0 + $0x128] sm:$0xf] }
 0x12d   :  { %9251 = vst [vmem:[#allocation42_spill] sm:$0xff] %v7210_v4 }
 0x12e   :  { %3062 = vmatpush.bf16.msrb.mxu3 %v5435_v60  ;;  %v4100_v60 = vld [vmem:[%s9112_s0 + $0x168] sm:$0xf0] }
 0x130   :  { %v2629_v62 = vpop.f32.mrf.mxu2  ;;  %v2534_v6 = vpop.f32.mrf.mxu0 }
 0x131   :  { %v2630_v19 = vadd.f32 %v2629_v62, %v2581_v18  ;;  %v2678_v23 = vpop.f32.mrf.mxu3  ;;  %v2535_v20 = vadd.f32 %v2534_v6, %v6716_v29  ;;  %v2583_v17 = vpop.f32.mrf.mxu1  ;;  %v5370_v18 = vld [vmem:[%s9111_s1 + $0x740] sm:$0xf]  ;;  %v5825_v29 = vld [vmem:[%s9111_s1 + $0x744] sm:$0xf0] }
 0x132   :  { %v5371_v30 = vor.u32 %v5825_v29, %v5370_v18  ;;  %v5306_v18 = vld [vmem:[%s9111_s1 + $0x6c0] sm:$0xf]  ;;  %v5809_v29 = vld [vmem:[%s9111_s1 + $0x6c4] sm:$0xf0] }
 0x133   :  { %v7219_v39 = vadd.f32 %v2678_v23, %v2630_v19  ;;  %v2584_v0 = vadd.f32 %v2583_v17, %v2535_v20  ;;  %2729 = vmatmul.bf16.gmra.mxu0 %v7210_v4  ;;  %v5242_v17 = vld [vmem:[%s9111_s1 + $0x640] sm:$0xf] }
 0x134   :  { %2778 = vmatmul.bf16.gmra.mxu1 %v7212_v38  ;;  %v5243_v32 = vor.u32 %v5793_v37, %v5242_v17  ;;  %3013 = vmatpush.bf16.msrb.mxu2 %v5371_v30  ;;  %v4090_v30 = vld [vmem:[%s9112_s0 + $0x120] sm:$0xf]  ;;  %v5500_v37 = vld [vmem:[%s9112_s0 + $0x124] sm:$0xf] }
 0x135   :  { %2827 = vmatmul.bf16.gmra.mxu2 %v7214_v58 }
 0x136   :  { %2876 = vmatmul.bf16.gmra.mxu3 %v7217_v31  ;;  %2915 = vmatpush.bf16.msrb.mxu0 %v5243_v32  ;;  %v5501_v32 = vld [vmem:[%s9112_s0 + $0x12c] sm:$0xf] }
 0x137   :  { %v7283_v58 = vor.u32 %v5501_v32, %v4100_v60 }
 0x138   :  { %v2632_v56 = vpop.f32.mrf.mxu2  ;;  %v2536_v19 = vpop.f32.mrf.mxu0 }
 0x139   :  { %v2633_v16 = vadd.f32 %v2632_v56, %v2584_v0  ;;  %v2681_v62 = vpop.f32.mrf.mxu3  ;;  %v2537_v23 = vadd.f32 %v2536_v19, %v6757_v35  ;;  %v2585_v6 = vpop.f32.mrf.mxu1  ;;  %v5307_v0 = vor.u32 %v5809_v29, %v5306_v18  ;;  %v5508_v35 = vld [vmem:[%s9112_s0 + $0x15c] sm:$0xf0]  ;;  %v5509_v56 = vld [vmem:[%s9112_s0 + $0x164] sm:$0xf0]  ;;  %v7278_v18 = vor.u32 %v5500_v37, %v4092_v55  ;;  %9258 = vst [vmem:[#allocation49_spill] sm:$0xff] %v7283_v58 }
 0x13a   :  { %v7280_v29 = vor.u32 %v5509_v56, %v4098_v36  ;;  %v5426_v37 = vld [vmem:[%s9111_s1 + $0x7b0] sm:$0xf]  ;;  %v5839_v55 = vld [vmem:[%s9111_s1 + $0x7b4] sm:$0xf0] }
 0x13b   :  { %v7244_v20 = vadd.f32 %v2681_v62, %v2633_v16  ;;  %v2586_v17 = vadd.f32 %v2585_v6, %v2537_v23  ;;  %2964 = vmatpush.bf16.msrb.mxu1 %v5307_v0  ;;  %v7276_v62 = vor.u32 %v5508_v35, %v4090_v30  ;;  %9256 = vst [vmem:[#allocation47_spill] sm:$0xff] %v7278_v18  ;;  %v5791_v35 = vld [vmem:[%s9111_s1 + $0x634] sm:$0xf0] }
 0x13c   :  { %9257 = vst [vmem:[#allocation48_spill] sm:$0xff] %v7280_v29  ;;  %v5427_v32 = vor.u32 %v5839_v55, %v5426_v37  ;;  %v4156_v37 = vld [vmem:[%s9112_s0 + $0x1e0] sm:$0xf0]  ;;  %v4162_v55 = vld [vmem:[%s9112_s0 + $0x1a8] sm:$0xf] }
 0x13d   :  { %9255 = vst [vmem:[#allocation46_spill] sm:$0xff] %v7276_v62 }
 0x13e   :  { %3063 = vmatpush.bf16.msrb.mxu3 %v5427_v32  ;;  %v4164_v32 = vld [vmem:[%s9112_s0 + $0x1e8] sm:$0xf0] }
 0x140   :  { %v2634_v16 = vpop.f32.mrf.mxu2  ;;  %v2539_v6 = vpop.f32.mrf.mxu0 }
 0x141   :  { %v2635_v19 = vadd.f32 %v2634_v16, %v2586_v17  ;;  %v2683_v23 = vpop.f32.mrf.mxu3  ;;  %v2540_v0 = vadd.f32 %v2539_v6, %v6782_v34  ;;  %v2588_v31 = vpop.f32.mrf.mxu1  ;;  %v5362_v17 = vld [vmem:[%s9111_s1 + $0x730] sm:$0xf]  ;;  %v5823_v34 = vld [vmem:[%s9111_s1 + $0x734] sm:$0xf0] }
 0x142   :  { %v5363_v30 = vor.u32 %v5823_v34, %v5362_v17  ;;  %v5298_v17 = vld [vmem:[%s9111_s1 + $0x6b0] sm:$0xf]  ;;  %v5807_v34 = vld [vmem:[%s9111_s1 + $0x6b4] sm:$0xf0] }
 0x143   :  { %v7285_v38 = vadd.f32 %v2683_v23, %v2635_v19  ;;  %v2589_v4 = vadd.f32 %v2588_v31, %v2540_v0  ;;  %2734 = vmatmul.bf16.gmra.mxu0 %v7276_v62  ;;  %v5234_v31 = vld [vmem:[%s9111_s1 + $0x630] sm:$0xf] }
 0x144   :  { %2783 = vmatmul.bf16.gmra.mxu1 %v7278_v18  ;;  %v5235_v56 = vor.u32 %v5791_v35, %v5234_v31  ;;  %3014 = vmatpush.bf16.msrb.mxu2 %v5363_v30  ;;  %v4154_v30 = vld [vmem:[%s9112_s0 + $0x1a0] sm:$0xf]  ;;  %v5516_v35 = vld [vmem:[%s9112_s0 + $0x1a4] sm:$0xf] }
 0x145   :  { %2832 = vmatmul.bf16.gmra.mxu2 %v7280_v29 }
 0x146   :  { %2881 = vmatmul.bf16.gmra.mxu3 %v7283_v58  ;;  %2916 = vmatpush.bf16.msrb.mxu0 %v5235_v56  ;;  %v5517_v56 = vld [vmem:[%s9112_s0 + $0x1ac] sm:$0xf] }
 0x147   :  { %v7349_v29 = vor.u32 %v5517_v56, %v4164_v32 }
 0x148   :  { %v2637_v36 = vpop.f32.mrf.mxu2  ;;  %v2541_v19 = vpop.f32.mrf.mxu0 }
 0x149   :  { %v2638_v60 = vadd.f32 %v2637_v36, %v2589_v4  ;;  %v2686_v16 = vpop.f32.mrf.mxu3  ;;  %v2542_v23 = vadd.f32 %v2541_v19, %v6823_v33  ;;  %v2590_v6 = vpop.f32.mrf.mxu1  ;;  %v5299_v4 = vor.u32 %v5807_v34, %v5298_v17  ;;  %v5524_v33 = vld [vmem:[%s9112_s0 + $0x1dc] sm:$0xf0]  ;;  %v5525_v36 = vld [vmem:[%s9112_s0 + $0x1e4] sm:$0xf0]  ;;  %v7344_v17 = vor.u32 %v5516_v35, %v4156_v37  ;;  %9262 = vst [vmem:[#allocation53_spill] sm:$0xff] %v7349_v29 }
 0x14a   :  { %v7346_v34 = vor.u32 %v5525_v36, %v4162_v55  ;;  %v5418_v35 = vld [vmem:[%s9111_s1 + $0x7a0] sm:$0xf]  ;;  %v5837_v37 = vld [vmem:[%s9111_s1 + $0x7a4] sm:$0xf0] }
 0x14b   :  { %v7310_v0 = vadd.f32 %v2686_v16, %v2638_v60  ;;  %v2591_v31 = vadd.f32 %v2590_v6, %v2542_v23  ;;  %2965 = vmatpush.bf16.msrb.mxu1 %v5299_v4  ;;  %v7342_v16 = vor.u32 %v5524_v33, %v4154_v30  ;;  %9260 = vst [vmem:[#allocation51_spill] sm:$0xff] %v7344_v17  ;;  %v5789_v33 = vld [vmem:[%s9111_s1 + $0x624] sm:$0xf0] }
 0x14c   :  { %9261 = vst [vmem:[#allocation52_spill] sm:$0xff] %v7346_v34  ;;  %v5419_v56 = vor.u32 %v5837_v37, %v5418_v35  ;;  %v4220_v35 = vld [vmem:[%s9112_s0 + $0x260] sm:$0xf0]  ;;  %v4226_v37 = vld [vmem:[%s9112_s0 + $0x228] sm:$0xf] }
 0x14d   :  { %9259 = vst [vmem:[#allocation50_spill] sm:$0xff] %v7342_v16 }
 0x14e   :  { %3064 = vmatpush.bf16.msrb.mxu3 %v5419_v56  ;;  %v4228_v56 = vld [vmem:[%s9112_s0 + $0x268] sm:$0xf0] }
 0x150   :  { %v2639_v60 = vpop.f32.mrf.mxu2  ;;  %v2544_v6 = vpop.f32.mrf.mxu0 }
 0x151   :  { %v2640_v19 = vadd.f32 %v2639_v60, %v2591_v31  ;;  %v2688_v23 = vpop.f32.mrf.mxu3  ;;  %v2545_v4 = vadd.f32 %v2544_v6, %v6848_v59  ;;  %v2593_v58 = vpop.f32.mrf.mxu1  ;;  %v5354_v31 = vld [vmem:[%s9111_s1 + $0x720] sm:$0xf]  ;;  %v5821_v59 = vld [vmem:[%s9111_s1 + $0x724] sm:$0xf0] }
 0x152   :  { %v5355_v30 = vor.u32 %v5821_v59, %v5354_v31  ;;  %v5290_v31 = vld [vmem:[%s9111_s1 + $0x6a0] sm:$0xf]  ;;  %v5805_v59 = vld [vmem:[%s9111_s1 + $0x6a4] sm:$0xf0] }
 0x153   :  { %v7351_v18 = vadd.f32 %v2688_v23, %v2640_v19  ;;  %v2594_v62 = vadd.f32 %v2593_v58, %v2545_v4  ;;  %2739 = vmatmul.bf16.gmra.mxu0 %v7342_v16  ;;  %v5226_v58 = vld [vmem:[%s9111_s1 + $0x620] sm:$0xf] }
 0x154   :  { %2788 = vmatmul.bf16.gmra.mxu1 %v7344_v17  ;;  %v5227_v36 = vor.u32 %v5789_v33, %v5226_v58  ;;  %3015 = vmatpush.bf16.msrb.mxu2 %v5355_v30  ;;  %v4218_v30 = vld [vmem:[%s9112_s0 + $0x220] sm:$0xf]  ;;  %v5532_v33 = vld [vmem:[%s9112_s0 + $0x224] sm:$0xf] }
 0x155   :  { %2837 = vmatmul.bf16.gmra.mxu2 %v7346_v34 }
 0x156   :  { %2886 = vmatmul.bf16.gmra.mxu3 %v7349_v29  ;;  %2917 = vmatpush.bf16.msrb.mxu0 %v5227_v36  ;;  %v5533_v36 = vld [vmem:[%s9112_s0 + $0x22c] sm:$0xf] }
 0x157   :  { %v7415_v34 = vor.u32 %v5533_v36, %v4228_v56 }
 0x158   :  { %v2642_v55 = vpop.f32.mrf.mxu2  ;;  %v2546_v19 = vpop.f32.mrf.mxu0 }
 0x159   :  { %v2643_v32 = vadd.f32 %v2642_v55, %v2594_v62  ;;  %v2691_v60 = vpop.f32.mrf.mxu3  ;;  %v2547_v23 = vadd.f32 %v2546_v19, %v6889_v28  ;;  %v2595_v6 = vpop.f32.mrf.mxu1  ;;  %v5291_v62 = vor.u32 %v5805_v59, %v5290_v31  ;;  %v5540_v28 = vld [vmem:[%s9112_s0 + $0x25c] sm:$0xf0]  ;;  %v5541_v55 = vld [vmem:[%s9112_s0 + $0x264] sm:$0xf0]  ;;  %v7410_v31 = vor.u32 %v5532_v33, %v4220_v35  ;;  %9266 = vst [vmem:[#allocation57_spill] sm:$0xff] %v7415_v34 }
 0x15a   :  { %v7412_v59 = vor.u32 %v5541_v55, %v4226_v37  ;;  %v5410_v33 = vld [vmem:[%s9111_s1 + $0x790] sm:$0xf]  ;;  %v5835_v35 = vld [vmem:[%s9111_s1 + $0x794] sm:$0xf0] }
 0x15b   :  { %v7376_v4 = vadd.f32 %v2691_v60, %v2643_v32  ;;  %v2596_v58 = vadd.f32 %v2595_v6, %v2547_v23  ;;  %2966 = vmatpush.bf16.msrb.mxu1 %v5291_v62  ;;  %v7408_v60 = vor.u32 %v5540_v28, %v4218_v30  ;;  %9264 = vst [vmem:[#allocation55_spill] sm:$0xff] %v7410_v31  ;;  %v5787_v28 = vld [vmem:[%s9111_s1 + $0x614] sm:$0xf0] }
 0x15c   :  { %9265 = vst [vmem:[#allocation56_spill] sm:$0xff] %v7412_v59  ;;  %v5411_v36 = vor.u32 %v5835_v35, %v5410_v33  ;;  %v4284_v33 = vld [vmem:[%s9112_s0 + $0x2e0] sm:$0xf0]  ;;  %v4290_v35 = vld [vmem:[%s9112_s0 + $0x2a8] sm:$0xf] }
 0x15d   :  { %9263 = vst [vmem:[#allocation54_spill] sm:$0xff] %v7408_v60 }
 0x15e   :  { %3065 = vmatpush.bf16.msrb.mxu3 %v5411_v36  ;;  %v4292_v36 = vld [vmem:[%s9112_s0 + $0x2e8] sm:$0xf0] }
 0x160   :  { %v2644_v32 = vpop.f32.mrf.mxu2  ;;  %v2549_v6 = vpop.f32.mrf.mxu0 }
 0x161   :  { %v2645_v19 = vadd.f32 %v2644_v32, %v2596_v58  ;;  %v2693_v23 = vpop.f32.mrf.mxu3  ;;  %v2550_v62 = vadd.f32 %v2549_v6, %v6914_v61  ;;  %v2598_v29 = vpop.f32.mrf.mxu1  ;;  %v5346_v58 = vld [vmem:[%s9111_s1 + $0x710] sm:$0xf]  ;;  %v5819_v61 = vld [vmem:[%s9111_s1 + $0x714] sm:$0xf0] }
 0x162   :  { %v5347_v30 = vor.u32 %v5819_v61, %v5346_v58  ;;  %v5282_v58 = vld [vmem:[%s9111_s1 + $0x690] sm:$0xf]  ;;  %v5803_v61 = vld [vmem:[%s9111_s1 + $0x694] sm:$0xf0] }
 0x163   :  { %v7417_v17 = vadd.f32 %v2693_v23, %v2645_v19  ;;  %v2599_v16 = vadd.f32 %v2598_v29, %v2550_v62  ;;  %2744 = vmatmul.bf16.gmra.mxu0 %v7408_v60  ;;  %v5218_v29 = vld [vmem:[%s9111_s1 + $0x610] sm:$0xf] }
 0x164   :  { %2793 = vmatmul.bf16.gmra.mxu1 %v7410_v31  ;;  %v5219_v55 = vor.u32 %v5787_v28, %v5218_v29  ;;  %3016 = vmatpush.bf16.msrb.mxu2 %v5347_v30  ;;  %v4282_v30 = vld [vmem:[%s9112_s0 + $0x2a0] sm:$0xf]  ;;  %v5548_v28 = vld [vmem:[%s9112_s0 + $0x2a4] sm:$0xf] }
 0x165   :  { %2842 = vmatmul.bf16.gmra.mxu2 %v7412_v59 }
 0x166   :  { %2891 = vmatmul.bf16.gmra.mxu3 %v7415_v34  ;;  %2918 = vmatpush.bf16.msrb.mxu0 %v5219_v55  ;;  %v5549_v55 = vld [vmem:[%s9112_s0 + $0x2ac] sm:$0xf] }
 0x167   :  { %v7481_v59 = vor.u32 %v5549_v55, %v4292_v36 }
 0x168   :  { %v2647_v37 = vpop.f32.mrf.mxu2  ;;  %v2551_v19 = vpop.f32.mrf.mxu0 }
 0x169   :  { %v2648_v56 = vadd.f32 %v2647_v37, %v2599_v16  ;;  %v2696_v32 = vpop.f32.mrf.mxu3  ;;  %v2552_v23 = vadd.f32 %v2551_v19, %v6955_v5  ;;  %v2600_v6 = vpop.f32.mrf.mxu1  ;;  %v5283_v16 = vor.u32 %v5803_v61, %v5282_v58  ;;  %v5556_v5 = vld [vmem:[%s9112_s0 + $0x2dc] sm:$0xf0]  ;;  %v5557_v37 = vld [vmem:[%s9112_s0 + $0x2e4] sm:$0xf0]  ;;  %v7476_v58 = vor.u32 %v5548_v28, %v4284_v33  ;;  %9270 = vst [vmem:[#allocation61_spill] sm:$0xff] %v7481_v59 }
 0x16a   :  { %v7478_v61 = vor.u32 %v5557_v37, %v4290_v35  ;;  %v5402_v28 = vld [vmem:[%s9111_s1 + $0x780] sm:$0xf]  ;;  %v5833_v33 = vld [vmem:[%s9111_s1 + $0x784] sm:$0xf0] }
 0x16b   :  { %v7442_v62 = vadd.f32 %v2696_v32, %v2648_v56  ;;  %v2601_v29 = vadd.f32 %v2600_v6, %v2552_v23  ;;  %2967 = vmatpush.bf16.msrb.mxu1 %v5283_v16  ;;  %v7474_v32 = vor.u32 %v5556_v5, %v4282_v30  ;;  %9268 = vst [vmem:[#allocation59_spill] sm:$0xff] %v7476_v58  ;;  %v5785_v5 = vld [vmem:[%s9111_s1 + $0x604] sm:$0xf0] }
 0x16c   :  { %9269 = vst [vmem:[#allocation60_spill] sm:$0xff] %v7478_v61  ;;  %v5403_v55 = vor.u32 %v5833_v33, %v5402_v28  ;;  %v4348_v28 = vld [vmem:[%s9112_s0 + $0x360] sm:$0xf0]  ;;  %v4354_v33 = vld [vmem:[%s9112_s0 + $0x328] sm:$0xf] }
 0x16d   :  { %9267 = vst [vmem:[#allocation58_spill] sm:$0xff] %v7474_v32 }
 0x16e   :  { %3066 = vmatpush.bf16.msrb.mxu3 %v5403_v55  ;;  %v4356_v55 = vld [vmem:[%s9112_s0 + $0x368] sm:$0xf0] }
 0x170   :  { %v2649_v56 = vpop.f32.mrf.mxu2  ;;  %v2554_v6 = vpop.f32.mrf.mxu0 }
 0x171   :  { %v2650_v19 = vadd.f32 %v2649_v56, %v2601_v29  ;;  %v2698_v23 = vpop.f32.mrf.mxu3  ;;  %v2555_v16 = vadd.f32 %v2554_v6, %v6980_v63  ;;  %v2603_v34 = vpop.f32.mrf.mxu1  ;;  %v5338_v29 = vld [vmem:[%s9111_s1 + $0x700] sm:$0xf]  ;;  %v5817_v63 = vld [vmem:[%s9111_s1 + $0x704] sm:$0xf0] }
 0x172   :  { %v5339_v30 = vor.u32 %v5817_v63, %v5338_v29  ;;  %v5274_v29 = vld [vmem:[%s9111_s1 + $0x680] sm:$0xf]  ;;  %v5801_v63 = vld [vmem:[%s9111_s1 + $0x684] sm:$0xf0] }
 0x173   :  { %v7483_v31 = vadd.f32 %v2698_v23, %v2650_v19  ;;  %v2604_v60 = vadd.f32 %v2603_v34, %v2555_v16  ;;  %2749 = vmatmul.bf16.gmra.mxu0 %v7474_v32  ;;  %v5210_v34 = vld [vmem:[%s9111_s1 + $0x600] sm:$0xf] }
 0x174   :  { %2798 = vmatmul.bf16.gmra.mxu1 %v7476_v58  ;;  %v5211_v37 = vor.u32 %v5785_v5, %v5210_v34  ;;  %3017 = vmatpush.bf16.msrb.mxu2 %v5339_v30  ;;  %v4346_v30 = vld [vmem:[%s9112_s0 + $0x320] sm:$0xf]  ;;  %v5564_v5 = vld [vmem:[%s9112_s0 + $0x324] sm:$0xf] }
 0x175   :  { %2847 = vmatmul.bf16.gmra.mxu2 %v7478_v61 }
 0x176   :  { %2896 = vmatmul.bf16.gmra.mxu3 %v7481_v59  ;;  %2919 = vmatpush.bf16.msrb.mxu0 %v5211_v37  ;;  %v5565_v37 = vld [vmem:[%s9112_s0 + $0x32c] sm:$0xf] }
 0x177   :  { %v7547_v61 = vor.u32 %v5565_v37, %v4356_v55 }
 0x178   :  { %v2652_v35 = vpop.f32.mrf.mxu2  ;;  %v2556_v19 = vpop.f32.mrf.mxu0 }
 0x179   :  { %v2653_v36 = vadd.f32 %v2652_v35, %v2604_v60  ;;  %v2701_v56 = vpop.f32.mrf.mxu3  ;;  %v2557_v23 = vadd.f32 %v2556_v19, %v7021_v2  ;;  %v2605_v6 = vpop.f32.mrf.mxu1  ;;  %v5275_v60 = vor.u32 %v5801_v63, %v5274_v29  ;;  %v5572_v2 = vld [vmem:[%s9112_s0 + $0x35c] sm:$0xf0]  ;;  %v5573_v35 = vld [vmem:[%s9112_s0 + $0x364] sm:$0xf0]  ;;  %v7542_v29 = vor.u32 %v5564_v5, %v4348_v28  ;;  %9274 = vst [vmem:[#allocation65_spill] sm:$0xff] %v7547_v61 }
 0x17a   :  { %v7544_v63 = vor.u32 %v5573_v35, %v4354_v33  ;;  %v5654_v5 = vld [vmem:[%s9111_s1 + $0x1f4] sm:$0xf]  ;;  %v4692_v28 = vld [vmem:[%s9111_s1 + $0x1f8] sm:$0xf0] }
 0x17b   :  { %v7508_v16 = vadd.f32 %v2701_v56, %v2653_v36  ;;  %v2606_v34 = vadd.f32 %v2605_v6, %v2557_v23  ;;  %2968 = vmatpush.bf16.msrb.mxu1 %v5275_v60  ;;  %v7540_v56 = vor.u32 %v5572_v2, %v4346_v30  ;;  %9272 = vst [vmem:[#allocation63_spill] sm:$0xff] %v7542_v29  ;;  %v4500_v2 = vld [vmem:[%s9111_s1 + $0x78] sm:$0xf0] }
 0x17c   :  { %9273 = vst [vmem:[#allocation64_spill] sm:$0xff] %v7544_v63  ;;  %v4695_v37 = vor.u32 %v5654_v5, %v4692_v28  ;;  %v4412_v5 = vld [vmem:[%s9112_s0 + $0x3e0] sm:$0xf0]  ;;  %v4418_v28 = vld [vmem:[%s9112_s0 + $0x3a8] sm:$0xf] }
 0x17d   :  { %9271 = vst [vmem:[#allocation62_spill] sm:$0xff] %v7540_v56 }
 0x17e   :  { %3255 = vmatpush.bf16.msra.mxu3 %v4695_v37  ;;  %v4420_v37 = vld [vmem:[%s9112_s0 + $0x3e8] sm:$0xf0] }
 0x180   :  { %v2654_v36 = vpop.f32.mrf.mxu2  ;;  %v2559_v6 = vpop.f32.mrf.mxu0 }
 0x181   :  { %v2655_v19 = vadd.f32 %v2654_v36, %v2606_v34  ;;  %v2703_v23 = vpop.f32.mrf.mxu3  ;;  %v2560_v60 = vadd.f32 %v2559_v6, %v7046_v3  ;;  %v2608_v59 = vpop.f32.mrf.mxu1  ;;  %v5638_v34 = vld [vmem:[%s9111_s1 + $0x174] sm:$0xf]  ;;  %v4628_v3 = vld [vmem:[%s9111_s1 + $0x178] sm:$0xf0] }
 0x182   :  { %v4631_v30 = vor.u32 %v5638_v34, %v4628_v3  ;;  %v5622_v34 = vld [vmem:[%s9111_s1 + $0xf4] sm:$0xf]  ;;  %v4564_v3 = vld [vmem:[%s9111_s1 + $0xf8] sm:$0xf0] }
 0x183   :  { %v7549_v58 = vadd.f32 %v2703_v23, %v2655_v19  ;;  %v2609_v32 = vadd.f32 %v2608_v59, %v2560_v60  ;;  %2754 = vmatmul.bf16.gmra.mxu0 %v7540_v56  ;;  %v5606_v59 = vld [vmem:[%s9111_s1 + $0x74] sm:$0xf] }
 0x184   :  { %2803 = vmatmul.bf16.gmra.mxu1 %v7542_v29  ;;  %v4503_v35 = vor.u32 %v5606_v59, %v4500_v2  ;;  %3206 = vmatpush.bf16.msra.mxu2 %v4631_v30  ;;  %v4410_v30 = vld [vmem:[%s9112_s0 + $0x3a0] sm:$0xf]  ;;  %v5580_v2 = vld [vmem:[%s9112_s0 + $0x3a4] sm:$0xf] }
 0x185   :  { %2852 = vmatmul.bf16.gmra.mxu2 %v7544_v63 }
 0x186   :  { %2901 = vmatmul.bf16.gmra.mxu3 %v7547_v61  ;;  %3108 = vmatpush.bf16.msra.mxu0 %v4503_v35  ;;  %v5581_v35 = vld [vmem:[%s9112_s0 + $0x3ac] sm:$0xf] }
 0x187   :  { %v7613_v63 = vor.u32 %v5581_v35, %v4420_v37 }
 0x188   :  { %v2657_v33 = vpop.f32.mrf.mxu2  ;;  %v2561_v19 = vpop.f32.mrf.mxu0 }
 0x189   :  { %v2658_v55 = vadd.f32 %v2657_v33, %v2609_v32  ;;  %v2706_v36 = vpop.f32.mrf.mxu3  ;;  %v2562_v23 = vadd.f32 %v2561_v19, %v7087_v22  ;;  %v2610_v6 = vpop.f32.mrf.mxu1  ;;  %v4567_v32 = vor.u32 %v5622_v34, %v4564_v3  ;;  %v5588_v22 = vld [vmem:[%s9112_s0 + $0x3dc] sm:$0xf0]  ;;  %v5589_v33 = vld [vmem:[%s9112_s0 + $0x3e4] sm:$0xf0]  ;;  %v7608_v34 = vor.u32 %v5580_v2, %v4412_v5  ;;  %9278 = vst [vmem:[#allocation69_spill] sm:$0xff] %v7613_v63 }
 0x18a   :  { %v7610_v3 = vor.u32 %v5589_v33, %v4418_v28  ;;  %v5652_v2 = vld [vmem:[%s9111_s1 + $0x1e4] sm:$0xf]  ;;  %v4684_v5 = vld [vmem:[%s9111_s1 + $0x1e8] sm:$0xf0] }
 0x18b   :  { %v7574_v60 = vadd.f32 %v2706_v36, %v2658_v55  ;;  %v2611_v59 = vadd.f32 %v2610_v6, %v2562_v23  ;;  %3157 = vmatpush.bf16.msra.mxu1 %v4567_v32  ;;  %v7606_v36 = vor.u32 %v5588_v22, %v4410_v30  ;;  %9276 = vst [vmem:[#allocation67_spill] sm:$0xff] %v7608_v34  ;;  %v4492_v22 = vld [vmem:[%s9111_s1 + $0x68] sm:$0xf0] }
 0x18c   :  { %9277 = vst [vmem:[#allocation68_spill] sm:$0xff] %v7610_v3  ;;  %v4687_v35 = vor.u32 %v5652_v2, %v4684_v5  ;;  %v3980_v2 = vld [vmem:[%s9112_s0 + $0x70] sm:$0xf0]  ;;  %v3986_v5 = vld [vmem:[%s9112_s0 + $0x38] sm:$0xf] }
 0x18d   :  { %9275 = vst [vmem:[#allocation66_spill] sm:$0xff] %v7606_v36 }
 0x18e   :  { %3256 = vmatpush.bf16.msra.mxu3 %v4687_v35  ;;  %v3988_v35 = vld [vmem:[%s9112_s0 + $0x78] sm:$0xf0] }
 0x190   :  { %v2659_v55 = vpop.f32.mrf.mxu2  ;;  %v2564_v6 = vpop.f32.mrf.mxu0 }
 0x191   :  { %v2660_v19 = vadd.f32 %v2659_v55, %v2611_v59  ;;  %v2708_v23 = vpop.f32.mrf.mxu3  ;;  %v2565_v32 = vadd.f32 %v2564_v6, %v7112_v7  ;;  %v2613_v61 = vpop.f32.mrf.mxu1  ;;  %v5636_v59 = vld [vmem:[%s9111_s1 + $0x164] sm:$0xf]  ;;  %v4620_v7 = vld [vmem:[%s9111_s1 + $0x168] sm:$0xf0] }
 0x192   :  { %v4623_v30 = vor.u32 %v5636_v59, %v4620_v7  ;;  %v5620_v59 = vld [vmem:[%s9111_s1 + $0xe4] sm:$0xf]  ;;  %v4556_v7 = vld [vmem:[%s9111_s1 + $0xe8] sm:$0xf0] }
 0x193   :  { %v7615_v29 = vadd.f32 %v2708_v23, %v2660_v19  ;;  %v2614_v56 = vadd.f32 %v2613_v61, %v2565_v32  ;;  %2759 = vmatmul.bf16.gmra.mxu0 %v7606_v36  ;;  %v5604_v61 = vld [vmem:[%s9111_s1 + $0x64] sm:$0xf] }
 0x194   :  { %2808 = vmatmul.bf16.gmra.mxu1 %v7608_v34  ;;  %v4495_v33 = vor.u32 %v5604_v61, %v4492_v22  ;;  %3207 = vmatpush.bf16.msra.mxu2 %v4623_v30  ;;  %v3978_v30 = vld [vmem:[%s9112_s0 + $0x30] sm:$0xf]  ;;  %v5470_v22 = vld [vmem:[%s9112_s0 + $0x34] sm:$0xf] }
 0x195   :  { %2857 = vmatmul.bf16.gmra.mxu2 %v7610_v3 }
 0x196   :  { %2906 = vmatmul.bf16.gmra.mxu3 %v7613_v63  ;;  %3109 = vmatpush.bf16.msra.mxu0 %v4495_v33  ;;  %v5471_v33 = vld [vmem:[%s9112_s0 + $0x3c] sm:$0xf] }
 0x197   :  { %v7679_v3 = vor.u32 %v5471_v33, %v3988_v35 }
 0x198   :  { %v2662_v28 = vpop.f32.mrf.mxu2  ;;  %v2566_v19 = vpop.f32.mrf.mxu0 }
 0x199   :  { %v2663_v37 = vadd.f32 %v2662_v28, %v2614_v56  ;;  %v2711_v55 = vpop.f32.mrf.mxu3  ;;  %v2567_v23 = vadd.f32 %v2566_v19, %v7153_v1  ;;  %v2615_v6 = vpop.f32.mrf.mxu1  ;;  %v4559_v56 = vor.u32 %v5620_v59, %v4556_v7  ;;  %v5478_v1 = vld [vmem:[%s9112_s0 + $0x6c] sm:$0xf0]  ;;  %v5479_v28 = vld [vmem:[%s9112_s0 + $0x74] sm:$0xf0]  ;;  %v7674_v59 = vor.u32 %v5470_v22, %v3980_v2  ;;  %9282 = vst [vmem:[#allocation73_spill] sm:$0xff] %v7679_v3 }
 0x19a   :  { %v7676_v7 = vor.u32 %v5479_v28, %v3986_v5  ;;  %v5650_v22 = vld [vmem:[%s9111_s1 + $0x1d4] sm:$0xf]  ;;  %v4676_v2 = vld [vmem:[%s9111_s1 + $0x1d8] sm:$0xf0] }
 0x19b   :  { %v7640_v32 = vadd.f32 %v2711_v55, %v2663_v37  ;;  %v2616_v61 = vadd.f32 %v2615_v6, %v2567_v23  ;;  %3158 = vmatpush.bf16.msra.mxu1 %v4559_v56  ;;  %v7672_v55 = vor.u32 %v5478_v1, %v3978_v30  ;;  %9280 = vst [vmem:[#allocation71_spill] sm:$0xff] %v7674_v59  ;;  %v4484_v1 = vld [vmem:[%s9111_s1 + $0x58] sm:$0xf0] }
 0x19c   :  { %9281 = vst [vmem:[#allocation72_spill] sm:$0xff] %v7676_v7  ;;  %v4679_v33 = vor.u32 %v5650_v22, %v4676_v2  ;;  %v4044_v22 = vld [vmem:[%s9112_s0 + $0xf0] sm:$0xf0]  ;;  %v4050_v2 = vld [vmem:[%s9112_s0 + $0xb8] sm:$0xf] }
 0x19d   :  { %9279 = vst [vmem:[#allocation70_spill] sm:$0xff] %v7672_v55 }
 0x19e   :  { %3257 = vmatpush.bf16.msra.mxu3 %v4679_v33  ;;  %v4052_v33 = vld [vmem:[%s9112_s0 + $0xf8] sm:$0xf0] }
 0x1a0   :  { %v2664_v37 = vpop.f32.mrf.mxu2  ;;  %v2725_v6 = vpop.f32.mrf.mxu0 }
 0x1a1   :  { %v2665_v19 = vadd.f32 %v2664_v37, %v2616_v61  ;;  %v2713_v23 = vpop.f32.mrf.mxu3  ;;  %v2726_v56 = vadd.f32 %v2725_v6, %v7178_v21  ;;  %v2774_v63 = vpop.f32.mrf.mxu1  ;;  %v5634_v61 = vld [vmem:[%s9111_s1 + $0x154] sm:$0xf]  ;;  %v4612_v21 = vld [vmem:[%s9111_s1 + $0x158] sm:$0xf0] }
 0x1a2   :  { %v4615_v30 = vor.u32 %v5634_v61, %v4612_v21  ;;  %v5618_v61 = vld [vmem:[%s9111_s1 + $0xd4] sm:$0xf]  ;;  %v4548_v21 = vld [vmem:[%s9111_s1 + $0xd8] sm:$0xf0] }
 0x1a3   :  { %v7681_v34 = vadd.f32 %v2713_v23, %v2665_v19  ;;  %v2775_v36 = vadd.f32 %v2774_v63, %v2726_v56  ;;  %2920 = vmatmul.bf16.vlgmr.msrb.gmra.mxu0 %v7672_v55  ;;  %v5602_v63 = vld [vmem:[%s9111_s1 + $0x54] sm:$0xf] }
 0x1a4   :  { %2969 = vmatmul.bf16.vlgmr.msrb.gmra.mxu1 %v7674_v59  ;;  %v4487_v28 = vor.u32 %v5602_v63, %v4484_v1  ;;  %3208 = vmatpush.bf16.msra.mxu2 %v4615_v30  ;;  %v4042_v30 = vld [vmem:[%s9112_s0 + $0xb0] sm:$0xf]  ;;  %v5486_v1 = vld [vmem:[%s9112_s0 + $0xb4] sm:$0xf] }
 0x1a5   :  { %3018 = vmatmul.bf16.vlgmr.msrb.gmra.mxu2 %v7676_v7 }
 0x1a6   :  { %3067 = vmatmul.bf16.vlgmr.msrb.gmra.mxu3 %v7679_v3  ;;  %3110 = vmatpush.bf16.msra.mxu0 %v4487_v28  ;;  %v5487_v28 = vld [vmem:[%s9112_s0 + $0xbc] sm:$0xf] }
 0x1a7   :  { %v7745_v7 = vor.u32 %v5487_v28, %v4052_v33 }
 0x1a8   :  { %v2823_v5 = vpop.f32.mrf.mxu2  ;;  %v2727_v19 = vpop.f32.mrf.mxu0 }
 0x1a9   :  { %v2824_v35 = vadd.f32 %v2823_v5, %v2775_v36  ;;  %v2872_v37 = vpop.f32.mrf.mxu3  ;;  %v2728_v23 = vadd.f32 %v2727_v19, %v7219_v39  ;;  %v2776_v6 = vpop.f32.mrf.mxu1  ;;  %v4551_v36 = vor.u32 %v5618_v61, %v4548_v21  ;;  %v5494_v39 = vld [vmem:[%s9112_s0 + $0xec] sm:$0xf0]  ;;  %v5495_v5 = vld [vmem:[%s9112_s0 + $0xf4] sm:$0xf0]  ;;  %v7740_v61 = vor.u32 %v5486_v1, %v4044_v22  ;;  %9286 = vst [vmem:[#allocation77_spill] sm:$0xff] %v7745_v7 }
 0x1aa   :  { %v7742_v21 = vor.u32 %v5495_v5, %v4050_v2  ;;  %v5648_v1 = vld [vmem:[%s9111_s1 + $0x1c4] sm:$0xf]  ;;  %v4668_v22 = vld [vmem:[%s9111_s1 + $0x1c8] sm:$0xf0] }
 0x1ab   :  { %v7706_v56 = vadd.f32 %v2872_v37, %v2824_v35  ;;  %v2777_v63 = vadd.f32 %v2776_v6, %v2728_v23  ;;  %3159 = vmatpush.bf16.msra.mxu1 %v4551_v36  ;;  %v7738_v37 = vor.u32 %v5494_v39, %v4042_v30  ;;  %9284 = vst [vmem:[#allocation75_spill] sm:$0xff] %v7740_v61  ;;  %v4476_v39 = vld [vmem:[%s9111_s1 + $0x48] sm:$0xf0] }
 0x1ac   :  { %9285 = vst [vmem:[#allocation76_spill] sm:$0xff] %v7742_v21  ;;  %v4671_v28 = vor.u32 %v5648_v1, %v4668_v22  ;;  %v4108_v1 = vld [vmem:[%s9112_s0 + $0x170] sm:$0xf0]  ;;  %v4114_v22 = vld [vmem:[%s9112_s0 + $0x138] sm:$0xf] }
 0x1ad   :  { %9283 = vst [vmem:[#allocation74_spill] sm:$0xff] %v7738_v37 }
 0x1ae   :  { %3258 = vmatpush.bf16.msra.mxu3 %v4671_v28  ;;  %v4116_v28 = vld [vmem:[%s9112_s0 + $0x178] sm:$0xf0] }
 0x1b0   :  { %v2825_v35 = vpop.f32.mrf.mxu2  ;;  %v2730_v6 = vpop.f32.mrf.mxu0 }
 0x1b1   :  { %v2826_v19 = vadd.f32 %v2825_v35, %v2777_v63  ;;  %v2874_v23 = vpop.f32.mrf.mxu3  ;;  %v2731_v36 = vadd.f32 %v2730_v6, %v7244_v20  ;;  %v2779_v3 = vpop.f32.mrf.mxu1  ;;  %v5632_v63 = vld [vmem:[%s9111_s1 + $0x144] sm:$0xf]  ;;  %v4604_v20 = vld [vmem:[%s9111_s1 + $0x148] sm:$0xf0] }
 0x1b2   :  { %v4607_v30 = vor.u32 %v5632_v63, %v4604_v20  ;;  %v5616_v63 = vld [vmem:[%s9111_s1 + $0xc4] sm:$0xf]  ;;  %v4540_v20 = vld [vmem:[%s9111_s1 + $0xc8] sm:$0xf0] }
 0x1b3   :  { %v7747_v59 = vadd.f32 %v2874_v23, %v2826_v19  ;;  %v2780_v55 = vadd.f32 %v2779_v3, %v2731_v36  ;;  %2925 = vmatmul.bf16.gmra.mxu0 %v7738_v37  ;;  %v5600_v3 = vld [vmem:[%s9111_s1 + $0x44] sm:$0xf] }
 0x1b4   :  { %2974 = vmatmul.bf16.gmra.mxu1 %v7740_v61  ;;  %v4479_v5 = vor.u32 %v5600_v3, %v4476_v39  ;;  %3209 = vmatpush.bf16.msra.mxu2 %v4607_v30  ;;  %v4106_v30 = vld [vmem:[%s9112_s0 + $0x130] sm:$0xf]  ;;  %v5502_v39 = vld [vmem:[%s9112_s0 + $0x134] sm:$0xf] }
 0x1b5   :  { %3023 = vmatmul.bf16.gmra.mxu2 %v7742_v21 }
 0x1b6   :  { %3072 = vmatmul.bf16.gmra.mxu3 %v7745_v7  ;;  %3111 = vmatpush.bf16.msra.mxu0 %v4479_v5  ;;  %v5503_v5 = vld [vmem:[%s9112_s0 + $0x13c] sm:$0xf] }
 0x1b7   :  { %v7811_v21 = vor.u32 %v5503_v5, %v4116_v28 }
 0x1b8   :  { %v2828_v2 = vpop.f32.mrf.mxu2  ;;  %v2732_v19 = vpop.f32.mrf.mxu0 }
 0x1b9   :  { %v2829_v33 = vadd.f32 %v2828_v2, %v2780_v55  ;;  %v2877_v35 = vpop.f32.mrf.mxu3  ;;  %v2733_v23 = vadd.f32 %v2732_v19, %v7285_v38  ;;  %v2781_v6 = vpop.f32.mrf.mxu1  ;;  %v4543_v55 = vor.u32 %v5616_v63, %v4540_v20  ;;  %v5510_v38 = vld [vmem:[%s9112_s0 + $0x16c] sm:$0xf0]  ;;  %v5511_v2 = vld [vmem:[%s9112_s0 + $0x174] sm:$0xf0]  ;;  %v7806_v63 = vor.u32 %v5502_v39, %v4108_v1  ;;  %9290 = vst [vmem:[#allocation81_spill] sm:$0xff] %v7811_v21 }
 0x1ba   :  { %v7808_v20 = vor.u32 %v5511_v2, %v4114_v22  ;;  %v5646_v39 = vld [vmem:[%s9111_s1 + $0x1b4] sm:$0xf]  ;;  %v4660_v1 = vld [vmem:[%s9111_s1 + $0x1b8] sm:$0xf0] }
 0x1bb   :  { %v7772_v36 = vadd.f32 %v2877_v35, %v2829_v33  ;;  %v2782_v3 = vadd.f32 %v2781_v6, %v2733_v23  ;;  %3160 = vmatpush.bf16.msra.mxu1 %v4543_v55  ;;  %v7804_v35 = vor.u32 %v5510_v38, %v4106_v30  ;;  %9288 = vst [vmem:[#allocation79_spill] sm:$0xff] %v7806_v63  ;;  %v4468_v38 = vld [vmem:[%s9111_s1 + $0x38] sm:$0xf0] }
 0x1bc   :  { %9289 = vst [vmem:[#allocation80_spill] sm:$0xff] %v7808_v20  ;;  %v4663_v5 = vor.u32 %v5646_v39, %v4660_v1  ;;  %v4172_v39 = vld [vmem:[%s9112_s0 + $0x1f0] sm:$0xf0]  ;;  %v4178_v1 = vld [vmem:[%s9112_s0 + $0x1b8] sm:$0xf] }
 0x1bd   :  { %9287 = vst [vmem:[#allocation78_spill] sm:$0xff] %v7804_v35 }
 0x1be   :  { %3259 = vmatpush.bf16.msra.mxu3 %v4663_v5  ;;  %v4180_v5 = vld [vmem:[%s9112_s0 + $0x1f8] sm:$0xf0] }
 0x1c0   :  { %v2830_v33 = vpop.f32.mrf.mxu2  ;;  %v2735_v6 = vpop.f32.mrf.mxu0 }
 0x1c1   :  { %v2831_v19 = vadd.f32 %v2830_v33, %v2782_v3  ;;  %v2879_v23 = vpop.f32.mrf.mxu3  ;;  %v2736_v55 = vadd.f32 %v2735_v6, %v7310_v0  ;;  %v2784_v7 = vpop.f32.mrf.mxu1  ;;  %v5630_v3 = vld [vmem:[%s9111_s1 + $0x134] sm:$0xf]  ;;  %v4596_v0 = vld [vmem:[%s9111_s1 + $0x138] sm:$0xf0] }
 0x1c2   :  { %v4599_v30 = vor.u32 %v5630_v3, %v4596_v0  ;;  %v5614_v3 = vld [vmem:[%s9111_s1 + $0xb4] sm:$0xf]  ;;  %v4532_v0 = vld [vmem:[%s9111_s1 + $0xb8] sm:$0xf0] }
 0x1c3   :  { %v7813_v61 = vadd.f32 %v2879_v23, %v2831_v19  ;;  %v2785_v37 = vadd.f32 %v2784_v7, %v2736_v55  ;;  %2930 = vmatmul.bf16.gmra.mxu0 %v7804_v35  ;;  %v5598_v7 = vld [vmem:[%s9111_s1 + $0x34] sm:$0xf] }
 0x1c4   :  { %2979 = vmatmul.bf16.gmra.mxu1 %v7806_v63  ;;  %v4471_v2 = vor.u32 %v5598_v7, %v4468_v38  ;;  %3210 = vmatpush.bf16.msra.mxu2 %v4599_v30  ;;  %v4170_v30 = vld [vmem:[%s9112_s0 + $0x1b0] sm:$0xf]  ;;  %v5518_v38 = vld [vmem:[%s9112_s0 + $0x1b4] sm:$0xf] }
 0x1c5   :  { %3028 = vmatmul.bf16.gmra.mxu2 %v7808_v20 }
 0x1c6   :  { %3077 = vmatmul.bf16.gmra.mxu3 %v7811_v21  ;;  %3112 = vmatpush.bf16.msra.mxu0 %v4471_v2  ;;  %v5519_v2 = vld [vmem:[%s9112_s0 + $0x1bc] sm:$0xf] }
 0x1c7   :  { %v7877_v20 = vor.u32 %v5519_v2, %v4180_v5 }
 0x1c8   :  { %v2833_v22 = vpop.f32.mrf.mxu2  ;;  %v2737_v19 = vpop.f32.mrf.mxu0 }
 0x1c9   :  { %v2834_v28 = vadd.f32 %v2833_v22, %v2785_v37  ;;  %v2882_v33 = vpop.f32.mrf.mxu3  ;;  %v2738_v23 = vadd.f32 %v2737_v19, %v7351_v18  ;;  %v2786_v6 = vpop.f32.mrf.mxu1  ;;  %v4535_v37 = vor.u32 %v5614_v3, %v4532_v0  ;;  %v5526_v18 = vld [vmem:[%s9112_s0 + $0x1ec] sm:$0xf0]  ;;  %v5527_v22 = vld [vmem:[%s9112_s0 + $0x1f4] sm:$0xf0]  ;;  %v7872_v3 = vor.u32 %v5518_v38, %v4172_v39  ;;  %9294 = vst [vmem:[#allocation85_spill] sm:$0xff] %v7877_v20 }
 0x1ca   :  { %v7874_v0 = vor.u32 %v5527_v22, %v4178_v1  ;;  %v5644_v38 = vld [vmem:[%s9111_s1 + $0x1a4] sm:$0xf]  ;;  %v4652_v39 = vld [vmem:[%s9111_s1 + $0x1a8] sm:$0xf0] }
 0x1cb   :  { %v7838_v55 = vadd.f32 %v2882_v33, %v2834_v28  ;;  %v2787_v7 = vadd.f32 %v2786_v6, %v2738_v23  ;;  %3161 = vmatpush.bf16.msra.mxu1 %v4535_v37  ;;  %v7870_v33 = vor.u32 %v5526_v18, %v4170_v30  ;;  %9292 = vst [vmem:[#allocation83_spill] sm:$0xff] %v7872_v3  ;;  %v4460_v18 = vld [vmem:[%s9111_s1 + $0x28] sm:$0xf0] }
 0x1cc   :  { %9293 = vst [vmem:[#allocation84_spill] sm:$0xff] %v7874_v0  ;;  %v4655_v2 = vor.u32 %v5644_v38, %v4652_v39  ;;  %v4236_v38 = vld [vmem:[%s9112_s0 + $0x270] sm:$0xf0]  ;;  %v4242_v39 = vld [vmem:[%s9112_s0 + $0x238] sm:$0xf] }
 0x1cd   :  { %9291 = vst [vmem:[#allocation82_spill] sm:$0xff] %v7870_v33 }
 0x1ce   :  { %3260 = vmatpush.bf16.msra.mxu3 %v4655_v2  ;;  %v4244_v2 = vld [vmem:[%s9112_s0 + $0x278] sm:$0xf0] }
 0x1d0   :  { %v2835_v28 = vpop.f32.mrf.mxu2  ;;  %v2740_v6 = vpop.f32.mrf.mxu0 }
 0x1d1   :  { %v2836_v19 = vadd.f32 %v2835_v28, %v2787_v7  ;;  %v2884_v23 = vpop.f32.mrf.mxu3  ;;  %v2741_v37 = vadd.f32 %v2740_v6, %v7376_v4  ;;  %v2789_v21 = vpop.f32.mrf.mxu1  ;;  %v5628_v7 = vld [vmem:[%s9111_s1 + $0x124] sm:$0xf]  ;;  %v4588_v4 = vld [vmem:[%s9111_s1 + $0x128] sm:$0xf0] }
 0x1d2   :  { %v4591_v30 = vor.u32 %v5628_v7, %v4588_v4  ;;  %v5612_v7 = vld [vmem:[%s9111_s1 + $0xa4] sm:$0xf]  ;;  %v4524_v4 = vld [vmem:[%s9111_s1 + $0xa8] sm:$0xf0] }
 0x1d3   :  { %v7879_v63 = vadd.f32 %v2884_v23, %v2836_v19  ;;  %v2790_v35 = vadd.f32 %v2789_v21, %v2741_v37  ;;  %2935 = vmatmul.bf16.gmra.mxu0 %v7870_v33  ;;  %v5596_v21 = vld [vmem:[%s9111_s1 + $0x24] sm:$0xf] }
 0x1d4   :  { %2984 = vmatmul.bf16.gmra.mxu1 %v7872_v3  ;;  %v4463_v22 = vor.u32 %v5596_v21, %v4460_v18  ;;  %3211 = vmatpush.bf16.msra.mxu2 %v4591_v30  ;;  %v4234_v30 = vld [vmem:[%s9112_s0 + $0x230] sm:$0xf]  ;;  %v5534_v18 = vld [vmem:[%s9112_s0 + $0x234] sm:$0xf] }
 0x1d5   :  { %3033 = vmatmul.bf16.gmra.mxu2 %v7874_v0 }
 0x1d6   :  { %3082 = vmatmul.bf16.gmra.mxu3 %v7877_v20  ;;  %3113 = vmatpush.bf16.msra.mxu0 %v4463_v22  ;;  %v5535_v22 = vld [vmem:[%s9112_s0 + $0x23c] sm:$0xf] }
 0x1d7   :  { %v7943_v0 = vor.u32 %v5535_v22, %v4244_v2 }
 0x1d8   :  { %v2838_v1 = vpop.f32.mrf.mxu2  ;;  %v2742_v19 = vpop.f32.mrf.mxu0 }
 0x1d9   :  { %v2839_v5 = vadd.f32 %v2838_v1, %v2790_v35  ;;  %v2887_v28 = vpop.f32.mrf.mxu3  ;;  %v2743_v23 = vadd.f32 %v2742_v19, %v7417_v17  ;;  %v2791_v6 = vpop.f32.mrf.mxu1  ;;  %v4527_v35 = vor.u32 %v5612_v7, %v4524_v4  ;;  %v5542_v17 = vld [vmem:[%s9112_s0 + $0x26c] sm:$0xf0]  ;;  %v5543_v1 = vld [vmem:[%s9112_s0 + $0x274] sm:$0xf0]  ;;  %v7938_v7 = vor.u32 %v5534_v18, %v4236_v38  ;;  %9298 = vst [vmem:[#allocation89_spill] sm:$0xff] %v7943_v0 }
 0x1da   :  { %v7940_v4 = vor.u32 %v5543_v1, %v4242_v39  ;;  %v5642_v18 = vld [vmem:[%s9111_s1 + $0x194] sm:$0xf]  ;;  %v4644_v38 = vld [vmem:[%s9111_s1 + $0x198] sm:$0xf0] }
 0x1db   :  { %v7904_v37 = vadd.f32 %v2887_v28, %v2839_v5  ;;  %v2792_v21 = vadd.f32 %v2791_v6, %v2743_v23  ;;  %3162 = vmatpush.bf16.msra.mxu1 %v4527_v35  ;;  %v7936_v28 = vor.u32 %v5542_v17, %v4234_v30  ;;  %9296 = vst [vmem:[#allocation87_spill] sm:$0xff] %v7938_v7  ;;  %v4452_v17 = vld [vmem:[%s9111_s1 + $0x18] sm:$0xf0] }
 0x1dc   :  { %9297 = vst [vmem:[#allocation88_spill] sm:$0xff] %v7940_v4  ;;  %v4647_v22 = vor.u32 %v5642_v18, %v4644_v38  ;;  %v4300_v18 = vld [vmem:[%s9112_s0 + $0x2f0] sm:$0xf0]  ;;  %v4306_v38 = vld [vmem:[%s9112_s0 + $0x2b8] sm:$0xf] }
 0x1dd   :  { %9295 = vst [vmem:[#allocation86_spill] sm:$0xff] %v7936_v28 }
 0x1de   :  { %3261 = vmatpush.bf16.msra.mxu3 %v4647_v22  ;;  %v4308_v22 = vld [vmem:[%s9112_s0 + $0x2f8] sm:$0xf0] }
 0x1e0   :  { %v2840_v5 = vpop.f32.mrf.mxu2  ;;  %v2745_v6 = vpop.f32.mrf.mxu0 }
 0x1e1   :  { %v2841_v19 = vadd.f32 %v2840_v5, %v2792_v21  ;;  %v2889_v23 = vpop.f32.mrf.mxu3  ;;  %v2746_v35 = vadd.f32 %v2745_v6, %v7442_v62  ;;  %v2794_v20 = vpop.f32.mrf.mxu1  ;;  %v5626_v21 = vld [vmem:[%s9111_s1 + $0x114] sm:$0xf]  ;;  %v4580_v62 = vld [vmem:[%s9111_s1 + $0x118] sm:$0xf0] }
 0x1e2   :  { %v4583_v30 = vor.u32 %v5626_v21, %v4580_v62  ;;  %v5610_v21 = vld [vmem:[%s9111_s1 + $0x94] sm:$0xf]  ;;  %v4516_v62 = vld [vmem:[%s9111_s1 + $0x98] sm:$0xf0] }
 0x1e3   :  { %v7945_v3 = vadd.f32 %v2889_v23, %v2841_v19  ;;  %v2795_v33 = vadd.f32 %v2794_v20, %v2746_v35  ;;  %2940 = vmatmul.bf16.gmra.mxu0 %v7936_v28  ;;  %v5594_v20 = vld [vmem:[%s9111_s1 + $0x14] sm:$0xf] }
 0x1e4   :  { %2989 = vmatmul.bf16.gmra.mxu1 %v7938_v7  ;;  %v4455_v1 = vor.u32 %v5594_v20, %v4452_v17  ;;  %3212 = vmatpush.bf16.msra.mxu2 %v4583_v30  ;;  %v4298_v30 = vld [vmem:[%s9112_s0 + $0x2b0] sm:$0xf]  ;;  %v5550_v17 = vld [vmem:[%s9112_s0 + $0x2b4] sm:$0xf] }
 0x1e5   :  { %3038 = vmatmul.bf16.gmra.mxu2 %v7940_v4 }
 0x1e6   :  { %3087 = vmatmul.bf16.gmra.mxu3 %v7943_v0  ;;  %3114 = vmatpush.bf16.msra.mxu0 %v4455_v1  ;;  %v5551_v1 = vld [vmem:[%s9112_s0 + $0x2bc] sm:$0xf] }
 0x1e7   :  { %v8009_v4 = vor.u32 %v5551_v1, %v4308_v22 }
 0x1e8   :  { %v2843_v39 = vpop.f32.mrf.mxu2  ;;  %v2747_v19 = vpop.f32.mrf.mxu0 }
 0x1e9   :  { %v2844_v2 = vadd.f32 %v2843_v39, %v2795_v33  ;;  %v2892_v5 = vpop.f32.mrf.mxu3  ;;  %v2748_v23 = vadd.f32 %v2747_v19, %v7483_v31  ;;  %v2796_v6 = vpop.f32.mrf.mxu1  ;;  %v4519_v33 = vor.u32 %v5610_v21, %v4516_v62  ;;  %v5558_v31 = vld [vmem:[%s9112_s0 + $0x2ec] sm:$0xf0]  ;;  %v5559_v39 = vld [vmem:[%s9112_s0 + $0x2f4] sm:$0xf0]  ;;  %v8004_v21 = vor.u32 %v5550_v17, %v4300_v18  ;;  %9302 = vst [vmem:[#allocation93_spill] sm:$0xff] %v8009_v4 }
 0x1ea   :  { %v8006_v62 = vor.u32 %v5559_v39, %v4306_v38  ;;  %v5640_v17 = vld [vmem:[%s9111_s1 + $0x184] sm:$0xf]  ;;  %v4636_v18 = vld [vmem:[%s9111_s1 + $0x188] sm:$0xf0] }
 0x1eb   :  { %v7970_v35 = vadd.f32 %v2892_v5, %v2844_v2  ;;  %v2797_v20 = vadd.f32 %v2796_v6, %v2748_v23  ;;  %3163 = vmatpush.bf16.msra.mxu1 %v4519_v33  ;;  %v8002_v5 = vor.u32 %v5558_v31, %v4298_v30  ;;  %9300 = vst [vmem:[#allocation91_spill] sm:$0xff] %v8004_v21  ;;  %v4444_v31 = vld [vmem:[%s9111_s1 + $0x8] sm:$0xf0] }
 0x1ec   :  { %9301 = vst [vmem:[#allocation92_spill] sm:$0xff] %v8006_v62  ;;  %v4639_v1 = vor.u32 %v5640_v17, %v4636_v18  ;;  %v4364_v17 = vld [vmem:[%s9112_s0 + $0x370] sm:$0xf0]  ;;  %v4370_v18 = vld [vmem:[%s9112_s0 + $0x338] sm:$0xf] }
 0x1ed   :  { %9299 = vst [vmem:[#allocation90_spill] sm:$0xff] %v8002_v5 }
 0x1ee   :  { %3262 = vmatpush.bf16.msra.mxu3 %v4639_v1  ;;  %v4372_v1 = vld [vmem:[%s9112_s0 + $0x378] sm:$0xf0] }
 0x1f0   :  { %v2845_v2 = vpop.f32.mrf.mxu2  ;;  %v2750_v6 = vpop.f32.mrf.mxu0 }
 0x1f1   :  { %v2846_v19 = vadd.f32 %v2845_v2, %v2797_v20  ;;  %v2894_v23 = vpop.f32.mrf.mxu3  ;;  %v2751_v33 = vadd.f32 %v2750_v6, %v7508_v16  ;;  %v2799_v0 = vpop.f32.mrf.mxu1  ;;  %v5624_v20 = vld [vmem:[%s9111_s1 + $0x104] sm:$0xf]  ;;  %v4572_v16 = vld [vmem:[%s9111_s1 + $0x108] sm:$0xf0] }
 0x1f2   :  { %v4575_v30 = vor.u32 %v5624_v20, %v4572_v16  ;;  %v5608_v20 = vld [vmem:[%s9111_s1 + $0x84] sm:$0xf]  ;;  %v4508_v16 = vld [vmem:[%s9111_s1 + $0x88] sm:$0xf0] }
 0x1f3   :  { %v8011_v7 = vadd.f32 %v2894_v23, %v2846_v19  ;;  %v2800_v28 = vadd.f32 %v2799_v0, %v2751_v33  ;;  %2945 = vmatmul.bf16.gmra.mxu0 %v8002_v5  ;;  %v5592_v0 = vld [vmem:[%s9111_s1 + $0x4] sm:$0xf] }
 0x1f4   :  { %2994 = vmatmul.bf16.gmra.mxu1 %v8004_v21  ;;  %v4447_v39 = vor.u32 %v5592_v0, %v4444_v31  ;;  %3213 = vmatpush.bf16.msra.mxu2 %v4575_v30  ;;  %v4362_v30 = vld [vmem:[%s9112_s0 + $0x330] sm:$0xf]  ;;  %v5566_v31 = vld [vmem:[%s9112_s0 + $0x334] sm:$0xf] }
 0x1f5   :  { %3043 = vmatmul.bf16.gmra.mxu2 %v8006_v62 }
 0x1f6   :  { %3092 = vmatmul.bf16.gmra.mxu3 %v8009_v4  ;;  %3115 = vmatpush.bf16.msra.mxu0 %v4447_v39  ;;  %v5567_v39 = vld [vmem:[%s9112_s0 + $0x33c] sm:$0xf] }
 0x1f7   :  { %v8075_v62 = vor.u32 %v5567_v39, %v4372_v1 }
 0x1f8   :  { %v2848_v38 = vpop.f32.mrf.mxu2  ;;  %v2752_v19 = vpop.f32.mrf.mxu0 }
 0x1f9   :  { %v2849_v22 = vadd.f32 %v2848_v38, %v2800_v28  ;;  %v2897_v2 = vpop.f32.mrf.mxu3  ;;  %v2753_v23 = vadd.f32 %v2752_v19, %v7549_v58  ;;  %v2801_v6 = vpop.f32.mrf.mxu1  ;;  %v4511_v28 = vor.u32 %v5608_v20, %v4508_v16  ;;  %v5574_v58 = vld [vmem:[%s9112_s0 + $0x36c] sm:$0xf0]  ;;  %v5575_v38 = vld [vmem:[%s9112_s0 + $0x374] sm:$0xf0]  ;;  %v8070_v20 = vor.u32 %v5566_v31, %v4364_v17  ;;  %9306 = vst [vmem:[#allocation97_spill] sm:$0xff] %v8075_v62 }
 0x1fa   :  { %v8072_v16 = vor.u32 %v5575_v38, %v4370_v18  ;;  %v5718_v31 = vld [vmem:[%s9111_s1 + $0x3f4] sm:$0xf]  ;;  %v4948_v17 = vld [vmem:[%s9111_s1 + $0x3f8] sm:$0xf0] }
 0x1fb   :  { %v8036_v33 = vadd.f32 %v2897_v2, %v2849_v22  ;;  %v2802_v0 = vadd.f32 %v2801_v6, %v2753_v23  ;;  %3164 = vmatpush.bf16.msra.mxu1 %v4511_v28  ;;  %v8068_v2 = vor.u32 %v5574_v58, %v4362_v30  ;;  %9304 = vst [vmem:[#allocation95_spill] sm:$0xff] %v8070_v20  ;;  %v4756_v58 = vld [vmem:[%s9111_s1 + $0x278] sm:$0xf0] }
 0x1fc   :  { %9305 = vst [vmem:[#allocation96_spill] sm:$0xff] %v8072_v16  ;;  %v4951_v39 = vor.u32 %v5718_v31, %v4948_v17  ;;  %v4428_v31 = vld [vmem:[%s9112_s0 + $0x3f0] sm:$0xf0]  ;;  %v4434_v17 = vld [vmem:[%s9112_s0 + $0x3b8] sm:$0xf] }
 0x1fd   :  { %9303 = vst [vmem:[#allocation94_spill] sm:$0xff] %v8068_v2 }
 0x1fe   :  { %3451 = vmatpush.bf16.msrb.mxu3 %v4951_v39  ;;  %v4436_v39 = vld [vmem:[%s9112_s0 + $0x3f8] sm:$0xf0] }
 0x200   :  { %v2850_v22 = vpop.f32.mrf.mxu2  ;;  %v2755_v6 = vpop.f32.mrf.mxu0 }
 0x201   :  { %v2851_v19 = vadd.f32 %v2850_v22, %v2802_v0  ;;  %v2899_v23 = vpop.f32.mrf.mxu3  ;;  %v2756_v28 = vadd.f32 %v2755_v6, %v7574_v60  ;;  %v2804_v4 = vpop.f32.mrf.mxu1  ;;  %v5702_v0 = vld [vmem:[%s9111_s1 + $0x374] sm:$0xf]  ;;  %v4884_v60 = vld [vmem:[%s9111_s1 + $0x378] sm:$0xf0] }
 0x202   :  { %v4887_v30 = vor.u32 %v5702_v0, %v4884_v60  ;;  %v5686_v0 = vld [vmem:[%s9111_s1 + $0x2f4] sm:$0xf]  ;;  %v4820_v60 = vld [vmem:[%s9111_s1 + $0x2f8] sm:$0xf0] }
 0x203   :  { %v8077_v21 = vadd.f32 %v2899_v23, %v2851_v19  ;;  %v2805_v5 = vadd.f32 %v2804_v4, %v2756_v28  ;;  %2950 = vmatmul.bf16.gmra.mxu0 %v8068_v2  ;;  %v5670_v4 = vld [vmem:[%s9111_s1 + $0x274] sm:$0xf] }
 0x204   :  { %2999 = vmatmul.bf16.gmra.mxu1 %v8070_v20  ;;  %v4759_v38 = vor.u32 %v5670_v4, %v4756_v58  ;;  %3402 = vmatpush.bf16.msrb.mxu2 %v4887_v30  ;;  %v4426_v30 = vld [vmem:[%s9112_s0 + $0x3b0] sm:$0xf]  ;;  %v5582_v58 = vld [vmem:[%s9112_s0 + $0x3b4] sm:$0xf] }
 0x205   :  { %3048 = vmatmul.bf16.gmra.mxu2 %v8072_v16 }
 0x206   :  { %3097 = vmatmul.bf16.gmra.mxu3 %v8075_v62  ;;  %3304 = vmatpush.bf16.msrb.mxu0 %v4759_v38  ;;  %v5583_v38 = vld [vmem:[%s9112_s0 + $0x3bc] sm:$0xf] }
 0x207   :  { %v8141_v16 = vor.u32 %v5583_v38, %v4436_v39 }
 0x208   :  { %v2853_v18 = vpop.f32.mrf.mxu2  ;;  %v2757_v19 = vpop.f32.mrf.mxu0 }
 0x209   :  { %v2854_v1 = vadd.f32 %v2853_v18, %v2805_v5  ;;  %v2902_v22 = vpop.f32.mrf.mxu3  ;;  %v2758_v23 = vadd.f32 %v2757_v19, %v7615_v29  ;;  %v2806_v6 = vpop.f32.mrf.mxu1  ;;  %v4823_v5 = vor.u32 %v5686_v0, %v4820_v60  ;;  %v5590_v29 = vld [vmem:[%s9112_s0 + $0x3ec] sm:$0xf0]  ;;  %v5591_v18 = vld [vmem:[%s9112_s0 + $0x3f4] sm:$0xf0]  ;;  %v8136_v0 = vor.u32 %v5582_v58, %v4428_v31  ;;  %v5716_v58 = vld [vmem:[%s9111_s1 + $0x3e4] sm:$0xf] }
 0x20a   :  { %v8138_v60 = vor.u32 %v5591_v18, %v4434_v17  ;;  %v4940_v31 = vld [vmem:[%s9111_s1 + $0x3e8] sm:$0xf0] }
 0x20b   :  { %v8102_v28 = vadd.f32 %v2902_v22, %v2854_v1  ;;  %v2807_v4 = vadd.f32 %v2806_v6, %v2758_v23  ;;  %3353 = vmatpush.bf16.msrb.mxu1 %v4823_v5  ;;  %v8134_v22 = vor.u32 %v5590_v29, %v4426_v30  ;;  %v4748_v29 = vld [vmem:[%s9111_s1 + $0x268] sm:$0xf0]  ;;  %v4943_v38 = vor.u32 %v5716_v58, %v4940_v31 }
 0x20d   :  { %3452 = vmatpush.bf16.msrb.mxu3 %v4943_v38 }
 0x210   :  { %v2855_v1 = vpop.f32.mrf.mxu2  ;;  %v2760_v6 = vpop.f32.mrf.mxu0 }
 0x211   :  { %v2856_v19 = vadd.f32 %v2855_v1, %v2807_v4  ;;  %v2904_v23 = vpop.f32.mrf.mxu3  ;;  %v2761_v5 = vadd.f32 %v2760_v6, %v7640_v32  ;;  %v2809_v62 = vpop.f32.mrf.mxu1  ;;  %v5700_v4 = vld [vmem:[%s9111_s1 + $0x364] sm:$0xf]  ;;  %v4876_v32 = vld [vmem:[%s9111_s1 + $0x368] sm:$0xf0] }
 0x212   :  { %v4879_v30 = vor.u32 %v5700_v4, %v4876_v32  ;;  %v5684_v4 = vld [vmem:[%s9111_s1 + $0x2e4] sm:$0xf]  ;;  %v4812_v32 = vld [vmem:[%s9111_s1 + $0x2e8] sm:$0xf0] }
 0x213   :  { %v8143_v20 = vadd.f32 %v2904_v23, %v2856_v19  ;;  %v2810_v2 = vadd.f32 %v2809_v62, %v2761_v5  ;;  %2955 = vmatmul.bf16.gmra.mxu0 %v8134_v22  ;;  %v5668_v62 = vld [vmem:[%s9111_s1 + $0x264] sm:$0xf] }
 0x214   :  { %3004 = vmatmul.bf16.gmra.mxu1 %v8136_v0  ;;  %v4751_v18 = vor.u32 %v5668_v62, %v4748_v29  ;;  %3403 = vmatpush.bf16.msrb.mxu2 %v4879_v30 }
 0x215   :  { %3053 = vmatmul.bf16.gmra.mxu2 %v8138_v60 }
 0x216   :  { %3102 = vmatmul.bf16.gmra.mxu3 %v8141_v16  ;;  %3305 = vmatpush.bf16.msrb.mxu0 %v4751_v18 }
 0x218   :  { %v2858_v17 = vpop.f32.mrf.mxu2  ;;  %v2762_v19 = vpop.f32.mrf.mxu0 }
 0x219   :  { %v2859_v39 = vadd.f32 %v2858_v17, %v2810_v2  ;;  %v2907_v1 = vpop.f32.mrf.mxu3  ;;  %v2763_v23 = vadd.f32 %v2762_v19, %v7681_v34  ;;  %v2811_v6 = vpop.f32.mrf.mxu1  ;;  %v4815_v2 = vor.u32 %v5684_v4, %v4812_v32 }
 0x21b   :  { %v8168_v5 = vadd.f32 %v2907_v1, %v2859_v39  ;;  %v2812_v62 = vadd.f32 %v2811_v6, %v2763_v23  ;;  %3354 = vmatpush.bf16.msrb.mxu1 %v4815_v2  ;;  %v5698_v39 = vld [vmem:[%s9111_s1 + $0x354] sm:$0xf] }
 0x21c   :  { %v5666_v1 = vld [vmem:[%s9111_s1 + $0x254] sm:$0xf] }
 0x220   :  { %v2860_v29 = vpop.f32.mrf.mxu2  ;;  %v2921_v34 = vpop.f32.mrf.mxu0 }
 0x221   :  { %v2861_v30 = vadd.f32 %v2860_v29, %v2812_v62  ;;  %v2909_v58 = vpop.f32.mrf.mxu3  ;;  %v2922_v31 = vadd.f32 %v2921_v34, %v7706_v56  ;;  %v2970_v17 = vpop.f32.mrf.mxu1  ;;  %v4868_v56 = vld [vmem:[%s9111_s1 + $0x358] sm:$0xf0] }
 0x222   :  { %v4871_v19 = vor.u32 %v5698_v39, %v4868_v56  ;;  %v4804_v34 = vld [vmem:[%s9111_s1 + $0x2d8] sm:$0xf0] }
 0x223   :  { %v8177_v18 = vadd.f32 %v2909_v58, %v2861_v30  ;;  %v2971_v38 = vadd.f32 %v2970_v17, %v2922_v31  ;;  %3116 = vmatmul.bf16.vlgmr.msra.gmra.mxu0 %v6106_v48  ;;  %v4740_v48 = vld [vmem:[%s9111_s1 + $0x258] sm:$0xf0]  ;;  %v5682_v58 = vld [vmem:[%s9111_s1 + $0x2d4] sm:$0xf] }
 0x224   :  { %3165 = vmatmul.bf16.vlgmr.msra.gmra.mxu1 %v6117_v53  ;;  %v5714_v53 = vld [vmem:[%s9111_s1 + $0x3d4] sm:$0xf]  ;;  %v4743_v23 = vor.u32 %v5666_v1, %v4740_v48  ;;  %3404 = vmatpush.bf16.msrb.mxu2 %v4871_v19  ;;  %v4807_v17 = vor.u32 %v5682_v58, %v4804_v34 }
 0x225   :  { %3214 = vmatmul.bf16.vlgmr.msra.gmra.mxu2 %v6119_v54  ;;  %v4932_v54 = vld [vmem:[%s9111_s1 + $0x3d8] sm:$0xf0] }
 0x226   :  { %3263 = vmatmul.bf16.vlgmr.msra.gmra.mxu3 %v6127_v57  ;;  %v4935_v6 = vor.u32 %v5714_v53, %v4932_v54  ;;  %3306 = vmatpush.bf16.msrb.mxu0 %v4743_v23  ;;  %v5696_v54 = vld [vmem:[%s9111_s1 + $0x344] sm:$0xf] }
 0x227   :  { %3355 = vmatpush.bf16.msrb.mxu1 %v4807_v17  ;;  %v4796_v17 = vld [vmem:[%s9111_s1 + $0x2c8] sm:$0xf0] }
 0x228   :  { %v3019_v57 = vpop.f32.mrf.mxu2  ;;  %v2923_v62 = vpop.f32.mrf.mxu0  ;;  %3453 = vmatpush.bf16.msrb.mxu3 %v4935_v6 }
 0x229   :  { %v3020_v4 = vadd.f32 %v3019_v57, %v2971_v38  ;;  %v3068_v32 = vpop.f32.mrf.mxu3  ;;  %v2924_v2 = vadd.f32 %v2923_v62, %v7747_v59  ;;  %v2972_v29 = vpop.f32.mrf.mxu1  ;;  %v5664_v57 = vld [vmem:[%s9111_s1 + $0x244] sm:$0xf] }
 0x22b   :  { %v8202_v30 = vadd.f32 %v3068_v32, %v3020_v4  ;;  %v2973_v31 = vadd.f32 %v2972_v29, %v2924_v2 }
 0x230   :  { %v3021_v38 = vpop.f32.mrf.mxu2  ;;  %v2926_v59 = vpop.f32.mrf.mxu0 }
 0x231   :  { %v3022_v39 = vadd.f32 %v3021_v38, %v2973_v31  ;;  %v3070_v56 = vpop.f32.mrf.mxu3  ;;  %v2927_v1 = vadd.f32 %v2926_v59, %v7772_v36  ;;  %v2975_v19 = vpop.f32.mrf.mxu1  ;;  %v4860_v36 = vld [vmem:[%s9111_s1 + $0x348] sm:$0xf0]  ;;  %v5680_v31 = vld [vmem:[%s9111_s1 + $0x2c4] sm:$0xf] }
 0x232   :  { %v4863_v23 = vor.u32 %v5696_v54, %v4860_v36 }
 0x233   :  { %v8211_v48 = vadd.f32 %v3070_v56, %v3022_v39  ;;  %v2976_v53 = vadd.f32 %v2975_v19, %v2927_v1  ;;  %3121 = vmatmul.bf16.gmra.mxu0 %v6193_v24  ;;  %v4732_v24 = vld [vmem:[%s9111_s1 + $0x248] sm:$0xf0]  ;;  %v4799_v39 = vor.u32 %v5680_v31, %v4796_v17 }
 0x234   :  { %3170 = vmatmul.bf16.gmra.mxu1 %v6195_v25  ;;  %v5712_v25 = vld [vmem:[%s9111_s1 + $0x3c4] sm:$0xf]  ;;  %v4735_v6 = vor.u32 %v5664_v57, %v4732_v24  ;;  %3405 = vmatpush.bf16.msrb.mxu2 %v4863_v23  ;;  %v5694_v57 = vld [vmem:[%s9111_s1 + $0x334] sm:$0xf] }
 0x235   :  { %3219 = vmatmul.bf16.gmra.mxu2 %v6197_v26  ;;  %v4924_v26 = vld [vmem:[%s9111_s1 + $0x3c8] sm:$0xf0]  ;;  %3356 = vmatpush.bf16.msrb.mxu1 %v4799_v39  ;;  %v5662_v23 = vld [vmem:[%s9111_s1 + $0x234] sm:$0xf] }
 0x236   :  { %3268 = vmatmul.bf16.gmra.mxu3 %v6199_v27  ;;  %v4927_v4 = vor.u32 %v5712_v25, %v4924_v26  ;;  %3307 = vmatpush.bf16.msrb.mxu0 %v4735_v6 }
 0x238   :  { %v3024_v27 = vpop.f32.mrf.mxu2  ;;  %v2928_v2 = vpop.f32.mrf.mxu0  ;;  %3454 = vmatpush.bf16.msrb.mxu3 %v4927_v4 }
 0x239   :  { %v3025_v32 = vadd.f32 %v3024_v27, %v2976_v53  ;;  %v3073_v62 = vpop.f32.mrf.mxu3  ;;  %v2929_v29 = vadd.f32 %v2928_v2, %v7813_v61  ;;  %v2977_v58 = vpop.f32.mrf.mxu1 }
 0x23b   :  { %v8236_v34 = vadd.f32 %v3073_v62, %v3025_v32  ;;  %v2978_v38 = vadd.f32 %v2977_v58, %v2929_v29  ;;  %v5678_v29 = vld [vmem:[%s9111_s1 + $0x2b4] sm:$0xf]  ;;  %v4788_v58 = vld [vmem:[%s9111_s1 + $0x2b8] sm:$0xf0] }
 0x23c   :  { %v4791_v17 = vor.u32 %v5678_v29, %v4788_v58 }
 0x23e   :  { %3357 = vmatpush.bf16.msrb.mxu1 %v4791_v17 }
 0x240   :  { %v3026_v56 = vpop.f32.mrf.mxu2  ;;  %v2931_v61 = vpop.f32.mrf.mxu0 }
 0x241   :  { %v3027_v59 = vadd.f32 %v3026_v56, %v2978_v38  ;;  %v3075_v1 = vpop.f32.mrf.mxu3  ;;  %v2932_v19 = vadd.f32 %v2931_v61, %v7838_v55  ;;  %v2980_v53 = vpop.f32.mrf.mxu1  ;;  %v4852_v55 = vld [vmem:[%s9111_s1 + $0x338] sm:$0xf0] }
 0x242   :  { %v4855_v24 = vor.u32 %v5694_v57, %v4852_v55 }
 0x243   :  { %v8245_v54 = vadd.f32 %v3075_v1, %v3027_v59  ;;  %v2981_v36 = vadd.f32 %v2980_v53, %v2932_v19  ;;  %3126 = vmatmul.bf16.gmra.mxu0 %v6253_v49  ;;  %v4724_v49 = vld [vmem:[%s9111_s1 + $0x238] sm:$0xf0]  ;;  %v5692_v53 = vld [vmem:[%s9111_s1 + $0x324] sm:$0xf] }
 0x244   :  { %3175 = vmatmul.bf16.gmra.mxu1 %v6255_v50  ;;  %v5710_v50 = vld [vmem:[%s9111_s1 + $0x3b4] sm:$0xf]  ;;  %v4727_v25 = vor.u32 %v5662_v23, %v4724_v49  ;;  %3406 = vmatpush.bf16.msrb.mxu2 %v4855_v24 }
 0x245   :  { %3224 = vmatmul.bf16.gmra.mxu2 %v6257_v51  ;;  %v4916_v51 = vld [vmem:[%s9111_s1 + $0x3b8] sm:$0xf0] }
 0x246   :  { %3273 = vmatmul.bf16.gmra.mxu3 %v6259_v52  ;;  %v4919_v26 = vor.u32 %v5710_v50, %v4916_v51  ;;  %3308 = vmatpush.bf16.msrb.mxu0 %v4727_v25 }
 0x248   :  { %v3029_v52 = vpop.f32.mrf.mxu2  ;;  %v2933_v4 = vpop.f32.mrf.mxu0  ;;  %3455 = vmatpush.bf16.msrb.mxu3 %v4919_v26  ;;  %v5676_v26 = vld [vmem:[%s9111_s1 + $0x2a4] sm:$0xf] }
 0x249   :  { %v3030_v27 = vadd.f32 %v3029_v52, %v2981_v36  ;;  %v3078_v6 = vpop.f32.mrf.mxu3  ;;  %v2934_v32 = vadd.f32 %v2933_v4, %v7879_v63  ;;  %v2982_v62 = vpop.f32.mrf.mxu1  ;;  %v5660_v36 = vld [vmem:[%s9111_s1 + $0x224] sm:$0xf] }
 0x24b   :  { %v8270_v2 = vadd.f32 %v3078_v6, %v3030_v27  ;;  %v2983_v31 = vadd.f32 %v2982_v62, %v2934_v32  ;;  %v4780_v27 = vld [vmem:[%s9111_s1 + $0x2a8] sm:$0xf0] }
 0x24c   :  { %v4783_v4 = vor.u32 %v5676_v26, %v4780_v27  ;;  %v5688_v27 = vld [vmem:[%s9111_s1 + $0x304] sm:$0xf] }
 0x24e   :  { %3358 = vmatpush.bf16.msrb.mxu1 %v4783_v4 }
 0x250   :  { %v3031_v38 = vpop.f32.mrf.mxu2  ;;  %v2936_v63 = vpop.f32.mrf.mxu0 }
 0x251   :  { %v3032_v39 = vadd.f32 %v3031_v38, %v2983_v31  ;;  %v3080_v56 = vpop.f32.mrf.mxu3  ;;  %v2937_v59 = vadd.f32 %v2936_v63, %v7904_v37  ;;  %v2985_v1 = vpop.f32.mrf.mxu1  ;;  %v4844_v37 = vld [vmem:[%s9111_s1 + $0x328] sm:$0xf0] }
 0x252   :  { %v4847_v57 = vor.u32 %v5692_v53, %v4844_v37 }
 0x253   :  { %v8279_v61 = vadd.f32 %v3080_v56, %v3032_v39  ;;  %v2986_v19 = vadd.f32 %v2985_v1, %v2937_v59  ;;  %3131 = vmatmul.bf16.gmra.mxu0 %v6313_v12  ;;  %v4716_v12 = vld [vmem:[%s9111_s1 + $0x228] sm:$0xf0]  ;;  %v5690_v39 = vld [vmem:[%s9111_s1 + $0x314] sm:$0xf] }
 0x254   :  { %3180 = vmatmul.bf16.gmra.mxu1 %v6315_v13  ;;  %v5708_v13 = vld [vmem:[%s9111_s1 + $0x3a4] sm:$0xf]  ;;  %v4719_v55 = vor.u32 %v5660_v36, %v4716_v12  ;;  %3407 = vmatpush.bf16.msrb.mxu2 %v4847_v57  ;;  %v5658_v56 = vld [vmem:[%s9111_s1 + $0x214] sm:$0xf] }
 0x255   :  { %3229 = vmatmul.bf16.gmra.mxu2 %v6317_v14  ;;  %v4908_v14 = vld [vmem:[%s9111_s1 + $0x3a8] sm:$0xf0] }
 0x256   :  { %3278 = vmatmul.bf16.gmra.mxu3 %v6319_v15  ;;  %v4911_v23 = vor.u32 %v5708_v13, %v4908_v14  ;;  %3309 = vmatpush.bf16.msrb.mxu0 %v4719_v55  ;;  %v5674_v13 = vld [vmem:[%s9111_s1 + $0x294] sm:$0xf]  ;;  %v4772_v14 = vld [vmem:[%s9111_s1 + $0x298] sm:$0xf0] }
 0x257   :  { %v4775_v55 = vor.u32 %v5674_v13, %v4772_v14 }
 0x258   :  { %v3034_v15 = vpop.f32.mrf.mxu2  ;;  %v2938_v50 = vpop.f32.mrf.mxu0  ;;  %3456 = vmatpush.bf16.msrb.mxu3 %v4911_v23 }
 0x259   :  { %v3035_v24 = vadd.f32 %v3034_v15, %v2986_v19  ;;  %v3083_v49 = vpop.f32.mrf.mxu3  ;;  %v2939_v51 = vadd.f32 %v2938_v50, %v7945_v3  ;;  %v2987_v52 = vpop.f32.mrf.mxu1  ;;  %3359 = vmatpush.bf16.msrb.mxu1 %v4775_v55 }
 0x25b   :  { %v8304_v25 = vadd.f32 %v3083_v49, %v3035_v24  ;;  %v2988_v6 = vadd.f32 %v2987_v52, %v2939_v51 }
 0x260   :  { %v3036_v32 = vpop.f32.mrf.mxu2  ;;  %v2941_v3 = vpop.f32.mrf.mxu0 }
 0x261   :  { %v3037_v62 = vadd.f32 %v3036_v32, %v2988_v6  ;;  %v3085_v29 = vpop.f32.mrf.mxu3  ;;  %v2942_v58 = vadd.f32 %v2941_v3, %v7970_v35  ;;  %v2990_v31 = vpop.f32.mrf.mxu1  ;;  %v4836_v35 = vld [vmem:[%s9111_s1 + $0x318] sm:$0xf0]  ;;  %v5656_v6 = vld [vmem:[%s9111_s1 + $0x204] sm:$0xf] }
 0x262   :  { %v4839_v63 = vor.u32 %v5690_v39, %v4836_v35  ;;  %v5672_v35 = vld [vmem:[%s9111_s1 + $0x284] sm:$0xf] }
 0x263   :  { %v8313_v17 = vadd.f32 %v3085_v29, %v3037_v62  ;;  %v2991_v38 = vadd.f32 %v2990_v31, %v2942_v58  ;;  %3136 = vmatmul.bf16.gmra.mxu0 %v6373_v40  ;;  %v4708_v40 = vld [vmem:[%s9111_s1 + $0x218] sm:$0xf0] }
 0x264   :  { %3185 = vmatmul.bf16.gmra.mxu1 %v6375_v41  ;;  %v5706_v41 = vld [vmem:[%s9111_s1 + $0x394] sm:$0xf]  ;;  %v4711_v59 = vor.u32 %v5658_v56, %v4708_v40  ;;  %3408 = vmatpush.bf16.msrb.mxu2 %v4839_v63  ;;  %v4764_v56 = vld [vmem:[%s9111_s1 + $0x288] sm:$0xf0] }
 0x265   :  { %3234 = vmatmul.bf16.gmra.mxu2 %v6377_v42  ;;  %v4900_v42 = vld [vmem:[%s9111_s1 + $0x398] sm:$0xf0]  ;;  %v4767_v40 = vor.u32 %v5672_v35, %v4764_v56  ;;  %v5004_v35 = vld [vmem:[%s9111_s1 + $0x468] sm:$0xf0]  ;;  %v5780_v56 = vld [vmem:[%s9111_s1 + $0x5e4] sm:$0xf] }
 0x266   :  { %3283 = vmatmul.bf16.gmra.mxu3 %v6379_v43  ;;  %v4903_v1 = vor.u32 %v5706_v41, %v4900_v42  ;;  %3310 = vmatpush.bf16.msrb.mxu0 %v4711_v59 }
 0x267   :  { %3360 = vmatpush.bf16.msrb.mxu1 %v4767_v40 }
 0x268   :  { %v3039_v43 = vpop.f32.mrf.mxu2  ;;  %v2943_v37 = vpop.f32.mrf.mxu0  ;;  %3457 = vmatpush.bf16.msrb.mxu3 %v4903_v1 }
 0x269   :  { %v3040_v19 = vadd.f32 %v3039_v43, %v2991_v38  ;;  %v3088_v53 = vpop.f32.mrf.mxu3  ;;  %v2944_v36 = vadd.f32 %v2943_v37, %v8011_v7  ;;  %v2992_v57 = vpop.f32.mrf.mxu1  ;;  %v5766_v37 = vld [vmem:[%s9111_s1 + $0x574] sm:$0xf] }
 0x26b   :  { %v8338_v12 = vadd.f32 %v3088_v53, %v3040_v19  ;;  %v2993_v15 = vadd.f32 %v2992_v57, %v2944_v36  ;;  %v5734_v36 = vld [vmem:[%s9111_s1 + $0x474] sm:$0xf] }
 0x270   :  { %v3041_v23 = vpop.f32.mrf.mxu2  ;;  %v2946_v7 = vpop.f32.mrf.mxu0 }
 0x271   :  { %v3042_v24 = vadd.f32 %v3041_v23, %v2993_v15  ;;  %v3090_v49 = vpop.f32.mrf.mxu3  ;;  %v2947_v50 = vadd.f32 %v2946_v7, %v8036_v33  ;;  %v2995_v51 = vpop.f32.mrf.mxu1  ;;  %v4828_v33 = vld [vmem:[%s9111_s1 + $0x308] sm:$0xf0] }
 0x272   :  { %v4831_v4 = vor.u32 %v5688_v27, %v4828_v33 }
 0x273   :  { %v8347_v52 = vadd.f32 %v3090_v49, %v3042_v24  ;;  %v2996_v26 = vadd.f32 %v2995_v51, %v2947_v50  ;;  %3141 = vmatmul.bf16.gmra.mxu0 %v6433_v8  ;;  %v4700_v8 = vld [vmem:[%s9111_s1 + $0x208] sm:$0xf0]  ;;  %v5750_v50 = vld [vmem:[%s9111_s1 + $0x4f4] sm:$0xf]  ;;  %v5076_v51 = vld [vmem:[%s9111_s1 + $0x4f8] sm:$0xf0] }
 0x274   :  { %3190 = vmatmul.bf16.gmra.mxu1 %v6435_v9  ;;  %v5704_v9 = vld [vmem:[%s9111_s1 + $0x384] sm:$0xf]  ;;  %v4703_v32 = vor.u32 %v5656_v6, %v4700_v8  ;;  %3409 = vmatpush.bf16.msrb.mxu2 %v4831_v4  ;;  %v5079_v27 = vor.u32 %v5750_v50, %v5076_v51  ;;  %v9312_v50 = vld [vmem:[#allocation7_spill] sm:$0xff]  ;;  %v9313_v51 = vld [vmem:[#allocation8_spill] sm:$0xff] }
 0x275   :  { %3239 = vmatmul.bf16.gmra.mxu2 %v6437_v10  ;;  %v4892_v10 = vld [vmem:[%s9111_s1 + $0x388] sm:$0xf0] }
 0x276   :  { %3288 = vmatmul.bf16.gmra.mxu3 %v6439_v11  ;;  %v4895_v62 = vor.u32 %v5704_v9, %v4892_v10  ;;  %3311 = vmatpush.bf16.msrb.mxu0 %v4703_v32  ;;  %v9307_v32 = vld [vmem:[#allocation2_spill] sm:$0xff] }
 0x277   :  { %3549 = vmatpush.bf16.msra.mxu1 %v5079_v27  ;;  %v5762_v27 = vld [vmem:[%s9111_s1 + $0x554] sm:$0xf] }
 0x278   :  { %v3044_v11 = vpop.f32.mrf.mxu2  ;;  %v2948_v58 = vpop.f32.mrf.mxu0  ;;  %3458 = vmatpush.bf16.msrb.mxu3 %v4895_v62  ;;  %v9308_v62 = vld [vmem:[#allocation3_spill] sm:$0xff] }
 0x279   :  { %v3045_v29 = vadd.f32 %v3044_v11, %v2996_v26  ;;  %v3093_v3 = vpop.f32.mrf.mxu3  ;;  %v2949_v31 = vadd.f32 %v2948_v58, %v8077_v21  ;;  %v2997_v38 = vpop.f32.mrf.mxu1  ;;  %v5764_v58 = vld [vmem:[%s9111_s1 + $0x564] sm:$0xf] }
 0x27b   :  { %v8372_v39 = vadd.f32 %v3093_v3, %v3045_v29  ;;  %v2998_v63 = vadd.f32 %v2997_v38, %v2949_v31  ;;  %v9309_v29 = vld [vmem:[#allocation4_spill] sm:$0xff]  ;;  %v9310_v3 = vld [vmem:[#allocation5_spill] sm:$0xff]  ;;  %v5732_v31 = vld [vmem:[%s9111_s1 + $0x464] sm:$0xf] }
 0x280   :  { %v3046_v41 = vpop.f32.mrf.mxu2  ;;  %v2951_v21 = vpop.f32.mrf.mxu0 }
 0x281   :  { %v3047_v42 = vadd.f32 %v3046_v41, %v2998_v63  ;;  %v3095_v43 = vpop.f32.mrf.mxu3  ;;  %v2952_v59 = vadd.f32 %v2951_v21, %v8102_v28  ;;  %v3000_v1 = vpop.f32.mrf.mxu1  ;;  %v5140_v28 = vld [vmem:[%s9111_s1 + $0x578] sm:$0xf0]  ;;  %v5196_v63 = vld [vmem:[%s9111_s1 + $0x5e8] sm:$0xf0]  ;;  %v5007_v41 = vor.u32 %v5732_v31, %v5004_v35  ;;  %v5746_v35 = vld [vmem:[%s9111_s1 + $0x4d4] sm:$0xf] }
 0x282   :  { %v5143_v57 = vor.u32 %v5766_v37, %v5140_v28  ;;  %v5748_v28 = vld [vmem:[%s9111_s1 + $0x4e4] sm:$0xf] }
 0x283   :  { %v8381_v19 = vadd.f32 %v3095_v43, %v3047_v42  ;;  %v3001_v53 = vadd.f32 %v3000_v1, %v2952_v59  ;;  %3146 = vmatmul.bf16.gmra.mxu0 %v6493_v44  ;;  %v5012_v44 = vld [vmem:[%s9111_s1 + $0x478] sm:$0xf0]  ;;  %v5199_v42 = vor.u32 %v5780_v56, %v5196_v63 }
 0x284   :  { %3195 = vmatmul.bf16.gmra.mxu1 %v6495_v45  ;;  %v5782_v45 = vld [vmem:[%s9111_s1 + $0x5f4] sm:$0xf]  ;;  %v5015_v13 = vor.u32 %v5734_v36, %v5012_v44  ;;  %3598 = vmatpush.bf16.msra.mxu2 %v5143_v57  ;;  %v5068_v36 = vld [vmem:[%s9111_s1 + $0x4e8] sm:$0xf0]  ;;  %v5060_v56 = vld [vmem:[%s9111_s1 + $0x4d8] sm:$0xf0] }
 0x285   :  { %3244 = vmatmul.bf16.gmra.mxu2 %v6497_v46  ;;  %v5204_v46 = vld [vmem:[%s9111_s1 + $0x5f8] sm:$0xf0]  ;;  %v5071_v44 = vor.u32 %v5748_v28, %v5068_v36  ;;  %v9315_v36 = vld [vmem:[#allocation10_spill] sm:$0xff] }
 0x286   :  { %3293 = vmatmul.bf16.gmra.mxu3 %v6499_v47  ;;  %v5207_v14 = vor.u32 %v5782_v45, %v5204_v46  ;;  %3500 = vmatpush.bf16.msra.mxu0 %v5015_v13  ;;  %v5848_v45 = vld [vmem:[%s9113_s2] sm:$0x3] }
 0x287   :  { %3550 = vmatpush.bf16.msra.mxu1 %v5071_v44  ;;  %v9317_v44 = vld [vmem:[#allocation12_spill] sm:$0xff] }
 0x288   :  { %v3049_v47 = vpop.f32.mrf.mxu2  ;;  %v2953_v23 = vpop.f32.mrf.mxu0  ;;  %3647 = vmatpush.bf16.msra.mxu3 %v5207_v14 }
 0x289   :  { %v3050_v15 = vadd.f32 %v3049_v47, %v3001_v53  ;;  %v3098_v55 = vpop.f32.mrf.mxu3  ;;  %v2954_v24 = vadd.f32 %v2953_v23, %v8143_v20  ;;  %v3002_v49 = vpop.f32.mrf.mxu1 }
 0x28a   :  { %3501 = vmatpush.bf16.msra.mxu0 %v5007_v41 }
 0x28b   :  { %v8406_v7 = vadd.f32 %v3098_v55, %v3050_v15  ;;  %v3003_v26 = vadd.f32 %v3002_v49, %v2954_v24  ;;  %v9311_v49 = vld [vmem:[#allocation6_spill] sm:$0xff] }
 0x28c   :  { %3648 = vmatpush.bf16.msra.mxu3 %v5199_v42 }
 0x290   :  { %v3051_v33 = vpop.f32.mrf.mxu2  ;;  %v2956_v20 = vpop.f32.mrf.mxu0 }
 0x291   :  { %v3052_v6 = vadd.f32 %v3051_v33, %v3003_v26  ;;  %v3100_v4 = vpop.f32.mrf.mxu3  ;;  %v2957_v8 = vadd.f32 %v2956_v20, %v8168_v5  ;;  %v3005_v9 = vpop.f32.mrf.mxu1  ;;  %v5132_v5 = vld [vmem:[%s9111_s1 + $0x568] sm:$0xf0]  ;;  %v9314_v26 = vld [vmem:[#allocation9_spill] sm:$0xff] }
 0x292   :  { %v5135_v38 = vor.u32 %v5764_v58, %v5132_v5  ;;  %v5124_v33 = vld [vmem:[%s9111_s1 + $0x558] sm:$0xf0] }
 0x293   :  { %v8415_v10 = vadd.f32 %v3100_v4, %v3052_v6  ;;  %v3006_v11 = vadd.f32 %v3005_v9, %v2957_v8  ;;  %3151 = vmatmul.bf16.gmra.mxu0 %v9307_v32  ;;  %v5730_v6 = vld [vmem:[%s9111_s1 + $0x454] sm:$0xf]  ;;  %v5127_v4 = vor.u32 %v5762_v27, %v5124_v33  ;;  %v4996_v20 = vld [vmem:[%s9111_s1 + $0x458] sm:$0xf0] }
 0x294   :  { %3200 = vmatmul.bf16.gmra.mxu1 %v9308_v62  ;;  %3599 = vmatpush.bf16.msra.mxu2 %v5135_v38  ;;  %v5778_v8 = vld [vmem:[%s9111_s1 + $0x5d4] sm:$0xf]  ;;  %v5188_v9 = vld [vmem:[%s9111_s1 + $0x5d8] sm:$0xf0]  ;;  %v4999_v32 = vor.u32 %v5730_v6, %v4996_v20 }
 0x295   :  { %3249 = vmatmul.bf16.gmra.mxu2 %v9309_v29  ;;  %v5191_v62 = vor.u32 %v5778_v8, %v5188_v9  ;;  %v5744_v8 = vld [vmem:[%s9111_s1 + $0x4c4] sm:$0xf]  ;;  %v5052_v9 = vld [vmem:[%s9111_s1 + $0x4c8] sm:$0xf0] }
 0x296   :  { %3298 = vmatmul.bf16.gmra.mxu3 %v9310_v3  ;;  %3502 = vmatpush.bf16.msra.mxu0 %v4999_v32  ;;  %v5055_v32 = vor.u32 %v5744_v8, %v5052_v9 }
 0x297   :  { %3649 = vmatpush.bf16.msra.mxu3 %v5191_v62 }
 0x298   :  { %v3054_v40 = vpop.f32.mrf.mxu2  ;;  %v2958_v59 = vpop.f32.mrf.mxu0  ;;  %3600 = vmatpush.bf16.msra.mxu2 %v5127_v4 }
 0x299   :  { %v3055_v43 = vadd.f32 %v3054_v40, %v3006_v11  ;;  %v3103_v21 = vpop.f32.mrf.mxu3  ;;  %v2959_v1 = vadd.f32 %v2958_v59, %v8177_v18  ;;  %v3007_v53 = vpop.f32.mrf.mxu1  ;;  %v8451_v18 = vperm.slane %v5848_v45, 1  ;;  %v5063_v40 = vor.u32 %v5746_v35, %v5060_v56  ;;  %v9318_v45 = vld [vmem:[#allocation13_spill] sm:$0xff] }
 0x29b   :  { %v8440_v37 = vadd.f32 %v3103_v21, %v3055_v43  ;;  %v3008_v57 = vadd.f32 %v3007_v53, %v2959_v1  ;;  %3551 = vmatpush.bf16.msra.mxu1 %v5063_v40  ;;  %v9320_v40 = vld [vmem:[#allocation15_spill] sm:$0xff] }
 0x29f   :  { %3552 = vmatpush.bf16.msra.mxu1 %v5055_v32 }
 0x2a0   :  { %v3056_v46 = vpop.f32.mrf.mxu2  ;;  %v3117_v14 = vpop.f32.mrf.mxu0 }
 0x2a1   :  { %v3057_v47 = vadd.f32 %v3056_v46, %v3008_v57  ;;  %v3105_v13 = vpop.f32.mrf.mxu3  ;;  %v3118_v15 = vadd.f32 %v3117_v14, %v8451_v18  ;;  %v3166_v55 = vpop.f32.mrf.mxu1  ;;  %v9316_v57 = vld [vmem:[#allocation11_spill] sm:$0xff]  ;;  %v5760_v46 = vld [vmem:[%s9111_s1 + $0x544] sm:$0xf] }
 0x2a3   :  { %v8454_v23 = vadd.f32 %v3105_v13, %v3057_v47  ;;  %v3167_v24 = vadd.f32 %v3166_v55, %v3118_v15  ;;  %3312 = vmatmul.bf16.vlgmr.msrb.gmra.mxu0 %v9311_v49  ;;  %v5116_v47 = vld [vmem:[%s9111_s1 + $0x548] sm:$0xf0]  ;;  %v5728_v13 = vld [vmem:[%s9111_s1 + $0x444] sm:$0xf] }
 0x2a4   :  { %3361 = vmatmul.bf16.vlgmr.msrb.gmra.mxu1 %v9312_v50  ;;  %v5119_v14 = vor.u32 %v5760_v46, %v5116_v47  ;;  %v4988_v15 = vld [vmem:[%s9111_s1 + $0x448] sm:$0xf0]  ;;  %v5776_v55 = vld [vmem:[%s9111_s1 + $0x5c4] sm:$0xf] }
 0x2a5   :  { %3410 = vmatmul.bf16.vlgmr.msrb.gmra.mxu2 %v9313_v51  ;;  %v4991_v50 = vor.u32 %v5728_v13, %v4988_v15 }
 0x2a6   :  { %3459 = vmatmul.bf16.vlgmr.msrb.gmra.mxu3 %v9314_v26  ;;  %3601 = vmatpush.bf16.msra.mxu2 %v5119_v14 }
 0x2a7   :  { %3503 = vmatpush.bf16.msra.mxu0 %v4991_v50  ;;  %v5044_v50 = vld [vmem:[%s9111_s1 + $0x4b8] sm:$0xf0] }
 0x2a8   :  { %v3215_v11 = vpop.f32.mrf.mxu2  ;;  %v3119_v58 = vpop.f32.mrf.mxu0 }
 0x2a9   :  { %v3216_v29 = vadd.f32 %v3215_v11, %v3167_v24  ;;  %v3264_v3 = vpop.f32.mrf.mxu3  ;;  %v3120_v5 = vadd.f32 %v3119_v58, %v8451_v18  ;;  %v3168_v31 = vpop.f32.mrf.mxu1  ;;  %v5180_v24 = vld [vmem:[%s9111_s1 + $0x5c8] sm:$0xf0] }
 0x2aa   :  { %v5183_v51 = vor.u32 %v5776_v55, %v5180_v24 }
 0x2ab   :  { %v8479_v38 = vadd.f32 %v3264_v3, %v3216_v29  ;;  %v3169_v63 = vadd.f32 %v3168_v31, %v3120_v5 }
 0x2ac   :  { %3650 = vmatpush.bf16.msra.mxu3 %v5183_v51 }
 0x2b0   :  { %v3217_v41 = vpop.f32.mrf.mxu2  ;;  %v3122_v21 = vpop.f32.mrf.mxu0 }
 0x2b1   :  { %v3218_v42 = vadd.f32 %v3217_v41, %v3169_v63  ;;  %v3266_v43 = vpop.f32.mrf.mxu3  ;;  %v3123_v59 = vadd.f32 %v3122_v21, %v8451_v18  ;;  %v3171_v1 = vpop.f32.mrf.mxu1  ;;  %v9319_v63 = vld [vmem:[#allocation14_spill] sm:$0xff]  ;;  %v9321_v41 = vld [vmem:[#allocation16_spill] sm:$0xff]  ;;  %v5108_v21 = vld [vmem:[%s9111_s1 + $0x538] sm:$0xf0] }
 0x2b3   :  { %v8488_v53 = vadd.f32 %v3266_v43, %v3218_v42  ;;  %v3172_v28 = vadd.f32 %v3171_v1, %v3123_v59  ;;  %3317 = vmatmul.bf16.gmra.mxu0 %v9315_v36  ;;  %v9322_v42 = vld [vmem:[#allocation17_spill] sm:$0xff]  ;;  %v5758_v43 = vld [vmem:[%s9111_s1 + $0x534] sm:$0xf] }
 0x2b4   :  { %3366 = vmatmul.bf16.gmra.mxu1 %v9316_v57  ;;  %v5726_v59 = vld [vmem:[%s9111_s1 + $0x434] sm:$0xf]  ;;  %v5111_v1 = vor.u32 %v5758_v43, %v5108_v21  ;;  %v5172_v57 = vld [vmem:[%s9111_s1 + $0x5b8] sm:$0xf0] }
 0x2b5   :  { %3415 = vmatmul.bf16.gmra.mxu2 %v9317_v44  ;;  %v5774_v36 = vld [vmem:[%s9111_s1 + $0x5b4] sm:$0xf] }
 0x2b6   :  { %3464 = vmatmul.bf16.gmra.mxu3 %v9318_v45  ;;  %v5175_v46 = vor.u32 %v5774_v36, %v5172_v57  ;;  %3602 = vmatpush.bf16.msra.mxu2 %v5111_v1 }
 0x2b8   :  { %v3220_v49 = vpop.f32.mrf.mxu2  ;;  %v3124_v33 = vpop.f32.mrf.mxu0  ;;  %3651 = vmatpush.bf16.msra.mxu3 %v5175_v46  ;;  %v5740_v46 = vld [vmem:[%s9111_s1 + $0x4a4] sm:$0xf] }
 0x2b9   :  { %v3221_v26 = vadd.f32 %v3220_v49, %v3172_v28  ;;  %v3269_v27 = vpop.f32.mrf.mxu3  ;;  %v3125_v6 = vadd.f32 %v3124_v33, %v8451_v18  ;;  %v3173_v4 = vpop.f32.mrf.mxu1  ;;  %v4980_v28 = vld [vmem:[%s9111_s1 + $0x438] sm:$0xf0]  ;;  %v5742_v49 = vld [vmem:[%s9111_s1 + $0x4b4] sm:$0xf] }
 0x2ba   :  { %v4983_v45 = vor.u32 %v5726_v59, %v4980_v28 }
 0x2bb   :  { %v8513_v20 = vadd.f32 %v3269_v27, %v3221_v26  ;;  %v3174_v11 = vadd.f32 %v3173_v4, %v3125_v6  ;;  %v5047_v26 = vor.u32 %v5742_v49, %v5044_v50 }
 0x2bc   :  { %3504 = vmatpush.bf16.msra.mxu0 %v4983_v45 }
 0x2bd   :  { %3553 = vmatpush.bf16.msra.mxu1 %v5047_v26 }
 0x2c0   :  { %v3222_v62 = vpop.f32.mrf.mxu2  ;;  %v3127_v58 = vpop.f32.mrf.mxu0 }
 0x2c1   :  { %v3223_v29 = vadd.f32 %v3222_v62, %v3174_v11  ;;  %v3271_v3 = vpop.f32.mrf.mxu3  ;;  %v3128_v5 = vadd.f32 %v3127_v58, %v8451_v18  ;;  %v3176_v31 = vpop.f32.mrf.mxu1  ;;  %v9323_v62 = vld [vmem:[#allocation18_spill] sm:$0xff]  ;;  %v9326_v58 = vld [vmem:[#allocation21_spill] sm:$0xff] }
 0x2c3   :  { %v8522_v35 = vadd.f32 %v3271_v3, %v3223_v29  ;;  %v3177_v56 = vadd.f32 %v3176_v31, %v3128_v5  ;;  %3322 = vmatmul.bf16.gmra.mxu0 %v9319_v63  ;;  %v9324_v29 = vld [vmem:[#allocation19_spill] sm:$0xff]  ;;  %v9325_v3 = vld [vmem:[#allocation20_spill] sm:$0xff]  ;;  %v5756_v5 = vld [vmem:[%s9111_s1 + $0x524] sm:$0xf] }
 0x2c4   :  { %3371 = vmatmul.bf16.gmra.mxu1 %v9320_v40  ;;  %v5100_v31 = vld [vmem:[%s9111_s1 + $0x528] sm:$0xf0] }
 0x2c5   :  { %3420 = vmatmul.bf16.gmra.mxu2 %v9321_v41  ;;  %v5103_v63 = vor.u32 %v5756_v5, %v5100_v31  ;;  %v4972_v40 = vld [vmem:[%s9111_s1 + $0x428] sm:$0xf0]  ;;  %v5772_v41 = vld [vmem:[%s9111_s1 + $0x5a4] sm:$0xf]  ;;  %v5770_v5 = vld [vmem:[%s9111_s1 + $0x594] sm:$0xf] }
 0x2c6   :  { %3469 = vmatmul.bf16.gmra.mxu3 %v9322_v42  ;;  %v5164_v42 = vld [vmem:[%s9111_s1 + $0x5a8] sm:$0xf0]  ;;  %v5156_v31 = vld [vmem:[%s9111_s1 + $0x598] sm:$0xf0] }
 0x2c7   :  { %v5167_v59 = vor.u32 %v5772_v41, %v5164_v42  ;;  %3603 = vmatpush.bf16.msra.mxu2 %v5103_v63 }
 0x2c8   :  { %v3225_v44 = vpop.f32.mrf.mxu2  ;;  %v3129_v14 = vpop.f32.mrf.mxu0 }
 0x2c9   :  { %v3226_v47 = vadd.f32 %v3225_v44, %v3177_v56  ;;  %v3274_v13 = vpop.f32.mrf.mxu3  ;;  %v3130_v15 = vadd.f32 %v3129_v14, %v8451_v18  ;;  %v3178_v55 = vpop.f32.mrf.mxu1  ;;  %v5724_v56 = vld [vmem:[%s9111_s1 + $0x424] sm:$0xf]  ;;  %3652 = vmatpush.bf16.msra.mxu3 %v5167_v59 }
 0x2ca   :  { %v4975_v21 = vor.u32 %v5724_v56, %v4972_v40  ;;  %v5159_v40 = vor.u32 %v5770_v5, %v5156_v31 }
 0x2cb   :  { %v8547_v24 = vadd.f32 %v3274_v13, %v3226_v47  ;;  %v3179_v51 = vadd.f32 %v3178_v55, %v3130_v15  ;;  %v5036_v47 = vld [vmem:[%s9111_s1 + $0x4a8] sm:$0xf0] }
 0x2cc   :  { %3505 = vmatpush.bf16.msra.mxu0 %v4975_v21  ;;  %v5039_v14 = vor.u32 %v5740_v46, %v5036_v47 }
 0x2cd   :  { %3653 = vmatpush.bf16.msra.mxu3 %v5159_v40 }
 0x2ce   :  { %3554 = vmatpush.bf16.msra.mxu1 %v5039_v14 }
 0x2d0   :  { %v3227_v27 = vpop.f32.mrf.mxu2  ;;  %v3132_v4 = vpop.f32.mrf.mxu0 }
 0x2d1   :  { %v3228_v33 = vadd.f32 %v3227_v27, %v3179_v51  ;;  %v3276_v6 = vpop.f32.mrf.mxu3  ;;  %v3133_v8 = vadd.f32 %v3132_v4, %v8451_v18  ;;  %v3181_v9 = vpop.f32.mrf.mxu1  ;;  %v9328_v4 = vld [vmem:[#allocation23_spill] sm:$0xff] }
 0x2d3   :  { %v8556_v11 = vadd.f32 %v3276_v6, %v3228_v33  ;;  %v3182_v32 = vadd.f32 %v3181_v9, %v3133_v8  ;;  %3327 = vmatmul.bf16.gmra.mxu0 %v9323_v62  ;;  %v9327_v6 = vld [vmem:[#allocation22_spill] sm:$0xff]  ;;  %v9329_v8 = vld [vmem:[#allocation24_spill] sm:$0xff]  ;;  %v9330_v9 = vld [vmem:[#allocation25_spill] sm:$0xff] }
 0x2d4   :  { %3376 = vmatmul.bf16.gmra.mxu1 %v9324_v29  ;;  %v5092_v62 = vld [vmem:[%s9111_s1 + $0x518] sm:$0xf0]  ;;  %v5722_v29 = vld [vmem:[%s9111_s1 + $0x414] sm:$0xf] }
 0x2d5   :  { %3425 = vmatmul.bf16.gmra.mxu2 %v9325_v3 }
 0x2d6   :  { %3474 = vmatmul.bf16.gmra.mxu3 %v9326_v58  ;;  %v4964_v58 = vld [vmem:[%s9111_s1 + $0x418] sm:$0xf0] }
 0x2d7   :  { %v4967_v63 = vor.u32 %v5722_v29, %v4964_v58  ;;  %v5768_v29 = vld [vmem:[%s9111_s1 + $0x584] sm:$0xf] }
 0x2d8   :  { %v3230_v43 = vpop.f32.mrf.mxu2  ;;  %v3134_v36 = vpop.f32.mrf.mxu0 }
 0x2d9   :  { %v3231_v1 = vadd.f32 %v3230_v43, %v3182_v32  ;;  %v3279_v28 = vpop.f32.mrf.mxu3  ;;  %v3135_v57 = vadd.f32 %v3134_v36, %v8451_v18  ;;  %v3183_v44 = vpop.f32.mrf.mxu1  ;;  %v5754_v32 = vld [vmem:[%s9111_s1 + $0x514] sm:$0xf]  ;;  %3506 = vmatpush.bf16.msra.mxu0 %v4967_v63  ;;  %v5028_v36 = vld [vmem:[%s9111_s1 + $0x498] sm:$0xf0] }
 0x2da   :  { %v5095_v3 = vor.u32 %v5754_v32, %v5092_v62  ;;  %v4956_v62 = vld [vmem:[%s9111_s1 + $0x408] sm:$0xf0] }
 0x2db   :  { %v8581_v45 = vadd.f32 %v3279_v28, %v3231_v1  ;;  %v3184_v13 = vadd.f32 %v3183_v44, %v3135_v57  ;;  %v5738_v28 = vld [vmem:[%s9111_s1 + $0x494] sm:$0xf] }
 0x2dc   :  { %3604 = vmatpush.bf16.msra.mxu2 %v5095_v3  ;;  %v5031_v44 = vor.u32 %v5738_v28, %v5028_v36  ;;  %v5148_v3 = vld [vmem:[%s9111_s1 + $0x588] sm:$0xf0] }
 0x2dd   :  { %v5151_v31 = vor.u32 %v5768_v29, %v5148_v3  ;;  %v5460_v29 = vld [vmem:[%s9111_s1 + $0x7f8] sm:$0xf0] }
 0x2de   :  { %3555 = vmatpush.bf16.msra.mxu1 %v5031_v44 }
 0x2df   :  { %3654 = vmatpush.bf16.msra.mxu3 %v5151_v31 }
 0x2e0   :  { %v3232_v15 = vpop.f32.mrf.mxu2  ;;  %v3137_v50 = vpop.f32.mrf.mxu0 }
 0x2e1   :  { %v3233_v55 = vadd.f32 %v3232_v15, %v3184_v13  ;;  %v3281_v49 = vpop.f32.mrf.mxu3  ;;  %v3138_v51 = vadd.f32 %v3137_v50, %v8451_v18  ;;  %v3186_v26 = vpop.f32.mrf.mxu1 }
 0x2e3   :  { %v8590_v27 = vadd.f32 %v3281_v49, %v3233_v55  ;;  %v3187_v33 = vadd.f32 %v3186_v26, %v3138_v51  ;;  %3332 = vmatmul.bf16.gmra.mxu0 %v9327_v6  ;;  %v9331_v51 = vld [vmem:[#allocation26_spill] sm:$0xff]  ;;  %v9332_v26 = vld [vmem:[#allocation27_spill] sm:$0xff]  ;;  %v9334_v6 = vld [vmem:[#allocation29_spill] sm:$0xff] }
 0x2e4   :  { %3381 = vmatmul.bf16.gmra.mxu1 %v9328_v4  ;;  %v5752_v4 = vld [vmem:[%s9111_s1 + $0x504] sm:$0xf] }
 0x2e5   :  { %3430 = vmatmul.bf16.gmra.mxu2 %v9329_v8  ;;  %v5084_v8 = vld [vmem:[%s9111_s1 + $0x508] sm:$0xf0] }
 0x2e6   :  { %3479 = vmatmul.bf16.gmra.mxu3 %v9330_v9  ;;  %v5720_v9 = vld [vmem:[%s9111_s1 + $0x404] sm:$0xf]  ;;  %v5087_v32 = vor.u32 %v5752_v4, %v5084_v8  ;;  %v5396_v4 = vld [vmem:[%s9111_s1 + $0x778] sm:$0xf0]  ;;  %v5798_v8 = vld [vmem:[%s9111_s1 + $0x674] sm:$0xf] }
 0x2e7   :  { %v4959_v5 = vor.u32 %v5720_v9, %v4956_v62  ;;  %v5846_v62 = vld [vmem:[%s9111_s1 + $0x7f4] sm:$0xf] }
 0x2e8   :  { %v3235_v56 = vpop.f32.mrf.mxu2  ;;  %v3139_v43 = vpop.f32.mrf.mxu0  ;;  %3605 = vmatpush.bf16.msra.mxu2 %v5087_v32  ;;  %v5268_v32 = vld [vmem:[%s9111_s1 + $0x678] sm:$0xf0] }
 0x2e9   :  { %v3236_v41 = vadd.f32 %v3235_v56, %v3187_v33  ;;  %v3284_v42 = vpop.f32.mrf.mxu3  ;;  %v3140_v21 = vadd.f32 %v3139_v43, %v8451_v18  ;;  %v3188_v59 = vpop.f32.mrf.mxu1  ;;  %v9333_v33 = vld [vmem:[#allocation28_spill] sm:$0xff]  ;;  %3507 = vmatpush.bf16.msra.mxu0 %v4959_v5  ;;  %v5463_v5 = vor.u32 %v5846_v62, %v5460_v29  ;;  %v5260_v62 = vld [vmem:[%s9111_s1 + $0x668] sm:$0xf0]  ;;  %v5844_v29 = vld [vmem:[%s9111_s1 + $0x7e4] sm:$0xf] }
 0x2eb   :  { %v8615_v1 = vadd.f32 %v3284_v42, %v3236_v41  ;;  %v3189_v57 = vadd.f32 %v3188_v59, %v3140_v21  ;;  %v5736_v21 = vld [vmem:[%s9111_s1 + $0x484] sm:$0xf]  ;;  %v5020_v59 = vld [vmem:[%s9111_s1 + $0x488] sm:$0xf0]  ;;  %3843 = vmatpush.bf16.msrb.mxu3 %v5463_v5 }
 0x2ec   :  { %v5023_v36 = vor.u32 %v5736_v21, %v5020_v59  ;;  %v5814_v21 = vld [vmem:[%s9111_s1 + $0x6f4] sm:$0xf]  ;;  %v5332_v59 = vld [vmem:[%s9111_s1 + $0x6f8] sm:$0xf0] }
 0x2ee   :  { %3556 = vmatpush.bf16.msra.mxu1 %v5023_v36  ;;  %v5335_v36 = vor.u32 %v5814_v21, %v5332_v59 }
 0x2f0   :  { %v3237_v46 = vpop.f32.mrf.mxu2  ;;  %v3142_v14 = vpop.f32.mrf.mxu0 }
 0x2f1   :  { %v3238_v47 = vadd.f32 %v3237_v46, %v3189_v57  ;;  %v3286_v13 = vpop.f32.mrf.mxu3  ;;  %v3143_v15 = vadd.f32 %v3142_v14, %v8451_v18  ;;  %v3191_v55 = vpop.f32.mrf.mxu1 }
 0x2f2   :  { %3745 = vmatpush.bf16.msrb.mxu1 %v5335_v36  ;;  %v5324_v36 = vld [vmem:[%s9111_s1 + $0x6e8] sm:$0xf0] }
 0x2f3   :  { %v8624_v49 = vadd.f32 %v3286_v13, %v3238_v47  ;;  %v3192_v50 = vadd.f32 %v3191_v55, %v3143_v15  ;;  %3337 = vmatmul.bf16.gmra.mxu0 %v9331_v51  ;;  %v9336_v51 = vld [vmem:[#allocation31_spill] sm:$0xff] }
 0x2f4   :  { %3386 = vmatmul.bf16.gmra.mxu1 %v9332_v26  ;;  %v9337_v26 = vld [vmem:[#allocation32_spill] sm:$0xff] }
 0x2f5   :  { %3435 = vmatmul.bf16.gmra.mxu2 %v9333_v33  ;;  %v9338_v33 = vld [vmem:[#allocation33_spill] sm:$0xff] }
 0x2f6   :  { %3484 = vmatmul.bf16.gmra.mxu3 %v9334_v6  ;;  %v5830_v6 = vld [vmem:[%s9111_s1 + $0x774] sm:$0xf] }
 0x2f7   :  { %v5399_v9 = vor.u32 %v5830_v6, %v5396_v4  ;;  %v9342_v6 = vld [vmem:[#allocation37_spill] sm:$0xff]  ;;  %v5828_v4 = vld [vmem:[%s9111_s1 + $0x764] sm:$0xf] }
 0x2f8   :  { %v3240_v58 = vpop.f32.mrf.mxu2  ;;  %v3144_v40 = vpop.f32.mrf.mxu0 }
 0x2f9   :  { %v3241_v56 = vadd.f32 %v3240_v58, %v3192_v50  ;;  %v3289_v63 = vpop.f32.mrf.mxu3  ;;  %v3145_v41 = vadd.f32 %v3144_v40, %v8451_v18  ;;  %v3193_v42 = vpop.f32.mrf.mxu1  ;;  %v9335_v50 = vld [vmem:[#allocation30_spill] sm:$0xff]  ;;  %v5271_v58 = vor.u32 %v5798_v8, %v5268_v32  ;;  %3794 = vmatpush.bf16.msrb.mxu2 %v5399_v9  ;;  %v5388_v8 = vld [vmem:[%s9111_s1 + $0x768] sm:$0xf0] }
 0x2fa   :  { %v5796_v9 = vld [vmem:[%s9111_s1 + $0x664] sm:$0xf]  ;;  %v5391_v32 = vor.u32 %v5828_v4, %v5388_v8  ;;  %v9345_v4 = vld [vmem:[#allocation40_spill] sm:$0xff]  ;;  %v9346_v8 = vld [vmem:[#allocation41_spill] sm:$0xff] }
 0x2fb   :  { %v8649_v43 = vadd.f32 %v3289_v63, %v3241_v56  ;;  %v3194_v28 = vadd.f32 %v3193_v42, %v3145_v41  ;;  %3696 = vmatpush.bf16.msrb.mxu0 %v5271_v58  ;;  %v5263_v5 = vor.u32 %v5796_v9, %v5260_v62  ;;  %v5826_v9 = vld [vmem:[%s9111_s1 + $0x754] sm:$0xf] }
 0x2fd   :  { %3795 = vmatpush.bf16.msrb.mxu2 %v5391_v32  ;;  %v5794_v32 = vld [vmem:[%s9111_s1 + $0x654] sm:$0xf] }
 0x2ff   :  { %3697 = vmatpush.bf16.msrb.mxu0 %v5263_v5 }
 0x300   :  { %v3242_v57 = vpop.f32.mrf.mxu2  ;;  %v3147_v47 = vpop.f32.mrf.mxu0 }
 0x301   :  { %v3243_v44 = vadd.f32 %v3242_v57, %v3194_v28  ;;  %v3291_v46 = vpop.f32.mrf.mxu3  ;;  %v3148_v13 = vadd.f32 %v3147_v47, %v8451_v18  ;;  %v3196_v14 = vpop.f32.mrf.mxu1 }
 0x303   :  { %v8658_v15 = vadd.f32 %v3291_v46, %v3243_v44  ;;  %v3197_v55 = vadd.f32 %v3196_v14, %v3148_v13  ;;  %3342 = vmatmul.bf16.gmra.mxu0 %v9335_v50 }
 0x304   :  { %3391 = vmatmul.bf16.gmra.mxu1 %v9336_v51  ;;  %v9339_v51 = vld [vmem:[#allocation34_spill] sm:$0xff] }
 0x305   :  { %3440 = vmatmul.bf16.gmra.mxu2 %v9337_v26  ;;  %v9340_v26 = vld [vmem:[#allocation35_spill] sm:$0xff] }
 0x306   :  { %3489 = vmatmul.bf16.gmra.mxu3 %v9338_v33  ;;  %v9341_v33 = vld [vmem:[#allocation36_spill] sm:$0xff] }
 0x308   :  { %v3245_v3 = vpop.f32.mrf.mxu2  ;;  %v3149_v63 = vpop.f32.mrf.mxu0 }
 0x309   :  { %v3246_v31 = vadd.f32 %v3245_v3, %v3197_v55  ;;  %v3294_v56 = vpop.f32.mrf.mxu3  ;;  %v3150_v40 = vadd.f32 %v3149_v63, %v8451_v18  ;;  %v3198_v41 = vpop.f32.mrf.mxu1  ;;  %v5452_v3 = vld [vmem:[%s9111_s1 + $0x7e8] sm:$0xf0] }
 0x30b   :  { %v8683_v42 = vadd.f32 %v3294_v56, %v3246_v31  ;;  %v3199_v28 = vadd.f32 %v3198_v41, %v3150_v40  ;;  %v5455_v31 = vor.u32 %v5844_v29, %v5452_v3  ;;  %v5252_v29 = vld [vmem:[%s9111_s1 + $0x658] sm:$0xf0]  ;;  %v5842_v3 = vld [vmem:[%s9111_s1 + $0x7d4] sm:$0xf] }
 0x30d   :  { %3844 = vmatpush.bf16.msrb.mxu3 %v5455_v31  ;;  %v5255_v31 = vor.u32 %v5794_v32, %v5252_v29  ;;  %v5824_v32 = vld [vmem:[%s9111_s1 + $0x744] sm:$0xf] }
 0x30f   :  { %3698 = vmatpush.bf16.msrb.mxu0 %v5255_v31 }
 0x310   :  { %v3247_v57 = vpop.f32.mrf.mxu2  ;;  %v3152_v47 = vpop.f32.mrf.mxu0 }
 0x311   :  { %v3248_v44 = vadd.f32 %v3247_v57, %v3199_v28  ;;  %v3296_v46 = vpop.f32.mrf.mxu3  ;;  %v3153_v13 = vadd.f32 %v3152_v47, %v8451_v18  ;;  %v3201_v14 = vpop.f32.mrf.mxu1  ;;  %v5812_v28 = vld [vmem:[%s9111_s1 + $0x6e4] sm:$0xf] }
 0x313   :  { %v8692_v55 = vadd.f32 %v3296_v46, %v3248_v44  ;;  %v3202_v50 = vadd.f32 %v3201_v14, %v3153_v13  ;;  %3347 = vmatmul.bf16.gmra.mxu0 %v9339_v51  ;;  %v5327_v44 = vor.u32 %v5812_v28, %v5324_v36 }
 0x314   :  { %3396 = vmatmul.bf16.gmra.mxu1 %v9340_v26 }
 0x315   :  { %3445 = vmatmul.bf16.gmra.mxu2 %v9341_v33  ;;  %3746 = vmatpush.bf16.msrb.mxu1 %v5327_v44  ;;  %v9343_v33 = vld [vmem:[#allocation38_spill] sm:$0xff]  ;;  %v5316_v44 = vld [vmem:[%s9111_s1 + $0x6d8] sm:$0xf0] }
 0x316   :  { %3494 = vmatmul.bf16.gmra.mxu3 %v9342_v6  ;;  %v9344_v6 = vld [vmem:[#allocation39_spill] sm:$0xff] }
 0x318   :  { %v3250_v58 = vpop.f32.mrf.mxu2  ;;  %v3154_v40 = vpop.f32.mrf.mxu0 }
 0x319   :  { %v3251_v56 = vadd.f32 %v3250_v58, %v3202_v50  ;;  %v3299_v63 = vpop.f32.mrf.mxu3  ;;  %v3155_v41 = vadd.f32 %v3154_v40, %v8451_v18  ;;  %v3203_v21 = vpop.f32.mrf.mxu1  ;;  %v5444_v58 = vld [vmem:[%s9111_s1 + $0x7d8] sm:$0xf0] }
 0x31b   :  { %v8717_v59 = vadd.f32 %v3299_v63, %v3251_v56  ;;  %v3204_v57 = vadd.f32 %v3203_v21, %v3155_v41  ;;  %v5447_v56 = vor.u32 %v5842_v3, %v5444_v58  ;;  %v5244_v3 = vld [vmem:[%s9111_s1 + $0x648] sm:$0xf0]  ;;  %v5840_v58 = vld [vmem:[%s9111_s1 + $0x7c4] sm:$0xf] }
 0x31d   :  { %3845 = vmatpush.bf16.msrb.mxu3 %v5447_v56 }
 0x320   :  { %v3252_v46 = vpop.f32.mrf.mxu2  ;;  %v3313_v18 = vpop.f32.mrf.mxu0 }
 0x321   :  { %v3253_v47 = vadd.f32 %v3252_v46, %v3204_v57  ;;  %v3301_v13 = vpop.f32.mrf.mxu3  ;;  %v3314_v14 = vadd.f32 %v3313_v18, %v8479_v38  ;;  %v3362_v50 = vpop.f32.mrf.mxu1  ;;  %v5380_v38 = vld [vmem:[%s9111_s1 + $0x758] sm:$0xf0]  ;;  %v5810_v57 = vld [vmem:[%s9111_s1 + $0x6d4] sm:$0xf] }
 0x322   :  { %v5383_v62 = vor.u32 %v5826_v9, %v5380_v38  ;;  %v9349_v9 = vld [vmem:[#allocation44_spill] sm:$0xff]  ;;  %v9350_v38 = vld [vmem:[#allocation45_spill] sm:$0xff] }
 0x323   :  { %v8726_v51 = vadd.f32 %v3301_v13, %v3253_v47  ;;  %v3363_v26 = vadd.f32 %v3362_v50, %v3314_v14  ;;  %3508 = vmatmul.bf16.vlgmr.msra.gmra.mxu0 %v9343_v33  ;;  %v5319_v47 = vor.u32 %v5810_v57, %v5316_v44 }
 0x324   :  { %3557 = vmatmul.bf16.vlgmr.msra.gmra.mxu1 %v9344_v6  ;;  %3796 = vmatpush.bf16.msrb.mxu2 %v5383_v62  ;;  %v5792_v62 = vld [vmem:[%s9111_s1 + $0x644] sm:$0xf] }
 0x325   :  { %3606 = vmatmul.bf16.vlgmr.msra.gmra.mxu2 %v9345_v4  ;;  %3747 = vmatpush.bf16.msrb.mxu1 %v5319_v47  ;;  %v9347_v4 = vld [vmem:[#allocation42_spill] sm:$0xff]  ;;  %v5247_v56 = vor.u32 %v5792_v62, %v5244_v3  ;;  %v5308_v47 = vld [vmem:[%s9111_s1 + $0x6c8] sm:$0xf0]  ;;  %v5822_v62 = vld [vmem:[%s9111_s1 + $0x734] sm:$0xf] }
 0x326   :  { %3655 = vmatmul.bf16.vlgmr.msra.gmra.mxu3 %v9346_v8  ;;  %v9348_v8 = vld [vmem:[#allocation43_spill] sm:$0xff] }
 0x327   :  { %3699 = vmatpush.bf16.msrb.mxu0 %v5247_v56 }
 0x328   :  { %v3411_v5 = vpop.f32.mrf.mxu2  ;;  %v3315_v41 = vpop.f32.mrf.mxu0 }
 0x329   :  { %v3412_v63 = vadd.f32 %v3411_v5, %v3363_v26  ;;  %v3460_v40 = vpop.f32.mrf.mxu3  ;;  %v3316_v21 = vadd.f32 %v3315_v41, %v8488_v53  ;;  %v3364_v28 = vpop.f32.mrf.mxu1  ;;  %v5436_v5 = vld [vmem:[%s9111_s1 + $0x7c8] sm:$0xf0] }
 0x32b   :  { %v8751_v36 = vadd.f32 %v3460_v40, %v3412_v63  ;;  %v3365_v46 = vadd.f32 %v3364_v28, %v3316_v21  ;;  %v5439_v63 = vor.u32 %v5840_v58, %v5436_v5  ;;  %v5236_v58 = vld [vmem:[%s9111_s1 + $0x638] sm:$0xf0]  ;;  %v5838_v5 = vld [vmem:[%s9111_s1 + $0x7b4] sm:$0xf] }
 0x32d   :  { %3846 = vmatpush.bf16.msrb.mxu3 %v5439_v63 }
 0x330   :  { %v3413_v13 = vpop.f32.mrf.mxu2  ;;  %v3318_v53 = vpop.f32.mrf.mxu0 }
 0x331   :  { %v3414_v18 = vadd.f32 %v3413_v13, %v3365_v46  ;;  %v3462_v14 = vpop.f32.mrf.mxu3  ;;  %v3319_v50 = vadd.f32 %v3318_v53, %v8513_v20  ;;  %v3367_v26 = vpop.f32.mrf.mxu1  ;;  %v5372_v20 = vld [vmem:[%s9111_s1 + $0x748] sm:$0xf0]  ;;  %v5808_v46 = vld [vmem:[%s9111_s1 + $0x6c4] sm:$0xf] }
 0x332   :  { %v5375_v29 = vor.u32 %v5824_v32, %v5372_v20  ;;  %v9353_v32 = vld [vmem:[#allocation48_spill] sm:$0xff]  ;;  %v9354_v20 = vld [vmem:[#allocation49_spill] sm:$0xff] }
 0x333   :  { %v8760_v33 = vadd.f32 %v3462_v14, %v3414_v18  ;;  %v3368_v6 = vadd.f32 %v3367_v26, %v3319_v50  ;;  %3513 = vmatmul.bf16.gmra.mxu0 %v9347_v4  ;;  %v5311_v18 = vor.u32 %v5808_v46, %v5308_v47 }
 0x334   :  { %3562 = vmatmul.bf16.gmra.mxu1 %v9348_v8  ;;  %3797 = vmatpush.bf16.msrb.mxu2 %v5375_v29  ;;  %v5790_v29 = vld [vmem:[%s9111_s1 + $0x634] sm:$0xf] }
 0x335   :  { %3611 = vmatmul.bf16.gmra.mxu2 %v9349_v9  ;;  %3748 = vmatpush.bf16.msrb.mxu1 %v5311_v18  ;;  %v9351_v9 = vld [vmem:[#allocation46_spill] sm:$0xff]  ;;  %v5239_v63 = vor.u32 %v5790_v29, %v5236_v58  ;;  %v5300_v18 = vld [vmem:[%s9111_s1 + $0x6b8] sm:$0xf0] }
 0x336   :  { %3660 = vmatmul.bf16.gmra.mxu3 %v9350_v38  ;;  %v9352_v38 = vld [vmem:[#allocation47_spill] sm:$0xff]  ;;  %v5820_v29 = vld [vmem:[%s9111_s1 + $0x724] sm:$0xf] }
 0x337   :  { %3700 = vmatpush.bf16.msrb.mxu0 %v5239_v63 }
 0x338   :  { %v3416_v31 = vpop.f32.mrf.mxu2  ;;  %v3320_v21 = vpop.f32.mrf.mxu0 }
 0x339   :  { %v3417_v40 = vadd.f32 %v3416_v31, %v3368_v6  ;;  %v3465_v41 = vpop.f32.mrf.mxu3  ;;  %v3321_v28 = vadd.f32 %v3320_v21, %v8522_v35  ;;  %v3369_v57 = vpop.f32.mrf.mxu1  ;;  %v5428_v31 = vld [vmem:[%s9111_s1 + $0x7b8] sm:$0xf0] }
 0x33b   :  { %v8785_v44 = vadd.f32 %v3465_v41, %v3417_v40  ;;  %v3370_v13 = vadd.f32 %v3369_v57, %v3321_v28  ;;  %v5431_v40 = vor.u32 %v5838_v5, %v5428_v31  ;;  %v5228_v5 = vld [vmem:[%s9111_s1 + $0x628] sm:$0xf0]  ;;  %v5836_v31 = vld [vmem:[%s9111_s1 + $0x7a4] sm:$0xf] }
 0x33d   :  { %3847 = vmatpush.bf16.msrb.mxu3 %v5431_v40 }
 0x340   :  { %v3418_v14 = vpop.f32.mrf.mxu2  ;;  %v3323_v35 = vpop.f32.mrf.mxu0 }
 0x341   :  { %v3419_v53 = vadd.f32 %v3418_v14, %v3370_v13  ;;  %v3467_v50 = vpop.f32.mrf.mxu3  ;;  %v3324_v26 = vadd.f32 %v3323_v35, %v8547_v24  ;;  %v3372_v6 = vpop.f32.mrf.mxu1  ;;  %v5364_v24 = vld [vmem:[%s9111_s1 + $0x738] sm:$0xf0]  ;;  %v5806_v13 = vld [vmem:[%s9111_s1 + $0x6b4] sm:$0xf] }
 0x342   :  { %v5367_v3 = vor.u32 %v5822_v62, %v5364_v24  ;;  %v9357_v62 = vld [vmem:[#allocation52_spill] sm:$0xff]  ;;  %v9358_v24 = vld [vmem:[#allocation53_spill] sm:$0xff] }
 0x343   :  { %v8794_v4 = vadd.f32 %v3467_v50, %v3419_v53  ;;  %v3373_v8 = vadd.f32 %v3372_v6, %v3324_v26  ;;  %3518 = vmatmul.bf16.gmra.mxu0 %v9351_v9  ;;  %v5303_v53 = vor.u32 %v5806_v13, %v5300_v18 }
 0x344   :  { %3567 = vmatmul.bf16.gmra.mxu1 %v9352_v38  ;;  %3798 = vmatpush.bf16.msrb.mxu2 %v5367_v3  ;;  %v5788_v3 = vld [vmem:[%s9111_s1 + $0x624] sm:$0xf] }
 0x345   :  { %3616 = vmatmul.bf16.gmra.mxu2 %v9353_v32  ;;  %3749 = vmatpush.bf16.msrb.mxu1 %v5303_v53  ;;  %v9355_v32 = vld [vmem:[#allocation50_spill] sm:$0xff]  ;;  %v5231_v40 = vor.u32 %v5788_v3, %v5228_v5  ;;  %v5292_v53 = vld [vmem:[%s9111_s1 + $0x6a8] sm:$0xf0]  ;;  %v5818_v3 = vld [vmem:[%s9111_s1 + $0x714] sm:$0xf] }
 0x346   :  { %3665 = vmatmul.bf16.gmra.mxu3 %v9354_v20  ;;  %v9356_v20 = vld [vmem:[#allocation51_spill] sm:$0xff] }
 0x347   :  { %3701 = vmatpush.bf16.msrb.mxu0 %v5231_v40 }
 0x348   :  { %v3421_v56 = vpop.f32.mrf.mxu2  ;;  %v3325_v28 = vpop.f32.mrf.mxu0 }
 0x349   :  { %v3422_v41 = vadd.f32 %v3421_v56, %v3373_v8  ;;  %v3470_v21 = vpop.f32.mrf.mxu3  ;;  %v3326_v57 = vadd.f32 %v3325_v28, %v8556_v11  ;;  %v3374_v46 = vpop.f32.mrf.mxu1  ;;  %v5420_v56 = vld [vmem:[%s9111_s1 + $0x7a8] sm:$0xf0] }
 0x34b   :  { %v8819_v47 = vadd.f32 %v3470_v21, %v3422_v41  ;;  %v3375_v14 = vadd.f32 %v3374_v46, %v3326_v57  ;;  %v5423_v41 = vor.u32 %v5836_v31, %v5420_v56  ;;  %v5220_v31 = vld [vmem:[%s9111_s1 + $0x618] sm:$0xf0]  ;;  %v5834_v56 = vld [vmem:[%s9111_s1 + $0x794] sm:$0xf] }
 0x34d   :  { %3848 = vmatpush.bf16.msrb.mxu3 %v5423_v41 }
 0x350   :  { %v3423_v50 = vpop.f32.mrf.mxu2  ;;  %v3328_v11 = vpop.f32.mrf.mxu0 }
 0x351   :  { %v3424_v35 = vadd.f32 %v3423_v50, %v3375_v14  ;;  %v3472_v26 = vpop.f32.mrf.mxu3  ;;  %v3329_v6 = vadd.f32 %v3328_v11, %v8581_v45  ;;  %v3377_v8 = vpop.f32.mrf.mxu1  ;;  %v5356_v45 = vld [vmem:[%s9111_s1 + $0x728] sm:$0xf0]  ;;  %v5804_v14 = vld [vmem:[%s9111_s1 + $0x6a4] sm:$0xf] }
 0x352   :  { %v5359_v58 = vor.u32 %v5820_v29, %v5356_v45  ;;  %v9361_v29 = vld [vmem:[#allocation56_spill] sm:$0xff]  ;;  %v9362_v45 = vld [vmem:[#allocation57_spill] sm:$0xff] }
 0x353   :  { %v8828_v9 = vadd.f32 %v3472_v26, %v3424_v35  ;;  %v3378_v38 = vadd.f32 %v3377_v8, %v3329_v6  ;;  %3523 = vmatmul.bf16.gmra.mxu0 %v9355_v32  ;;  %v5295_v35 = vor.u32 %v5804_v14, %v5292_v53 }
 0x354   :  { %3572 = vmatmul.bf16.gmra.mxu1 %v9356_v20  ;;  %3799 = vmatpush.bf16.msrb.mxu2 %v5359_v58  ;;  %v5786_v58 = vld [vmem:[%s9111_s1 + $0x614] sm:$0xf] }
 0x355   :  { %3621 = vmatmul.bf16.gmra.mxu2 %v9357_v62  ;;  %3750 = vmatpush.bf16.msrb.mxu1 %v5295_v35  ;;  %v9359_v62 = vld [vmem:[#allocation54_spill] sm:$0xff]  ;;  %v5223_v41 = vor.u32 %v5786_v58, %v5220_v31  ;;  %v5284_v35 = vld [vmem:[%s9111_s1 + $0x698] sm:$0xf0] }
 0x356   :  { %3670 = vmatmul.bf16.gmra.mxu3 %v9358_v24  ;;  %v9360_v24 = vld [vmem:[#allocation55_spill] sm:$0xff]  ;;  %v5816_v58 = vld [vmem:[%s9111_s1 + $0x704] sm:$0xf] }
 0x357   :  { %3702 = vmatpush.bf16.msrb.mxu0 %v5223_v41 }
 0x358   :  { %v3426_v63 = vpop.f32.mrf.mxu2  ;;  %v3330_v57 = vpop.f32.mrf.mxu0 }
 0x359   :  { %v3427_v21 = vadd.f32 %v3426_v63, %v3378_v38  ;;  %v3475_v28 = vpop.f32.mrf.mxu3  ;;  %v3331_v46 = vadd.f32 %v3330_v57, %v8590_v27  ;;  %v3379_v13 = vpop.f32.mrf.mxu1  ;;  %v5412_v63 = vld [vmem:[%s9111_s1 + $0x798] sm:$0xf0] }
 0x35b   :  { %v8853_v18 = vadd.f32 %v3475_v28, %v3427_v21  ;;  %v3380_v50 = vadd.f32 %v3379_v13, %v3331_v46  ;;  %v5415_v21 = vor.u32 %v5834_v56, %v5412_v63  ;;  %v5212_v56 = vld [vmem:[%s9111_s1 + $0x608] sm:$0xf0]  ;;  %v5832_v63 = vld [vmem:[%s9111_s1 + $0x784] sm:$0xf] }
 0x35d   :  { %3849 = vmatpush.bf16.msrb.mxu3 %v5415_v21 }
 0x360   :  { %v3428_v26 = vpop.f32.mrf.mxu2  ;;  %v3333_v27 = vpop.f32.mrf.mxu0 }
 0x361   :  { %v3429_v11 = vadd.f32 %v3428_v26, %v3380_v50  ;;  %v3477_v6 = vpop.f32.mrf.mxu3  ;;  %v3334_v8 = vadd.f32 %v3333_v27, %v8615_v1  ;;  %v3382_v38 = vpop.f32.mrf.mxu1  ;;  %v5348_v1 = vld [vmem:[%s9111_s1 + $0x718] sm:$0xf0]  ;;  %v5802_v50 = vld [vmem:[%s9111_s1 + $0x694] sm:$0xf] }
 0x362   :  { %v5351_v5 = vor.u32 %v5818_v3, %v5348_v1  ;;  %v9365_v3 = vld [vmem:[#allocation60_spill] sm:$0xff]  ;;  %v9366_v1 = vld [vmem:[#allocation61_spill] sm:$0xff] }
 0x363   :  { %v8862_v32 = vadd.f32 %v3477_v6, %v3429_v11  ;;  %v3383_v20 = vadd.f32 %v3382_v38, %v3334_v8  ;;  %3528 = vmatmul.bf16.gmra.mxu0 %v9359_v62  ;;  %v5287_v11 = vor.u32 %v5802_v50, %v5284_v35 }
 0x364   :  { %3577 = vmatmul.bf16.gmra.mxu1 %v9360_v24  ;;  %3800 = vmatpush.bf16.msrb.mxu2 %v5351_v5  ;;  %v5784_v5 = vld [vmem:[%s9111_s1 + $0x604] sm:$0xf] }
 0x365   :  { %3626 = vmatmul.bf16.gmra.mxu2 %v9361_v29  ;;  %3751 = vmatpush.bf16.msrb.mxu1 %v5287_v11  ;;  %v9363_v29 = vld [vmem:[#allocation58_spill] sm:$0xff]  ;;  %v5215_v21 = vor.u32 %v5784_v5, %v5212_v56  ;;  %v5276_v11 = vld [vmem:[%s9111_s1 + $0x688] sm:$0xf0] }
 0x366   :  { %3675 = vmatmul.bf16.gmra.mxu3 %v9362_v45  ;;  %v9364_v45 = vld [vmem:[#allocation59_spill] sm:$0xff] }
 0x367   :  { %3703 = vmatpush.bf16.msrb.mxu0 %v5215_v21 }
 0x368   :  { %v3431_v40 = vpop.f32.mrf.mxu2  ;;  %v3335_v46 = vpop.f32.mrf.mxu0 }
 0x369   :  { %v3432_v28 = vadd.f32 %v3431_v40, %v3383_v20  ;;  %v3480_v57 = vpop.f32.mrf.mxu3  ;;  %v3336_v13 = vadd.f32 %v3335_v46, %v8624_v49  ;;  %v3384_v14 = vpop.f32.mrf.mxu1  ;;  %v5404_v40 = vld [vmem:[%s9111_s1 + $0x788] sm:$0xf0] }
 0x36b   :  { %v8887_v53 = vadd.f32 %v3480_v57, %v3432_v28  ;;  %v3385_v26 = vadd.f32 %v3384_v14, %v3336_v13  ;;  %v5407_v28 = vor.u32 %v5832_v63, %v5404_v40 }
 0x36d   :  { %3850 = vmatpush.bf16.msrb.mxu3 %v5407_v28 }
 0x370   :  { %v3433_v6 = vpop.f32.mrf.mxu2  ;;  %v3338_v49 = vpop.f32.mrf.mxu0 }
 0x371   :  { %v3434_v27 = vadd.f32 %v3433_v6, %v3385_v26  ;;  %v3482_v8 = vpop.f32.mrf.mxu3  ;;  %v3339_v38 = vadd.f32 %v3338_v49, %v8649_v43  ;;  %v3387_v20 = vpop.f32.mrf.mxu1  ;;  %v5340_v43 = vld [vmem:[%s9111_s1 + $0x708] sm:$0xf0]  ;;  %v5800_v26 = vld [vmem:[%s9111_s1 + $0x684] sm:$0xf] }
 0x372   :  { %v5343_v31 = vor.u32 %v5816_v58, %v5340_v43  ;;  %v9369_v58 = vld [vmem:[#allocation64_spill] sm:$0xff]  ;;  %v9370_v43 = vld [vmem:[#allocation65_spill] sm:$0xff] }
 0x373   :  { %v8896_v62 = vadd.f32 %v3482_v8, %v3434_v27  ;;  %v3388_v24 = vadd.f32 %v3387_v20, %v3339_v38  ;;  %3533 = vmatmul.bf16.gmra.mxu0 %v9363_v29  ;;  %v5279_v27 = vor.u32 %v5800_v26, %v5276_v11 }
 0x374   :  { %3582 = vmatmul.bf16.gmra.mxu1 %v9364_v45  ;;  %3801 = vmatpush.bf16.msrb.mxu2 %v5343_v31 }
 0x375   :  { %3631 = vmatmul.bf16.gmra.mxu2 %v9365_v3  ;;  %3752 = vmatpush.bf16.msrb.mxu1 %v5279_v27  ;;  %v9367_v3 = vld [vmem:[#allocation62_spill] sm:$0xff]  ;;  %v9372_v27 = vld [vmem:[#allocation67_spill] sm:$0xff] }
 0x376   :  { %3680 = vmatmul.bf16.gmra.mxu3 %v9366_v1  ;;  %v9368_v1 = vld [vmem:[#allocation63_spill] sm:$0xff] }
 0x378   :  { %v3436_v41 = vpop.f32.mrf.mxu2  ;;  %v3340_v13 = vpop.f32.mrf.mxu0 }
 0x379   :  { %v3437_v57 = vadd.f32 %v3436_v41, %v3388_v24  ;;  %v3485_v46 = vpop.f32.mrf.mxu3  ;;  %v3341_v14 = vadd.f32 %v3340_v13, %v8658_v15  ;;  %v3389_v50 = vpop.f32.mrf.mxu1 }
 0x37b   :  { %v8921_v35 = vadd.f32 %v3485_v46, %v3437_v57  ;;  %v3390_v6 = vadd.f32 %v3389_v50, %v3341_v14 }
 0x380   :  { %v3438_v8 = vpop.f32.mrf.mxu2  ;;  %v3343_v15 = vpop.f32.mrf.mxu0 }
 0x381   :  { %v3439_v49 = vadd.f32 %v3438_v8, %v3390_v6  ;;  %v3487_v38 = vpop.f32.mrf.mxu3  ;;  %v3344_v20 = vadd.f32 %v3343_v15, %v8683_v42  ;;  %v3392_v24 = vpop.f32.mrf.mxu1  ;;  %v9371_v6 = vld [vmem:[#allocation66_spill] sm:$0xff]  ;;  %v9373_v8 = vld [vmem:[#allocation68_spill] sm:$0xff] }
 0x383   :  { %v8930_v29 = vadd.f32 %v3487_v38, %v3439_v49  ;;  %v3393_v45 = vadd.f32 %v3392_v24, %v3344_v20  ;;  %3538 = vmatmul.bf16.gmra.mxu0 %v9367_v3 }
 0x384   :  { %3587 = vmatmul.bf16.gmra.mxu1 %v9368_v1 }
 0x385   :  { %3636 = vmatmul.bf16.gmra.mxu2 %v9369_v58 }
 0x386   :  { %3685 = vmatmul.bf16.gmra.mxu3 %v9370_v43 }
 0x388   :  { %v3441_v5 = vpop.f32.mrf.mxu2  ;;  %v3345_v63 = vpop.f32.mrf.mxu0 }
 0x389   :  { %v3442_v31 = vadd.f32 %v3441_v5, %v3393_v45  ;;  %v3490_v56 = vpop.f32.mrf.mxu3  ;;  %v3346_v40 = vadd.f32 %v3345_v63, %v8692_v55  ;;  %v3394_v41 = vpop.f32.mrf.mxu1  ;;  %v9374_v55 = vld [vmem:[#allocation69_spill] sm:$0xff] }
 0x38b   :  { %v8937_v42 = vadd.f32 %v3490_v56, %v3442_v31  ;;  %v3395_v21 = vadd.f32 %v3394_v41, %v3346_v40  ;;  %v9375_v41 = vld [vmem:[#allocation70_spill] sm:$0xff] }
 0x390   :  { %v3443_v28 = vpop.f32.mrf.mxu2  ;;  %v3348_v13 = vpop.f32.mrf.mxu0 }
 0x391   :  { %v3444_v57 = vadd.f32 %v3443_v28, %v3395_v21  ;;  %v3492_v46 = vpop.f32.mrf.mxu3  ;;  %v3349_v14 = vadd.f32 %v3348_v13, %v8717_v59  ;;  %v3397_v50 = vpop.f32.mrf.mxu1  ;;  %v9376_v21 = vld [vmem:[#allocation71_spill] sm:$0xff]  ;;  %v9377_v28 = vld [vmem:[#allocation72_spill] sm:$0xff] }
 0x393   :  { %v8940_v26 = vadd.f32 %v3492_v46, %v3444_v57  ;;  %v3398_v11 = vadd.f32 %v3397_v50, %v3349_v14  ;;  %3543 = vmatmul.bf16.gmra.mxu0 %v9371_v6 }
 0x394   :  { %3592 = vmatmul.bf16.gmra.mxu1 %v9372_v27 }
 0x395   :  { %3641 = vmatmul.bf16.gmra.mxu2 %v9373_v8 }
 0x396   :  { %3690 = vmatmul.bf16.gmra.mxu3 %v9374_v55 }
 0x398   :  { %v3446_v49 = vpop.f32.mrf.mxu2  ;;  %v3350_v20 = vpop.f32.mrf.mxu0 }
 0x399   :  { %v3447_v38 = vadd.f32 %v3446_v49, %v3398_v11  ;;  %v3495_v15 = vpop.f32.mrf.mxu3  ;;  %v3351_v24 = vadd.f32 %v3350_v20, %v8726_v51  ;;  %v3399_v45 = vpop.f32.mrf.mxu1  ;;  %v9378_v51 = vld [vmem:[#allocation73_spill] sm:$0xff] }
 0x39b   :  { %v8947_v59 = vadd.f32 %v3495_v15, %v3447_v38  ;;  %v3400_v3 = vadd.f32 %v3399_v45, %v3351_v24  ;;  %v9379_v45 = vld [vmem:[#allocation74_spill] sm:$0xff] }
 0x3a0   :  { %v3448_v1 = vpop.f32.mrf.mxu2  ;;  %v3509_v5 = vpop.f32.mrf.mxu0 }
 0x3a1   :  { %v3449_v58 = vadd.f32 %v3448_v1, %v3400_v3  ;;  %v3497_v43 = vpop.f32.mrf.mxu3  ;;  %v3510_v31 = vadd.f32 %v3509_v5, %v8751_v36  ;;  %v3558_v56 = vpop.f32.mrf.mxu1  ;;  %v9380_v3 = vld [vmem:[#allocation75_spill] sm:$0xff]  ;;  %v9381_v1 = vld [vmem:[#allocation76_spill] sm:$0xff] }
 0x3a3   :  { %v8950_v63 = vadd.f32 %v3497_v43, %v3449_v58  ;;  %v3559_v40 = vadd.f32 %v3558_v56, %v3510_v31  ;;  %3704 = vmatmul.bf16.vlgmr.msrb.gmra.mxu0 %v9375_v41 }
 0x3a4   :  { %3753 = vmatmul.bf16.vlgmr.msrb.gmra.mxu1 %v9376_v21 }
 0x3a5   :  { %3802 = vmatmul.bf16.vlgmr.msrb.gmra.mxu2 %v9377_v28 }
 0x3a6   :  { %3851 = vmatmul.bf16.vlgmr.msrb.gmra.mxu3 %v9378_v51 }
 0x3a8   :  { %v3607_v57 = vpop.f32.mrf.mxu2  ;;  %v3511_v14 = vpop.f32.mrf.mxu0 }
 0x3a9   :  { %v3608_v46 = vadd.f32 %v3607_v57, %v3559_v40  ;;  %v3656_v13 = vpop.f32.mrf.mxu3  ;;  %v3512_v50 = vadd.f32 %v3511_v14, %v8760_v33  ;;  %v3560_v11 = vpop.f32.mrf.mxu1  ;;  %v9382_v33 = vld [vmem:[#allocation77_spill] sm:$0xff] }
 0x3ab   :  { %v8957_v36 = vadd.f32 %v3656_v13, %v3608_v46  ;;  %v3561_v6 = vadd.f32 %v3560_v11, %v3512_v50  ;;  %v9383_v11 = vld [vmem:[#allocation78_spill] sm:$0xff] }
 0x3b0   :  { %v3609_v27 = vpop.f32.mrf.mxu2  ;;  %v3514_v49 = vpop.f32.mrf.mxu0 }
 0x3b1   :  { %v3610_v8 = vadd.f32 %v3609_v27, %v3561_v6  ;;  %v3658_v55 = vpop.f32.mrf.mxu3  ;;  %v3515_v38 = vadd.f32 %v3514_v49, %v8785_v44  ;;  %v3563_v15 = vpop.f32.mrf.mxu1  ;;  %v9384_v6 = vld [vmem:[#allocation79_spill] sm:$0xff]  ;;  %v9385_v27 = vld [vmem:[#allocation80_spill] sm:$0xff] }
 0x3b3   :  { %v8960_v20 = vadd.f32 %v3658_v55, %v3610_v8  ;;  %v3564_v24 = vadd.f32 %v3563_v15, %v3515_v38  ;;  %3709 = vmatmul.bf16.gmra.mxu0 %v9379_v45 }
 0x3b4   :  { %3758 = vmatmul.bf16.gmra.mxu1 %v9380_v3 }
 0x3b5   :  { %3807 = vmatmul.bf16.gmra.mxu2 %v9381_v1 }
 0x3b6   :  { %3856 = vmatmul.bf16.gmra.mxu3 %v9382_v33 }
 0x3b8   :  { %v3612_v58 = vpop.f32.mrf.mxu2  ;;  %v3516_v31 = vpop.f32.mrf.mxu0 }
 0x3b9   :  { %v3613_v43 = vadd.f32 %v3612_v58, %v3564_v24  ;;  %v3661_v5 = vpop.f32.mrf.mxu3  ;;  %v3517_v56 = vadd.f32 %v3516_v31, %v8794_v4  ;;  %v3565_v40 = vpop.f32.mrf.mxu1  ;;  %v9386_v4 = vld [vmem:[#allocation81_spill] sm:$0xff] }
 0x3bb   :  { %v8967_v44 = vadd.f32 %v3661_v5, %v3613_v43  ;;  %v3566_v41 = vadd.f32 %v3565_v40, %v3517_v56  ;;  %v9387_v40 = vld [vmem:[#allocation82_spill] sm:$0xff] }
 0x3c0   :  { %v3614_v21 = vpop.f32.mrf.mxu2  ;;  %v3519_v57 = vpop.f32.mrf.mxu0 }
 0x3c1   :  { %v3615_v28 = vadd.f32 %v3614_v21, %v3566_v41  ;;  %v3663_v51 = vpop.f32.mrf.mxu3  ;;  %v3520_v46 = vadd.f32 %v3519_v57, %v8819_v47  ;;  %v3568_v13 = vpop.f32.mrf.mxu1  ;;  %v9388_v41 = vld [vmem:[#allocation83_spill] sm:$0xff]  ;;  %v9389_v21 = vld [vmem:[#allocation84_spill] sm:$0xff] }
 0x3c3   :  { %v8970_v14 = vadd.f32 %v3663_v51, %v3615_v28  ;;  %v3569_v50 = vadd.f32 %v3568_v13, %v3520_v46  ;;  %3714 = vmatmul.bf16.gmra.mxu0 %v9383_v11 }
 0x3c4   :  { %3763 = vmatmul.bf16.gmra.mxu1 %v9384_v6 }
 0x3c5   :  { %3812 = vmatmul.bf16.gmra.mxu2 %v9385_v27 }
 0x3c6   :  { %3861 = vmatmul.bf16.gmra.mxu3 %v9386_v4 }
 0x3c8   :  { %v3617_v8 = vpop.f32.mrf.mxu2  ;;  %v3521_v38 = vpop.f32.mrf.mxu0 }
 0x3c9   :  { %v3618_v55 = vadd.f32 %v3617_v8, %v3569_v50  ;;  %v3666_v49 = vpop.f32.mrf.mxu3  ;;  %v3522_v15 = vadd.f32 %v3521_v38, %v8828_v9  ;;  %v3570_v24 = vpop.f32.mrf.mxu1  ;;  %v9390_v9 = vld [vmem:[#allocation85_spill] sm:$0xff] }
 0x3cb   :  { %v8977_v47 = vadd.f32 %v3666_v49, %v3618_v55  ;;  %v3571_v45 = vadd.f32 %v3570_v24, %v3522_v15  ;;  %v9391_v24 = vld [vmem:[#allocation86_spill] sm:$0xff] }
 0x3d0   :  { %v3619_v3 = vpop.f32.mrf.mxu2  ;;  %v3524_v58 = vpop.f32.mrf.mxu0 }
 0x3d1   :  { %v3620_v1 = vadd.f32 %v3619_v3, %v3571_v45  ;;  %v3668_v33 = vpop.f32.mrf.mxu3  ;;  %v3525_v43 = vadd.f32 %v3524_v58, %v8853_v18  ;;  %v3573_v5 = vpop.f32.mrf.mxu1  ;;  %v9392_v45 = vld [vmem:[#allocation87_spill] sm:$0xff]  ;;  %v9393_v3 = vld [vmem:[#allocation88_spill] sm:$0xff] }
 0x3d3   :  { %v8980_v31 = vadd.f32 %v3668_v33, %v3620_v1  ;;  %v3574_v56 = vadd.f32 %v3573_v5, %v3525_v43  ;;  %3719 = vmatmul.bf16.gmra.mxu0 %v9387_v40 }
 0x3d4   :  { %3768 = vmatmul.bf16.gmra.mxu1 %v9388_v41 }
 0x3d5   :  { %3817 = vmatmul.bf16.gmra.mxu2 %v9389_v21 }
 0x3d6   :  { %3866 = vmatmul.bf16.gmra.mxu3 %v9390_v9 }
 0x3d8   :  { %v3622_v28 = vpop.f32.mrf.mxu2  ;;  %v3526_v46 = vpop.f32.mrf.mxu0 }
 0x3d9   :  { %v3623_v51 = vadd.f32 %v3622_v28, %v3574_v56  ;;  %v3671_v57 = vpop.f32.mrf.mxu3  ;;  %v3527_v13 = vadd.f32 %v3526_v46, %v8862_v32  ;;  %v3575_v50 = vpop.f32.mrf.mxu1  ;;  %v9394_v32 = vld [vmem:[#allocation89_spill] sm:$0xff] }
 0x3db   :  { %v8987_v18 = vadd.f32 %v3671_v57, %v3623_v51  ;;  %v3576_v11 = vadd.f32 %v3575_v50, %v3527_v13  ;;  %v9395_v50 = vld [vmem:[#allocation90_spill] sm:$0xff] }
 0x3e0   :  { %v3624_v6 = vpop.f32.mrf.mxu2  ;;  %v3529_v8 = vpop.f32.mrf.mxu0 }
 0x3e1   :  { %v3625_v27 = vadd.f32 %v3624_v6, %v3576_v11  ;;  %v3673_v4 = vpop.f32.mrf.mxu3  ;;  %v3530_v55 = vadd.f32 %v3529_v8, %v8887_v53  ;;  %v3578_v49 = vpop.f32.mrf.mxu1  ;;  %v9396_v11 = vld [vmem:[#allocation91_spill] sm:$0xff]  ;;  %v9397_v6 = vld [vmem:[#allocation92_spill] sm:$0xff] }
 0x3e3   :  { %v8990_v38 = vadd.f32 %v3673_v4, %v3625_v27  ;;  %v3579_v15 = vadd.f32 %v3578_v49, %v3530_v55  ;;  %3724 = vmatmul.bf16.gmra.mxu0 %v9391_v24 }
 0x3e4   :  { %3773 = vmatmul.bf16.gmra.mxu1 %v9392_v45 }
 0x3e5   :  { %3822 = vmatmul.bf16.gmra.mxu2 %v9393_v3 }
 0x3e6   :  { %3871 = vmatmul.bf16.gmra.mxu3 %v9394_v32 }
 0x3e8   :  { %v3627_v1 = vpop.f32.mrf.mxu2  ;;  %v3531_v43 = vpop.f32.mrf.mxu0 }
 0x3e9   :  { %v3628_v33 = vadd.f32 %v3627_v1, %v3579_v15  ;;  %v3676_v58 = vpop.f32.mrf.mxu3  ;;  %v3532_v5 = vadd.f32 %v3531_v43, %v8896_v62  ;;  %v3580_v56 = vpop.f32.mrf.mxu1  ;;  %v9398_v62 = vld [vmem:[#allocation93_spill] sm:$0xff] }
 0x3eb   :  { %v8997_v53 = vadd.f32 %v3676_v58, %v3628_v33  ;;  %v3581_v40 = vadd.f32 %v3580_v56, %v3532_v5  ;;  %v9399_v56 = vld [vmem:[#allocation94_spill] sm:$0xff] }
 0x3f0   :  { %v3629_v41 = vpop.f32.mrf.mxu2  ;;  %v3534_v28 = vpop.f32.mrf.mxu0 }
 0x3f1   :  { %v3630_v21 = vadd.f32 %v3629_v41, %v3581_v40  ;;  %v3678_v9 = vpop.f32.mrf.mxu3  ;;  %v3535_v51 = vadd.f32 %v3534_v28, %v8921_v35  ;;  %v3583_v57 = vpop.f32.mrf.mxu1  ;;  %v9400_v40 = vld [vmem:[#allocation95_spill] sm:$0xff]  ;;  %v9401_v41 = vld [vmem:[#allocation96_spill] sm:$0xff] }
 0x3f3   :  { %v9000_v46 = vadd.f32 %v3678_v9, %v3630_v21  ;;  %v3584_v13 = vadd.f32 %v3583_v57, %v3535_v51  ;;  %3729 = vmatmul.bf16.gmra.mxu0 %v9395_v50 }
 0x3f4   :  { %3778 = vmatmul.bf16.gmra.mxu1 %v9396_v11 }
 0x3f5   :  { %3827 = vmatmul.bf16.gmra.mxu2 %v9397_v6 }
 0x3f6   :  { %3876 = vmatmul.bf16.gmra.mxu3 %v9398_v62 }
 0x3f8   :  { %v3632_v27 = vpop.f32.mrf.mxu2  ;;  %v3536_v55 = vpop.f32.mrf.mxu0 }
 0x3f9   :  { %v3633_v4 = vadd.f32 %v3632_v27, %v3584_v13  ;;  %v3681_v8 = vpop.f32.mrf.mxu3  ;;  %v3537_v49 = vadd.f32 %v3536_v55, %v8930_v29  ;;  %v3585_v15 = vpop.f32.mrf.mxu1  ;;  %v9402_v29 = vld [vmem:[#allocation97_spill] sm:$0xff] }
 0x3fb   :  { %v9007_v35 = vadd.f32 %v3681_v8, %v3633_v4  ;;  %v3586_v24 = vadd.f32 %v3585_v15, %v3537_v49 }
 0x400   :  { %v3634_v45 = vpop.f32.mrf.mxu2  ;;  %v3539_v1 = vpop.f32.mrf.mxu0 }
 0x401   :  { %v3635_v3 = vadd.f32 %v3634_v45, %v3586_v24  ;;  %v3683_v32 = vpop.f32.mrf.mxu3  ;;  %v3540_v33 = vadd.f32 %v3539_v1, %v8937_v42  ;;  %v3588_v58 = vpop.f32.mrf.mxu1 }
 0x403   :  { %v9010_v43 = vadd.f32 %v3683_v32, %v3635_v3  ;;  %v3589_v5 = vadd.f32 %v3588_v58, %v3540_v33  ;;  %3734 = vmatmul.bf16.gmra.mxu0 %v9399_v56 }
 0x404   :  { %3783 = vmatmul.bf16.gmra.mxu1 %v9400_v40 }
 0x405   :  { %3832 = vmatmul.bf16.gmra.mxu2 %v9401_v41 }
 0x406   :  { %3881 = vmatmul.bf16.gmra.mxu3 %v9402_v29 }
 0x408   :  { %v3637_v21 = vpop.f32.mrf.mxu2  ;;  %v3541_v51 = vpop.f32.mrf.mxu0 }
 0x409   :  { %v3638_v9 = vadd.f32 %v3637_v21, %v3589_v5  ;;  %v3686_v28 = vpop.f32.mrf.mxu3  ;;  %v3542_v57 = vadd.f32 %v3541_v51, %v8940_v26  ;;  %v3590_v13 = vpop.f32.mrf.mxu1 }
 0x40b   :  { %v9017_v42 = vadd.f32 %v3686_v28, %v3638_v9  ;;  %v3591_v50 = vadd.f32 %v3590_v13, %v3542_v57 }
 0x410   :  { %v3639_v11 = vpop.f32.mrf.mxu2  ;;  %v3544_v27 = vpop.f32.mrf.mxu0 }
 0x411   :  { %v3640_v6 = vadd.f32 %v3639_v11, %v3591_v50  ;;  %v3688_v62 = vpop.f32.mrf.mxu3  ;;  %v3545_v4 = vadd.f32 %v3544_v27, %v8947_v59  ;;  %v3593_v8 = vpop.f32.mrf.mxu1 }
 0x413   :  { %v9020_v55 = vadd.f32 %v3688_v62, %v3640_v6  ;;  %v3594_v49 = vadd.f32 %v3593_v8, %v3545_v4  ;;  %3739 = vmatmul.bf16.gmra.mxu0 %v8134_v22 }
 0x414   :  { %3788 = vmatmul.bf16.gmra.mxu1 %v8136_v0 }
 0x415   :  { %3837 = vmatmul.bf16.gmra.mxu2 %v8138_v60 }
 0x416   :  { %3886 = vmatmul.bf16.gmra.mxu3 %v8141_v16 }
 0x418   :  { %v3642_v26 = vpop.f32.mrf.mxu2  ;;  %v3546_v45 = vpop.f32.mrf.mxu0 }
 0x419   :  { %v3643_v15 = vadd.f32 %v3642_v26, %v3594_v49  ;;  %v3691_v24 = vpop.f32.mrf.mxu3  ;;  %v3547_v3 = vadd.f32 %v3546_v45, %v8950_v63  ;;  %v3595_v32 = vpop.f32.mrf.mxu1 }
 0x41b   :  { %v9027_v59 = vadd.f32 %v3691_v24, %v3643_v15  ;;  %v3596_v1 = vadd.f32 %v3595_v32, %v3547_v3 }
 0x420   :  { %v3644_v33 = vpop.f32.mrf.mxu2  ;;  %v3705_v22 = vpop.f32.mrf.mxu0 }
 0x421   :  { %v3645_v58 = vadd.f32 %v3644_v33, %v3596_v1  ;;  %v3693_v5 = vpop.f32.mrf.mxu3  ;;  %v3754_v56 = vpop.f32.mrf.mxu1  ;;  %v3706_v60 = vadd.f32 %v3705_v22, %v8957_v36 }
 0x423   :  { %v9029_v0 = vadd.f32 %v3693_v5, %v3645_v58  ;;  %v3755_v16 = vadd.f32 %v3754_v56, %v3706_v60 }
 0x428   :  { %v3803_v40 = vpop.f32.mrf.mxu2  ;;  %v3707_v21 = vpop.f32.mrf.mxu0 }
 0x429   :  { %v3804_v41 = vadd.f32 %v3803_v40, %v3755_v16  ;;  %v3852_v29 = vpop.f32.mrf.mxu3  ;;  %v3756_v9 = vpop.f32.mrf.mxu1  ;;  %v3708_v28 = vadd.f32 %v3707_v21, %v8960_v20 }
 0x42b   :  { %v3853_v63 = vadd.f32 %v3852_v29, %v3804_v41  ;;  %v3757_v57 = vadd.f32 %v3756_v9, %v3708_v28 }
 0x42d   :  { %v3892_v51 = vpack.c.bf16 %v3853_v63, %v8202_v30 }
 0x42f   :  { %3908 = vst [vmem:[%s9114_s3] sm:$0xff] %v3892_v51 }
 0x430   :  { %v3805_v13 = vpop.f32.mrf.mxu2  ;;  %v3710_v36 = vpop.f32.mrf.mxu0 }
 0x431   :  { %v3806_v50 = vadd.f32 %v3805_v13, %v3757_v57  ;;  %v3854_v11 = vpop.f32.mrf.mxu3  ;;  %v3759_v6 = vpop.f32.mrf.mxu1  ;;  %v3711_v27 = vadd.f32 %v3710_v36, %v8967_v44 }
 0x433   :  { %v3855_v62 = vadd.f32 %v3854_v11, %v3806_v50  ;;  %v3760_v30 = vadd.f32 %v3759_v6, %v3711_v27 }
 0x435   :  { %v3893_v4 = vpack.c.bf16 %v3855_v62, %v8211_v48 }
 0x437   :  { %3909 = vst [vmem:[%s9114_s3 + $0x8] sm:$0xff] %v3893_v4 }
 0x438   :  { %v3808_v20 = vpop.f32.mrf.mxu2  ;;  %v3712_v26 = vpop.f32.mrf.mxu0 }
 0x439   :  { %v3809_v8 = vadd.f32 %v3808_v20, %v3760_v30  ;;  %v3857_v49 = vpop.f32.mrf.mxu3  ;;  %v3761_v15 = vpop.f32.mrf.mxu1  ;;  %v3713_v45 = vadd.f32 %v3712_v26, %v8970_v14 }
 0x43b   :  { %v3858_v24 = vadd.f32 %v3857_v49, %v3809_v8  ;;  %v3762_v48 = vadd.f32 %v3761_v15, %v3713_v45 }
 0x43d   :  { %v3894_v3 = vpack.c.bf16 %v3858_v24, %v8236_v34 }
 0x43f   :  { %3910 = vst [vmem:[%s9114_s3 + $0x10] sm:$0xff] %v3894_v3 }
 0x440   :  { %v3810_v44 = vpop.f32.mrf.mxu2  ;;  %v3715_v33 = vpop.f32.mrf.mxu0 }
 0x441   :  { %v3811_v32 = vadd.f32 %v3810_v44, %v3762_v48  ;;  %v3859_v1 = vpop.f32.mrf.mxu3  ;;  %v3764_v58 = vpop.f32.mrf.mxu1  ;;  %v3716_v22 = vadd.f32 %v3715_v33, %v8977_v47 }
 0x443   :  { %v3860_v5 = vadd.f32 %v3859_v1, %v3811_v32  ;;  %v3765_v34 = vadd.f32 %v3764_v58, %v3716_v22 }
 0x445   :  { %v3895_v56 = vpack.c.bf16 %v3860_v5, %v8245_v54 }
 0x447   :  { %3911 = vst [vmem:[%s9114_s3 + $0x18] sm:$0xff] %v3895_v56 }
 0x448   :  { %v3813_v14 = vpop.f32.mrf.mxu2  ;;  %v3717_v40 = vpop.f32.mrf.mxu0 }
 0x449   :  { %v3814_v60 = vadd.f32 %v3813_v14, %v3765_v34  ;;  %v3862_v16 = vpop.f32.mrf.mxu3  ;;  %v3766_v41 = vpop.f32.mrf.mxu1  ;;  %v3718_v21 = vadd.f32 %v3717_v40, %v8980_v31 }
 0x44b   :  { %v3863_v29 = vadd.f32 %v3862_v16, %v3814_v60  ;;  %v3767_v54 = vadd.f32 %v3766_v41, %v3718_v21 }
 0x44d   :  { %v3896_v9 = vpack.c.bf16 %v3863_v29, %v8270_v2 }
 0x44f   :  { %3912 = vst [vmem:[%s9114_s3 + $0x20] sm:$0xff] %v3896_v9 }
 0x450   :  { %v3815_v47 = vpop.f32.mrf.mxu2  ;;  %v3720_v51 = vpop.f32.mrf.mxu0 }
 0x451   :  { %v3816_v63 = vadd.f32 %v3815_v47, %v3767_v54  ;;  %v3864_v28 = vpop.f32.mrf.mxu3  ;;  %v3769_v57 = vpop.f32.mrf.mxu1  ;;  %v3721_v50 = vadd.f32 %v3720_v51, %v8987_v18 }
 0x453   :  { %v3865_v13 = vadd.f32 %v3864_v28, %v3816_v63  ;;  %v3770_v2 = vadd.f32 %v3769_v57, %v3721_v50 }
 0x455   :  { %v3897_v11 = vpack.c.bf16 %v3865_v13, %v8279_v61 }
 0x457   :  { %3913 = vst [vmem:[%s9114_s3 + $0x28] sm:$0xff] %v3897_v11 }
 0x458   :  { %v3818_v31 = vpop.f32.mrf.mxu2  ;;  %v3722_v62 = vpop.f32.mrf.mxu0 }
 0x459   :  { %v3819_v36 = vadd.f32 %v3818_v31, %v3770_v2  ;;  %v3867_v6 = vpop.f32.mrf.mxu3  ;;  %v3771_v27 = vpop.f32.mrf.mxu1  ;;  %v3723_v30 = vadd.f32 %v3722_v62, %v8990_v38 }
 0x45b   :  { %v3868_v4 = vadd.f32 %v3867_v6, %v3819_v36  ;;  %v3772_v61 = vadd.f32 %v3771_v27, %v3723_v30 }
 0x45d   :  { %v3898_v20 = vpack.c.bf16 %v3868_v4, %v8304_v25 }
 0x45f   :  { %3914 = vst [vmem:[%s9114_s3 + $0x30] sm:$0xff] %v3898_v20 }
 0x460   :  { %v3820_v18 = vpop.f32.mrf.mxu2  ;;  %v3725_v26 = vpop.f32.mrf.mxu0 }
 0x461   :  { %v3821_v8 = vadd.f32 %v3820_v18, %v3772_v61  ;;  %v3869_v49 = vpop.f32.mrf.mxu3  ;;  %v3774_v15 = vpop.f32.mrf.mxu1  ;;  %v3726_v45 = vadd.f32 %v3725_v26, %v8997_v53 }
 0x463   :  { %v3870_v24 = vadd.f32 %v3869_v49, %v3821_v8  ;;  %v3775_v25 = vadd.f32 %v3774_v15, %v3726_v45 }
 0x465   :  { %v3899_v3 = vpack.c.bf16 %v3870_v24, %v8313_v17 }
 0x467   :  { %3915 = vst [vmem:[%s9114_s3 + $0x38] sm:$0xff] %v3899_v3 }
 0x468   :  { %v3823_v38 = vpop.f32.mrf.mxu2  ;;  %v3727_v32 = vpop.f32.mrf.mxu0 }
 0x469   :  { %v3824_v48 = vadd.f32 %v3823_v38, %v3775_v25  ;;  %v3872_v44 = vpop.f32.mrf.mxu3  ;;  %v3776_v1 = vpop.f32.mrf.mxu1  ;;  %v3728_v58 = vadd.f32 %v3727_v32, %v9000_v46 }
 0x46b   :  { %v3873_v33 = vadd.f32 %v3872_v44, %v3824_v48  ;;  %v3777_v17 = vadd.f32 %v3776_v1, %v3728_v58 }
 0x46d   :  { %v3900_v5 = vpack.c.bf16 %v3873_v33, %v8338_v12 }
 0x46f   :  { %3916 = vst [vmem:[%s9114_s3 + $0x40] sm:$0xff] %v3900_v5 }
 0x470   :  { %v3825_v53 = vpop.f32.mrf.mxu2  ;;  %v3730_v34 = vpop.f32.mrf.mxu0 }
 0x471   :  { %v3826_v22 = vadd.f32 %v3825_v53, %v3777_v17  ;;  %v3874_v56 = vpop.f32.mrf.mxu3  ;;  %v3779_v14 = vpop.f32.mrf.mxu1  ;;  %v3731_v16 = vadd.f32 %v3730_v34, %v9007_v35 }
 0x473   :  { %v3875_v60 = vadd.f32 %v3874_v56, %v3826_v22  ;;  %v3780_v12 = vadd.f32 %v3779_v14, %v3731_v16 }
 0x475   :  { %v3901_v40 = vpack.c.bf16 %v3875_v60, %v8347_v52 }
 0x477   :  { %3917 = vst [vmem:[%s9114_s3 + $0x48] sm:$0xff] %v3901_v40 }
 0x478   :  { %v3828_v46 = vpop.f32.mrf.mxu2  ;;  %v3732_v21 = vpop.f32.mrf.mxu0 }
 0x479   :  { %v3829_v41 = vadd.f32 %v3828_v46, %v3780_v12  ;;  %v3877_v29 = vpop.f32.mrf.mxu3  ;;  %v3781_v9 = vpop.f32.mrf.mxu1  ;;  %v3733_v47 = vadd.f32 %v3732_v21, %v9010_v43 }
 0x47b   :  { %v3878_v54 = vadd.f32 %v3877_v29, %v3829_v41  ;;  %v3782_v52 = vadd.f32 %v3781_v9, %v3733_v47 }
 0x47d   :  { %v3902_v63 = vpack.c.bf16 %v3878_v54, %v8372_v39 }
 0x47f   :  { %3918 = vst [vmem:[%s9114_s3 + $0x50] sm:$0xff] %v3902_v63 }
 0x480   :  { %v3830_v35 = vpop.f32.mrf.mxu2  ;;  %v3735_v57 = vpop.f32.mrf.mxu0 }
 0x481   :  { %v3831_v28 = vadd.f32 %v3830_v35, %v3782_v52  ;;  %v3879_v51 = vpop.f32.mrf.mxu3  ;;  %v3784_v13 = vpop.f32.mrf.mxu1  ;;  %v3736_v11 = vadd.f32 %v3735_v57, %v9017_v42 }
 0x483   :  { %v3880_v50 = vadd.f32 %v3879_v51, %v3831_v28  ;;  %v3785_v39 = vadd.f32 %v3784_v13, %v3736_v11 }
 0x485   :  { %v3903_v2 = vpack.c.bf16 %v3880_v50, %v8381_v19 }
 0x487   :  { %3919 = vst [vmem:[%s9114_s3 + $0x58] sm:$0xff] %v3903_v2 }
 0x488   :  { %v3833_v43 = vpop.f32.mrf.mxu2  ;;  %v3737_v6 = vpop.f32.mrf.mxu0 }
 0x489   :  { %v3834_v31 = vadd.f32 %v3833_v43, %v3785_v39  ;;  %v3882_v36 = vpop.f32.mrf.mxu3  ;;  %v3786_v62 = vpop.f32.mrf.mxu1  ;;  %v3738_v4 = vadd.f32 %v3737_v6, %v9020_v55 }
 0x48b   :  { %v3883_v27 = vadd.f32 %v3882_v36, %v3834_v31  ;;  %v3787_v19 = vadd.f32 %v3786_v62, %v3738_v4 }
 0x48d   :  { %v3904_v30 = vpack.c.bf16 %v3883_v27, %v8406_v7 }
 0x48f   :  { %3920 = vst [vmem:[%s9114_s3 + $0x60] sm:$0xff] %v3904_v30 }
 0x490   :  { %v3835_v42 = vpop.f32.mrf.mxu2  ;;  %v3740_v18 = vpop.f32.mrf.mxu0 }
 0x491   :  { %v3836_v20 = vadd.f32 %v3835_v42, %v3787_v19  ;;  %v3884_v61 = vpop.f32.mrf.mxu3  ;;  %v3741_v49 = vadd.f32 %v3740_v18, %v9027_v59  ;;  %v3789_v26 = vpop.f32.mrf.mxu1 }
 0x493   :  { %v3885_v8 = vadd.f32 %v3884_v61, %v3836_v20  ;;  %v3790_v7 = vadd.f32 %v3789_v26, %v3741_v49 }
 0x495   :  { %v3905_v15 = vpack.c.bf16 %v3885_v8, %v8415_v10 }
 0x497   :  { %3921 = vst [vmem:[%s9114_s3 + $0x68] sm:$0xff] %v3905_v15 }
 0x498   :  { %v3838_v55 = vpop.f32.mrf.mxu2  ;;  %v3742_v3 = vpop.f32.mrf.mxu0 }
 0x499   :  { %v3839_v24 = vadd.f32 %v3838_v55, %v3790_v7  ;;  %v3887_v45 = vpop.f32.mrf.mxu3  ;;  %v3743_v38 = vadd.f32 %v3742_v3, %v9029_v0  ;;  %v3791_v44 = vpop.f32.mrf.mxu1 }
 0x49b   :  { %v3888_v25 = vadd.f32 %v3887_v45, %v3839_v24  ;;  %v3792_v10 = vadd.f32 %v3791_v44, %v3743_v38 }
 0x49d   :  { %v3906_v48 = vpack.c.bf16 %v3888_v25, %v8440_v37 }
 0x49f   :  { %3922 = vst [vmem:[%s9114_s3 + $0x70] sm:$0xff] %v3906_v48 }
 0x4a0   :  { %v3840_v59 = vpop.f32.mrf.mxu2 }
 0x4a1   :  { %v3841_v32 = vadd.f32 %v3840_v59, %v3792_v10  ;;  %v3889_v1 = vpop.f32.mrf.mxu3 }
 0x4a3   :  { %v3890_v33 = vadd.f32 %v3889_v1, %v3841_v32 }
 0x4a5   :  { %v3907_v58 = vpack.c.bf16 %v3890_v33, %v8454_v23 }
 0x4a7   :  { %3923 = vst [vmem:[%s9114_s3 + $0x78] sm:$0xff] %v3907_v58 }

</bundles_post_ra>
